<compile_context>
chip_gen: v7x
topology: tpu7x:2x2x1
jax: 0.10.0
libtpu: 0.0.40
codegen_flags: <defaults>
</compile_context>

<pallas_src>
import jax
import jax.numpy as jnp
from jax.experimental import pallas as pl
from jax.experimental.pallas import tpu as pltpu
import numpy as np

IMG_SHAPE = (3, 32, 32)
IN_DIM = int(np.prod(IMG_SHAPE))   # 3072
H1 = 512
H2 = 256
OUT_PAD = 128          # lane-dense padded output head (real out dim = 1)
MAX_TB = 512           # max batch-tile rows
SPLIT_MIN_ROWS = 128   # force >= 2 tiles once each tile would have >= 128 rows


def _leaky_relu(x, slope=0.2):
    return jnp.where(x > 0, x, slope * x)


def disc_kernel(x_ref, w1_ref, b1_ref, w2_ref, b2_ref, w3_ref, b3_ref, o_ref):
    # x : (TB, 3072) f32  (cast to bf16 here; VPU work hidden under the MXU)
    # w1: (3072, 512) bf16   b1: (1, 512) f32
    # w2: (512, 256)  bf16   b2: (1, 256) f32
    # w3: (256, 128)  bf16   b3: (1, 128) f32   (only column 0 is "real")
    x = x_ref[...].astype(jnp.bfloat16)

    h1 = jnp.dot(x, w1_ref[...], preferred_element_type=jnp.float32) + b1_ref[...]
    h1 = _leaky_relu(h1).astype(jnp.bfloat16)

    h2 = jnp.dot(h1, w2_ref[...], preferred_element_type=jnp.float32) + b2_ref[...]
    h2 = _leaky_relu(h2).astype(jnp.bfloat16)

    logits = jnp.dot(h2, w3_ref[...], preferred_element_type=jnp.float32) + b3_ref[...]
    o_ref[...] = jax.nn.sigmoid(logits).astype(o_ref.dtype)


def prepare_params(params):
    """One-time conversion to kernel-ready layout/dtypes (hoisted out of forward)."""
    w1, b1, w2, b2, w3, b3 = params
    w3_p = jnp.zeros((H2, OUT_PAD), jnp.float32).at[:, :1].set(w3)
    b3_p = jnp.zeros((1, OUT_PAD), jnp.float32).at[:, :1].set(b3.reshape(1, 1))
    return (
        w1.astype(jnp.bfloat16),
        b1.reshape(1, H1).astype(jnp.float32),
        w2.astype(jnp.bfloat16),
        b2.reshape(1, H2).astype(jnp.float32),
        w3_p.astype(jnp.bfloat16),
        b3_p.astype(jnp.float32),
    )


def _choose_tiling(B):
    """Balanced batch tiles: >=2 tiles for medium/large B (v7x megacore),
    tile rows a multiple of 8 (sublane granularity), minimal padding."""
    num_tiles = pl.cdiv(B, MAX_TB)
    if num_tiles < 2 and B >= 2 * SPLIT_MIN_ROWS:
        num_tiles = 2
    TB = ((pl.cdiv(B, num_tiles) + 7) // 8) * 8
    return TB, num_tiles


def _pallas_forward(flat_padded, prepped, TB, num_tiles, single_buffer_weights):
    w1, b1, w2, b2, w3_p, b3_p = prepped
    B_pad = flat_padded.shape[0]

    if single_buffer_weights:
        def resident(shape):
            # Constant index_map -> never re-fetched; one buffer is enough.
            return pl.BlockSpec(shape, lambda i: (0, 0), pipeline_mode=pl.Buffered(1))
    else:
        def resident(shape):
            return pl.BlockSpec(shape, lambda i: (0, 0))

    cost = pl.CostEstimate(
        flops=2 * B_pad * (IN_DIM * H1 + H1 * H2 + H2 * 1),
        transcendentals=B_pad,                                # one sigmoid / element
        bytes_accessed=(
            4 * B_pad * IN_DIM                                # f32 input
            + 2 * (IN_DIM * H1 + H1 * H2 + H2 * OUT_PAD)      # bf16 weights
            + 4 * (H1 + H2 + OUT_PAD)                         # f32 biases
            + 2 * B_pad * OUT_PAD                             # bf16 output slab
        ),
    )

    return pl.pallas_call(
        disc_kernel,
        out_shape=jax.ShapeDtypeStruct((B_pad, OUT_PAD), jnp.bfloat16),
        grid=(num_tiles,),
        in_specs=[
            pl.BlockSpec((TB, IN_DIM), lambda i: (i, 0)),     # x tile (f32)
            resident((IN_DIM, H1)),                           # w1
            resident((1, H1)),                                # b1
            resident((H1, H2)),                               # w2
            resident((1, H2)),                                # b2
            resident((H2, OUT_PAD)),                          # w3 (padded head)
            resident((1, OUT_PAD)),                           # b3 (padded head)
        ],
        out_specs=pl.BlockSpec((TB, OUT_PAD), lambda i: (i, 0)),
        compiler_params=pltpu.CompilerParams(
            dimension_semantics=("parallel",),
            vmem_limit_bytes=32 << 20,
        ),
        cost_estimate=cost,
    )(flat_padded, w1, b1, w2, b2, w3_p, b3_p)


def discriminator_forward(img, prepped):
    """img: (B, 3, 32, 32) float32 -> validity (B, 1) float32."""
    B = img.shape[0]
    flat = img.reshape(B, IN_DIM)            # stays f32; bf16 cast happens in-kernel

    TB, num_tiles = _choose_tiling(B)
    B_pad = TB * num_tiles
    if B_pad != B:
        flat = jnp.pad(flat, ((0, B_pad - B), (0, 0)))

    try:
        out_padded = _pallas_forward(flat, prepped, TB, num_tiles, True)
    except Exception:
        # pipeline_mode single-buffering not supported on this jax/libtpu:
        # fall back to default double-buffered resident weights.
        out_padded = _pallas_forward(flat, prepped, TB, num_tiles, False)

    return out_padded[:B, :1].astype(jnp.float32)


def init_params(key):
    """Deterministic init mirroring nn.Linear default (uniform +/- 1/sqrt(fan_in))."""
    ks = jax.random.split(key, 6)

    def lin(kw, kb, fan_in, fan_out):
        bound = 1.0 / np.sqrt(fan_in)
        w = jax.random.uniform(kw, (fan_in, fan_out), jnp.float32, -bound, bound)
        b = jax.random.uniform(kb, (fan_out,), jnp.float32, -bound, bound)
        return w, b

    w1, b1 = lin(ks[0], ks[1], IN_DIM, H1)
    w2, b2 = lin(ks[2], ks[3], H1, H2)
    w3, b3 = lin(ks[4], ks[5], H2, 1)
    return (w1, b1, w2, b2, w3, b3)


if __name__ == "__main__":
    key = jax.random.PRNGKey(0)
    k_img, k_par = jax.random.split(key)

    B = 2
    img = jax.random.normal(k_img, (B,) + IMG_SHAPE, jnp.float32)
    params = init_params(k_par)
    prepped = prepare_params(params)

    validity = discriminator_forward(img, prepped)
    validity = jax.block_until_ready(validity)
    assert validity.shape == (B, 1)
    validity_np = np.asarray(validity)

    # Reference with identical numerics (bf16 matmul inputs, f32 accumulate,
    # bf16 output rounding).
    w1, b1, w2, b2, w3, b3 = params
    x = img.reshape(B, IN_DIM).astype(jnp.bfloat16)

    def mm(a, w):
        return jnp.dot(a, w.astype(jnp.bfloat16), preferred_element_type=jnp.float32)

    h1 = _leaky_relu(mm(x, w1) + b1).astype(jnp.bfloat16)
    h2 = _leaky_relu(mm(h1, w2) + b2).astype(jnp.bfloat16)
    ref_bf16 = jax.nn.sigmoid(mm(h2, w3) + b3).astype(jnp.bfloat16).astype(jnp.float32)
    np.testing.assert_allclose(validity_np, np.asarray(ref_bf16), rtol=1e-2, atol=1e-2)

    # Also sanity-check against the full-f32 PyTorch-equivalent forward
    # (loose tolerance because the kernel uses bf16 matmul inputs/weights).
    xf = img.reshape(B, IN_DIM)
    h1f = _leaky_relu(xf @ w1 + b1)
    h2f = _leaky_relu(h1f @ w2 + b2)
    ref_f32 = jax.nn.sigmoid(h2f @ w3 + b3)
    np.testing.assert_allclose(validity_np, np.asarray(ref_f32), rtol=2e-2, atol=2e-2)

    print("KERNEL_OK")
</pallas_src>

<mosaic_0001>
module attributes {stable_mosaic.version = 11 : i64} {
  func.func @disc_kernel(%arg0: i32, %arg1: memref<8x3072xf32, #tpu.memory_space<vmem>>, %arg2: memref<3072x512xbf16, #tpu.memory_space<vmem>>, %arg3: memref<1x512xf32, #tpu.memory_space<vmem>>, %arg4: memref<512x256xbf16, #tpu.memory_space<vmem>>, %arg5: memref<1x256xf32, #tpu.memory_space<vmem>>, %arg6: memref<256x128xbf16, #tpu.memory_space<vmem>>, %arg7: memref<1x128xf32, #tpu.memory_space<vmem>>, %arg8: memref<8x128xbf16, #tpu.memory_space<vmem>>) attributes {dimension_semantics = [#tpu.dimension_semantics<parallel>], iteration_bounds = array<i64: 1>, scalar_prefetch = 0 : i64, scratch_operands = 0 : i64, tpu.core_type = #tpu.core_type<tc>, window_params = [{transform_indices = @transform_0, window_bounds = array<i64: 8, 3072>}, {pipeline_mode = #tpu.pipeline_mode<synchronous>, transform_indices = @transform_1, window_bounds = array<i64: 3072, 512>}, {pipeline_mode = #tpu.pipeline_mode<synchronous>, transform_indices = @transform_2, window_bounds = array<i64: 1, 512>}, {pipeline_mode = #tpu.pipeline_mode<synchronous>, transform_indices = @transform_3, window_bounds = array<i64: 512, 256>}, {pipeline_mode = #tpu.pipeline_mode<synchronous>, transform_indices = @transform_4, window_bounds = array<i64: 1, 256>}, {pipeline_mode = #tpu.pipeline_mode<synchronous>, transform_indices = @transform_5, window_bounds = array<i64: 256, 128>}, {pipeline_mode = #tpu.pipeline_mode<synchronous>, transform_indices = @transform_6, window_bounds = array<i64: 1, 128>}, {transform_indices = @transform_7, window_bounds = array<i64: 8, 128>}]} {
    %c0 = arith.constant 0 : index
    %c0_0 = arith.constant 0 : index
    %0 = vector.load %arg1[%c0, %c0_0] : memref<8x3072xf32, #tpu.memory_space<vmem>>, vector<8x3072xf32>
    %1 = arith.truncf %0 : vector<8x3072xf32> to vector<8x3072xbf16>
    %c0_1 = arith.constant 0 : index
    %c0_2 = arith.constant 0 : index
    %2 = vector.load %arg2[%c0_1, %c0_2] : memref<3072x512xbf16, #tpu.memory_space<vmem>>, vector<3072x512xbf16>
    %cst = arith.constant dense<0.000000e+00> : vector<8x512xf32>
    %3 = tpu.matmul %1, %2, %cst {dimension_numbers = #tpu.dot_dimension_numbers<[1], [0], [0], [1], [0, 0, 1, 1], [], []>} : vector<8x3072xbf16>, vector<3072x512xbf16>, vector<8x512xf32> -> vector<8x512xf32>
    %c0_3 = arith.constant 0 : index
    %c0_4 = arith.constant 0 : index
    %4 = vector.load %arg3[%c0_3, %c0_4] : memref<1x512xf32, #tpu.memory_space<vmem>>, vector<1x512xf32>
    %5 = vector.broadcast %4 : vector<1x512xf32> to vector<8x512xf32>
    %6 = arith.addf %3, %5 : vector<8x512xf32>
    %cst_5 = arith.constant 0.000000e+00 : f32
    %7 = vector.broadcast %cst_5 : f32 to vector<8x512xf32>
    %8 = arith.cmpf ogt, %6, %7 : vector<8x512xf32>
    %cst_6 = arith.constant 2.000000e-01 : f32
    %9 = vector.broadcast %cst_6 : f32 to vector<8x512xf32>
    %10 = arith.mulf %9, %6 : vector<8x512xf32>
    %11 = arith.select %8, %6, %10 : vector<8x512xi1>, vector<8x512xf32>
    %12 = arith.truncf %11 : vector<8x512xf32> to vector<8x512xbf16>
    %c0_7 = arith.constant 0 : index
    %c0_8 = arith.constant 0 : index
    %13 = vector.load %arg4[%c0_7, %c0_8] : memref<512x256xbf16, #tpu.memory_space<vmem>>, vector<512x256xbf16>
    %cst_9 = arith.constant dense<0.000000e+00> : vector<8x256xf32>
    %14 = tpu.matmul %12, %13, %cst_9 {dimension_numbers = #tpu.dot_dimension_numbers<[1], [0], [0], [1], [0, 0, 1, 1], [], []>} : vector<8x512xbf16>, vector<512x256xbf16>, vector<8x256xf32> -> vector<8x256xf32>
    %c0_10 = arith.constant 0 : index
    %c0_11 = arith.constant 0 : index
    %15 = vector.load %arg5[%c0_10, %c0_11] : memref<1x256xf32, #tpu.memory_space<vmem>>, vector<1x256xf32>
    %16 = vector.broadcast %15 : vector<1x256xf32> to vector<8x256xf32>
    %17 = arith.addf %14, %16 : vector<8x256xf32>
    %cst_12 = arith.constant 0.000000e+00 : f32
    %18 = vector.broadcast %cst_12 : f32 to vector<8x256xf32>
    %19 = arith.cmpf ogt, %17, %18 : vector<8x256xf32>
    %cst_13 = arith.constant 2.000000e-01 : f32
    %20 = vector.broadcast %cst_13 : f32 to vector<8x256xf32>
    %21 = arith.mulf %20, %17 : vector<8x256xf32>
    %22 = arith.select %19, %17, %21 : vector<8x256xi1>, vector<8x256xf32>
    %23 = arith.truncf %22 : vector<8x256xf32> to vector<8x256xbf16>
    %c0_14 = arith.constant 0 : index
    %c0_15 = arith.constant 0 : index
    %24 = vector.load %arg6[%c0_14, %c0_15] : memref<256x128xbf16, #tpu.memory_space<vmem>>, vector<256x128xbf16>
    %cst_16 = arith.constant dense<0.000000e+00> : vector<8x128xf32>
    %25 = tpu.matmul %23, %24, %cst_16 {dimension_numbers = #tpu.dot_dimension_numbers<[1], [0], [0], [1], [0, 0, 1, 1], [], []>} : vector<8x256xbf16>, vector<256x128xbf16>, vector<8x128xf32> -> vector<8x128xf32>
    %c0_17 = arith.constant 0 : index
    %c0_18 = arith.constant 0 : index
    %26 = vector.load %arg7[%c0_17, %c0_18] : memref<1x128xf32, #tpu.memory_space<vmem>>, vector<1x128xf32>
    %27 = vector.broadcast %26 : vector<1x128xf32> to vector<8x128xf32>
    %28 = arith.addf %25, %27 : vector<8x128xf32>
    %29 = arith.negf %28 : vector<8x128xf32>
    %30 = math.exp %29 : vector<8x128xf32>
    %cst_19 = arith.constant 1.000000e+00 : f32
    %31 = vector.broadcast %cst_19 : f32 to vector<8x128xf32>
    %32 = arith.addf %31, %30 : vector<8x128xf32>
    %33 = arith.divf %31, %32 : vector<8x128xf32>
    %34 = arith.truncf %33 : vector<8x128xf32> to vector<8x128xbf16>
    %c0_20 = arith.constant 0 : index
    %c0_21 = arith.constant 0 : index
    %35 = vector.load %arg8[%c0_20, %c0_21] : memref<8x128xbf16, #tpu.memory_space<vmem>>, vector<8x128xbf16>
    tpu.vector_store %arg8[%c0_20, %c0_21], %34 {strides = array<i32>} : memref<8x128xbf16, #tpu.memory_space<vmem>>, vector<8x128xbf16>,
    return
  }
  func.func @transform_0(%arg0: i32) -> (i32, i32) {
    %c0_i32 = arith.constant 0 : i32
    %c0_i32_0 = arith.constant 0 : i32
    return %arg0, %c0_i32 : i32, i32
  }
  func.func @transform_1(%arg0: i32) -> (i32, i32) {
    %c0_i32 = arith.constant 0 : i32
    %c0_i32_0 = arith.constant 0 : i32
    %c0_i32_1 = arith.constant 0 : i32
    return %c0_i32, %c0_i32_0 : i32, i32
  }
  func.func @transform_2(%arg0: i32) -> (i32, i32) {
    %c0_i32 = arith.constant 0 : i32
    %c0_i32_0 = arith.constant 0 : i32
    %c0_i32_1 = arith.constant 0 : i32
    return %c0_i32, %c0_i32_0 : i32, i32
  }
  func.func @transform_3(%arg0: i32) -> (i32, i32) {
    %c0_i32 = arith.constant 0 : i32
    %c0_i32_0 = arith.constant 0 : i32
    %c0_i32_1 = arith.constant 0 : i32
    return %c0_i32, %c0_i32_0 : i32, i32
  }
  func.func @transform_4(%arg0: i32) -> (i32, i32) {
    %c0_i32 = arith.constant 0 : i32
    %c0_i32_0 = arith.constant 0 : i32
    %c0_i32_1 = arith.constant 0 : i32
    return %c0_i32, %c0_i32_0 : i32, i32
  }
  func.func @transform_5(%arg0: i32) -> (i32, i32) {
    %c0_i32 = arith.constant 0 : i32
    %c0_i32_0 = arith.constant 0 : i32
    %c0_i32_1 = arith.constant 0 : i32
    return %c0_i32, %c0_i32_0 : i32, i32
  }
  func.func @transform_6(%arg0: i32) -> (i32, i32) {
    %c0_i32 = arith.constant 0 : i32
    %c0_i32_0 = arith.constant 0 : i32
    %c0_i32_1 = arith.constant 0 : i32
    return %c0_i32, %c0_i32_0 : i32, i32
  }
  func.func @transform_7(%arg0: i32) -> (i32, i32) {
    %c0_i32 = arith.constant 0 : i32
    %c0_i32_0 = arith.constant 0 : i32
    return %arg0, %c0_i32 : i32, i32
  }
}

module attributes {stable_mosaic.version = 11 : i64} {
  func.func @disc_kernel(%arg0: i32, %arg1: memref<8x3072xf32, #tpu.memory_space<vmem>>, %arg2: memref<3072x512xbf16, #tpu.memory_space<vmem>>, %arg3: memref<1x512xf32, #tpu.memory_space<vmem>>, %arg4: memref<512x256xbf16, #tpu.memory_space<vmem>>, %arg5: memref<1x256xf32, #tpu.memory_space<vmem>>, %arg6: memref<256x128xbf16, #tpu.memory_space<vmem>>, %arg7: memref<1x128xf32, #tpu.memory_space<vmem>>, %arg8: memref<8x128xbf16, #tpu.memory_space<vmem>>) attributes {dimension_semantics = [#tpu.dimension_semantics<parallel>], iteration_bounds = array<i64: 1>, scalar_prefetch = 0 : i64, scratch_operands = 0 : i64, tpu.core_type = #tpu.core_type<tc>, window_params = [{transform_indices = @transform_0, window_bounds = array<i64: 8, 3072>}, {pipeline_mode = #tpu.pipeline_mode<synchronous>, transform_indices = @transform_1, window_bounds = array<i64: 3072, 512>}, {pipeline_mode = #tpu.pipeline_mode<synchronous>, transform_indices = @transform_2, window_bounds = array<i64: 1, 512>}, {pipeline_mode = #tpu.pipeline_mode<synchronous>, transform_indices = @transform_3, window_bounds = array<i64: 512, 256>}, {pipeline_mode = #tpu.pipeline_mode<synchronous>, transform_indices = @transform_4, window_bounds = array<i64: 1, 256>}, {pipeline_mode = #tpu.pipeline_mode<synchronous>, transform_indices = @transform_5, window_bounds = array<i64: 256, 128>}, {pipeline_mode = #tpu.pipeline_mode<synchronous>, transform_indices = @transform_6, window_bounds = array<i64: 1, 128>}, {transform_indices = @transform_7, window_bounds = array<i64: 8, 128>}]} {
    %c0 = arith.constant 0 : index
    %c0_0 = arith.constant 0 : index
    %0 = vector.load %arg1[%c0, %c0_0] : memref<8x3072xf32, #tpu.memory_space<vmem>>, vector<8x3072xf32>
    %1 = arith.truncf %0 : vector<8x3072xf32> to vector<8x3072xbf16>
    %c0_1 = arith.constant 0 : index
    %c0_2 = arith.constant 0 : index
    %2 = vector.load %arg2[%c0_1, %c0_2] : memref<3072x512xbf16, #tpu.memory_space<vmem>>, vector<3072x512xbf16>
    %cst = arith.constant dense<0.000000e+00> : vector<8x512xf32>
    %3 = tpu.matmul %1, %2, %cst {dimension_numbers = #tpu.dot_dimension_numbers<[1], [0], [0], [1], [0, 0, 1, 1], [], []>} : vector<8x3072xbf16>, vector<3072x512xbf16>, vector<8x512xf32> -> vector<8x512xf32>
    %c0_3 = arith.constant 0 : index
    %c0_4 = arith.constant 0 : index
    %4 = vector.load %arg3[%c0_3, %c0_4] : memref<1x512xf32, #tpu.memory_space<vmem>>, vector<1x512xf32>
    %5 = vector.broadcast %4 : vector<1x512xf32> to vector<8x512xf32>
    %6 = arith.addf %3, %5 : vector<8x512xf32>
    %cst_5 = arith.constant 0.000000e+00 : f32
    %7 = vector.broadcast %cst_5 : f32 to vector<8x512xf32>
    %8 = arith.cmpf ogt, %6, %7 : vector<8x512xf32>
    %cst_6 = arith.constant 2.000000e-01 : f32
    %9 = vector.broadcast %cst_6 : f32 to vector<8x512xf32>
    %10 = arith.mulf %9, %6 : vector<8x512xf32>
    %11 = arith.select %8, %6, %10 : vector<8x512xi1>, vector<8x512xf32>
    %12 = arith.truncf %11 : vector<8x512xf32> to vector<8x512xbf16>
    %c0_7 = arith.constant 0 : index
    %c0_8 = arith.constant 0 : index
    %13 = vector.load %arg4[%c0_7, %c0_8] : memref<512x256xbf16, #tpu.memory_space<vmem>>, vector<512x256xbf16>
    %cst_9 = arith.constant dense<0.000000e+00> : vector<8x256xf32>
    %14 = tpu.matmul %12, %13, %cst_9 {dimension_numbers = #tpu.dot_dimension_numbers<[1], [0], [0], [1], [0, 0, 1, 1], [], []>} : vector<8x512xbf16>, vector<512x256xbf16>, vector<8x256xf32> -> vector<8x256xf32>
    %c0_10 = arith.constant 0 : index
    %c0_11 = arith.constant 0 : index
    %15 = vector.load %arg5[%c0_10, %c0_11] : memref<1x256xf32, #tpu.memory_space<vmem>>, vector<1x256xf32>
    %16 = vector.broadcast %15 : vector<1x256xf32> to vector<8x256xf32>
    %17 = arith.addf %14, %16 : vector<8x256xf32>
    %cst_12 = arith.constant 0.000000e+00 : f32
    %18 = vector.broadcast %cst_12 : f32 to vector<8x256xf32>
    %19 = arith.cmpf ogt, %17, %18 : vector<8x256xf32>
    %cst_13 = arith.constant 2.000000e-01 : f32
    %20 = vector.broadcast %cst_13 : f32 to vector<8x256xf32>
    %21 = arith.mulf %20, %17 : vector<8x256xf32>
    %22 = arith.select %19, %17, %21 : vector<8x256xi1>, vector<8x256xf32>
    %23 = arith.truncf %22 : vector<8x256xf32> to vector<8x256xbf16>
    %c0_14 = arith.constant 0 : index
    %c0_15 = arith.constant 0 : index
    %24 = vector.load %arg6[%c0_14, %c0_15] : memref<256x128xbf16, #tpu.memory_space<vmem>>, vector<256x128xbf16>
    %cst_16 = arith.constant dense<0.000000e+00> : vector<8x128xf32>
    %25 = tpu.matmul %23, %24, %cst_16 {dimension_numbers = #tpu.dot_dimension_numbers<[1], [0], [0], [1], [0, 0, 1, 1], [], []>} : vector<8x256xbf16>, vector<256x128xbf16>, vector<8x128xf32> -> vector<8x128xf32>
    %c0_17 = arith.constant 0 : index
    %c0_18 = arith.constant 0 : index
    %26 = vector.load %arg7[%c0_17, %c0_18] : memref<1x128xf32, #tpu.memory_space<vmem>>, vector<1x128xf32>
    %27 = vector.broadcast %26 : vector<1x128xf32> to vector<8x128xf32>
    %28 = arith.addf %25, %27 : vector<8x128xf32>
    %29 = arith.negf %28 : vector<8x128xf32>
    %30 = math.exp %29 : vector<8x128xf32>
    %cst_19 = arith.constant 1.000000e+00 : f32
    %31 = vector.broadcast %cst_19 : f32 to vector<8x128xf32>
    %32 = arith.addf %31, %30 : vector<8x128xf32>
    %33 = arith.divf %31, %32 : vector<8x128xf32>
    %34 = arith.truncf %33 : vector<8x128xf32> to vector<8x128xbf16>
    %c0_20 = arith.constant 0 : index
    %c0_21 = arith.constant 0 : index
    %35 = vector.load %arg8[%c0_20, %c0_21] : memref<8x128xbf16, #tpu.memory_space<vmem>>, vector<8x128xbf16>
    tpu.vector_store %arg8[%c0_20, %c0_21], %34 {strides = array<i32>} : memref<8x128xbf16, #tpu.memory_space<vmem>>, vector<8x128xbf16>,
    return
  }
  func.func @transform_0(%arg0: i32) -> (i32, i32) {
    %c0_i32 = arith.constant 0 : i32
    %c0_i32_0 = arith.constant 0 : i32
    return %arg0, %c0_i32 : i32, i32
  }
  func.func @transform_1(%arg0: i32) -> (i32, i32) {
    %c0_i32 = arith.constant 0 : i32
    %c0_i32_0 = arith.constant 0 : i32
    %c0_i32_1 = arith.constant 0 : i32
    return %c0_i32, %c0_i32_0 : i32, i32
  }
  func.func @transform_2(%arg0: i32) -> (i32, i32) {
    %c0_i32 = arith.constant 0 : i32
    %c0_i32_0 = arith.constant 0 : i32
    %c0_i32_1 = arith.constant 0 : i32
    return %c0_i32, %c0_i32_0 : i32, i32
  }
  func.func @transform_3(%arg0: i32) -> (i32, i32) {
    %c0_i32 = arith.constant 0 : i32
    %c0_i32_0 = arith.constant 0 : i32
    %c0_i32_1 = arith.constant 0 : i32
    return %c0_i32, %c0_i32_0 : i32, i32
  }
  func.func @transform_4(%arg0: i32) -> (i32, i32) {
    %c0_i32 = arith.constant 0 : i32
    %c0_i32_0 = arith.constant 0 : i32
    %c0_i32_1 = arith.constant 0 : i32
    return %c0_i32, %c0_i32_0 : i32, i32
  }
  func.func @transform_5(%arg0: i32) -> (i32, i32) {
    %c0_i32 = arith.constant 0 : i32
    %c0_i32_0 = arith.constant 0 : i32
    %c0_i32_1 = arith.constant 0 : i32
    return %c0_i32, %c0_i32_0 : i32, i32
  }
  func.func @transform_6(%arg0: i32) -> (i32, i32) {
    %c0_i32 = arith.constant 0 : i32
    %c0_i32_0 = arith.constant 0 : i32
    %c0_i32_1 = arith.constant 0 : i32
    return %c0_i32, %c0_i32_0 : i32, i32
  }
  func.func @transform_7(%arg0: i32) -> (i32, i32) {
    %c0_i32 = arith.constant 0 : i32
    %c0_i32_0 = arith.constant 0 : i32
    return %arg0, %c0_i32 : i32, i32
  }
}

</mosaic_0001>

<bundles_post_ra>
// kernel: tpu_custom_call.1
= control target key start
LH: loop header
LB: loop body
LE: loop exit
PB: predicated region body
PF: predicated region fallthrough
CT: control target
= control target key end

     0   :  { %12 = vsyncpa [#allocation3], 0  ;;  %s9188_s0 = inlined_call_operand.hbm [shape: f32[8,3072], index: 0, kind: input, shape index: {}]   ;;  %s9189_s1 = inlined_call_operand.hbm [shape: bf16[3072,512], index: 1, kind: input, shape index: {}]   ;;  %s9190_s2 = inlined_call_operand.hbm [shape: f32[1,512], index: 2, kind: input, shape index: {}]   ;;  %s9191_s3 = inlined_call_operand.hbm [shape: bf16[512,256], index: 3, kind: input, shape index: {}]   ;;  %s9192_s4 = inlined_call_operand.hbm [shape: f32[1,256], index: 4, kind: input, shape index: {}]   ;;  %s9193_s5 = inlined_call_operand.hbm [shape: bf16[256,128], index: 5, kind: input, shape index: {}]   ;;  %s9194_s6 = inlined_call_operand.hbm [shape: f32[1,128], index: 6, kind: input, shape index: {}]   ;;  %s9195_s7 = inlined_call_operand.hbm [shape: bf16[8,128], index: 7, kind: output, shape index: {}]  }
   0x1   :  { %13 = vsyncpa [#allocation6], 0 }
   0x2   :  { %14 = vsyncpa [#allocation9], 0 }
   0x3   :  { %15 = vsyncpa [#allocation12], 0 }
   0x4   :  { %16 = vsyncpa [#allocation4], 0  ;;  %s8916_s24 = smov [#allocation5]   ;;  %s8730_s28 = scalar_lea.hbm %s9189_s1, 98304 }
   0x5   :  { %s32_s25 = sshll.u32 %s8916_s24, 4  ;;  %p8731_p0 = scmp.ne.s32.totalorder %s9189_s1, %s8730_s28  ;;  %s33_s25 = int_to_ptr.vmem [resolvable:$true] %s32_s25 }
   0x6   :  { %p8734_p1 = scmp.lt.u32.totalorder %s8730_s28, %s9189_s1 }
   0x8   :  { %p8736_p2 = pnand %p8734_p1, %p8731_p0 }
   0xa   :  { %8739 = shalt.err (!%p8736_p2)
}
   0xb   :  { %s8740_s10 = scalar_lea.vmem %s33_s25, 98304  ;;  %p8745_p4 = scmp.lt.s32.totalorder %s33_s25, %s33_s25 }
   0xc   :  { %p8741_p3 = scmp.ne.s32.totalorder %s33_s25, %s8740_s10  ;;  %p8746_p5 = scmp.lt.s32.totalorder %s8740_s10, %s8740_s10 }
   0xe   :  { %p8747_p6 = por %p8746_p5, %p8745_p4 }
  0x10   :  { %p8748_p7 = pnand %p8747_p6, %p8741_p3 }
  0x12   :  { %8751 = shalt.err (!%p8748_p7)
}
  0x13   :  { %s8917_s11 = smov 256   ;;  %s8918_s12 = smov 16  }
  0x14   :  { %38 = dma.hbm_to_vmem [thread:$0]  %s9189_s1, 98304, %s33_s25, [#allocation6], %s8917_s11, %s8917_s11, %s8918_s12  }
  0x15   :  { %s8919_s15 = smov [#allocation8]   ;;  %s8752_s19 = scalar_lea.hbm %s9191_s3, 8192 }
  0x16   :  { %s54_s16 = sshll.u32 %s8919_s15, 4  ;;  %p8753_p8 = scmp.ne.s32.totalorder %s9191_s3, %s8752_s19  ;;  %s55_s16 = int_to_ptr.vmem [resolvable:$true] %s54_s16 }
  0x17   :  { %p8756_p9 = scmp.lt.u32.totalorder %s8752_s19, %s9191_s3 }
  0x19   :  { %p8758_p10 = pnand %p8756_p9, %p8753_p8 }
  0x1b   :  { %8761 = shalt.err (!%p8758_p10)
}
  0x1c   :  { %s8762_s24 = scalar_lea.vmem %s55_s16, 8192  ;;  %p8767_p12 = scmp.lt.s32.totalorder %s55_s16, %s55_s16 }
  0x1d   :  { %p8763_p11 = scmp.ne.s32.totalorder %s55_s16, %s8762_s24  ;;  %p8768_p13 = scmp.lt.s32.totalorder %s8762_s24, %s8762_s24 }
  0x1f   :  { %p8769_p0 = por %p8768_p13, %p8767_p12 }
  0x21   :  { %p8770_p1 = pnand %p8769_p0, %p8763_p11 }
  0x23   :  { %8773 = shalt.err (!%p8770_p1)
}
  0x24   :  { %s8920_s1 = smov 128   ;;  %s8921_s25 = smov 8  }
  0x25   :  { %60 = dma.hbm_to_vmem [thread:$0]  %s9191_s3, 8192, %s55_s16, [#allocation9], %s8920_s1, %s8920_s1, %s8921_s25  }
  0x26   :  { %s8922_s28 = smov [#allocation11]   ;;  %s8774_s9 = scalar_lea.hbm %s9193_s5, 2048 }
  0x27   :  { %s76_s29 = sshll.u32 %s8922_s28, 4  ;;  %p8775_p2 = scmp.ne.s32.totalorder %s9193_s5, %s8774_s9  ;;  %s77_s29 = int_to_ptr.vmem [resolvable:$true] %s76_s29 }
  0x28   :  { %p8778_p3 = scmp.lt.u32.totalorder %s8774_s9, %s9193_s5 }
  0x2a   :  { %p8780_p4 = pnand %p8778_p3, %p8775_p2 }
  0x2c   :  { %8783 = shalt.err (!%p8780_p4)
}
  0x2d   :  { %s8784_s14 = scalar_lea.vmem %s77_s29, 2048  ;;  %p8789_p6 = scmp.lt.s32.totalorder %s77_s29, %s77_s29 }
  0x2e   :  { %p8785_p5 = scmp.ne.s32.totalorder %s77_s29, %s8784_s14  ;;  %p8790_p7 = scmp.lt.s32.totalorder %s8784_s14, %s8784_s14 }
  0x30   :  { %p8791_p8 = por %p8790_p7, %p8789_p6 }
  0x32   :  { %p8792_p9 = pnand %p8791_p8, %p8785_p5 }
  0x34   :  { %8795 = shalt.err (!%p8792_p9)
}
  0x35   :  { %s8923_s3 = smov 64   ;;  %s8924_s15 = smov 4  }
  0x36   :  { %82 = dma.hbm_to_vmem [thread:$0]  %s9193_s5, 2048, %s77_s29, [#allocation12], %s8923_s3, %s8923_s3, %s8924_s15  }
  0x37   :  { %s8925_s18 = smov [#allocation2]   ;;  %s8926_s20 = smov [#allocation7]  }
  0x38   :  { %s23_s19 = sshll.u32 %s8925_s18, 4  ;;  %s45_s21 = sshll.u32 %s8926_s20, 4  ;;  %s24_s19 = int_to_ptr.vmem [resolvable:$true] %s23_s19  ;;  %s46_s21 = int_to_ptr.vmem [resolvable:$true] %s45_s21 }
  0x39   :  { %s8796_s24 = scalar_lea.hbm %s9188_s0, 3072 }
  0x3a   :  { %p8797_p10 = scmp.ne.s32.totalorder %s9188_s0, %s8796_s24  ;;  %p8800_p11 = scmp.lt.u32.totalorder %s8796_s24, %s9188_s0 }
  0x3c   :  { %p8802_p12 = pnand %p8800_p11, %p8797_p10 }
  0x3e   :  { %8805 = shalt.err (!%p8802_p12)
}
  0x3f   :  { %s8806_s5 = scalar_lea.vmem %s24_s19, 3072  ;;  %p8811_p0 = scmp.lt.s32.totalorder %s24_s19, %s24_s19 }
  0x40   :  { %p8807_p13 = scmp.ne.s32.totalorder %s24_s19, %s8806_s5  ;;  %p8812_p1 = scmp.lt.s32.totalorder %s8806_s5, %s8806_s5 }
  0x42   :  { %p8813_p2 = por %p8812_p1, %p8811_p0 }
  0x44   :  { %p8814_p3 = pnand %p8813_p2, %p8807_p13 }
  0x46   :  { %8817 = shalt.err (!%p8814_p3)
}
  0x47   :  { %26 = dma.hbm_to_vmem [thread:$0]  %s9188_s0, 3072, %s24_s19, [#allocation3]  }
  0x48   :  { %s8818_s9 = scalar_lea.hbm %s9190_s2, 64 }
  0x49   :  { %p8819_p4 = scmp.ne.s32.totalorder %s9190_s2, %s8818_s9  ;;  %p8822_p5 = scmp.lt.u32.totalorder %s8818_s9, %s9190_s2 }
  0x4b   :  { %p8824_p6 = pnand %p8822_p5, %p8819_p4 }
  0x4d   :  { %8827 = shalt.err (!%p8824_p6)
}
  0x4e   :  { %s8828_s14 = scalar_lea.vmem %s46_s21, 64  ;;  %p8833_p8 = scmp.lt.s32.totalorder %s46_s21, %s46_s21 }
  0x4f   :  { %p8829_p7 = scmp.ne.s32.totalorder %s46_s21, %s8828_s14  ;;  %p8834_p9 = scmp.lt.s32.totalorder %s8828_s14, %s8828_s14 }
  0x51   :  { %p8835_p10 = por %p8834_p9, %p8833_p8 }
  0x53   :  { %p8836_p11 = pnand %p8835_p10, %p8829_p7 }
  0x55   :  { %8839 = shalt.err (!%p8836_p11)
}
  0x56   :  { %48 = dma.hbm_to_vmem [thread:$0]  %s9190_s2, 64, %s46_s21, [#allocation6]  }
  0x57   :  { %s8927_s15 = smov [#allocation10]   ;;  %s8928_s17 = smov [#allocation13]  }
  0x58   :  { %s67_s16 = sshll.u32 %s8927_s15, 4  ;;  %s89_s18 = sshll.u32 %s8928_s17, 4  ;;  %s68_s16 = int_to_ptr.vmem [resolvable:$true] %s67_s16  ;;  %s90_s18 = int_to_ptr.vmem [resolvable:$true] %s89_s18 }
  0x59   :  { %s8840_s22 = scalar_lea.hbm %s9192_s4, 32 }
  0x5a   :  { %p8841_p12 = scmp.ne.s32.totalorder %s9192_s4, %s8840_s22  ;;  %p8844_p13 = scmp.lt.u32.totalorder %s8840_s22, %s9192_s4 }
  0x5c   :  { %p8846_p0 = pnand %p8844_p13, %p8841_p12 }
  0x5e   :  { %8849 = shalt.err (!%p8846_p0)
}
  0x5f   :  { %s8850_s2 = scalar_lea.vmem %s68_s16, 32  ;;  %p8855_p2 = scmp.lt.s32.totalorder %s68_s16, %s68_s16 }
  0x60   :  { %p8851_p1 = scmp.ne.s32.totalorder %s68_s16, %s8850_s2  ;;  %p8856_p3 = scmp.lt.s32.totalorder %s8850_s2, %s8850_s2 }
  0x62   :  { %p8857_p4 = por %p8856_p3, %p8855_p2 }
  0x64   :  { %p8858_p5 = pnand %p8857_p4, %p8851_p1 }
  0x66   :  { %8861 = shalt.err (!%p8858_p5)
}
  0x67   :  { %70 = dma.hbm_to_vmem [thread:$0]  %s9192_s4, 32, %s68_s16, [#allocation9]  }
  0x68   :  { %s8862_s28 = scalar_lea.hbm %s9194_s6, 16 }
  0x69   :  { %p8863_p6 = scmp.ne.s32.totalorder %s9194_s6, %s8862_s28  ;;  %p8866_p7 = scmp.lt.u32.totalorder %s8862_s28, %s9194_s6 }
  0x6b   :  { %p8868_p8 = pnand %p8866_p7, %p8863_p6 }
  0x6d   :  { %8871 = shalt.err (!%p8868_p8)
}
  0x6e   :  { %s8872_s10 = scalar_lea.vmem %s90_s18, 16  ;;  %s8876_s11 = scalar_lea.vmem %s90_s18, 32 }
  0x6f   :  { %p8873_p9 = scmp.ne.s32.totalorder %s90_s18, %s8872_s10  ;;  %p8877_p10 = scmp.lt.s32.totalorder %s90_s18, %s90_s18 }
  0x70   :  { %p8878_p11 = scmp.lt.s32.totalorder %s8876_s11, %s8872_s10 }
  0x72   :  { %p8879_p12 = por %p8878_p11, %p8877_p10 }
  0x74   :  { %p8880_p13 = pnand %p8879_p12, %p8873_p9 }
  0x76   :  { %8883 = shalt.err (!%p8880_p13)
}
  0x77   :  { %92 = dma.hbm_to_vmem [thread:$0]  %s9194_s6, 16, %s90_s18, [#allocation12]  }
  0x78   :  { %8906 = dma.done.wait [#allocation3], 3072  }
  0x79   :  { %8907 = vsyncadd [#allocation3], 4294964224 }
  0x7a   :  { %8908 = dma.done.wait [#allocation6], 98368  }
  0x7b   :  { %8909 = vsyncadd [#allocation6], 4294868928 }
  0x7c   :  { %8910 = dma.done.wait [#allocation9], 8224  }
  0x7d   :  { %8911 = vsyncadd [#allocation9], 4294959072 }
  0x7e   :  { %8912 = dma.done.wait [#allocation12], 2064  }
  0x7f   :  { %8913 = vsyncadd [#allocation12], 4294965232  ;;  %v7462_v0 = vld [vmem:[#allocation5 + $0x4] ss:$16 sps:$4 sm:$0xff]   ;;  %v7466_v2 = vld [vmem:[#allocation5] ss:$16 sps:$4 sm:$0xff]  }
  0x80   :  { %v7464_v1 = vld [vmem:[#allocation5 + $0x204] ss:$16 sps:$4 sm:$0xff]   ;;  %4793 = vmatprep.subr.bf16.mxu1 %v7462_v0  ;;  %v7467_v3 = vld [vmem:[#allocation5 + $0x200] ss:$16 sps:$4 sm:$0xff]   ;;  %v116_v46 = vld [vmem:[#allocation2 + $0x8] sm:$0xff]  ;;  %s8929_s6 = smov [#allocation14]  }
  0x81   :  { %4834 = vmatprep.subr.bf16.mxu0 %v7464_v1  ;;  %v7468_v4 = vld [vmem:[#allocation5 + $0x24] ss:$16 sps:$4 sm:$0xff]   ;;  %4794 = vmatpush1.bf16.msra.mxu1 %v7466_v2  ;;  %v7472_v6 = vld [vmem:[#allocation5 + $0x20] ss:$16 sps:$4 sm:$0xff]   ;;  %v9054_v48 = vpack.c.bf16 %v116_v46, %v116_v46  ;;  %v118_v49 = vld [vmem:[#allocation2 + $0x18] sm:$0xff]  ;;  %s6468_s13 = sshll.u32 %s8929_s6, 4  ;;  %s6469_s13 = int_to_ptr.vmem [resolvable:$true] %s6468_s13 }
  0x82   :  { %4835 = vmatpush1.bf16.msra.mxu0 %v7467_v3  ;;  %v7470_v5 = vld [vmem:[#allocation5 + $0x224] ss:$16 sps:$4 sm:$0xff]   ;;  %4795 = vmatprep.subr.bf16.mxu1 %v7468_v4  ;;  %v7473_v7 = vld [vmem:[#allocation5 + $0x220] ss:$16 sps:$4 sm:$0xff]   ;;  %v9056_v52 = vpack.c.bf16 %v118_v49, %v118_v49  ;;  %v7615_v49 = vld [vmem:[#allocation5 + $0x128] ss:$16 sps:$4 sm:$0xff]   ;;  %p8889_p1 = scmp.lt.s32.totalorder %s6469_s13, %s6469_s13 }
  0x83   :  { %4836 = vmatprep.subr.bf16.mxu0 %v7470_v5  ;;  %v7474_v8 = vld [vmem:[#allocation5 + $0x44] ss:$16 sps:$4 sm:$0xff]   ;;  %v7478_v10 = vld [vmem:[#allocation5 + $0x40] ss:$16 sps:$4 sm:$0xff]   ;;  %4825 = vmatprep.mubr.bf16.mxu1 %v9054_v48  ;;  %s8884_s14 = scalar_lea.vmem %s6469_s13, 64 }
  0x84   :  { %v7476_v9 = vld [vmem:[#allocation5 + $0x244] ss:$16 sps:$4 sm:$0xff]   ;;  %v7479_v11 = vld [vmem:[#allocation5 + $0x240] ss:$16 sps:$4 sm:$0xff]   ;;  %4866 = vmatprep.mubr.bf16.mxu0 %v9056_v52  ;;  %p8885_p0 = scmp.ne.s32.totalorder %s6469_s13, %s8884_s14  ;;  %p8890_p2 = scmp.lt.s32.totalorder %s8884_s14, %s8884_s14 }
  0x85   :  { %4796 = vmatpush1.bf16.msra.mxu1 %v7472_v6  ;;  %v7480_v12 = vld [vmem:[#allocation5 + $0x64] ss:$16 sps:$4 sm:$0xff]   ;;  %v7484_v14 = vld [vmem:[#allocation5 + $0x60] ss:$16 sps:$4 sm:$0xff]  }
  0x86   :  { %4837 = vmatpush1.bf16.msra.mxu0 %v7473_v7  ;;  %4797 = vmatprep.subr.bf16.mxu1 %v7474_v8  ;;  %v7482_v13 = vld [vmem:[#allocation5 + $0x264] ss:$16 sps:$4 sm:$0xff]   ;;  %v7485_v15 = vld [vmem:[#allocation5 + $0x260] ss:$16 sps:$4 sm:$0xff]   ;;  %v7563_v7 = vld [vmem:[#allocation5 + $0xc] ss:$16 sps:$4 sm:$0xff]   ;;  %p8891_p3 = por %p8890_p2, %p8889_p1 }
  0x87   :  { %4838 = vmatprep.subr.bf16.mxu0 %v7476_v9  ;;  %v7486_v16 = vld [vmem:[#allocation5 + $0x84] ss:$16 sps:$4 sm:$0xff]   ;;  %v7490_v18 = vld [vmem:[#allocation5 + $0x80] ss:$16 sps:$4 sm:$0xff]  }
  0x88   :  { %v7488_v17 = vld [vmem:[#allocation5 + $0x284] ss:$16 sps:$4 sm:$0xff]   ;;  %v7491_v19 = vld [vmem:[#allocation5 + $0x280] ss:$16 sps:$4 sm:$0xff]   ;;  %p8892_p4 = pnand %p8891_p3, %p8885_p0 }
  0x89   :  { %4798 = vmatpush1.bf16.msra.mxu1 %v7478_v10  ;;  %v7492_v20 = vld [vmem:[#allocation5 + $0xa4] ss:$16 sps:$4 sm:$0xff]   ;;  %v7496_v22 = vld [vmem:[#allocation5 + $0xa0] ss:$16 sps:$4 sm:$0xff]   ;;  %v7561_v10 = vld [vmem:[#allocation5 + $0x8] ss:$16 sps:$4 sm:$0xff]  }
  0x8a   :  { %4839 = vmatpush1.bf16.msra.mxu0 %v7479_v11  ;;  %4799 = vmatprep.subr.bf16.mxu1 %v7480_v12  ;;  %v7494_v21 = vld [vmem:[#allocation5 + $0x2a4] ss:$16 sps:$4 sm:$0xff]   ;;  %v7497_v23 = vld [vmem:[#allocation5 + $0x2a0] ss:$16 sps:$4 sm:$0xff]  }
  0x8b   :  { %4840 = vmatprep.subr.bf16.mxu0 %v7482_v13  ;;  %v7498_v24 = vld [vmem:[#allocation5 + $0xc4] ss:$16 sps:$4 sm:$0xff]   ;;  %v7502_v26 = vld [vmem:[#allocation5 + $0xc0] ss:$16 sps:$4 sm:$0xff]   ;;  %v7569_v13 = vld [vmem:[#allocation5 + $0x2c] ss:$16 sps:$4 sm:$0xff]  }
  0x8c   :  { %v7500_v25 = vld [vmem:[#allocation5 + $0x2c4] ss:$16 sps:$4 sm:$0xff]   ;;  %v7503_v27 = vld [vmem:[#allocation5 + $0x2c0] ss:$16 sps:$4 sm:$0xff]  }
  0x8d   :  { %4800 = vmatpush1.bf16.msra.mxu1 %v7484_v14  ;;  %v7504_v28 = vld [vmem:[#allocation5 + $0xe4] ss:$16 sps:$4 sm:$0xff]   ;;  %v7508_v30 = vld [vmem:[#allocation5 + $0xe0] ss:$16 sps:$4 sm:$0xff]  }
  0x8e   :  { %4841 = vmatpush1.bf16.msra.mxu0 %v7485_v15  ;;  %4801 = vmatprep.subr.bf16.mxu1 %v7486_v16  ;;  %v7506_v29 = vld [vmem:[#allocation5 + $0x2e4] ss:$16 sps:$4 sm:$0xff]   ;;  %v7509_v31 = vld [vmem:[#allocation5 + $0x2e0] ss:$16 sps:$4 sm:$0xff]   ;;  %v7567_v15 = vld [vmem:[#allocation5 + $0x28] ss:$16 sps:$4 sm:$0xff]  }
  0x8f   :  { %4842 = vmatprep.subr.bf16.mxu0 %v7488_v17  ;;  %v7510_v32 = vld [vmem:[#allocation5 + $0x104] ss:$16 sps:$4 sm:$0xff]   ;;  %v7514_v34 = vld [vmem:[#allocation5 + $0x100] ss:$16 sps:$4 sm:$0xff]   ;;  %v7575_v17 = vld [vmem:[#allocation5 + $0x4c] ss:$16 sps:$4 sm:$0xff]  }
  0x90   :  { %v7512_v33 = vld [vmem:[#allocation5 + $0x304] ss:$16 sps:$4 sm:$0xff]   ;;  %v7515_v35 = vld [vmem:[#allocation5 + $0x300] ss:$16 sps:$4 sm:$0xff]  }
  0x91   :  { %4802 = vmatpush1.bf16.msra.mxu1 %v7490_v18  ;;  %v7516_v36 = vld [vmem:[#allocation5 + $0x124] ss:$16 sps:$4 sm:$0xff]   ;;  %v7520_v38 = vld [vmem:[#allocation5 + $0x120] ss:$16 sps:$4 sm:$0xff]  }
  0x92   :  { %4843 = vmatpush1.bf16.msra.mxu0 %v7491_v19  ;;  %4803 = vmatprep.subr.bf16.mxu1 %v7492_v20  ;;  %v7518_v37 = vld [vmem:[#allocation5 + $0x324] ss:$16 sps:$4 sm:$0xff]   ;;  %v7521_v39 = vld [vmem:[#allocation5 + $0x320] ss:$16 sps:$4 sm:$0xff]   ;;  %v7573_v19 = vld [vmem:[#allocation5 + $0x48] ss:$16 sps:$4 sm:$0xff]  }
  0x93   :  { %4844 = vmatprep.subr.bf16.mxu0 %v7494_v21  ;;  %v7522_v40 = vld [vmem:[#allocation5 + $0x144] ss:$16 sps:$4 sm:$0xff]   ;;  %v7526_v42 = vld [vmem:[#allocation5 + $0x140] ss:$16 sps:$4 sm:$0xff]   ;;  %v7581_v21 = vld [vmem:[#allocation5 + $0x6c] ss:$16 sps:$4 sm:$0xff]  }
  0x94   :  { %v7524_v41 = vld [vmem:[#allocation5 + $0x344] ss:$16 sps:$4 sm:$0xff]   ;;  %v7527_v43 = vld [vmem:[#allocation5 + $0x340] ss:$16 sps:$4 sm:$0xff]  }
  0x95   :  { %4804 = vmatpush1.bf16.msra.mxu1 %v7496_v22  ;;  %v7528_v44 = vld [vmem:[#allocation5 + $0x164] ss:$16 sps:$4 sm:$0xff]   ;;  %v7532_v47 = vld [vmem:[#allocation5 + $0x160] ss:$16 sps:$4 sm:$0xff]  }
  0x96   :  { %4845 = vmatpush1.bf16.msra.mxu0 %v7497_v23  ;;  %4805 = vmatprep.subr.bf16.mxu1 %v7498_v24  ;;  %v7530_v45 = vld [vmem:[#allocation5 + $0x364] ss:$16 sps:$4 sm:$0xff]   ;;  %v7533_v50 = vld [vmem:[#allocation5 + $0x360] ss:$16 sps:$4 sm:$0xff]   ;;  %v7579_v23 = vld [vmem:[#allocation5 + $0x68] ss:$16 sps:$4 sm:$0xff]  }
  0x97   :  { %4846 = vmatprep.subr.bf16.mxu0 %v7500_v25  ;;  %v7534_v51 = vld [vmem:[#allocation5 + $0x184] ss:$16 sps:$4 sm:$0xff]   ;;  %v7538_v54 = vld [vmem:[#allocation5 + $0x180] ss:$16 sps:$4 sm:$0xff]   ;;  %v7587_v25 = vld [vmem:[#allocation5 + $0x8c] ss:$16 sps:$4 sm:$0xff]  }
  0x98   :  { %v7536_v53 = vld [vmem:[#allocation5 + $0x384] ss:$16 sps:$4 sm:$0xff]   ;;  %v7539_v55 = vld [vmem:[#allocation5 + $0x380] ss:$16 sps:$4 sm:$0xff]  }
  0x99   :  { %4806 = vmatpush1.bf16.msra.mxu1 %v7502_v26  ;;  %v7540_v56 = vld [vmem:[#allocation5 + $0x1a4] ss:$16 sps:$4 sm:$0xff]   ;;  %v7544_v58 = vld [vmem:[#allocation5 + $0x1a0] ss:$16 sps:$4 sm:$0xff]  }
  0x9a   :  { %4847 = vmatpush1.bf16.msra.mxu0 %v7503_v27  ;;  %4807 = vmatprep.subr.bf16.mxu1 %v7504_v28  ;;  %v7542_v57 = vld [vmem:[#allocation5 + $0x3a4] ss:$16 sps:$4 sm:$0xff]   ;;  %v7545_v59 = vld [vmem:[#allocation5 + $0x3a0] ss:$16 sps:$4 sm:$0xff]   ;;  %v7585_v27 = vld [vmem:[#allocation5 + $0x88] ss:$16 sps:$4 sm:$0xff]  }
  0x9b   :  { %4848 = vmatprep.subr.bf16.mxu0 %v7506_v29  ;;  %v7546_v60 = vld [vmem:[#allocation5 + $0x1c4] ss:$16 sps:$4 sm:$0xff]   ;;  %v7550_v62 = vld [vmem:[#allocation5 + $0x1c0] ss:$16 sps:$4 sm:$0xff]   ;;  %v7593_v29 = vld [vmem:[#allocation5 + $0xac] ss:$16 sps:$4 sm:$0xff]  }
  0x9c   :  { %v7548_v61 = vld [vmem:[#allocation5 + $0x3c4] ss:$16 sps:$4 sm:$0xff]   ;;  %v7551_v63 = vld [vmem:[#allocation5 + $0x3c0] ss:$16 sps:$4 sm:$0xff]  }
  0x9d   :  { %4808 = vmatpush1.bf16.msra.mxu1 %v7508_v30  ;;  %v7552_v0 = vld [vmem:[#allocation5 + $0x1e4] ss:$16 sps:$4 sm:$0xff]   ;;  %v7556_v2 = vld [vmem:[#allocation5 + $0x1e0] ss:$16 sps:$4 sm:$0xff]  }
  0x9e   :  { %4849 = vmatpush1.bf16.msra.mxu0 %v7509_v31  ;;  %4809 = vmatprep.subr.bf16.mxu1 %v7510_v32  ;;  %v7554_v1 = vld [vmem:[#allocation5 + $0x3e4] ss:$16 sps:$4 sm:$0xff]   ;;  %v7557_v3 = vld [vmem:[#allocation5 + $0x3e0] ss:$16 sps:$4 sm:$0xff]   ;;  %v7591_v31 = vld [vmem:[#allocation5 + $0xa8] ss:$16 sps:$4 sm:$0xff]  }
  0x9f   :  { %4850 = vmatprep.subr.bf16.mxu0 %v7512_v33  ;;  %v115_v4 = vld [vmem:[#allocation2] sm:$0xff]  ;;  %v117_v6 = vld [vmem:[#allocation2 + $0x10] sm:$0xff]  ;;  %v7599_v33 = vld [vmem:[#allocation5 + $0xcc] ss:$16 sps:$4 sm:$0xff]  }
  0xa0   :  { %v7560_v5 = vld [vmem:[#allocation5 + $0x404] ss:$16 sps:$4 sm:$0xff]   ;;  %v9060_v8 = vpack.c.bf16 %v115_v4, %v115_v4  ;;  %v7558_v9 = vld [vmem:[#allocation5 + $0x400] ss:$16 sps:$4 sm:$0xff]   ;;  %v9062_v11 = vpack.c.bf16 %v117_v6, %v117_v6  ;;  %v7647_v4 = vld [vmem:[#allocation5 + $0x1cc] ss:$16 sps:$4 sm:$0xff]  }
  0xa1   :  { %4810 = vmatpush1.bf16.msra.mxu1 %v7514_v34  ;;  %v7566_v12 = vld [vmem:[#allocation5 + $0x424] ss:$16 sps:$4 sm:$0xff]   ;;  %v7564_v14 = vld [vmem:[#allocation5 + $0x420] ss:$16 sps:$4 sm:$0xff]   ;;  %v120_v34 = vld [vmem:[#allocation2 + $0x28] sm:$0xff] }
  0xa2   :  { %4851 = vmatpush1.bf16.msra.mxu0 %v7515_v35  ;;  %4811 = vmatprep.subr.bf16.mxu1 %v7516_v36  ;;  %v7572_v16 = vld [vmem:[#allocation5 + $0x444] ss:$16 sps:$4 sm:$0xff]   ;;  %v7570_v18 = vld [vmem:[#allocation5 + $0x440] ss:$16 sps:$4 sm:$0xff]   ;;  %v9067_v36 = vpack.c.bf16 %v120_v34, %v120_v34  ;;  %v7645_v6 = vld [vmem:[#allocation5 + $0x1c8] ss:$16 sps:$4 sm:$0xff]  }
  0xa3   :  { %4852 = vmatprep.subr.bf16.mxu0 %v7518_v37  ;;  %v7578_v20 = vld [vmem:[#allocation5 + $0x464] ss:$16 sps:$4 sm:$0xff]   ;;  %v7576_v22 = vld [vmem:[#allocation5 + $0x460] ss:$16 sps:$4 sm:$0xff]   ;;  %v7597_v37 = vld [vmem:[#allocation5 + $0xc8] ss:$16 sps:$4 sm:$0xff]  }
  0xa4   :  { %v7584_v24 = vld [vmem:[#allocation5 + $0x484] ss:$16 sps:$4 sm:$0xff]   ;;  %v7582_v26 = vld [vmem:[#allocation5 + $0x480] ss:$16 sps:$4 sm:$0xff]  }
  0xa5   :  { %4812 = vmatpush1.bf16.msra.mxu1 %v7520_v38  ;;  %v7590_v28 = vld [vmem:[#allocation5 + $0x4a4] ss:$16 sps:$4 sm:$0xff]   ;;  %v7588_v30 = vld [vmem:[#allocation5 + $0x4a0] ss:$16 sps:$4 sm:$0xff]  }
  0xa6   :  { %4853 = vmatpush1.bf16.msra.mxu0 %v7521_v39  ;;  %4813 = vmatprep.subr.bf16.mxu1 %v7522_v40  ;;  %v7596_v32 = vld [vmem:[#allocation5 + $0x4c4] ss:$16 sps:$4 sm:$0xff]   ;;  %v7594_v35 = vld [vmem:[#allocation5 + $0x4c0] ss:$16 sps:$4 sm:$0xff]   ;;  %v7605_v39 = vld [vmem:[#allocation5 + $0xec] ss:$16 sps:$4 sm:$0xff]  }
  0xa7   :  { %4854 = vmatprep.subr.bf16.mxu0 %v7524_v41  ;;  %v7602_v38 = vld [vmem:[#allocation5 + $0x4e4] ss:$16 sps:$4 sm:$0xff]   ;;  %v7600_v40 = vld [vmem:[#allocation5 + $0x4e0] ss:$16 sps:$4 sm:$0xff]   ;;  %v7603_v41 = vld [vmem:[#allocation5 + $0xe8] ss:$16 sps:$4 sm:$0xff]  }
  0xa8   :  { %v7614_v46 = vld [vmem:[#allocation5 + $0x524] ss:$16 sps:$4 sm:$0xff]   ;;  %v7678_v34 = vld [vmem:[#allocation5 + $0x680] ss:$16 sps:$4 sm:$0xff]  }
  0xa9   :  { %4814 = vmatpush1.bf16.msra.mxu1 %v7526_v42  ;;  %v7608_v42 = vld [vmem:[#allocation5 + $0x504] ss:$16 sps:$4 sm:$0xff]  }
  0xaa   :  { %4855 = vmatpush1.bf16.msra.mxu0 %v7527_v43  ;;  %4815 = vmatprep.subr.bf16.mxu1 %v7528_v44  ;;  %v7611_v43 = vld [vmem:[#allocation5 + $0x10c] ss:$16 sps:$4 sm:$0xff]   ;;  %v7606_v44 = vld [vmem:[#allocation5 + $0x500] ss:$16 sps:$4 sm:$0xff]  }
  0xab   :  { %4856 = vmatprep.subr.bf16.mxu0 %v7530_v45  ;;  %v7609_v45 = vld [vmem:[#allocation5 + $0x108] ss:$16 sps:$4 sm:$0xff]  }
  0xad   :  { %4816 = vmatpush1.bf16.msra.mxu1 %v7532_v47  ;;  %v7617_v47 = vld [vmem:[#allocation5 + $0x12c] ss:$16 sps:$4 sm:$0xff]  }
  0xae   :  { %4857 = vmatpush1.bf16.msra.mxu0 %v7533_v50  ;;  %4817 = vmatprep.subr.bf16.mxu1 %v7534_v51  ;;  %v7620_v50 = vld [vmem:[#allocation5 + $0x544] ss:$16 sps:$4 sm:$0xff]   ;;  %v7623_v51 = vld [vmem:[#allocation5 + $0x14c] ss:$16 sps:$4 sm:$0xff]  }
  0xaf   :  { %4858 = vmatprep.subr.bf16.mxu0 %v7536_v53  ;;  %v7618_v53 = vld [vmem:[#allocation5 + $0x540] ss:$16 sps:$4 sm:$0xff]  }
  0xb1   :  { %4818 = vmatpush1.bf16.msra.mxu1 %v7538_v54  ;;  %v7621_v54 = vld [vmem:[#allocation5 + $0x148] ss:$16 sps:$4 sm:$0xff]  }
  0xb2   :  { %4859 = vmatpush1.bf16.msra.mxu0 %v7539_v55  ;;  %4819 = vmatprep.subr.bf16.mxu1 %v7540_v56  ;;  %v7626_v55 = vld [vmem:[#allocation5 + $0x564] ss:$16 sps:$4 sm:$0xff]   ;;  %v7629_v56 = vld [vmem:[#allocation5 + $0x16c] ss:$16 sps:$4 sm:$0xff]  }
  0xb3   :  { %4860 = vmatprep.subr.bf16.mxu0 %v7542_v57  ;;  %v7624_v57 = vld [vmem:[#allocation5 + $0x560] ss:$16 sps:$4 sm:$0xff]  }
  0xb5   :  { %4820 = vmatpush1.bf16.msra.mxu1 %v7544_v58  ;;  %v7627_v58 = vld [vmem:[#allocation5 + $0x168] ss:$16 sps:$4 sm:$0xff]  }
  0xb6   :  { %4861 = vmatpush1.bf16.msra.mxu0 %v7545_v59  ;;  %4821 = vmatprep.subr.bf16.mxu1 %v7546_v60  ;;  %v7632_v59 = vld [vmem:[#allocation5 + $0x584] ss:$16 sps:$4 sm:$0xff]   ;;  %v7635_v60 = vld [vmem:[#allocation5 + $0x18c] ss:$16 sps:$4 sm:$0xff]  }
  0xb7   :  { %4862 = vmatprep.subr.bf16.mxu0 %v7548_v61  ;;  %v7630_v61 = vld [vmem:[#allocation5 + $0x580] ss:$16 sps:$4 sm:$0xff]  }
  0xb9   :  { %4822 = vmatpush1.bf16.msra.mxu1 %v7550_v62  ;;  %v7633_v62 = vld [vmem:[#allocation5 + $0x188] ss:$16 sps:$4 sm:$0xff]  }
  0xba   :  { %4863 = vmatpush1.bf16.msra.mxu0 %v7551_v63  ;;  %4823 = vmatprep.subr.bf16.mxu1 %v7552_v0  ;;  %v7638_v63 = vld [vmem:[#allocation5 + $0x5a4] ss:$16 sps:$4 sm:$0xff]   ;;  %v7641_v0 = vld [vmem:[#allocation5 + $0x1ac] ss:$16 sps:$4 sm:$0xff]  }
  0xbb   :  { %4864 = vmatprep.subr.bf16.mxu0 %v7554_v1  ;;  %v7636_v1 = vld [vmem:[#allocation5 + $0x5a0] ss:$16 sps:$4 sm:$0xff]  }
  0xbd   :  { %4824 = vmatpush1.bf16.msra.mxu1 %v7556_v2  ;;  %v7639_v2 = vld [vmem:[#allocation5 + $0x1a8] ss:$16 sps:$4 sm:$0xff]  }
  0xbe   :  { %4865 = vmatpush1.bf16.msra.mxu0 %v7557_v3  ;;  %5285 = vmatprep.subr.bf16.mxu1 %v7563_v7  ;;  %v7644_v3 = vld [vmem:[#allocation5 + $0x5c4] ss:$16 sps:$4 sm:$0xff]  }
  0xbf   :  { %4875 = vmatprep.subr.bf16.mxu0 %v7560_v5  ;;  %v7642_v5 = vld [vmem:[#allocation5 + $0x5c0] ss:$16 sps:$4 sm:$0xff]   ;;  %v7650_v7 = vld [vmem:[#allocation5 + $0x5e4] ss:$16 sps:$4 sm:$0xff]  }
  0xc0   :  { %4826 = vmatmul.mubr.bf16.vlgmr.msra.gmra.mrb[0].mxu1 %v9060_v8 }
  0xc1   :  { %4867 = vmatmul.mubr.bf16.vlgmr.msra.gmra.mrb[0].mxu0 %v9062_v11  ;;  %5286 = vmatpush1.bf16.msra.mxu1 %v7561_v10  ;;  %v7648_v10 = vld [vmem:[#allocation5 + $0x5e0] ss:$16 sps:$4 sm:$0xff]  }
  0xc2   :  { %4876 = vmatpush1.bf16.msra.mxu0 %v7558_v9  ;;  %5287 = vmatprep.subr.bf16.mxu1 %v7569_v13  ;;  %v7653_v9 = vld [vmem:[#allocation5 + $0x1ec] ss:$16 sps:$4 sm:$0xff]   ;;  %v119_v13 = vld [vmem:[#allocation2 + $0x20] sm:$0xff] }
  0xc3   :  { %4877 = vmatprep.subr.bf16.mxu0 %v7566_v12  ;;  %5317 = vmatprep.mubr.bf16.mxu1 %v9054_v48  ;;  %v7612_v48 = vld [vmem:[#allocation5 + $0x520] ss:$16 sps:$4 sm:$0xff]   ;;  %v7651_v12 = vld [vmem:[#allocation5 + $0x1e8] ss:$16 sps:$4 sm:$0xff]  }
  0xc4   :  { %4907 = vmatprep.mubr.bf16.mxu0 %v9067_v36 }
  0xc5   :  { %5288 = vmatpush1.bf16.msra.mxu1 %v7567_v15  ;;  %v7659_v15 = vld [vmem:[#allocation5 + $0x20c] ss:$16 sps:$4 sm:$0xff]  }
  0xc6   :  { %4878 = vmatpush1.bf16.msra.mxu0 %v7564_v14  ;;  %5289 = vmatprep.subr.bf16.mxu1 %v7575_v17  ;;  %v7656_v14 = vld [vmem:[#allocation5 + $0x604] ss:$16 sps:$4 sm:$0xff]   ;;  %v7654_v17 = vld [vmem:[#allocation5 + $0x600] ss:$16 sps:$4 sm:$0xff]  }
  0xc7   :  { %4879 = vmatprep.subr.bf16.mxu0 %v7572_v16  ;;  %v9070_v16 = vpack.c.bf16 %v119_v13, %v119_v13  ;;  %v7738_v13 = vld [vmem:[#allocation5 + $0x7c0] ss:$16 sps:$4 sm:$0xff]  }
  0xc9   :  { %5290 = vmatpush1.bf16.msra.mxu1 %v7573_v19  ;;  %v7662_v19 = vld [vmem:[#allocation5 + $0x624] ss:$16 sps:$4 sm:$0xff]  }
  0xca   :  { %4880 = vmatpush1.bf16.msra.mxu0 %v7570_v18  ;;  %5291 = vmatprep.subr.bf16.mxu1 %v7581_v21  ;;  %v7657_v18 = vld [vmem:[#allocation5 + $0x208] ss:$16 sps:$4 sm:$0xff]  }
  0xcb   :  { %4881 = vmatprep.subr.bf16.mxu0 %v7578_v20  ;;  %v7665_v20 = vld [vmem:[#allocation5 + $0x22c] ss:$16 sps:$4 sm:$0xff]  }
  0xcc   :  { %v122_v21 = vld [vmem:[#allocation2 + $0x38] sm:$0xff] }
  0xcd   :  { %5292 = vmatpush1.bf16.msra.mxu1 %v7579_v23  ;;  %v9074_v23 = vpack.c.bf16 %v122_v21, %v122_v21  ;;  %v121_v21 = vld [vmem:[#allocation2 + $0x30] sm:$0xff] }
  0xce   :  { %4882 = vmatpush1.bf16.msra.mxu0 %v7576_v22  ;;  %5293 = vmatprep.subr.bf16.mxu1 %v7587_v25  ;;  %v7660_v22 = vld [vmem:[#allocation5 + $0x620] ss:$16 sps:$4 sm:$0xff]   ;;  %v7668_v25 = vld [vmem:[#allocation5 + $0x644] ss:$16 sps:$4 sm:$0xff]  }
  0xcf   :  { %4883 = vmatprep.subr.bf16.mxu0 %v7584_v24  ;;  %v7663_v24 = vld [vmem:[#allocation5 + $0x228] ss:$16 sps:$4 sm:$0xff]  }
  0xd1   :  { %5294 = vmatpush1.bf16.msra.mxu1 %v7585_v27  ;;  %v7666_v27 = vld [vmem:[#allocation5 + $0x640] ss:$16 sps:$4 sm:$0xff]  }
  0xd2   :  { %4884 = vmatpush1.bf16.msra.mxu0 %v7582_v26  ;;  %5295 = vmatprep.subr.bf16.mxu1 %v7593_v29  ;;  %v7671_v26 = vld [vmem:[#allocation5 + $0x24c] ss:$16 sps:$4 sm:$0xff]   ;;  %v7674_v29 = vld [vmem:[#allocation5 + $0x664] ss:$16 sps:$4 sm:$0xff]  }
  0xd3   :  { %4885 = vmatprep.subr.bf16.mxu0 %v7590_v28  ;;  %v7669_v28 = vld [vmem:[#allocation5 + $0x248] ss:$16 sps:$4 sm:$0xff]  }
  0xd5   :  { %5296 = vmatpush1.bf16.msra.mxu1 %v7591_v31  ;;  %v7675_v31 = vld [vmem:[#allocation5 + $0x268] ss:$16 sps:$4 sm:$0xff]  }
  0xd6   :  { %4886 = vmatpush1.bf16.msra.mxu0 %v7588_v30  ;;  %5297 = vmatprep.subr.bf16.mxu1 %v7599_v33  ;;  %v7672_v30 = vld [vmem:[#allocation5 + $0x660] ss:$16 sps:$4 sm:$0xff]   ;;  %v7683_v33 = vld [vmem:[#allocation5 + $0x28c] ss:$16 sps:$4 sm:$0xff]  }
  0xd7   :  { %4887 = vmatprep.subr.bf16.mxu0 %v7596_v32  ;;  %v7680_v32 = vld [vmem:[#allocation5 + $0x684] ss:$16 sps:$4 sm:$0xff]  }
  0xd9   :  { %5298 = vmatpush1.bf16.msra.mxu1 %v7597_v37  ;;  %v7689_v37 = vld [vmem:[#allocation5 + $0x2ac] ss:$16 sps:$4 sm:$0xff]  }
  0xda   :  { %4888 = vmatpush1.bf16.msra.mxu0 %v7594_v35  ;;  %5299 = vmatprep.subr.bf16.mxu1 %v7605_v39  ;;  %v7681_v35 = vld [vmem:[#allocation5 + $0x288] ss:$16 sps:$4 sm:$0xff]  }
  0xdb   :  { %4889 = vmatprep.subr.bf16.mxu0 %v7602_v38  ;;  %v7684_v38 = vld [vmem:[#allocation5 + $0x6a0] ss:$16 sps:$4 sm:$0xff]   ;;  %v7687_v39 = vld [vmem:[#allocation5 + $0x2a8] ss:$16 sps:$4 sm:$0xff]  }
  0xdd   :  { %5300 = vmatpush1.bf16.msra.mxu1 %v7603_v41  ;;  %v7695_v41 = vld [vmem:[#allocation5 + $0x2cc] ss:$16 sps:$4 sm:$0xff]  }
  0xde   :  { %4890 = vmatpush1.bf16.msra.mxu0 %v7600_v40  ;;  %5301 = vmatprep.subr.bf16.mxu1 %v7611_v43  ;;  %v7692_v40 = vld [vmem:[#allocation5 + $0x6c4] ss:$16 sps:$4 sm:$0xff]   ;;  %v7693_v43 = vld [vmem:[#allocation5 + $0x2c8] ss:$16 sps:$4 sm:$0xff]  }
  0xdf   :  { %4891 = vmatprep.subr.bf16.mxu0 %v7608_v42  ;;  %v7690_v42 = vld [vmem:[#allocation5 + $0x6c0] ss:$16 sps:$4 sm:$0xff]  }
  0xe1   :  { %5302 = vmatpush1.bf16.msra.mxu1 %v7609_v45  ;;  %v7701_v45 = vld [vmem:[#allocation5 + $0x2ec] ss:$16 sps:$4 sm:$0xff]  }
  0xe2   :  { %4892 = vmatpush1.bf16.msra.mxu0 %v7606_v44  ;;  %5303 = vmatprep.subr.bf16.mxu1 %v7617_v47  ;;  %v7698_v44 = vld [vmem:[#allocation5 + $0x6e4] ss:$16 sps:$4 sm:$0xff]   ;;  %v7699_v47 = vld [vmem:[#allocation5 + $0x2e8] ss:$16 sps:$4 sm:$0xff]  }
  0xe3   :  { %4893 = vmatprep.subr.bf16.mxu0 %v7614_v46  ;;  %v7696_v46 = vld [vmem:[#allocation5 + $0x6e0] ss:$16 sps:$4 sm:$0xff]  }
  0xe5   :  { %5304 = vmatpush1.bf16.msra.mxu1 %v7615_v49  ;;  %v7707_v49 = vld [vmem:[#allocation5 + $0x30c] ss:$16 sps:$4 sm:$0xff]  }
  0xe6   :  { %4894 = vmatpush1.bf16.msra.mxu0 %v7612_v48  ;;  %5305 = vmatprep.subr.bf16.mxu1 %v7623_v51  ;;  %v7704_v48 = vld [vmem:[#allocation5 + $0x704] ss:$16 sps:$4 sm:$0xff]   ;;  %v7705_v51 = vld [vmem:[#allocation5 + $0x308] ss:$16 sps:$4 sm:$0xff]  }
  0xe7   :  { %4895 = vmatprep.subr.bf16.mxu0 %v7620_v50  ;;  %v7702_v50 = vld [vmem:[#allocation5 + $0x700] ss:$16 sps:$4 sm:$0xff]  }
  0xe9   :  { %5306 = vmatpush1.bf16.msra.mxu1 %v7621_v54  ;;  %v7713_v54 = vld [vmem:[#allocation5 + $0x32c] ss:$16 sps:$4 sm:$0xff]  }
  0xea   :  { %4896 = vmatpush1.bf16.msra.mxu0 %v7618_v53  ;;  %5307 = vmatprep.subr.bf16.mxu1 %v7629_v56  ;;  %v7710_v53 = vld [vmem:[#allocation5 + $0x724] ss:$16 sps:$4 sm:$0xff]   ;;  %v7711_v56 = vld [vmem:[#allocation5 + $0x328] ss:$16 sps:$4 sm:$0xff]  }
  0xeb   :  { %4897 = vmatprep.subr.bf16.mxu0 %v7626_v55  ;;  %v7708_v55 = vld [vmem:[#allocation5 + $0x720] ss:$16 sps:$4 sm:$0xff]  }
  0xed   :  { %5308 = vmatpush1.bf16.msra.mxu1 %v7627_v58  ;;  %v7719_v58 = vld [vmem:[#allocation5 + $0x34c] ss:$16 sps:$4 sm:$0xff]  }
  0xee   :  { %4898 = vmatpush1.bf16.msra.mxu0 %v7624_v57  ;;  %5309 = vmatprep.subr.bf16.mxu1 %v7635_v60  ;;  %v7716_v57 = vld [vmem:[#allocation5 + $0x744] ss:$16 sps:$4 sm:$0xff]   ;;  %v7717_v60 = vld [vmem:[#allocation5 + $0x348] ss:$16 sps:$4 sm:$0xff]  }
  0xef   :  { %4899 = vmatprep.subr.bf16.mxu0 %v7632_v59  ;;  %v7714_v59 = vld [vmem:[#allocation5 + $0x740] ss:$16 sps:$4 sm:$0xff]  }
  0xf1   :  { %5310 = vmatpush1.bf16.msra.mxu1 %v7633_v62  ;;  %v7725_v62 = vld [vmem:[#allocation5 + $0x36c] ss:$16 sps:$4 sm:$0xff]  }
  0xf2   :  { %4900 = vmatpush1.bf16.msra.mxu0 %v7630_v61  ;;  %5311 = vmatprep.subr.bf16.mxu1 %v7641_v0  ;;  %v7722_v61 = vld [vmem:[#allocation5 + $0x764] ss:$16 sps:$4 sm:$0xff]   ;;  %v7723_v0 = vld [vmem:[#allocation5 + $0x368] ss:$16 sps:$4 sm:$0xff]  }
  0xf3   :  { %4901 = vmatprep.subr.bf16.mxu0 %v7638_v63  ;;  %v7720_v63 = vld [vmem:[#allocation5 + $0x760] ss:$16 sps:$4 sm:$0xff]  }
  0xf5   :  { %5312 = vmatpush1.bf16.msra.mxu1 %v7639_v2  ;;  %v7731_v2 = vld [vmem:[#allocation5 + $0x38c] ss:$16 sps:$4 sm:$0xff]  }
  0xf6   :  { %4902 = vmatpush1.bf16.msra.mxu0 %v7636_v1  ;;  %5313 = vmatprep.subr.bf16.mxu1 %v7647_v4  ;;  %v7728_v1 = vld [vmem:[#allocation5 + $0x784] ss:$16 sps:$4 sm:$0xff]   ;;  %v7729_v4 = vld [vmem:[#allocation5 + $0x388] ss:$16 sps:$4 sm:$0xff]  }
  0xf7   :  { %4903 = vmatprep.subr.bf16.mxu0 %v7644_v3  ;;  %v7726_v3 = vld [vmem:[#allocation5 + $0x780] ss:$16 sps:$4 sm:$0xff]  }
  0xf9   :  { %5314 = vmatpush1.bf16.msra.mxu1 %v7645_v6  ;;  %v7737_v6 = vld [vmem:[#allocation5 + $0x3ac] ss:$16 sps:$4 sm:$0xff]  }
  0xfa   :  { %4904 = vmatpush1.bf16.msra.mxu0 %v7642_v5  ;;  %5315 = vmatprep.subr.bf16.mxu1 %v7653_v9  ;;  %v7734_v5 = vld [vmem:[#allocation5 + $0x7a4] ss:$16 sps:$4 sm:$0xff]   ;;  %v7735_v9 = vld [vmem:[#allocation5 + $0x3a8] ss:$16 sps:$4 sm:$0xff]  }
  0xfb   :  { %4905 = vmatprep.subr.bf16.mxu0 %v7650_v7  ;;  %v7732_v7 = vld [vmem:[#allocation5 + $0x7a0] ss:$16 sps:$4 sm:$0xff]  }
  0xfd   :  { %5316 = vmatpush1.bf16.msra.mxu1 %v7651_v12  ;;  %v7743_v12 = vld [vmem:[#allocation5 + $0x3cc] ss:$16 sps:$4 sm:$0xff]  }
  0xfe   :  { %4906 = vmatpush1.bf16.msra.mxu0 %v7648_v10  ;;  %5326 = vmatprep.subr.bf16.mxu1 %v7659_v15  ;;  %v7740_v10 = vld [vmem:[#allocation5 + $0x7c4] ss:$16 sps:$4 sm:$0xff]  }
  0xff   :  { %4916 = vmatprep.subr.bf16.mxu0 %v7656_v14  ;;  %v7741_v14 = vld [vmem:[#allocation5 + $0x3c8] ss:$16 sps:$4 sm:$0xff]   ;;  %v7746_v15 = vld [vmem:[#allocation5 + $0x7e4] ss:$16 sps:$4 sm:$0xff]  }
 0x100   :  { %5318 = vmatmul.mubr.bf16.vlgmr.msra.gmra.mrb[4].mxu1 %v9060_v8  ;;  %v7677_v8 = vld [vmem:[#allocation5 + $0x26c] ss:$16 sps:$4 sm:$0xff]  }
 0x101   :  { %4908 = vmatmul.mubr.bf16.vlgmr.msra.gmra.mrb[0].mxu0 %v9070_v16  ;;  %5327 = vmatpush1.bf16.msra.mxu1 %v7657_v18  ;;  %v7744_v18 = vld [vmem:[#allocation5 + $0x7e0] ss:$16 sps:$4 sm:$0xff]  }
 0x102   :  { %4917 = vmatpush1.bf16.msra.mxu0 %v7654_v17  ;;  %5328 = vmatprep.subr.bf16.mxu1 %v7665_v20  ;;  %v7749_v17 = vld [vmem:[#allocation5 + $0x3ec] ss:$16 sps:$4 sm:$0xff]   ;;  %v7752_v20 = vld [vmem:[#allocation5 + $0x804] ss:$16 sps:$4 sm:$0xff]  }
 0x103   :  { %4918 = vmatprep.subr.bf16.mxu0 %v7662_v19  ;;  %4948 = vmatprep.mubr.bf16.mxu0 %v9074_v23  ;;  %v7747_v19 = vld [vmem:[#allocation5 + $0x3e8] ss:$16 sps:$4 sm:$0xff]  }
 0x104   :  { %5358 = vmatprep.mubr.bf16.mxu1 %v9056_v52  ;;  %v7686_v52 = vld [vmem:[#allocation5 + $0x6a4] ss:$16 sps:$4 sm:$0xff]  }
 0x105   :  { %5329 = vmatpush1.bf16.msra.mxu1 %v7663_v24  ;;  %v7750_v24 = vld [vmem:[#allocation5 + $0x800] ss:$16 sps:$4 sm:$0xff]  }
 0x106   :  { %4919 = vmatpush1.bf16.msra.mxu0 %v7660_v22  ;;  %5330 = vmatprep.subr.bf16.mxu1 %v7671_v26  ;;  %v7755_v22 = vld [vmem:[#allocation5 + $0x40c] ss:$16 sps:$4 sm:$0xff]  }
 0x107   :  { %4920 = vmatprep.subr.bf16.mxu0 %v7668_v25  ;;  %v9078_v25 = vpack.c.bf16 %v121_v21, %v121_v21  ;;  %v124_v26 = vld [vmem:[#allocation2 + $0x48] sm:$0xff] }
 0x108   :  { %v7837_v21 = vld [vmem:[#allocation5 + $0x5c8] ss:$16 sps:$4 sm:$0xff]  }
 0x109   :  { %5331 = vmatpush1.bf16.msra.mxu1 %v7669_v28  ;;  %v7758_v28 = vld [vmem:[#allocation5 + $0x824] ss:$16 sps:$4 sm:$0xff]  }
 0x10a   :  { %4921 = vmatpush1.bf16.msra.mxu0 %v7666_v27  ;;  %5332 = vmatprep.subr.bf16.mxu1 %v7677_v8  ;;  %v7753_v27 = vld [vmem:[#allocation5 + $0x408] ss:$16 sps:$4 sm:$0xff]   ;;  %v9080_v8 = vpack.c.bf16 %v124_v26, %v124_v26  ;;  %v7840_v26 = vld [vmem:[#allocation5 + $0x9e0] ss:$16 sps:$4 sm:$0xff]  }
 0x10b   :  { %4922 = vmatprep.subr.bf16.mxu0 %v7674_v29  ;;  %v7761_v29 = vld [vmem:[#allocation5 + $0x42c] ss:$16 sps:$4 sm:$0xff]  }
 0x10d   :  { %5333 = vmatpush1.bf16.msra.mxu1 %v7675_v31  ;;  %v7759_v31 = vld [vmem:[#allocation5 + $0x428] ss:$16 sps:$4 sm:$0xff]  }
 0x10e   :  { %4923 = vmatpush1.bf16.msra.mxu0 %v7672_v30  ;;  %5334 = vmatprep.subr.bf16.mxu1 %v7683_v33  ;;  %v7756_v30 = vld [vmem:[#allocation5 + $0x820] ss:$16 sps:$4 sm:$0xff]   ;;  %v7767_v33 = vld [vmem:[#allocation5 + $0x44c] ss:$16 sps:$4 sm:$0xff]  }
 0x10f   :  { %4924 = vmatprep.subr.bf16.mxu0 %v7680_v32  ;;  %v7764_v32 = vld [vmem:[#allocation5 + $0x844] ss:$16 sps:$4 sm:$0xff]  }
 0x111   :  { %5335 = vmatpush1.bf16.msra.mxu1 %v7681_v35  ;;  %v7765_v35 = vld [vmem:[#allocation5 + $0x448] ss:$16 sps:$4 sm:$0xff]  }
 0x112   :  { %4925 = vmatpush1.bf16.msra.mxu0 %v7678_v34  ;;  %5336 = vmatprep.subr.bf16.mxu1 %v7689_v37  ;;  %v7762_v34 = vld [vmem:[#allocation5 + $0x840] ss:$16 sps:$4 sm:$0xff]  }
 0x113   :  { %4926 = vmatprep.subr.bf16.mxu0 %v7686_v52  ;;  %v7770_v52 = vld [vmem:[#allocation5 + $0x864] ss:$16 sps:$4 sm:$0xff]   ;;  %v7768_v37 = vld [vmem:[#allocation5 + $0x860] ss:$16 sps:$4 sm:$0xff]  }
 0x115   :  { %5337 = vmatpush1.bf16.msra.mxu1 %v7687_v39  ;;  %v7776_v39 = vld [vmem:[#allocation5 + $0x884] ss:$16 sps:$4 sm:$0xff]  }
 0x116   :  { %4927 = vmatpush1.bf16.msra.mxu0 %v7684_v38  ;;  %5338 = vmatprep.subr.bf16.mxu1 %v7695_v41  ;;  %v7771_v38 = vld [vmem:[#allocation5 + $0x468] ss:$16 sps:$4 sm:$0xff]   ;;  %v7774_v41 = vld [vmem:[#allocation5 + $0x880] ss:$16 sps:$4 sm:$0xff]  }
 0x117   :  { %4928 = vmatprep.subr.bf16.mxu0 %v7692_v40  ;;  %v7779_v40 = vld [vmem:[#allocation5 + $0x48c] ss:$16 sps:$4 sm:$0xff]  }
 0x119   :  { %5339 = vmatpush1.bf16.msra.mxu1 %v7693_v43  ;;  %v7785_v43 = vld [vmem:[#allocation5 + $0x4ac] ss:$16 sps:$4 sm:$0xff]  }
 0x11a   :  { %4929 = vmatpush1.bf16.msra.mxu0 %v7690_v42  ;;  %5340 = vmatprep.subr.bf16.mxu1 %v7701_v45  ;;  %v7782_v42 = vld [vmem:[#allocation5 + $0x8a4] ss:$16 sps:$4 sm:$0xff]   ;;  %v7783_v45 = vld [vmem:[#allocation5 + $0x4a8] ss:$16 sps:$4 sm:$0xff]  }
 0x11b   :  { %4930 = vmatprep.subr.bf16.mxu0 %v7698_v44  ;;  %v7780_v44 = vld [vmem:[#allocation5 + $0x8a0] ss:$16 sps:$4 sm:$0xff]  }
 0x11d   :  { %5341 = vmatpush1.bf16.msra.mxu1 %v7699_v47  ;;  %v7791_v47 = vld [vmem:[#allocation5 + $0x4cc] ss:$16 sps:$4 sm:$0xff]  }
 0x11e   :  { %4931 = vmatpush1.bf16.msra.mxu0 %v7696_v46  ;;  %5342 = vmatprep.subr.bf16.mxu1 %v7707_v49  ;;  %v7788_v46 = vld [vmem:[#allocation5 + $0x8c4] ss:$16 sps:$4 sm:$0xff]   ;;  %v7789_v49 = vld [vmem:[#allocation5 + $0x4c8] ss:$16 sps:$4 sm:$0xff]  }
 0x11f   :  { %4932 = vmatprep.subr.bf16.mxu0 %v7704_v48  ;;  %v7786_v48 = vld [vmem:[#allocation5 + $0x8c0] ss:$16 sps:$4 sm:$0xff]  }
 0x121   :  { %5343 = vmatpush1.bf16.msra.mxu1 %v7705_v51  ;;  %v7797_v51 = vld [vmem:[#allocation5 + $0x4ec] ss:$16 sps:$4 sm:$0xff]  }
 0x122   :  { %4933 = vmatpush1.bf16.msra.mxu0 %v7702_v50  ;;  %5344 = vmatprep.subr.bf16.mxu1 %v7713_v54  ;;  %v7794_v50 = vld [vmem:[#allocation5 + $0x8e4] ss:$16 sps:$4 sm:$0xff]   ;;  %v7795_v54 = vld [vmem:[#allocation5 + $0x4e8] ss:$16 sps:$4 sm:$0xff]  }
 0x123   :  { %4934 = vmatprep.subr.bf16.mxu0 %v7710_v53  ;;  %v7792_v53 = vld [vmem:[#allocation5 + $0x8e0] ss:$16 sps:$4 sm:$0xff]  }
 0x125   :  { %5345 = vmatpush1.bf16.msra.mxu1 %v7711_v56  ;;  %v7803_v56 = vld [vmem:[#allocation5 + $0x50c] ss:$16 sps:$4 sm:$0xff]  }
 0x126   :  { %4935 = vmatpush1.bf16.msra.mxu0 %v7708_v55  ;;  %5346 = vmatprep.subr.bf16.mxu1 %v7719_v58  ;;  %v7800_v55 = vld [vmem:[#allocation5 + $0x904] ss:$16 sps:$4 sm:$0xff]   ;;  %v7801_v58 = vld [vmem:[#allocation5 + $0x508] ss:$16 sps:$4 sm:$0xff]  }
 0x127   :  { %4936 = vmatprep.subr.bf16.mxu0 %v7716_v57  ;;  %v7798_v57 = vld [vmem:[#allocation5 + $0x900] ss:$16 sps:$4 sm:$0xff]  }
 0x129   :  { %5347 = vmatpush1.bf16.msra.mxu1 %v7717_v60  ;;  %v7809_v60 = vld [vmem:[#allocation5 + $0x52c] ss:$16 sps:$4 sm:$0xff]  }
 0x12a   :  { %4937 = vmatpush1.bf16.msra.mxu0 %v7714_v59  ;;  %5348 = vmatprep.subr.bf16.mxu1 %v7725_v62  ;;  %v7806_v59 = vld [vmem:[#allocation5 + $0x924] ss:$16 sps:$4 sm:$0xff]   ;;  %v7807_v62 = vld [vmem:[#allocation5 + $0x528] ss:$16 sps:$4 sm:$0xff]  }
 0x12b   :  { %4938 = vmatprep.subr.bf16.mxu0 %v7722_v61  ;;  %v7804_v61 = vld [vmem:[#allocation5 + $0x920] ss:$16 sps:$4 sm:$0xff]  }
 0x12d   :  { %5349 = vmatpush1.bf16.msra.mxu1 %v7723_v0  ;;  %v7815_v0 = vld [vmem:[#allocation5 + $0x54c] ss:$16 sps:$4 sm:$0xff]  }
 0x12e   :  { %4939 = vmatpush1.bf16.msra.mxu0 %v7720_v63  ;;  %5350 = vmatprep.subr.bf16.mxu1 %v7731_v2  ;;  %v7812_v63 = vld [vmem:[#allocation5 + $0x944] ss:$16 sps:$4 sm:$0xff]   ;;  %v7813_v2 = vld [vmem:[#allocation5 + $0x548] ss:$16 sps:$4 sm:$0xff]  }
 0x12f   :  { %4940 = vmatprep.subr.bf16.mxu0 %v7728_v1  ;;  %v7810_v1 = vld [vmem:[#allocation5 + $0x940] ss:$16 sps:$4 sm:$0xff]  }
 0x131   :  { %5351 = vmatpush1.bf16.msra.mxu1 %v7729_v4  ;;  %v7821_v4 = vld [vmem:[#allocation5 + $0x56c] ss:$16 sps:$4 sm:$0xff]  }
 0x132   :  { %4941 = vmatpush1.bf16.msra.mxu0 %v7726_v3  ;;  %5352 = vmatprep.subr.bf16.mxu1 %v7737_v6  ;;  %v7818_v3 = vld [vmem:[#allocation5 + $0x964] ss:$16 sps:$4 sm:$0xff]   ;;  %v7819_v6 = vld [vmem:[#allocation5 + $0x568] ss:$16 sps:$4 sm:$0xff]  }
 0x133   :  { %4942 = vmatprep.subr.bf16.mxu0 %v7734_v5  ;;  %v7816_v5 = vld [vmem:[#allocation5 + $0x960] ss:$16 sps:$4 sm:$0xff]  }
 0x135   :  { %5353 = vmatpush1.bf16.msra.mxu1 %v7735_v9  ;;  %v7827_v9 = vld [vmem:[#allocation5 + $0x58c] ss:$16 sps:$4 sm:$0xff]  }
 0x136   :  { %4943 = vmatpush1.bf16.msra.mxu0 %v7732_v7  ;;  %5354 = vmatprep.subr.bf16.mxu1 %v7743_v12  ;;  %v7824_v7 = vld [vmem:[#allocation5 + $0x984] ss:$16 sps:$4 sm:$0xff]   ;;  %v7825_v12 = vld [vmem:[#allocation5 + $0x588] ss:$16 sps:$4 sm:$0xff]  }
 0x137   :  { %4944 = vmatprep.subr.bf16.mxu0 %v7740_v10  ;;  %v7822_v10 = vld [vmem:[#allocation5 + $0x980] ss:$16 sps:$4 sm:$0xff]  }
 0x139   :  { %5355 = vmatpush1.bf16.msra.mxu1 %v7741_v14  ;;  %v7833_v14 = vld [vmem:[#allocation5 + $0x5ac] ss:$16 sps:$4 sm:$0xff]  }
 0x13a   :  { %4945 = vmatpush1.bf16.msra.mxu0 %v7738_v13  ;;  %5356 = vmatprep.subr.bf16.mxu1 %v7749_v17  ;;  %v7830_v13 = vld [vmem:[#allocation5 + $0x9a4] ss:$16 sps:$4 sm:$0xff]   ;;  %v7831_v17 = vld [vmem:[#allocation5 + $0x5a8] ss:$16 sps:$4 sm:$0xff]  }
 0x13b   :  { %4946 = vmatprep.subr.bf16.mxu0 %v7746_v15  ;;  %v7828_v15 = vld [vmem:[#allocation5 + $0x9a0] ss:$16 sps:$4 sm:$0xff]  }
 0x13d   :  { %5357 = vmatpush1.bf16.msra.mxu1 %v7747_v19  ;;  %v7839_v19 = vld [vmem:[#allocation5 + $0x5cc] ss:$16 sps:$4 sm:$0xff]  }
 0x13e   :  { %4947 = vmatpush1.bf16.msra.mxu0 %v7744_v18  ;;  %5367 = vmatprep.subr.bf16.mxu1 %v7755_v22  ;;  %v7836_v18 = vld [vmem:[#allocation5 + $0x9c4] ss:$16 sps:$4 sm:$0xff]  }
 0x13f   :  { %4957 = vmatprep.subr.bf16.mxu0 %v7752_v20  ;;  %v7834_v20 = vld [vmem:[#allocation5 + $0x9c0] ss:$16 sps:$4 sm:$0xff]   ;;  %v7842_v22 = vld [vmem:[#allocation5 + $0x9e4] ss:$16 sps:$4 sm:$0xff]  }
 0x140   :  { %5359 = vmatmul.mubr.bf16.vlgmr.msra.gmra.mrb[4].mxu1 %v9062_v11  ;;  %v7773_v11 = vld [vmem:[#allocation5 + $0x46c] ss:$16 sps:$4 sm:$0xff]  }
 0x141   :  { %4949 = vmatmul.mubr.bf16.vlgmr.msra.gmra.mrb[0].mxu0 %v9078_v25  ;;  %5368 = vmatpush1.bf16.msra.mxu1 %v7753_v27  ;;  %v7843_v27 = vld [vmem:[#allocation5 + $0x5e8] ss:$16 sps:$4 sm:$0xff]  }
 0x142   :  { %4958 = vmatpush1.bf16.msra.mxu0 %v7750_v24  ;;  %5369 = vmatprep.subr.bf16.mxu1 %v7761_v29  ;;  %v7845_v24 = vld [vmem:[#allocation5 + $0x5ec] ss:$16 sps:$4 sm:$0xff]   ;;  %v7848_v29 = vld [vmem:[#allocation5 + $0xa04] ss:$16 sps:$4 sm:$0xff]  }
 0x143   :  { %4959 = vmatprep.subr.bf16.mxu0 %v7758_v28  ;;  %4989 = vmatprep.mubr.bf16.mxu0 %v9080_v8  ;;  %v123_v28 = vld [vmem:[#allocation2 + $0x40] sm:$0xff] }
 0x144   :  { %5399 = vmatprep.mubr.bf16.mxu1 %v9067_v36  ;;  %v7777_v36 = vld [vmem:[#allocation5 + $0x488] ss:$16 sps:$4 sm:$0xff]  }
 0x145   :  { %5370 = vmatpush1.bf16.msra.mxu1 %v7759_v31  ;;  %v7846_v31 = vld [vmem:[#allocation5 + $0xa00] ss:$16 sps:$4 sm:$0xff]  }
 0x146   :  { %4960 = vmatpush1.bf16.msra.mxu0 %v7756_v30  ;;  %5371 = vmatprep.subr.bf16.mxu1 %v7767_v33  ;;  %v7851_v30 = vld [vmem:[#allocation5 + $0x60c] ss:$16 sps:$4 sm:$0xff]  }
 0x147   :  { %4961 = vmatprep.subr.bf16.mxu0 %v7764_v32  ;;  %v9086_v32 = vpack.c.bf16 %v123_v28, %v123_v28  ;;  %v126_v33 = vld [vmem:[#allocation2 + $0x58] sm:$0xff]  ;;  %v7924_v28 = vld [vmem:[#allocation5 + $0xba0] ss:$16 sps:$4 sm:$0xff]  }
 0x149   :  { %5372 = vmatpush1.bf16.msra.mxu1 %v7765_v35  ;;  %v7854_v35 = vld [vmem:[#allocation5 + $0xa24] ss:$16 sps:$4 sm:$0xff]  }
 0x14a   :  { %4962 = vmatpush1.bf16.msra.mxu0 %v7762_v34  ;;  %5373 = vmatprep.subr.bf16.mxu1 %v7773_v11  ;;  %v7849_v34 = vld [vmem:[#allocation5 + $0x608] ss:$16 sps:$4 sm:$0xff]   ;;  %v9088_v11 = vpack.c.bf16 %v126_v33, %v126_v33  ;;  %v7930_v33 = vld [vmem:[#allocation5 + $0xbc0] ss:$16 sps:$4 sm:$0xff]  }
 0x14b   :  { %4963 = vmatprep.subr.bf16.mxu0 %v7770_v52  ;;  %v7857_v52 = vld [vmem:[#allocation5 + $0x62c] ss:$16 sps:$4 sm:$0xff]  }
 0x14d   :  { %5374 = vmatpush1.bf16.msra.mxu1 %v7771_v38  ;;  %v7855_v38 = vld [vmem:[#allocation5 + $0x628] ss:$16 sps:$4 sm:$0xff]  }
 0x14e   :  { %4964 = vmatpush1.bf16.msra.mxu0 %v7768_v37  ;;  %5375 = vmatprep.subr.bf16.mxu1 %v7779_v40  ;;  %v7852_v37 = vld [vmem:[#allocation5 + $0xa20] ss:$16 sps:$4 sm:$0xff]   ;;  %v7863_v40 = vld [vmem:[#allocation5 + $0x64c] ss:$16 sps:$4 sm:$0xff]  }
 0x14f   :  { %4965 = vmatprep.subr.bf16.mxu0 %v7776_v39  ;;  %v7860_v39 = vld [vmem:[#allocation5 + $0xa44] ss:$16 sps:$4 sm:$0xff]  }
 0x151   :  { %5376 = vmatpush1.bf16.msra.mxu1 %v7777_v36  ;;  %v7861_v36 = vld [vmem:[#allocation5 + $0x648] ss:$16 sps:$4 sm:$0xff]  }
 0x152   :  { %4966 = vmatpush1.bf16.msra.mxu0 %v7774_v41  ;;  %5377 = vmatprep.subr.bf16.mxu1 %v7785_v43  ;;  %v7858_v41 = vld [vmem:[#allocation5 + $0xa40] ss:$16 sps:$4 sm:$0xff]  }
 0x153   :  { %4967 = vmatprep.subr.bf16.mxu0 %v7782_v42  ;;  %v7866_v42 = vld [vmem:[#allocation5 + $0xa64] ss:$16 sps:$4 sm:$0xff]   ;;  %v7864_v43 = vld [vmem:[#allocation5 + $0xa60] ss:$16 sps:$4 sm:$0xff]  }
 0x155   :  { %5378 = vmatpush1.bf16.msra.mxu1 %v7783_v45  ;;  %v7872_v45 = vld [vmem:[#allocation5 + $0xa84] ss:$16 sps:$4 sm:$0xff]  }
 0x156   :  { %4968 = vmatpush1.bf16.msra.mxu0 %v7780_v44  ;;  %5379 = vmatprep.subr.bf16.mxu1 %v7791_v47  ;;  %v7867_v44 = vld [vmem:[#allocation5 + $0x668] ss:$16 sps:$4 sm:$0xff]   ;;  %v7870_v47 = vld [vmem:[#allocation5 + $0xa80] ss:$16 sps:$4 sm:$0xff]  }
 0x157   :  { %4969 = vmatprep.subr.bf16.mxu0 %v7788_v46  ;;  %v7875_v46 = vld [vmem:[#allocation5 + $0x68c] ss:$16 sps:$4 sm:$0xff]  }
 0x159   :  { %5380 = vmatpush1.bf16.msra.mxu1 %v7789_v49  ;;  %v7881_v49 = vld [vmem:[#allocation5 + $0x6ac] ss:$16 sps:$4 sm:$0xff]  }
 0x15a   :  { %4970 = vmatpush1.bf16.msra.mxu0 %v7786_v48  ;;  %5381 = vmatprep.subr.bf16.mxu1 %v7797_v51  ;;  %v7878_v48 = vld [vmem:[#allocation5 + $0xaa4] ss:$16 sps:$4 sm:$0xff]   ;;  %v7879_v51 = vld [vmem:[#allocation5 + $0x6a8] ss:$16 sps:$4 sm:$0xff]  }
 0x15b   :  { %4971 = vmatprep.subr.bf16.mxu0 %v7794_v50  ;;  %v7876_v50 = vld [vmem:[#allocation5 + $0xaa0] ss:$16 sps:$4 sm:$0xff]  }
 0x15d   :  { %5382 = vmatpush1.bf16.msra.mxu1 %v7795_v54  ;;  %v7887_v54 = vld [vmem:[#allocation5 + $0x6cc] ss:$16 sps:$4 sm:$0xff]  }
 0x15e   :  { %4972 = vmatpush1.bf16.msra.mxu0 %v7792_v53  ;;  %5383 = vmatprep.subr.bf16.mxu1 %v7803_v56  ;;  %v7884_v53 = vld [vmem:[#allocation5 + $0xac4] ss:$16 sps:$4 sm:$0xff]  }
 0x15f   :  { %4973 = vmatprep.subr.bf16.mxu0 %v7800_v55 }
 0x161   :  { %5384 = vmatpush1.bf16.msra.mxu1 %v7801_v58  ;;  %v7882_v58 = vld [vmem:[#allocation5 + $0xac0] ss:$16 sps:$4 sm:$0xff]  }
 0x162   :  { %4974 = vmatpush1.bf16.msra.mxu0 %v7798_v57  ;;  %5385 = vmatprep.subr.bf16.mxu1 %v7809_v60 }
 0x163   :  { %4975 = vmatprep.subr.bf16.mxu0 %v7806_v59  ;;  %v7885_v59 = vld [vmem:[#allocation5 + $0x6c8] ss:$16 sps:$4 sm:$0xff]  }
 0x165   :  { %5386 = vmatpush1.bf16.msra.mxu1 %v7807_v62  ;;  %v7893_v62 = vld [vmem:[#allocation5 + $0x6ec] ss:$16 sps:$4 sm:$0xff]  }
 0x166   :  { %4976 = vmatpush1.bf16.msra.mxu0 %v7804_v61  ;;  %5387 = vmatprep.subr.bf16.mxu1 %v7815_v0  ;;  %v7890_v61 = vld [vmem:[#allocation5 + $0xae4] ss:$16 sps:$4 sm:$0xff]   ;;  %v7891_v0 = vld [vmem:[#allocation5 + $0x6e8] ss:$16 sps:$4 sm:$0xff]  }
 0x167   :  { %4977 = vmatprep.subr.bf16.mxu0 %v7812_v63  ;;  %v7888_v63 = vld [vmem:[#allocation5 + $0xae0] ss:$16 sps:$4 sm:$0xff]  }
 0x169   :  { %5388 = vmatpush1.bf16.msra.mxu1 %v7813_v2  ;;  %v7899_v2 = vld [vmem:[#allocation5 + $0x70c] ss:$16 sps:$4 sm:$0xff]  }
 0x16a   :  { %4978 = vmatpush1.bf16.msra.mxu0 %v7810_v1  ;;  %5389 = vmatprep.subr.bf16.mxu1 %v7821_v4  ;;  %v7896_v1 = vld [vmem:[#allocation5 + $0xb04] ss:$16 sps:$4 sm:$0xff]   ;;  %v7897_v4 = vld [vmem:[#allocation5 + $0x708] ss:$16 sps:$4 sm:$0xff]  }
 0x16b   :  { %4979 = vmatprep.subr.bf16.mxu0 %v7818_v3  ;;  %v7894_v3 = vld [vmem:[#allocation5 + $0xb00] ss:$16 sps:$4 sm:$0xff]  }
 0x16d   :  { %5390 = vmatpush1.bf16.msra.mxu1 %v7819_v6  ;;  %v7905_v6 = vld [vmem:[#allocation5 + $0x72c] ss:$16 sps:$4 sm:$0xff]  }
 0x16e   :  { %4980 = vmatpush1.bf16.msra.mxu0 %v7816_v5  ;;  %5391 = vmatprep.subr.bf16.mxu1 %v7827_v9  ;;  %v7902_v5 = vld [vmem:[#allocation5 + $0xb24] ss:$16 sps:$4 sm:$0xff]   ;;  %v7903_v9 = vld [vmem:[#allocation5 + $0x728] ss:$16 sps:$4 sm:$0xff]  }
 0x16f   :  { %4981 = vmatprep.subr.bf16.mxu0 %v7824_v7  ;;  %v7900_v7 = vld [vmem:[#allocation5 + $0xb20] ss:$16 sps:$4 sm:$0xff]  }
 0x171   :  { %5392 = vmatpush1.bf16.msra.mxu1 %v7825_v12  ;;  %v7911_v12 = vld [vmem:[#allocation5 + $0x74c] ss:$16 sps:$4 sm:$0xff]  }
 0x172   :  { %4982 = vmatpush1.bf16.msra.mxu0 %v7822_v10  ;;  %5393 = vmatprep.subr.bf16.mxu1 %v7833_v14  ;;  %v7908_v10 = vld [vmem:[#allocation5 + $0xb44] ss:$16 sps:$4 sm:$0xff]   ;;  %v7909_v14 = vld [vmem:[#allocation5 + $0x748] ss:$16 sps:$4 sm:$0xff]  }
 0x173   :  { %4983 = vmatprep.subr.bf16.mxu0 %v7830_v13  ;;  %v7906_v13 = vld [vmem:[#allocation5 + $0xb40] ss:$16 sps:$4 sm:$0xff]  }
 0x175   :  { %5394 = vmatpush1.bf16.msra.mxu1 %v7831_v17  ;;  %v7917_v17 = vld [vmem:[#allocation5 + $0x76c] ss:$16 sps:$4 sm:$0xff]  }
 0x176   :  { %4984 = vmatpush1.bf16.msra.mxu0 %v7828_v15  ;;  %5395 = vmatprep.subr.bf16.mxu1 %v7839_v19  ;;  %v7914_v15 = vld [vmem:[#allocation5 + $0xb64] ss:$16 sps:$4 sm:$0xff]   ;;  %v7915_v19 = vld [vmem:[#allocation5 + $0x768] ss:$16 sps:$4 sm:$0xff]  }
 0x177   :  { %4985 = vmatprep.subr.bf16.mxu0 %v7836_v18  ;;  %v7912_v18 = vld [vmem:[#allocation5 + $0xb60] ss:$16 sps:$4 sm:$0xff]  }
 0x179   :  { %5396 = vmatpush1.bf16.msra.mxu1 %v7837_v21  ;;  %v7923_v21 = vld [vmem:[#allocation5 + $0x78c] ss:$16 sps:$4 sm:$0xff]  }
 0x17a   :  { %4986 = vmatpush1.bf16.msra.mxu0 %v7834_v20  ;;  %5397 = vmatprep.subr.bf16.mxu1 %v7845_v24  ;;  %v7920_v20 = vld [vmem:[#allocation5 + $0xb84] ss:$16 sps:$4 sm:$0xff]   ;;  %v7921_v24 = vld [vmem:[#allocation5 + $0x788] ss:$16 sps:$4 sm:$0xff]  }
 0x17b   :  { %4987 = vmatprep.subr.bf16.mxu0 %v7842_v22  ;;  %v7918_v22 = vld [vmem:[#allocation5 + $0xb80] ss:$16 sps:$4 sm:$0xff]  }
 0x17d   :  { %5398 = vmatpush1.bf16.msra.mxu1 %v7843_v27  ;;  %v7929_v27 = vld [vmem:[#allocation5 + $0x7ac] ss:$16 sps:$4 sm:$0xff]  }
 0x17e   :  { %4988 = vmatpush1.bf16.msra.mxu0 %v7840_v26  ;;  %5408 = vmatprep.subr.bf16.mxu1 %v7851_v30  ;;  %v7926_v26 = vld [vmem:[#allocation5 + $0xba4] ss:$16 sps:$4 sm:$0xff]  }
 0x17f   :  { %4998 = vmatprep.subr.bf16.mxu0 %v7848_v29  ;;  %v7927_v29 = vld [vmem:[#allocation5 + $0x7a8] ss:$16 sps:$4 sm:$0xff]   ;;  %v7932_v30 = vld [vmem:[#allocation5 + $0xbc4] ss:$16 sps:$4 sm:$0xff]  }
 0x180   :  { %5400 = vmatmul.mubr.bf16.vlgmr.msra.gmra.mrb[4].mxu1 %v9070_v16  ;;  %v7869_v16 = vld [vmem:[#allocation5 + $0x66c] ss:$16 sps:$4 sm:$0xff]  }
 0x181   :  { %4990 = vmatmul.mubr.bf16.vlgmr.msra.gmra.mrb[0].mxu0 %v9086_v32  ;;  %5409 = vmatpush1.bf16.msra.mxu1 %v7849_v34  ;;  %v7933_v34 = vld [vmem:[#allocation5 + $0x7c8] ss:$16 sps:$4 sm:$0xff]  }
 0x182   :  { %4999 = vmatpush1.bf16.msra.mxu0 %v7846_v31  ;;  %5410 = vmatprep.subr.bf16.mxu1 %v7857_v52  ;;  %v7935_v31 = vld [vmem:[#allocation5 + $0x7cc] ss:$16 sps:$4 sm:$0xff]  }
 0x183   :  { %5000 = vmatprep.subr.bf16.mxu0 %v7854_v35  ;;  %5030 = vmatprep.mubr.bf16.mxu0 %v9088_v11  ;;  %v7938_v35 = vld [vmem:[#allocation5 + $0xbe4] ss:$16 sps:$4 sm:$0xff]   ;;  %v7941_v52 = vld [vmem:[#allocation5 + $0x7ec] ss:$16 sps:$4 sm:$0xff]  }
 0x184   :  { %5440 = vmatprep.mubr.bf16.mxu1 %v9074_v23  ;;  %v7873_v23 = vld [vmem:[#allocation5 + $0x688] ss:$16 sps:$4 sm:$0xff]  }
 0x185   :  { %5411 = vmatpush1.bf16.msra.mxu1 %v7855_v38  ;;  %v7939_v38 = vld [vmem:[#allocation5 + $0x7e8] ss:$16 sps:$4 sm:$0xff]  }
 0x186   :  { %5001 = vmatpush1.bf16.msra.mxu0 %v7852_v37  ;;  %5412 = vmatprep.subr.bf16.mxu1 %v7863_v40  ;;  %v7936_v37 = vld [vmem:[#allocation5 + $0xbe0] ss:$16 sps:$4 sm:$0xff]  }
 0x187   :  { %5002 = vmatprep.subr.bf16.mxu0 %v7860_v39  ;;  %v7944_v39 = vld [vmem:[#allocation5 + $0xc04] ss:$16 sps:$4 sm:$0xff]  }
 0x188   :  { %v125_v40 = vld [vmem:[#allocation2 + $0x50] sm:$0xff] }
 0x189   :  { %5413 = vmatpush1.bf16.msra.mxu1 %v7861_v36  ;;  %v128_v36 = vld [vmem:[#allocation2 + $0x68] sm:$0xff] }
 0x18a   :  { %5003 = vmatpush1.bf16.msra.mxu0 %v7858_v41  ;;  %5414 = vmatprep.subr.bf16.mxu1 %v7869_v16  ;;  %v7947_v41 = vld [vmem:[#allocation5 + $0x80c] ss:$16 sps:$4 sm:$0xff]   ;;  %v7942_v16 = vld [vmem:[#allocation5 + $0xc00] ss:$16 sps:$4 sm:$0xff]  }
 0x18b   :  { %5004 = vmatprep.subr.bf16.mxu0 %v7866_v42  ;;  %v9098_v42 = vpack.c.bf16 %v125_v40, %v125_v40  ;;  %v8031_v40 = vld [vmem:[#allocation5 + $0x9cc] ss:$16 sps:$4 sm:$0xff]  }
 0x18d   :  { %5415 = vmatpush1.bf16.msra.mxu1 %v7867_v44  ;;  %v7950_v44 = vld [vmem:[#allocation5 + $0xc24] ss:$16 sps:$4 sm:$0xff]  }
 0x18e   :  { %5005 = vmatpush1.bf16.msra.mxu0 %v7864_v43  ;;  %5416 = vmatprep.subr.bf16.mxu1 %v7875_v46  ;;  %v7945_v43 = vld [vmem:[#allocation5 + $0x808] ss:$16 sps:$4 sm:$0xff]   ;;  %v9100_v46 = vpack.c.bf16 %v128_v36, %v128_v36 }
 0x18f   :  { %5006 = vmatprep.subr.bf16.mxu0 %v7872_v45  ;;  %v7953_v45 = vld [vmem:[#allocation5 + $0x82c] ss:$16 sps:$4 sm:$0xff]   ;;  %v8029_v36 = vld [vmem:[#allocation5 + $0x9c8] ss:$16 sps:$4 sm:$0xff]  }
 0x191   :  { %5417 = vmatpush1.bf16.msra.mxu1 %v7873_v23  ;;  %v7951_v23 = vld [vmem:[#allocation5 + $0x828] ss:$16 sps:$4 sm:$0xff]  }
 0x192   :  { %5007 = vmatpush1.bf16.msra.mxu0 %v7870_v47  ;;  %5418 = vmatprep.subr.bf16.mxu1 %v7881_v49  ;;  %v7948_v47 = vld [vmem:[#allocation5 + $0xc20] ss:$16 sps:$4 sm:$0xff]   ;;  %v7959_v49 = vld [vmem:[#allocation5 + $0x84c] ss:$16 sps:$4 sm:$0xff]  }
 0x193   :  { %5008 = vmatprep.subr.bf16.mxu0 %v7878_v48  ;;  %v9094_v55 = vpop.f32.mrb[0].mxu1  ;;  %v7956_v48 = vld [vmem:[#allocation5 + $0xc44] ss:$16 sps:$4 sm:$0xff]  }
 0x194   :  { %v9096_v56 = vpop.f32.mrb[1].mxu1 }
 0x195   :  { %v4831_v57 = vpop.f32.mrb[2].mxu1  ;;  %5419 = vmatpush1.bf16.msra.mxu1 %v7879_v51  ;;  %v7957_v51 = vld [vmem:[#allocation5 + $0x848] ss:$16 sps:$4 sm:$0xff]  }
 0x196   :  { %5009 = vmatpush1.bf16.msra.mxu0 %v7876_v50  ;;  %v4832_v60 = vpop.f32.mrb[3].mxu1  ;;  %5420 = vmatprep.subr.bf16.mxu1 %v7887_v54  ;;  %v7954_v50 = vld [vmem:[#allocation5 + $0xc40] ss:$16 sps:$4 sm:$0xff]   ;;  %v7963_v57 = vld [vmem:[#allocation5 + $0x868] ss:$16 sps:$4 sm:$0xff]  }
 0x197   :  { %5010 = vmatprep.subr.bf16.mxu0 %v7884_v53  ;;  %v7962_v53 = vld [vmem:[#allocation5 + $0xc64] ss:$16 sps:$4 sm:$0xff]   ;;  %v7960_v54 = vld [vmem:[#allocation5 + $0xc60] ss:$16 sps:$4 sm:$0xff]  }
 0x198   :  { %v7966_v60 = vld [vmem:[#allocation5 + $0xc80] ss:$16 sps:$4 sm:$0xff]  }
 0x199   :  { %5421 = vmatpush1.bf16.msra.mxu1 %v7885_v59  ;;  %v7971_v59 = vld [vmem:[#allocation5 + $0x88c] ss:$16 sps:$4 sm:$0xff]  }
 0x19a   :  { %5011 = vmatpush1.bf16.msra.mxu0 %v7882_v58  ;;  %5422 = vmatprep.subr.bf16.mxu1 %v7893_v62  ;;  %v7968_v58 = vld [vmem:[#allocation5 + $0xc84] ss:$16 sps:$4 sm:$0xff]   ;;  %v7977_v62 = vld [vmem:[#allocation5 + $0x8ac] ss:$16 sps:$4 sm:$0xff]  }
 0x19b   :  { %5012 = vmatprep.subr.bf16.mxu0 %v7890_v61  ;;  %v7974_v61 = vld [vmem:[#allocation5 + $0xca4] ss:$16 sps:$4 sm:$0xff]  }
 0x19d   :  { %5423 = vmatpush1.bf16.msra.mxu1 %v7891_v0  ;;  %v7975_v0 = vld [vmem:[#allocation5 + $0x8a8] ss:$16 sps:$4 sm:$0xff]  }
 0x19e   :  { %5013 = vmatpush1.bf16.msra.mxu0 %v7888_v63  ;;  %5424 = vmatprep.subr.bf16.mxu1 %v7899_v2  ;;  %v7972_v63 = vld [vmem:[#allocation5 + $0xca0] ss:$16 sps:$4 sm:$0xff]   ;;  %v7983_v2 = vld [vmem:[#allocation5 + $0x8cc] ss:$16 sps:$4 sm:$0xff]  }
 0x19f   :  { %5014 = vmatprep.subr.bf16.mxu0 %v7896_v1  ;;  %v7980_v1 = vld [vmem:[#allocation5 + $0xcc4] ss:$16 sps:$4 sm:$0xff]  }
 0x1a1   :  { %5425 = vmatpush1.bf16.msra.mxu1 %v7897_v4  ;;  %v7981_v4 = vld [vmem:[#allocation5 + $0x8c8] ss:$16 sps:$4 sm:$0xff]  }
 0x1a2   :  { %5015 = vmatpush1.bf16.msra.mxu0 %v7894_v3  ;;  %5426 = vmatprep.subr.bf16.mxu1 %v7905_v6  ;;  %v7978_v3 = vld [vmem:[#allocation5 + $0xcc0] ss:$16 sps:$4 sm:$0xff]   ;;  %v7989_v6 = vld [vmem:[#allocation5 + $0x8ec] ss:$16 sps:$4 sm:$0xff]  }
 0x1a3   :  { %5016 = vmatprep.subr.bf16.mxu0 %v7902_v5  ;;  %v7986_v5 = vld [vmem:[#allocation5 + $0xce4] ss:$16 sps:$4 sm:$0xff]  }
 0x1a5   :  { %5427 = vmatpush1.bf16.msra.mxu1 %v7903_v9  ;;  %v7987_v9 = vld [vmem:[#allocation5 + $0x8e8] ss:$16 sps:$4 sm:$0xff]  }
 0x1a6   :  { %5017 = vmatpush1.bf16.msra.mxu0 %v7900_v7  ;;  %5428 = vmatprep.subr.bf16.mxu1 %v7911_v12  ;;  %v7984_v7 = vld [vmem:[#allocation5 + $0xce0] ss:$16 sps:$4 sm:$0xff]   ;;  %v7995_v12 = vld [vmem:[#allocation5 + $0x90c] ss:$16 sps:$4 sm:$0xff]  }
 0x1a7   :  { %5018 = vmatprep.subr.bf16.mxu0 %v7908_v10  ;;  %v7992_v10 = vld [vmem:[#allocation5 + $0xd04] ss:$16 sps:$4 sm:$0xff]  }
 0x1a9   :  { %5429 = vmatpush1.bf16.msra.mxu1 %v7909_v14  ;;  %v7993_v14 = vld [vmem:[#allocation5 + $0x908] ss:$16 sps:$4 sm:$0xff]  }
 0x1aa   :  { %5019 = vmatpush1.bf16.msra.mxu0 %v7906_v13  ;;  %5430 = vmatprep.subr.bf16.mxu1 %v7917_v17  ;;  %v7990_v13 = vld [vmem:[#allocation5 + $0xd00] ss:$16 sps:$4 sm:$0xff]   ;;  %v8001_v17 = vld [vmem:[#allocation5 + $0x92c] ss:$16 sps:$4 sm:$0xff]  }
 0x1ab   :  { %5020 = vmatprep.subr.bf16.mxu0 %v7914_v15  ;;  %v7998_v15 = vld [vmem:[#allocation5 + $0xd24] ss:$16 sps:$4 sm:$0xff]  }
 0x1ad   :  { %5431 = vmatpush1.bf16.msra.mxu1 %v7915_v19  ;;  %v7999_v19 = vld [vmem:[#allocation5 + $0x928] ss:$16 sps:$4 sm:$0xff]  }
 0x1ae   :  { %5021 = vmatpush1.bf16.msra.mxu0 %v7912_v18  ;;  %5432 = vmatprep.subr.bf16.mxu1 %v7923_v21  ;;  %v7996_v18 = vld [vmem:[#allocation5 + $0xd20] ss:$16 sps:$4 sm:$0xff]   ;;  %v8007_v21 = vld [vmem:[#allocation5 + $0x94c] ss:$16 sps:$4 sm:$0xff]  }
 0x1af   :  { %5022 = vmatprep.subr.bf16.mxu0 %v7920_v20  ;;  %v8004_v20 = vld [vmem:[#allocation5 + $0xd44] ss:$16 sps:$4 sm:$0xff]  }
 0x1b1   :  { %5433 = vmatpush1.bf16.msra.mxu1 %v7921_v24  ;;  %v8005_v24 = vld [vmem:[#allocation5 + $0x948] ss:$16 sps:$4 sm:$0xff]  }
 0x1b2   :  { %5023 = vmatpush1.bf16.msra.mxu0 %v7918_v22  ;;  %5434 = vmatprep.subr.bf16.mxu1 %v7929_v27  ;;  %v8002_v22 = vld [vmem:[#allocation5 + $0xd40] ss:$16 sps:$4 sm:$0xff]   ;;  %v8013_v27 = vld [vmem:[#allocation5 + $0x96c] ss:$16 sps:$4 sm:$0xff]  }
 0x1b3   :  { %5024 = vmatprep.subr.bf16.mxu0 %v7926_v26  ;;  %v8010_v26 = vld [vmem:[#allocation5 + $0xd64] ss:$16 sps:$4 sm:$0xff]  }
 0x1b5   :  { %5435 = vmatpush1.bf16.msra.mxu1 %v7927_v29  ;;  %v8011_v29 = vld [vmem:[#allocation5 + $0x968] ss:$16 sps:$4 sm:$0xff]  }
 0x1b6   :  { %5025 = vmatpush1.bf16.msra.mxu0 %v7924_v28  ;;  %5436 = vmatprep.subr.bf16.mxu1 %v7935_v31  ;;  %v8008_v28 = vld [vmem:[#allocation5 + $0xd60] ss:$16 sps:$4 sm:$0xff]   ;;  %v8019_v31 = vld [vmem:[#allocation5 + $0x98c] ss:$16 sps:$4 sm:$0xff]  }
 0x1b7   :  { %5026 = vmatprep.subr.bf16.mxu0 %v7932_v30  ;;  %v8016_v30 = vld [vmem:[#allocation5 + $0xd84] ss:$16 sps:$4 sm:$0xff]  }
 0x1b9   :  { %5437 = vmatpush1.bf16.msra.mxu1 %v7933_v34  ;;  %v8017_v34 = vld [vmem:[#allocation5 + $0x988] ss:$16 sps:$4 sm:$0xff]  }
 0x1ba   :  { %5027 = vmatpush1.bf16.msra.mxu0 %v7930_v33  ;;  %5438 = vmatprep.subr.bf16.mxu1 %v7941_v52  ;;  %v8014_v33 = vld [vmem:[#allocation5 + $0xd80] ss:$16 sps:$4 sm:$0xff]   ;;  %v8025_v52 = vld [vmem:[#allocation5 + $0x9ac] ss:$16 sps:$4 sm:$0xff]  }
 0x1bb   :  { %5028 = vmatprep.subr.bf16.mxu0 %v7938_v35  ;;  %v8022_v35 = vld [vmem:[#allocation5 + $0xda4] ss:$16 sps:$4 sm:$0xff]  }
 0x1bd   :  { %5439 = vmatpush1.bf16.msra.mxu1 %v7939_v38  ;;  %v8023_v38 = vld [vmem:[#allocation5 + $0x9a8] ss:$16 sps:$4 sm:$0xff]  }
 0x1be   :  { %5029 = vmatpush1.bf16.msra.mxu0 %v7936_v37  ;;  %5449 = vmatprep.subr.bf16.mxu1 %v7947_v41  ;;  %v8020_v37 = vld [vmem:[#allocation5 + $0xda0] ss:$16 sps:$4 sm:$0xff]  }
 0x1bf   :  { %5039 = vmatprep.subr.bf16.mxu0 %v7944_v39  ;;  %v8028_v39 = vld [vmem:[#allocation5 + $0xdc4] ss:$16 sps:$4 sm:$0xff]   ;;  %v8026_v41 = vld [vmem:[#allocation5 + $0xdc0] ss:$16 sps:$4 sm:$0xff]  }
 0x1c0   :  { %5441 = vmatmul.mubr.bf16.vlgmr.msra.gmra.mrb[4].mxu1 %v9078_v25  ;;  %v7965_v25 = vld [vmem:[#allocation5 + $0x86c] ss:$16 sps:$4 sm:$0xff]  }
 0x1c1   :  { %5031 = vmatmul.mubr.bf16.vlgmr.msra.gmra.mrb[0].mxu0 %v9098_v42  ;;  %5450 = vmatpush1.bf16.msra.mxu1 %v7945_v43  ;;  %v8037_v43 = vld [vmem:[#allocation5 + $0x9ec] ss:$16 sps:$4 sm:$0xff]  }
 0x1c2   :  { %5040 = vmatpush1.bf16.msra.mxu0 %v7942_v16  ;;  %5451 = vmatprep.subr.bf16.mxu1 %v7953_v45  ;;  %v8034_v16 = vld [vmem:[#allocation5 + $0xde4] ss:$16 sps:$4 sm:$0xff]   ;;  %v8035_v45 = vld [vmem:[#allocation5 + $0x9e8] ss:$16 sps:$4 sm:$0xff]  }
 0x1c3   :  { %5041 = vmatprep.subr.bf16.mxu0 %v7950_v44  ;;  %5071 = vmatprep.mubr.bf16.mxu0 %v9100_v46  ;;  %v8032_v44 = vld [vmem:[#allocation5 + $0xde0] ss:$16 sps:$4 sm:$0xff]  }
 0x1c4   :  { %5481 = vmatprep.mubr.bf16.mxu1 %v9080_v8  ;;  %v7969_v8 = vld [vmem:[#allocation5 + $0x888] ss:$16 sps:$4 sm:$0xff]  }
 0x1c5   :  { %5452 = vmatpush1.bf16.msra.mxu1 %v7951_v23  ;;  %v127_v23 = vld [vmem:[#allocation2 + $0x60] sm:$0xff] }
 0x1c6   :  { %5042 = vmatpush1.bf16.msra.mxu0 %v7948_v47  ;;  %5453 = vmatprep.subr.bf16.mxu1 %v7959_v49  ;;  %v8040_v47 = vld [vmem:[#allocation5 + $0xe04] ss:$16 sps:$4 sm:$0xff]   ;;  %v130_v49 = vld [vmem:[#allocation2 + $0x78] sm:$0xff] }
 0x1c7   :  { %5043 = vmatprep.subr.bf16.mxu0 %v7956_v48  ;;  %v8043_v48 = vld [vmem:[#allocation5 + $0xa0c] ss:$16 sps:$4 sm:$0xff]  }
 0x1c9   :  { %5454 = vmatpush1.bf16.msra.mxu1 %v7957_v51  ;;  %v8038_v51 = vld [vmem:[#allocation5 + $0xe00] ss:$16 sps:$4 sm:$0xff]  }
 0x1ca   :  { %5044 = vmatpush1.bf16.msra.mxu0 %v7954_v50  ;;  %5455 = vmatprep.subr.bf16.mxu1 %v7965_v25  ;;  %v9106_v50 = vpack.c.bf16 %v127_v23, %v127_v23  ;;  %v8046_v25 = vld [vmem:[#allocation5 + $0xe24] ss:$16 sps:$4 sm:$0xff]   ;;  %v8127_v23 = vld [vmem:[#allocation5 + $0xbcc] ss:$16 sps:$4 sm:$0xff]  }
 0x1cb   :  { %5045 = vmatprep.subr.bf16.mxu0 %v7962_v53  ;;  %v8041_v53 = vld [vmem:[#allocation5 + $0xa08] ss:$16 sps:$4 sm:$0xff]  }
 0x1cd   :  { %5456 = vmatpush1.bf16.msra.mxu1 %v7963_v57  ;;  %v9108_v57 = vpack.c.bf16 %v130_v49, %v130_v49  ;;  %v8125_v49 = vld [vmem:[#allocation5 + $0xbc8] ss:$16 sps:$4 sm:$0xff]  }
 0x1ce   :  { %5046 = vmatpush1.bf16.msra.mxu0 %v7960_v54  ;;  %5457 = vmatprep.subr.bf16.mxu1 %v7971_v59  ;;  %v8049_v54 = vld [vmem:[#allocation5 + $0xa2c] ss:$16 sps:$4 sm:$0xff]   ;;  %v8047_v59 = vld [vmem:[#allocation5 + $0xa28] ss:$16 sps:$4 sm:$0xff]  }
 0x1cf   :  { %5047 = vmatprep.subr.bf16.mxu0 %v7968_v58  ;;  %v8044_v58 = vld [vmem:[#allocation5 + $0xe20] ss:$16 sps:$4 sm:$0xff]  }
 0x1d1   :  { %5458 = vmatpush1.bf16.msra.mxu1 %v7969_v8  ;;  %v8055_v8 = vld [vmem:[#allocation5 + $0xa4c] ss:$16 sps:$4 sm:$0xff]  }
 0x1d2   :  { %5048 = vmatpush1.bf16.msra.mxu0 %v7966_v60  ;;  %5459 = vmatprep.subr.bf16.mxu1 %v7977_v62  ;;  %v8052_v60 = vld [vmem:[#allocation5 + $0xe44] ss:$16 sps:$4 sm:$0xff]   ;;  %v8053_v62 = vld [vmem:[#allocation5 + $0xa48] ss:$16 sps:$4 sm:$0xff]  }
 0x1d3   :  { %5049 = vmatprep.subr.bf16.mxu0 %v7974_v61  ;;  %v8050_v61 = vld [vmem:[#allocation5 + $0xe40] ss:$16 sps:$4 sm:$0xff]  }
 0x1d5   :  { %5460 = vmatpush1.bf16.msra.mxu1 %v7975_v0  ;;  %v8056_v0 = vld [vmem:[#allocation5 + $0xe60] ss:$16 sps:$4 sm:$0xff]  }
 0x1d6   :  { %5050 = vmatpush1.bf16.msra.mxu0 %v7972_v63  ;;  %5461 = vmatprep.subr.bf16.mxu1 %v7983_v2  ;;  %v8058_v63 = vld [vmem:[#allocation5 + $0xe64] ss:$16 sps:$4 sm:$0xff]  }
 0x1d7   :  { %5051 = vmatprep.subr.bf16.mxu0 %v7980_v1  ;;  %v8059_v1 = vld [vmem:[#allocation5 + $0xa68] ss:$16 sps:$4 sm:$0xff]   ;;  %v8064_v2 = vld [vmem:[#allocation5 + $0xe84] ss:$16 sps:$4 sm:$0xff]  }
 0x1d9   :  { %5462 = vmatpush1.bf16.msra.mxu1 %v7981_v4  ;;  %v8062_v4 = vld [vmem:[#allocation5 + $0xe80] ss:$16 sps:$4 sm:$0xff]  }
 0x1da   :  { %5052 = vmatpush1.bf16.msra.mxu0 %v7978_v3  ;;  %5463 = vmatprep.subr.bf16.mxu1 %v7989_v6  ;;  %v8067_v3 = vld [vmem:[#allocation5 + $0xa8c] ss:$16 sps:$4 sm:$0xff]  }
 0x1db   :  { %5053 = vmatprep.subr.bf16.mxu0 %v7986_v5  ;;  %v8070_v5 = vld [vmem:[#allocation5 + $0xea4] ss:$16 sps:$4 sm:$0xff]   ;;  %v8073_v6 = vld [vmem:[#allocation5 + $0xaac] ss:$16 sps:$4 sm:$0xff]  }
 0x1dd   :  { %5464 = vmatpush1.bf16.msra.mxu1 %v7987_v9  ;;  %v8071_v9 = vld [vmem:[#allocation5 + $0xaa8] ss:$16 sps:$4 sm:$0xff]  }
 0x1de   :  { %5054 = vmatpush1.bf16.msra.mxu0 %v7984_v7  ;;  %5465 = vmatprep.subr.bf16.mxu1 %v7995_v12  ;;  %v8068_v7 = vld [vmem:[#allocation5 + $0xea0] ss:$16 sps:$4 sm:$0xff]   ;;  %v8079_v12 = vld [vmem:[#allocation5 + $0xacc] ss:$16 sps:$4 sm:$0xff]  }
 0x1df   :  { %5055 = vmatprep.subr.bf16.mxu0 %v7992_v10  ;;  %v8076_v10 = vld [vmem:[#allocation5 + $0xec4] ss:$16 sps:$4 sm:$0xff]  }
 0x1e1   :  { %5466 = vmatpush1.bf16.msra.mxu1 %v7993_v14  ;;  %v8077_v14 = vld [vmem:[#allocation5 + $0xac8] ss:$16 sps:$4 sm:$0xff]  }
 0x1e2   :  { %5056 = vmatpush1.bf16.msra.mxu0 %v7990_v13  ;;  %5467 = vmatprep.subr.bf16.mxu1 %v8001_v17  ;;  %v8074_v13 = vld [vmem:[#allocation5 + $0xec0] ss:$16 sps:$4 sm:$0xff]   ;;  %v8085_v17 = vld [vmem:[#allocation5 + $0xaec] ss:$16 sps:$4 sm:$0xff]  }
 0x1e3   :  { %5057 = vmatprep.subr.bf16.mxu0 %v7998_v15  ;;  %v8082_v15 = vld [vmem:[#allocation5 + $0xee4] ss:$16 sps:$4 sm:$0xff]  }
 0x1e5   :  { %5468 = vmatpush1.bf16.msra.mxu1 %v7999_v19  ;;  %v8083_v19 = vld [vmem:[#allocation5 + $0xae8] ss:$16 sps:$4 sm:$0xff]  }
 0x1e6   :  { %5058 = vmatpush1.bf16.msra.mxu0 %v7996_v18  ;;  %5469 = vmatprep.subr.bf16.mxu1 %v8007_v21  ;;  %v8080_v18 = vld [vmem:[#allocation5 + $0xee0] ss:$16 sps:$4 sm:$0xff]   ;;  %v8091_v21 = vld [vmem:[#allocation5 + $0xb0c] ss:$16 sps:$4 sm:$0xff]  }
 0x1e7   :  { %5059 = vmatprep.subr.bf16.mxu0 %v8004_v20  ;;  %v8088_v20 = vld [vmem:[#allocation5 + $0xf04] ss:$16 sps:$4 sm:$0xff]  }
 0x1e9   :  { %5470 = vmatpush1.bf16.msra.mxu1 %v8005_v24  ;;  %v8089_v24 = vld [vmem:[#allocation5 + $0xb08] ss:$16 sps:$4 sm:$0xff]  }
 0x1ea   :  { %5060 = vmatpush1.bf16.msra.mxu0 %v8002_v22  ;;  %5471 = vmatprep.subr.bf16.mxu1 %v8013_v27  ;;  %v8086_v22 = vld [vmem:[#allocation5 + $0xf00] ss:$16 sps:$4 sm:$0xff]   ;;  %v8097_v27 = vld [vmem:[#allocation5 + $0xb2c] ss:$16 sps:$4 sm:$0xff]  }
 0x1eb   :  { %5061 = vmatprep.subr.bf16.mxu0 %v8010_v26  ;;  %v8094_v26 = vld [vmem:[#allocation5 + $0xf24] ss:$16 sps:$4 sm:$0xff]  }
 0x1ed   :  { %5472 = vmatpush1.bf16.msra.mxu1 %v8011_v29  ;;  %v8095_v29 = vld [vmem:[#allocation5 + $0xb28] ss:$16 sps:$4 sm:$0xff]  }
 0x1ee   :  { %5062 = vmatpush1.bf16.msra.mxu0 %v8008_v28  ;;  %5473 = vmatprep.subr.bf16.mxu1 %v8019_v31  ;;  %v8092_v28 = vld [vmem:[#allocation5 + $0xf20] ss:$16 sps:$4 sm:$0xff]   ;;  %v8103_v31 = vld [vmem:[#allocation5 + $0xb4c] ss:$16 sps:$4 sm:$0xff]  }
 0x1ef   :  { %5063 = vmatprep.subr.bf16.mxu0 %v8016_v30  ;;  %v8100_v30 = vld [vmem:[#allocation5 + $0xf44] ss:$16 sps:$4 sm:$0xff]  }
 0x1f1   :  { %5474 = vmatpush1.bf16.msra.mxu1 %v8017_v34  ;;  %v8101_v34 = vld [vmem:[#allocation5 + $0xb48] ss:$16 sps:$4 sm:$0xff]  }
 0x1f2   :  { %5064 = vmatpush1.bf16.msra.mxu0 %v8014_v33  ;;  %5475 = vmatprep.subr.bf16.mxu1 %v8025_v52  ;;  %v8098_v33 = vld [vmem:[#allocation5 + $0xf40] ss:$16 sps:$4 sm:$0xff]   ;;  %v8109_v52 = vld [vmem:[#allocation5 + $0xb6c] ss:$16 sps:$4 sm:$0xff]  }
 0x1f3   :  { %5065 = vmatprep.subr.bf16.mxu0 %v8022_v35  ;;  %v8106_v35 = vld [vmem:[#allocation5 + $0xf64] ss:$16 sps:$4 sm:$0xff]  }
 0x1f5   :  { %5476 = vmatpush1.bf16.msra.mxu1 %v8023_v38  ;;  %v8107_v38 = vld [vmem:[#allocation5 + $0xb68] ss:$16 sps:$4 sm:$0xff]  }
 0x1f6   :  { %5066 = vmatpush1.bf16.msra.mxu0 %v8020_v37  ;;  %5477 = vmatprep.subr.bf16.mxu1 %v8031_v40  ;;  %v8104_v37 = vld [vmem:[#allocation5 + $0xf60] ss:$16 sps:$4 sm:$0xff]   ;;  %v8115_v40 = vld [vmem:[#allocation5 + $0xb8c] ss:$16 sps:$4 sm:$0xff]  }
 0x1f7   :  { %5067 = vmatprep.subr.bf16.mxu0 %v8028_v39  ;;  %v8112_v39 = vld [vmem:[#allocation5 + $0xf84] ss:$16 sps:$4 sm:$0xff]  }
 0x1f9   :  { %5478 = vmatpush1.bf16.msra.mxu1 %v8029_v36  ;;  %v8113_v36 = vld [vmem:[#allocation5 + $0xb88] ss:$16 sps:$4 sm:$0xff]  }
 0x1fa   :  { %5068 = vmatpush1.bf16.msra.mxu0 %v8026_v41  ;;  %5479 = vmatprep.subr.bf16.mxu1 %v8037_v43  ;;  %v8110_v41 = vld [vmem:[#allocation5 + $0xf80] ss:$16 sps:$4 sm:$0xff]   ;;  %v8121_v43 = vld [vmem:[#allocation5 + $0xbac] ss:$16 sps:$4 sm:$0xff]  }
 0x1fb   :  { %5069 = vmatprep.subr.bf16.mxu0 %v8034_v16  ;;  %v8118_v16 = vld [vmem:[#allocation5 + $0xfa4] ss:$16 sps:$4 sm:$0xff]  }
 0x1fd   :  { %5480 = vmatpush1.bf16.msra.mxu1 %v8035_v45  ;;  %v8119_v45 = vld [vmem:[#allocation5 + $0xba8] ss:$16 sps:$4 sm:$0xff]  }
 0x1fe   :  { %5070 = vmatpush1.bf16.msra.mxu0 %v8032_v44  ;;  %5490 = vmatprep.subr.bf16.mxu1 %v8043_v48  ;;  %v8116_v44 = vld [vmem:[#allocation5 + $0xfa0] ss:$16 sps:$4 sm:$0xff]  }
 0x1ff   :  { %5080 = vmatprep.subr.bf16.mxu0 %v8040_v47  ;;  %v8124_v47 = vld [vmem:[#allocation5 + $0xfc4] ss:$16 sps:$4 sm:$0xff]   ;;  %v8122_v48 = vld [vmem:[#allocation5 + $0xfc0] ss:$16 sps:$4 sm:$0xff]  }
 0x200   :  { %5482 = vmatmul.mubr.bf16.vlgmr.msra.gmra.mrb[4].mxu1 %v9086_v32  ;;  %v8061_v32 = vld [vmem:[#allocation5 + $0xa6c] ss:$16 sps:$4 sm:$0xff]  }
 0x201   :  { %5072 = vmatmul.mubr.bf16.vlgmr.msra.gmra.mrb[0].mxu0 %v9106_v50  ;;  %5491 = vmatpush1.bf16.msra.mxu1 %v8041_v53  ;;  %v8133_v53 = vld [vmem:[#allocation5 + $0xbec] ss:$16 sps:$4 sm:$0xff]  }
 0x202   :  { %5081 = vmatpush1.bf16.msra.mxu0 %v8038_v51  ;;  %5492 = vmatprep.subr.bf16.mxu1 %v8049_v54  ;;  %v8130_v51 = vld [vmem:[#allocation5 + $0xfe4] ss:$16 sps:$4 sm:$0xff]   ;;  %v8131_v54 = vld [vmem:[#allocation5 + $0xbe8] ss:$16 sps:$4 sm:$0xff]  }
 0x203   :  { %5082 = vmatprep.subr.bf16.mxu0 %v8046_v25  ;;  %5112 = vmatprep.mubr.bf16.mxu0 %v9108_v57  ;;  %v8128_v25 = vld [vmem:[#allocation5 + $0xfe0] ss:$16 sps:$4 sm:$0xff]  }
 0x204   :  { %5522 = vmatprep.mubr.bf16.mxu1 %v9088_v11  ;;  %v8065_v11 = vld [vmem:[#allocation5 + $0xa88] ss:$16 sps:$4 sm:$0xff]  }
 0x205   :  { %5493 = vmatpush1.bf16.msra.mxu1 %v8047_v59  ;;  %v129_v59 = vld [vmem:[#allocation2 + $0x70] sm:$0xff] }
 0x206   :  { %5083 = vmatpush1.bf16.msra.mxu0 %v8044_v58  ;;  %5494 = vmatprep.subr.bf16.mxu1 %v8055_v8  ;;  %v8136_v58 = vld [vmem:[#allocation5 + $0x1004] ss:$16 sps:$4 sm:$0xff]   ;;  %v132_v8 = vld [vmem:[#allocation2 + $0x88] sm:$0xff] }
 0x207   :  { %5084 = vmatprep.subr.bf16.mxu0 %v8052_v60  ;;  %v8139_v60 = vld [vmem:[#allocation5 + $0xc0c] ss:$16 sps:$4 sm:$0xff]  }
 0x209   :  { %5495 = vmatpush1.bf16.msra.mxu1 %v8053_v62  ;;  %v8134_v62 = vld [vmem:[#allocation5 + $0x1000] ss:$16 sps:$4 sm:$0xff]  }
 0x20a   :  { %5085 = vmatpush1.bf16.msra.mxu0 %v8050_v61  ;;  %5496 = vmatprep.subr.bf16.mxu1 %v8061_v32  ;;  %v9114_v61 = vpack.c.bf16 %v129_v59, %v129_v59  ;;  %v8142_v32 = vld [vmem:[#allocation5 + $0x1024] ss:$16 sps:$4 sm:$0xff]   ;;  %v8223_v59 = vld [vmem:[#allocation5 + $0xdcc] ss:$16 sps:$4 sm:$0xff]  }
 0x20b   :  { %5086 = vmatprep.subr.bf16.mxu0 %v8058_v63  ;;  %v8137_v63 = vld [vmem:[#allocation5 + $0xc08] ss:$16 sps:$4 sm:$0xff]  }
 0x20d   :  { %5497 = vmatpush1.bf16.msra.mxu1 %v8059_v1  ;;  %v9116_v1 = vpack.c.bf16 %v132_v8, %v132_v8  ;;  %v8221_v8 = vld [vmem:[#allocation5 + $0xdc8] ss:$16 sps:$4 sm:$0xff]  }
 0x20e   :  { %5087 = vmatpush1.bf16.msra.mxu0 %v8056_v0  ;;  %5498 = vmatprep.subr.bf16.mxu1 %v8067_v3  ;;  %v8145_v0 = vld [vmem:[#allocation5 + $0xc2c] ss:$16 sps:$4 sm:$0xff]   ;;  %v8143_v3 = vld [vmem:[#allocation5 + $0xc28] ss:$16 sps:$4 sm:$0xff]  }
 0x20f   :  { %5088 = vmatprep.subr.bf16.mxu0 %v8064_v2  ;;  %v8140_v2 = vld [vmem:[#allocation5 + $0x1020] ss:$16 sps:$4 sm:$0xff]  }
 0x211   :  { %5499 = vmatpush1.bf16.msra.mxu1 %v8065_v11  ;;  %v8151_v11 = vld [vmem:[#allocation5 + $0xc4c] ss:$16 sps:$4 sm:$0xff]  }
 0x212   :  { %5089 = vmatpush1.bf16.msra.mxu0 %v8062_v4  ;;  %5500 = vmatprep.subr.bf16.mxu1 %v8073_v6  ;;  %v8148_v4 = vld [vmem:[#allocation5 + $0x1044] ss:$16 sps:$4 sm:$0xff]   ;;  %v8149_v6 = vld [vmem:[#allocation5 + $0xc48] ss:$16 sps:$4 sm:$0xff]  }
 0x213   :  { %5090 = vmatprep.subr.bf16.mxu0 %v8070_v5  ;;  %v8146_v5 = vld [vmem:[#allocation5 + $0x1040] ss:$16 sps:$4 sm:$0xff]  }
 0x215   :  { %5501 = vmatpush1.bf16.msra.mxu1 %v8071_v9  ;;  %v8152_v9 = vld [vmem:[#allocation5 + $0x1060] ss:$16 sps:$4 sm:$0xff]  }
 0x216   :  { %5091 = vmatpush1.bf16.msra.mxu0 %v8068_v7  ;;  %5502 = vmatprep.subr.bf16.mxu1 %v8079_v12  ;;  %v8154_v7 = vld [vmem:[#allocation5 + $0x1064] ss:$16 sps:$4 sm:$0xff]  }
 0x217   :  { %5092 = vmatprep.subr.bf16.mxu0 %v8076_v10  ;;  %v8155_v10 = vld [vmem:[#allocation5 + $0xc68] ss:$16 sps:$4 sm:$0xff]   ;;  %v8160_v12 = vld [vmem:[#allocation5 + $0x1084] ss:$16 sps:$4 sm:$0xff]  }
 0x219   :  { %5503 = vmatpush1.bf16.msra.mxu1 %v8077_v14  ;;  %v8158_v14 = vld [vmem:[#allocation5 + $0x1080] ss:$16 sps:$4 sm:$0xff]  }
 0x21a   :  { %5093 = vmatpush1.bf16.msra.mxu0 %v8074_v13  ;;  %5504 = vmatprep.subr.bf16.mxu1 %v8085_v17  ;;  %v8163_v13 = vld [vmem:[#allocation5 + $0xc8c] ss:$16 sps:$4 sm:$0xff]  }
 0x21b   :  { %5094 = vmatprep.subr.bf16.mxu0 %v8082_v15  ;;  %v8166_v15 = vld [vmem:[#allocation5 + $0x10a4] ss:$16 sps:$4 sm:$0xff]   ;;  %v8169_v17 = vld [vmem:[#allocation5 + $0xcac] ss:$16 sps:$4 sm:$0xff]  }
 0x21d   :  { %5505 = vmatpush1.bf16.msra.mxu1 %v8083_v19  ;;  %v8167_v19 = vld [vmem:[#allocation5 + $0xca8] ss:$16 sps:$4 sm:$0xff]  }
 0x21e   :  { %5095 = vmatpush1.bf16.msra.mxu0 %v8080_v18  ;;  %5506 = vmatprep.subr.bf16.mxu1 %v8091_v21  ;;  %v8164_v18 = vld [vmem:[#allocation5 + $0x10a0] ss:$16 sps:$4 sm:$0xff]   ;;  %v8175_v21 = vld [vmem:[#allocation5 + $0xccc] ss:$16 sps:$4 sm:$0xff]  }
 0x21f   :  { %5096 = vmatprep.subr.bf16.mxu0 %v8088_v20  ;;  %v8172_v20 = vld [vmem:[#allocation5 + $0x10c4] ss:$16 sps:$4 sm:$0xff]  }
 0x221   :  { %5507 = vmatpush1.bf16.msra.mxu1 %v8089_v24  ;;  %v8173_v24 = vld [vmem:[#allocation5 + $0xcc8] ss:$16 sps:$4 sm:$0xff]  }
 0x222   :  { %5097 = vmatpush1.bf16.msra.mxu0 %v8086_v22  ;;  %5508 = vmatprep.subr.bf16.mxu1 %v8097_v27  ;;  %v8170_v22 = vld [vmem:[#allocation5 + $0x10c0] ss:$16 sps:$4 sm:$0xff]   ;;  %v8181_v27 = vld [vmem:[#allocation5 + $0xcec] ss:$16 sps:$4 sm:$0xff]  }
 0x223   :  { %5098 = vmatprep.subr.bf16.mxu0 %v8094_v26  ;;  %v8178_v26 = vld [vmem:[#allocation5 + $0x10e4] ss:$16 sps:$4 sm:$0xff]  }
 0x225   :  { %5509 = vmatpush1.bf16.msra.mxu1 %v8095_v29  ;;  %v8179_v29 = vld [vmem:[#allocation5 + $0xce8] ss:$16 sps:$4 sm:$0xff]  }
 0x226   :  { %5099 = vmatpush1.bf16.msra.mxu0 %v8092_v28  ;;  %5510 = vmatprep.subr.bf16.mxu1 %v8103_v31  ;;  %v8176_v28 = vld [vmem:[#allocation5 + $0x10e0] ss:$16 sps:$4 sm:$0xff]   ;;  %v8187_v31 = vld [vmem:[#allocation5 + $0xd0c] ss:$16 sps:$4 sm:$0xff]  }
 0x227   :  { %5100 = vmatprep.subr.bf16.mxu0 %v8100_v30  ;;  %v8184_v30 = vld [vmem:[#allocation5 + $0x1104] ss:$16 sps:$4 sm:$0xff]  }
 0x229   :  { %5511 = vmatpush1.bf16.msra.mxu1 %v8101_v34  ;;  %v8185_v34 = vld [vmem:[#allocation5 + $0xd08] ss:$16 sps:$4 sm:$0xff]  }
 0x22a   :  { %5101 = vmatpush1.bf16.msra.mxu0 %v8098_v33  ;;  %5512 = vmatprep.subr.bf16.mxu1 %v8109_v52  ;;  %v8182_v33 = vld [vmem:[#allocation5 + $0x1100] ss:$16 sps:$4 sm:$0xff]   ;;  %v8193_v52 = vld [vmem:[#allocation5 + $0xd2c] ss:$16 sps:$4 sm:$0xff]  }
 0x22b   :  { %5102 = vmatprep.subr.bf16.mxu0 %v8106_v35  ;;  %v8190_v35 = vld [vmem:[#allocation5 + $0x1124] ss:$16 sps:$4 sm:$0xff]  }
 0x22d   :  { %5513 = vmatpush1.bf16.msra.mxu1 %v8107_v38  ;;  %v8191_v38 = vld [vmem:[#allocation5 + $0xd28] ss:$16 sps:$4 sm:$0xff]  }
 0x22e   :  { %5103 = vmatpush1.bf16.msra.mxu0 %v8104_v37  ;;  %5514 = vmatprep.subr.bf16.mxu1 %v8115_v40  ;;  %v8188_v37 = vld [vmem:[#allocation5 + $0x1120] ss:$16 sps:$4 sm:$0xff]   ;;  %v8199_v40 = vld [vmem:[#allocation5 + $0xd4c] ss:$16 sps:$4 sm:$0xff]  }
 0x22f   :  { %5104 = vmatprep.subr.bf16.mxu0 %v8112_v39  ;;  %v8196_v39 = vld [vmem:[#allocation5 + $0x1144] ss:$16 sps:$4 sm:$0xff]  }
 0x231   :  { %5515 = vmatpush1.bf16.msra.mxu1 %v8113_v36  ;;  %v8197_v36 = vld [vmem:[#allocation5 + $0xd48] ss:$16 sps:$4 sm:$0xff]  }
 0x232   :  { %5105 = vmatpush1.bf16.msra.mxu0 %v8110_v41  ;;  %5516 = vmatprep.subr.bf16.mxu1 %v8121_v43  ;;  %v8194_v41 = vld [vmem:[#allocation5 + $0x1140] ss:$16 sps:$4 sm:$0xff]   ;;  %v8205_v43 = vld [vmem:[#allocation5 + $0xd6c] ss:$16 sps:$4 sm:$0xff]  }
 0x233   :  { %5106 = vmatprep.subr.bf16.mxu0 %v8118_v16  ;;  %v8202_v16 = vld [vmem:[#allocation5 + $0x1164] ss:$16 sps:$4 sm:$0xff]  }
 0x235   :  { %5517 = vmatpush1.bf16.msra.mxu1 %v8119_v45  ;;  %v8203_v45 = vld [vmem:[#allocation5 + $0xd68] ss:$16 sps:$4 sm:$0xff]  }
 0x236   :  { %5107 = vmatpush1.bf16.msra.mxu0 %v8116_v44  ;;  %5518 = vmatprep.subr.bf16.mxu1 %v8127_v23  ;;  %v8200_v44 = vld [vmem:[#allocation5 + $0x1160] ss:$16 sps:$4 sm:$0xff]   ;;  %v8211_v23 = vld [vmem:[#allocation5 + $0xd8c] ss:$16 sps:$4 sm:$0xff]  }
 0x237   :  { %5108 = vmatprep.subr.bf16.mxu0 %v8124_v47  ;;  %v8208_v47 = vld [vmem:[#allocation5 + $0x1184] ss:$16 sps:$4 sm:$0xff]  }
 0x239   :  { %5519 = vmatpush1.bf16.msra.mxu1 %v8125_v49  ;;  %v8209_v49 = vld [vmem:[#allocation5 + $0xd88] ss:$16 sps:$4 sm:$0xff]  }
 0x23a   :  { %5109 = vmatpush1.bf16.msra.mxu0 %v8122_v48  ;;  %5520 = vmatprep.subr.bf16.mxu1 %v8133_v53  ;;  %v8206_v48 = vld [vmem:[#allocation5 + $0x1180] ss:$16 sps:$4 sm:$0xff]   ;;  %v8217_v53 = vld [vmem:[#allocation5 + $0xdac] ss:$16 sps:$4 sm:$0xff]  }
 0x23b   :  { %5110 = vmatprep.subr.bf16.mxu0 %v8130_v51  ;;  %v8214_v51 = vld [vmem:[#allocation5 + $0x11a4] ss:$16 sps:$4 sm:$0xff]  }
 0x23d   :  { %5521 = vmatpush1.bf16.msra.mxu1 %v8131_v54  ;;  %v8215_v54 = vld [vmem:[#allocation5 + $0xda8] ss:$16 sps:$4 sm:$0xff]  }
 0x23e   :  { %5111 = vmatpush1.bf16.msra.mxu0 %v8128_v25  ;;  %5531 = vmatprep.subr.bf16.mxu1 %v8139_v60  ;;  %v8212_v25 = vld [vmem:[#allocation5 + $0x11a0] ss:$16 sps:$4 sm:$0xff]  }
 0x23f   :  { %5121 = vmatprep.subr.bf16.mxu0 %v8136_v58  ;;  %v8220_v58 = vld [vmem:[#allocation5 + $0x11c4] ss:$16 sps:$4 sm:$0xff]   ;;  %v8218_v60 = vld [vmem:[#allocation5 + $0x11c0] ss:$16 sps:$4 sm:$0xff]  }
 0x240   :  { %5523 = vmatmul.mubr.bf16.vlgmr.msra.gmra.mrb[4].mxu1 %v9098_v42  ;;  %v8157_v42 = vld [vmem:[#allocation5 + $0xc6c] ss:$16 sps:$4 sm:$0xff]  }
 0x241   :  { %5113 = vmatmul.mubr.bf16.vlgmr.msra.gmra.mrb[0].mxu0 %v9114_v61  ;;  %5532 = vmatpush1.bf16.msra.mxu1 %v8137_v63  ;;  %v8229_v63 = vld [vmem:[#allocation5 + $0xdec] ss:$16 sps:$4 sm:$0xff]  }
 0x242   :  { %5122 = vmatpush1.bf16.msra.mxu0 %v8134_v62  ;;  %5533 = vmatprep.subr.bf16.mxu1 %v8145_v0  ;;  %v8226_v62 = vld [vmem:[#allocation5 + $0x11e4] ss:$16 sps:$4 sm:$0xff]   ;;  %v8227_v0 = vld [vmem:[#allocation5 + $0xde8] ss:$16 sps:$4 sm:$0xff]  }
 0x243   :  { %5123 = vmatprep.subr.bf16.mxu0 %v8142_v32  ;;  %5153 = vmatprep.mubr.bf16.mxu0 %v9116_v1  ;;  %v8224_v32 = vld [vmem:[#allocation5 + $0x11e0] ss:$16 sps:$4 sm:$0xff]  }
 0x244   :  { %5563 = vmatprep.mubr.bf16.mxu1 %v9100_v46  ;;  %v8161_v46 = vld [vmem:[#allocation5 + $0xc88] ss:$16 sps:$4 sm:$0xff]  }
 0x245   :  { %5534 = vmatpush1.bf16.msra.mxu1 %v8143_v3  ;;  %v8232_v3 = vld [vmem:[#allocation5 + $0x1204] ss:$16 sps:$4 sm:$0xff]  }
 0x246   :  { %5124 = vmatpush1.bf16.msra.mxu0 %v8140_v2  ;;  %5535 = vmatprep.subr.bf16.mxu1 %v8151_v11  ;;  %v131_v2 = vld [vmem:[#allocation2 + $0x80] sm:$0xff] }
 0x247   :  { %5125 = vmatprep.subr.bf16.mxu0 %v8148_v4  ;;  %v8235_v4 = vld [vmem:[#allocation5 + $0xe0c] ss:$16 sps:$4 sm:$0xff]   ;;  %v9122_v11 = vpack.c.bf16 %v131_v2, %v131_v2  ;;  %v8316_v2 = vld [vmem:[#allocation5 + $0x13c4] ss:$16 sps:$4 sm:$0xff]  }
 0x249   :  { %5536 = vmatpush1.bf16.msra.mxu1 %v8149_v6  ;;  %v8230_v6 = vld [vmem:[#allocation5 + $0x1200] ss:$16 sps:$4 sm:$0xff]  }
 0x24a   :  { %5126 = vmatpush1.bf16.msra.mxu0 %v8146_v5  ;;  %5537 = vmatprep.subr.bf16.mxu1 %v8157_v42  ;;  %v134_v5 = vld [vmem:[#allocation2 + $0x98] sm:$0xff]  ;;  %v8238_v42 = vld [vmem:[#allocation5 + $0x1224] ss:$16 sps:$4 sm:$0xff]  }
 0x24b   :  { %5127 = vmatprep.subr.bf16.mxu0 %v8154_v7  ;;  %v8233_v7 = vld [vmem:[#allocation5 + $0xe08] ss:$16 sps:$4 sm:$0xff]  }
 0x24d   :  { %5538 = vmatpush1.bf16.msra.mxu1 %v8155_v10  ;;  %v9124_v10 = vpack.c.bf16 %v134_v5, %v134_v5  ;;  %v8317_v5 = vld [vmem:[#allocation5 + $0xfc8] ss:$16 sps:$4 sm:$0xff]  }
 0x24e   :  { %5128 = vmatpush1.bf16.msra.mxu0 %v8152_v9  ;;  %5539 = vmatprep.subr.bf16.mxu1 %v8163_v13  ;;  %v8241_v9 = vld [vmem:[#allocation5 + $0xe2c] ss:$16 sps:$4 sm:$0xff]   ;;  %v8239_v13 = vld [vmem:[#allocation5 + $0xe28] ss:$16 sps:$4 sm:$0xff]  }
 0x24f   :  { %5129 = vmatprep.subr.bf16.mxu0 %v8160_v12  ;;  %v8236_v12 = vld [vmem:[#allocation5 + $0x1220] ss:$16 sps:$4 sm:$0xff]  }
 0x251   :  { %5540 = vmatpush1.bf16.msra.mxu1 %v8161_v46  ;;  %v8247_v46 = vld [vmem:[#allocation5 + $0xe4c] ss:$16 sps:$4 sm:$0xff]  }
 0x252   :  { %5130 = vmatpush1.bf16.msra.mxu0 %v8158_v14  ;;  %5541 = vmatprep.subr.bf16.mxu1 %v8169_v17  ;;  %v8244_v14 = vld [vmem:[#allocation5 + $0x1244] ss:$16 sps:$4 sm:$0xff]   ;;  %v8245_v17 = vld [vmem:[#allocation5 + $0xe48] ss:$16 sps:$4 sm:$0xff]  }
 0x253   :  { %5131 = vmatprep.subr.bf16.mxu0 %v8166_v15  ;;  %v8242_v15 = vld [vmem:[#allocation5 + $0x1240] ss:$16 sps:$4 sm:$0xff]  }
 0x255   :  { %5542 = vmatpush1.bf16.msra.mxu1 %v8167_v19  ;;  %v8248_v19 = vld [vmem:[#allocation5 + $0x1260] ss:$16 sps:$4 sm:$0xff]  }
 0x256   :  { %5132 = vmatpush1.bf16.msra.mxu0 %v8164_v18  ;;  %5543 = vmatprep.subr.bf16.mxu1 %v8175_v21  ;;  %v8250_v18 = vld [vmem:[#allocation5 + $0x1264] ss:$16 sps:$4 sm:$0xff]  }
 0x257   :  { %5133 = vmatprep.subr.bf16.mxu0 %v8172_v20  ;;  %v8251_v20 = vld [vmem:[#allocation5 + $0xe68] ss:$16 sps:$4 sm:$0xff]   ;;  %v8256_v21 = vld [vmem:[#allocation5 + $0x1284] ss:$16 sps:$4 sm:$0xff]  }
 0x259   :  { %5544 = vmatpush1.bf16.msra.mxu1 %v8173_v24  ;;  %v8254_v24 = vld [vmem:[#allocation5 + $0x1280] ss:$16 sps:$4 sm:$0xff]  }
 0x25a   :  { %5134 = vmatpush1.bf16.msra.mxu0 %v8170_v22  ;;  %5545 = vmatprep.subr.bf16.mxu1 %v8181_v27  ;;  %v8259_v22 = vld [vmem:[#allocation5 + $0xe8c] ss:$16 sps:$4 sm:$0xff]  }
 0x25b   :  { %5135 = vmatprep.subr.bf16.mxu0 %v8178_v26  ;;  %v8262_v26 = vld [vmem:[#allocation5 + $0x12a4] ss:$16 sps:$4 sm:$0xff]   ;;  %v8265_v27 = vld [vmem:[#allocation5 + $0xeac] ss:$16 sps:$4 sm:$0xff]  }
 0x25d   :  { %5546 = vmatpush1.bf16.msra.mxu1 %v8179_v29  ;;  %v8263_v29 = vld [vmem:[#allocation5 + $0xea8] ss:$16 sps:$4 sm:$0xff]  }
 0x25e   :  { %5136 = vmatpush1.bf16.msra.mxu0 %v8176_v28  ;;  %5547 = vmatprep.subr.bf16.mxu1 %v8187_v31  ;;  %v8260_v28 = vld [vmem:[#allocation5 + $0x12a0] ss:$16 sps:$4 sm:$0xff]   ;;  %v8271_v31 = vld [vmem:[#allocation5 + $0xecc] ss:$16 sps:$4 sm:$0xff]  }
 0x25f   :  { %5137 = vmatprep.subr.bf16.mxu0 %v8184_v30  ;;  %v8268_v30 = vld [vmem:[#allocation5 + $0x12c4] ss:$16 sps:$4 sm:$0xff]  }
 0x261   :  { %5548 = vmatpush1.bf16.msra.mxu1 %v8185_v34  ;;  %v8269_v34 = vld [vmem:[#allocation5 + $0xec8] ss:$16 sps:$4 sm:$0xff]  }
 0x262   :  { %5138 = vmatpush1.bf16.msra.mxu0 %v8182_v33  ;;  %5549 = vmatprep.subr.bf16.mxu1 %v8193_v52  ;;  %v8266_v33 = vld [vmem:[#allocation5 + $0x12c0] ss:$16 sps:$4 sm:$0xff]   ;;  %v8277_v52 = vld [vmem:[#allocation5 + $0xeec] ss:$16 sps:$4 sm:$0xff]  }
 0x263   :  { %5139 = vmatprep.subr.bf16.mxu0 %v8190_v35  ;;  %v8274_v35 = vld [vmem:[#allocation5 + $0x12e4] ss:$16 sps:$4 sm:$0xff]  }
 0x265   :  { %5550 = vmatpush1.bf16.msra.mxu1 %v8191_v38  ;;  %v8275_v38 = vld [vmem:[#allocation5 + $0xee8] ss:$16 sps:$4 sm:$0xff]  }
 0x266   :  { %5140 = vmatpush1.bf16.msra.mxu0 %v8188_v37  ;;  %5551 = vmatprep.subr.bf16.mxu1 %v8199_v40  ;;  %v8272_v37 = vld [vmem:[#allocation5 + $0x12e0] ss:$16 sps:$4 sm:$0xff]   ;;  %v8283_v40 = vld [vmem:[#allocation5 + $0xf0c] ss:$16 sps:$4 sm:$0xff]  }
 0x267   :  { %5141 = vmatprep.subr.bf16.mxu0 %v8196_v39  ;;  %v8280_v39 = vld [vmem:[#allocation5 + $0x1304] ss:$16 sps:$4 sm:$0xff]  }
 0x269   :  { %5552 = vmatpush1.bf16.msra.mxu1 %v8197_v36  ;;  %v8281_v36 = vld [vmem:[#allocation5 + $0xf08] ss:$16 sps:$4 sm:$0xff]  }
 0x26a   :  { %5142 = vmatpush1.bf16.msra.mxu0 %v8194_v41  ;;  %5553 = vmatprep.subr.bf16.mxu1 %v8205_v43  ;;  %v8278_v41 = vld [vmem:[#allocation5 + $0x1300] ss:$16 sps:$4 sm:$0xff]   ;;  %v8289_v43 = vld [vmem:[#allocation5 + $0xf2c] ss:$16 sps:$4 sm:$0xff]  }
 0x26b   :  { %5143 = vmatprep.subr.bf16.mxu0 %v8202_v16  ;;  %v8286_v16 = vld [vmem:[#allocation5 + $0x1324] ss:$16 sps:$4 sm:$0xff]  }
 0x26d   :  { %5554 = vmatpush1.bf16.msra.mxu1 %v8203_v45  ;;  %v8287_v45 = vld [vmem:[#allocation5 + $0xf28] ss:$16 sps:$4 sm:$0xff]  }
 0x26e   :  { %5144 = vmatpush1.bf16.msra.mxu0 %v8200_v44  ;;  %5555 = vmatprep.subr.bf16.mxu1 %v8211_v23  ;;  %v8284_v44 = vld [vmem:[#allocation5 + $0x1320] ss:$16 sps:$4 sm:$0xff]   ;;  %v8295_v23 = vld [vmem:[#allocation5 + $0xf4c] ss:$16 sps:$4 sm:$0xff]  }
 0x26f   :  { %5145 = vmatprep.subr.bf16.mxu0 %v8208_v47  ;;  %v8292_v47 = vld [vmem:[#allocation5 + $0x1344] ss:$16 sps:$4 sm:$0xff]  }
 0x271   :  { %5556 = vmatpush1.bf16.msra.mxu1 %v8209_v49  ;;  %v8293_v49 = vld [vmem:[#allocation5 + $0xf48] ss:$16 sps:$4 sm:$0xff]  }
 0x272   :  { %5146 = vmatpush1.bf16.msra.mxu0 %v8206_v48  ;;  %5557 = vmatprep.subr.bf16.mxu1 %v8217_v53  ;;  %v8290_v48 = vld [vmem:[#allocation5 + $0x1340] ss:$16 sps:$4 sm:$0xff]   ;;  %v8301_v53 = vld [vmem:[#allocation5 + $0xf6c] ss:$16 sps:$4 sm:$0xff]  }
 0x273   :  { %5147 = vmatprep.subr.bf16.mxu0 %v8214_v51  ;;  %v8298_v51 = vld [vmem:[#allocation5 + $0x1364] ss:$16 sps:$4 sm:$0xff]  }
 0x275   :  { %5558 = vmatpush1.bf16.msra.mxu1 %v8215_v54  ;;  %v8299_v54 = vld [vmem:[#allocation5 + $0xf68] ss:$16 sps:$4 sm:$0xff]  }
 0x276   :  { %5148 = vmatpush1.bf16.msra.mxu0 %v8212_v25  ;;  %5559 = vmatprep.subr.bf16.mxu1 %v8223_v59  ;;  %v8296_v25 = vld [vmem:[#allocation5 + $0x1360] ss:$16 sps:$4 sm:$0xff]   ;;  %v8307_v59 = vld [vmem:[#allocation5 + $0xf8c] ss:$16 sps:$4 sm:$0xff]  }
 0x277   :  { %5149 = vmatprep.subr.bf16.mxu0 %v8220_v58  ;;  %v8304_v58 = vld [vmem:[#allocation5 + $0x1384] ss:$16 sps:$4 sm:$0xff]  }
 0x279   :  { %5560 = vmatpush1.bf16.msra.mxu1 %v8221_v8  ;;  %v8305_v8 = vld [vmem:[#allocation5 + $0xf88] ss:$16 sps:$4 sm:$0xff]  }
 0x27a   :  { %5150 = vmatpush1.bf16.msra.mxu0 %v8218_v60  ;;  %5561 = vmatprep.subr.bf16.mxu1 %v8229_v63  ;;  %v8302_v60 = vld [vmem:[#allocation5 + $0x1380] ss:$16 sps:$4 sm:$0xff]   ;;  %v8313_v63 = vld [vmem:[#allocation5 + $0xfac] ss:$16 sps:$4 sm:$0xff]  }
 0x27b   :  { %5151 = vmatprep.subr.bf16.mxu0 %v8226_v62  ;;  %v8310_v62 = vld [vmem:[#allocation5 + $0x13a4] ss:$16 sps:$4 sm:$0xff]  }
 0x27d   :  { %5562 = vmatpush1.bf16.msra.mxu1 %v8227_v0  ;;  %v8311_v0 = vld [vmem:[#allocation5 + $0xfa8] ss:$16 sps:$4 sm:$0xff]  }
 0x27e   :  { %5152 = vmatpush1.bf16.msra.mxu0 %v8224_v32  ;;  %5572 = vmatprep.subr.bf16.mxu1 %v8235_v4  ;;  %v8308_v32 = vld [vmem:[#allocation5 + $0x13a0] ss:$16 sps:$4 sm:$0xff]  }
 0x27f   :  { %5162 = vmatprep.subr.bf16.mxu0 %v8232_v3  ;;  %v8319_v3 = vld [vmem:[#allocation5 + $0xfcc] ss:$16 sps:$4 sm:$0xff]   ;;  %v8314_v4 = vld [vmem:[#allocation5 + $0x13c0] ss:$16 sps:$4 sm:$0xff]  }
 0x280   :  { %5564 = vmatmul.mubr.bf16.vlgmr.msra.gmra.mrb[4].mxu1 %v9106_v50  ;;  %v8253_v50 = vld [vmem:[#allocation5 + $0xe6c] ss:$16 sps:$4 sm:$0xff]  }
 0x281   :  { %5154 = vmatmul.mubr.bf16.vlgmr.msra.gmra.mrb[0].mxu0 %v9122_v11  ;;  %5573 = vmatpush1.bf16.msra.mxu1 %v8233_v7  ;;  %v8325_v7 = vld [vmem:[#allocation5 + $0xfec] ss:$16 sps:$4 sm:$0xff]  }
 0x282   :  { %5163 = vmatpush1.bf16.msra.mxu0 %v8230_v6  ;;  %5574 = vmatprep.subr.bf16.mxu1 %v8241_v9  ;;  %v8322_v6 = vld [vmem:[#allocation5 + $0x13e4] ss:$16 sps:$4 sm:$0xff]   ;;  %v8323_v9 = vld [vmem:[#allocation5 + $0xfe8] ss:$16 sps:$4 sm:$0xff]  }
 0x283   :  { %5164 = vmatprep.subr.bf16.mxu0 %v8238_v42  ;;  %5194 = vmatprep.mubr.bf16.mxu0 %v9124_v10  ;;  %v8320_v42 = vld [vmem:[#allocation5 + $0x13e0] ss:$16 sps:$4 sm:$0xff]  }
 0x284   :  { %5604 = vmatprep.mubr.bf16.mxu1 %v9108_v57  ;;  %v8257_v57 = vld [vmem:[#allocation5 + $0xe88] ss:$16 sps:$4 sm:$0xff]  }
 0x285   :  { %5575 = vmatpush1.bf16.msra.mxu1 %v8239_v13  ;;  %v8328_v13 = vld [vmem:[#allocation5 + $0x1404] ss:$16 sps:$4 sm:$0xff]  }
 0x286   :  { %5165 = vmatpush1.bf16.msra.mxu0 %v8236_v12  ;;  %5576 = vmatprep.subr.bf16.mxu1 %v8247_v46  ;;  %v133_v12 = vld [vmem:[#allocation2 + $0x90] sm:$0xff] }
 0x287   :  { %5166 = vmatprep.subr.bf16.mxu0 %v8244_v14  ;;  %v8331_v14 = vld [vmem:[#allocation5 + $0x100c] ss:$16 sps:$4 sm:$0xff]   ;;  %v9130_v46 = vpack.c.bf16 %v133_v12, %v133_v12  ;;  %v8412_v12 = vld [vmem:[#allocation5 + $0x15c4] ss:$16 sps:$4 sm:$0xff]  }
 0x289   :  { %5577 = vmatpush1.bf16.msra.mxu1 %v8245_v17  ;;  %v8326_v17 = vld [vmem:[#allocation5 + $0x1400] ss:$16 sps:$4 sm:$0xff]  }
 0x28a   :  { %5167 = vmatpush1.bf16.msra.mxu0 %v8242_v15  ;;  %5578 = vmatprep.subr.bf16.mxu1 %v8253_v50  ;;  %v136_v15 = vld [vmem:[#allocation2 + $0xa8] sm:$0xff]  ;;  %v8334_v50 = vld [vmem:[#allocation5 + $0x1424] ss:$16 sps:$4 sm:$0xff]  }
 0x28b   :  { %5168 = vmatprep.subr.bf16.mxu0 %v8250_v18  ;;  %v8329_v18 = vld [vmem:[#allocation5 + $0x1008] ss:$16 sps:$4 sm:$0xff]  }
 0x28d   :  { %5579 = vmatpush1.bf16.msra.mxu1 %v8251_v20  ;;  %v9132_v20 = vpack.c.bf16 %v136_v15, %v136_v15  ;;  %v8413_v15 = vld [vmem:[#allocation5 + $0x11c8] ss:$16 sps:$4 sm:$0xff]  }
 0x28e   :  { %5169 = vmatpush1.bf16.msra.mxu0 %v8248_v19  ;;  %5580 = vmatprep.subr.bf16.mxu1 %v8259_v22  ;;  %v8337_v19 = vld [vmem:[#allocation5 + $0x102c] ss:$16 sps:$4 sm:$0xff]   ;;  %v8335_v22 = vld [vmem:[#allocation5 + $0x1028] ss:$16 sps:$4 sm:$0xff]  }
 0x28f   :  { %5170 = vmatprep.subr.bf16.mxu0 %v8256_v21  ;;  %v8332_v21 = vld [vmem:[#allocation5 + $0x1420] ss:$16 sps:$4 sm:$0xff]  }
 0x291   :  { %5581 = vmatpush1.bf16.msra.mxu1 %v8257_v57  ;;  %v8343_v57 = vld [vmem:[#allocation5 + $0x104c] ss:$16 sps:$4 sm:$0xff]  }
 0x292   :  { %5171 = vmatpush1.bf16.msra.mxu0 %v8254_v24  ;;  %5582 = vmatprep.subr.bf16.mxu1 %v8265_v27  ;;  %v8340_v24 = vld [vmem:[#allocation5 + $0x1444] ss:$16 sps:$4 sm:$0xff]   ;;  %v8341_v27 = vld [vmem:[#allocation5 + $0x1048] ss:$16 sps:$4 sm:$0xff]  }
 0x293   :  { %5172 = vmatprep.subr.bf16.mxu0 %v8262_v26  ;;  %v8338_v26 = vld [vmem:[#allocation5 + $0x1440] ss:$16 sps:$4 sm:$0xff]  }
 0x295   :  { %5583 = vmatpush1.bf16.msra.mxu1 %v8263_v29  ;;  %v8344_v29 = vld [vmem:[#allocation5 + $0x1460] ss:$16 sps:$4 sm:$0xff]  }
 0x296   :  { %5173 = vmatpush1.bf16.msra.mxu0 %v8260_v28  ;;  %5584 = vmatprep.subr.bf16.mxu1 %v8271_v31  ;;  %v8346_v28 = vld [vmem:[#allocation5 + $0x1464] ss:$16 sps:$4 sm:$0xff]  }
 0x297   :  { %5174 = vmatprep.subr.bf16.mxu0 %v8268_v30  ;;  %v8347_v30 = vld [vmem:[#allocation5 + $0x1068] ss:$16 sps:$4 sm:$0xff]   ;;  %v8352_v31 = vld [vmem:[#allocation5 + $0x1484] ss:$16 sps:$4 sm:$0xff]  }
 0x299   :  { %5585 = vmatpush1.bf16.msra.mxu1 %v8269_v34  ;;  %v8350_v34 = vld [vmem:[#allocation5 + $0x1480] ss:$16 sps:$4 sm:$0xff]  }
 0x29a   :  { %5175 = vmatpush1.bf16.msra.mxu0 %v8266_v33  ;;  %5586 = vmatprep.subr.bf16.mxu1 %v8277_v52  ;;  %v8355_v33 = vld [vmem:[#allocation5 + $0x108c] ss:$16 sps:$4 sm:$0xff]  }
 0x29b   :  { %5176 = vmatprep.subr.bf16.mxu0 %v8274_v35  ;;  %v8358_v35 = vld [vmem:[#allocation5 + $0x14a4] ss:$16 sps:$4 sm:$0xff]   ;;  %v8361_v52 = vld [vmem:[#allocation5 + $0x10ac] ss:$16 sps:$4 sm:$0xff]  }
 0x29d   :  { %5587 = vmatpush1.bf16.msra.mxu1 %v8275_v38  ;;  %v8359_v38 = vld [vmem:[#allocation5 + $0x10a8] ss:$16 sps:$4 sm:$0xff]  }
 0x29e   :  { %5177 = vmatpush1.bf16.msra.mxu0 %v8272_v37  ;;  %5588 = vmatprep.subr.bf16.mxu1 %v8283_v40  ;;  %v8356_v37 = vld [vmem:[#allocation5 + $0x14a0] ss:$16 sps:$4 sm:$0xff]   ;;  %v8367_v40 = vld [vmem:[#allocation5 + $0x10cc] ss:$16 sps:$4 sm:$0xff]  }
 0x29f   :  { %5178 = vmatprep.subr.bf16.mxu0 %v8280_v39  ;;  %v8364_v39 = vld [vmem:[#allocation5 + $0x14c4] ss:$16 sps:$4 sm:$0xff]  }
 0x2a1   :  { %5589 = vmatpush1.bf16.msra.mxu1 %v8281_v36  ;;  %v8365_v36 = vld [vmem:[#allocation5 + $0x10c8] ss:$16 sps:$4 sm:$0xff]  }
 0x2a2   :  { %5179 = vmatpush1.bf16.msra.mxu0 %v8278_v41  ;;  %5590 = vmatprep.subr.bf16.mxu1 %v8289_v43  ;;  %v8362_v41 = vld [vmem:[#allocation5 + $0x14c0] ss:$16 sps:$4 sm:$0xff]   ;;  %v8373_v43 = vld [vmem:[#allocation5 + $0x10ec] ss:$16 sps:$4 sm:$0xff]  }
 0x2a3   :  { %5180 = vmatprep.subr.bf16.mxu0 %v8286_v16  ;;  %v8370_v16 = vld [vmem:[#allocation5 + $0x14e4] ss:$16 sps:$4 sm:$0xff]  }
 0x2a5   :  { %5591 = vmatpush1.bf16.msra.mxu1 %v8287_v45  ;;  %v8371_v45 = vld [vmem:[#allocation5 + $0x10e8] ss:$16 sps:$4 sm:$0xff]  }
 0x2a6   :  { %5181 = vmatpush1.bf16.msra.mxu0 %v8284_v44  ;;  %5592 = vmatprep.subr.bf16.mxu1 %v8295_v23  ;;  %v8368_v44 = vld [vmem:[#allocation5 + $0x14e0] ss:$16 sps:$4 sm:$0xff]   ;;  %v8379_v23 = vld [vmem:[#allocation5 + $0x110c] ss:$16 sps:$4 sm:$0xff]  }
 0x2a7   :  { %5182 = vmatprep.subr.bf16.mxu0 %v8292_v47  ;;  %v8376_v47 = vld [vmem:[#allocation5 + $0x1504] ss:$16 sps:$4 sm:$0xff]  }
 0x2a9   :  { %5593 = vmatpush1.bf16.msra.mxu1 %v8293_v49  ;;  %v8377_v49 = vld [vmem:[#allocation5 + $0x1108] ss:$16 sps:$4 sm:$0xff]  }
 0x2aa   :  { %5183 = vmatpush1.bf16.msra.mxu0 %v8290_v48  ;;  %5594 = vmatprep.subr.bf16.mxu1 %v8301_v53  ;;  %v8374_v48 = vld [vmem:[#allocation5 + $0x1500] ss:$16 sps:$4 sm:$0xff]   ;;  %v8385_v53 = vld [vmem:[#allocation5 + $0x112c] ss:$16 sps:$4 sm:$0xff]  }
 0x2ab   :  { %5184 = vmatprep.subr.bf16.mxu0 %v8298_v51  ;;  %v8382_v51 = vld [vmem:[#allocation5 + $0x1524] ss:$16 sps:$4 sm:$0xff]  }
 0x2ad   :  { %5595 = vmatpush1.bf16.msra.mxu1 %v8299_v54  ;;  %v8383_v54 = vld [vmem:[#allocation5 + $0x1128] ss:$16 sps:$4 sm:$0xff]  }
 0x2ae   :  { %5185 = vmatpush1.bf16.msra.mxu0 %v8296_v25  ;;  %5596 = vmatprep.subr.bf16.mxu1 %v8307_v59  ;;  %v8380_v25 = vld [vmem:[#allocation5 + $0x1520] ss:$16 sps:$4 sm:$0xff]   ;;  %v8391_v59 = vld [vmem:[#allocation5 + $0x114c] ss:$16 sps:$4 sm:$0xff]  }
 0x2af   :  { %5186 = vmatprep.subr.bf16.mxu0 %v8304_v58  ;;  %v8388_v58 = vld [vmem:[#allocation5 + $0x1544] ss:$16 sps:$4 sm:$0xff]  }
 0x2b1   :  { %5597 = vmatpush1.bf16.msra.mxu1 %v8305_v8  ;;  %v8389_v8 = vld [vmem:[#allocation5 + $0x1148] ss:$16 sps:$4 sm:$0xff]  }
 0x2b2   :  { %5187 = vmatpush1.bf16.msra.mxu0 %v8302_v60  ;;  %5598 = vmatprep.subr.bf16.mxu1 %v8313_v63  ;;  %v8386_v60 = vld [vmem:[#allocation5 + $0x1540] ss:$16 sps:$4 sm:$0xff]   ;;  %v8397_v63 = vld [vmem:[#allocation5 + $0x116c] ss:$16 sps:$4 sm:$0xff]  }
 0x2b3   :  { %5188 = vmatprep.subr.bf16.mxu0 %v8310_v62  ;;  %v8394_v62 = vld [vmem:[#allocation5 + $0x1564] ss:$16 sps:$4 sm:$0xff]  }
 0x2b5   :  { %5599 = vmatpush1.bf16.msra.mxu1 %v8311_v0  ;;  %v8395_v0 = vld [vmem:[#allocation5 + $0x1168] ss:$16 sps:$4 sm:$0xff]  }
 0x2b6   :  { %5189 = vmatpush1.bf16.msra.mxu0 %v8308_v32  ;;  %5600 = vmatprep.subr.bf16.mxu1 %v8319_v3  ;;  %v8392_v32 = vld [vmem:[#allocation5 + $0x1560] ss:$16 sps:$4 sm:$0xff]   ;;  %v8403_v3 = vld [vmem:[#allocation5 + $0x118c] ss:$16 sps:$4 sm:$0xff]  }
 0x2b7   :  { %5190 = vmatprep.subr.bf16.mxu0 %v8316_v2  ;;  %v8400_v2 = vld [vmem:[#allocation5 + $0x1584] ss:$16 sps:$4 sm:$0xff]  }
 0x2b9   :  { %5601 = vmatpush1.bf16.msra.mxu1 %v8317_v5  ;;  %v8401_v5 = vld [vmem:[#allocation5 + $0x1188] ss:$16 sps:$4 sm:$0xff]  }
 0x2ba   :  { %5191 = vmatpush1.bf16.msra.mxu0 %v8314_v4  ;;  %5602 = vmatprep.subr.bf16.mxu1 %v8325_v7  ;;  %v8398_v4 = vld [vmem:[#allocation5 + $0x1580] ss:$16 sps:$4 sm:$0xff]   ;;  %v8409_v7 = vld [vmem:[#allocation5 + $0x11ac] ss:$16 sps:$4 sm:$0xff]  }
 0x2bb   :  { %5192 = vmatprep.subr.bf16.mxu0 %v8322_v6  ;;  %v8406_v6 = vld [vmem:[#allocation5 + $0x15a4] ss:$16 sps:$4 sm:$0xff]  }
 0x2bd   :  { %5603 = vmatpush1.bf16.msra.mxu1 %v8323_v9  ;;  %v8407_v9 = vld [vmem:[#allocation5 + $0x11a8] ss:$16 sps:$4 sm:$0xff]  }
 0x2be   :  { %5193 = vmatpush1.bf16.msra.mxu0 %v8320_v42  ;;  %5613 = vmatprep.subr.bf16.mxu1 %v8331_v14  ;;  %v8404_v42 = vld [vmem:[#allocation5 + $0x15a0] ss:$16 sps:$4 sm:$0xff]  }
 0x2bf   :  { %5203 = vmatprep.subr.bf16.mxu0 %v8328_v13  ;;  %v8415_v13 = vld [vmem:[#allocation5 + $0x11cc] ss:$16 sps:$4 sm:$0xff]   ;;  %v8410_v14 = vld [vmem:[#allocation5 + $0x15c0] ss:$16 sps:$4 sm:$0xff]  }
 0x2c0   :  { %5605 = vmatmul.mubr.bf16.vlgmr.msra.gmra.mrb[4].mxu1 %v9114_v61  ;;  %v8349_v61 = vld [vmem:[#allocation5 + $0x106c] ss:$16 sps:$4 sm:$0xff]  }
 0x2c1   :  { %5195 = vmatmul.mubr.bf16.vlgmr.msra.gmra.mrb[0].mxu0 %v9130_v46  ;;  %5614 = vmatpush1.bf16.msra.mxu1 %v8329_v18  ;;  %v8421_v18 = vld [vmem:[#allocation5 + $0x11ec] ss:$16 sps:$4 sm:$0xff]  }
 0x2c2   :  { %5204 = vmatpush1.bf16.msra.mxu0 %v8326_v17  ;;  %5615 = vmatprep.subr.bf16.mxu1 %v8337_v19  ;;  %v8418_v17 = vld [vmem:[#allocation5 + $0x15e4] ss:$16 sps:$4 sm:$0xff]   ;;  %v8419_v19 = vld [vmem:[#allocation5 + $0x11e8] ss:$16 sps:$4 sm:$0xff]  }
 0x2c3   :  { %5205 = vmatprep.subr.bf16.mxu0 %v8334_v50  ;;  %5235 = vmatprep.mubr.bf16.mxu0 %v9132_v20  ;;  %v8416_v50 = vld [vmem:[#allocation5 + $0x15e0] ss:$16 sps:$4 sm:$0xff]  }
 0x2c4   :  { %5645 = vmatprep.mubr.bf16.mxu1 %v9116_v1  ;;  %v8353_v1 = vld [vmem:[#allocation5 + $0x1088] ss:$16 sps:$4 sm:$0xff]  }
 0x2c5   :  { %5616 = vmatpush1.bf16.msra.mxu1 %v8335_v22  ;;  %v8424_v22 = vld [vmem:[#allocation5 + $0x1604] ss:$16 sps:$4 sm:$0xff]  }
 0x2c6   :  { %5206 = vmatpush1.bf16.msra.mxu0 %v8332_v21  ;;  %5617 = vmatprep.subr.bf16.mxu1 %v8343_v57  ;;  %v135_v21 = vld [vmem:[#allocation2 + $0xa0] sm:$0xff] }
 0x2c7   :  { %5207 = vmatprep.subr.bf16.mxu0 %v8340_v24  ;;  %v8427_v24 = vld [vmem:[#allocation5 + $0x120c] ss:$16 sps:$4 sm:$0xff]   ;;  %v9138_v57 = vpack.c.bf16 %v135_v21, %v135_v21  ;;  %v8508_v21 = vld [vmem:[#allocation5 + $0x17c4] ss:$16 sps:$4 sm:$0xff]  }
 0x2c9   :  { %5618 = vmatpush1.bf16.msra.mxu1 %v8341_v27  ;;  %v8422_v27 = vld [vmem:[#allocation5 + $0x1600] ss:$16 sps:$4 sm:$0xff]  }
 0x2ca   :  { %5208 = vmatpush1.bf16.msra.mxu0 %v8338_v26  ;;  %5619 = vmatprep.subr.bf16.mxu1 %v8349_v61  ;;  %v138_v26 = vld [vmem:[#allocation2 + $0xb8] sm:$0xff]  ;;  %v8430_v61 = vld [vmem:[#allocation5 + $0x1624] ss:$16 sps:$4 sm:$0xff]  }
 0x2cb   :  { %5209 = vmatprep.subr.bf16.mxu0 %v8346_v28  ;;  %v8425_v28 = vld [vmem:[#allocation5 + $0x1208] ss:$16 sps:$4 sm:$0xff]  }
 0x2cd   :  { %5620 = vmatpush1.bf16.msra.mxu1 %v8347_v30  ;;  %v9140_v30 = vpack.c.bf16 %v138_v26, %v138_v26  ;;  %v8509_v26 = vld [vmem:[#allocation5 + $0x13c8] ss:$16 sps:$4 sm:$0xff]  }
 0x2ce   :  { %5210 = vmatpush1.bf16.msra.mxu0 %v8344_v29  ;;  %5621 = vmatprep.subr.bf16.mxu1 %v8355_v33  ;;  %v8433_v29 = vld [vmem:[#allocation5 + $0x122c] ss:$16 sps:$4 sm:$0xff]   ;;  %v8431_v33 = vld [vmem:[#allocation5 + $0x1228] ss:$16 sps:$4 sm:$0xff]  }
 0x2cf   :  { %5211 = vmatprep.subr.bf16.mxu0 %v8352_v31  ;;  %v8428_v31 = vld [vmem:[#allocation5 + $0x1620] ss:$16 sps:$4 sm:$0xff]  }
 0x2d1   :  { %5622 = vmatpush1.bf16.msra.mxu1 %v8353_v1  ;;  %v8439_v1 = vld [vmem:[#allocation5 + $0x124c] ss:$16 sps:$4 sm:$0xff]  }
 0x2d2   :  { %5212 = vmatpush1.bf16.msra.mxu0 %v8350_v34  ;;  %5623 = vmatprep.subr.bf16.mxu1 %v8361_v52  ;;  %v8436_v34 = vld [vmem:[#allocation5 + $0x1644] ss:$16 sps:$4 sm:$0xff]   ;;  %v8437_v52 = vld [vmem:[#allocation5 + $0x1248] ss:$16 sps:$4 sm:$0xff]  }
 0x2d3   :  { %5213 = vmatprep.subr.bf16.mxu0 %v8358_v35  ;;  %v8434_v35 = vld [vmem:[#allocation5 + $0x1640] ss:$16 sps:$4 sm:$0xff]  }
 0x2d5   :  { %5624 = vmatpush1.bf16.msra.mxu1 %v8359_v38  ;;  %v8440_v38 = vld [vmem:[#allocation5 + $0x1660] ss:$16 sps:$4 sm:$0xff]  }
 0x2d6   :  { %5214 = vmatpush1.bf16.msra.mxu0 %v8356_v37  ;;  %5625 = vmatprep.subr.bf16.mxu1 %v8367_v40  ;;  %v8442_v37 = vld [vmem:[#allocation5 + $0x1664] ss:$16 sps:$4 sm:$0xff]  }
 0x2d7   :  { %5215 = vmatprep.subr.bf16.mxu0 %v8364_v39  ;;  %v8443_v39 = vld [vmem:[#allocation5 + $0x1268] ss:$16 sps:$4 sm:$0xff]   ;;  %v8448_v40 = vld [vmem:[#allocation5 + $0x1684] ss:$16 sps:$4 sm:$0xff]  }
 0x2d9   :  { %5626 = vmatpush1.bf16.msra.mxu1 %v8365_v36  ;;  %v8446_v36 = vld [vmem:[#allocation5 + $0x1680] ss:$16 sps:$4 sm:$0xff]  }
 0x2da   :  { %5216 = vmatpush1.bf16.msra.mxu0 %v8362_v41  ;;  %5627 = vmatprep.subr.bf16.mxu1 %v8373_v43  ;;  %v8451_v41 = vld [vmem:[#allocation5 + $0x128c] ss:$16 sps:$4 sm:$0xff]  }
 0x2db   :  { %5217 = vmatprep.subr.bf16.mxu0 %v8370_v16  ;;  %v8454_v16 = vld [vmem:[#allocation5 + $0x16a4] ss:$16 sps:$4 sm:$0xff]   ;;  %v8457_v43 = vld [vmem:[#allocation5 + $0x12ac] ss:$16 sps:$4 sm:$0xff]  }
 0x2dd   :  { %5628 = vmatpush1.bf16.msra.mxu1 %v8371_v45  ;;  %v8455_v45 = vld [vmem:[#allocation5 + $0x12a8] ss:$16 sps:$4 sm:$0xff]  }
 0x2de   :  { %5218 = vmatpush1.bf16.msra.mxu0 %v8368_v44  ;;  %5629 = vmatprep.subr.bf16.mxu1 %v8379_v23  ;;  %v8452_v44 = vld [vmem:[#allocation5 + $0x16a0] ss:$16 sps:$4 sm:$0xff]   ;;  %v8463_v23 = vld [vmem:[#allocation5 + $0x12cc] ss:$16 sps:$4 sm:$0xff]  }
 0x2df   :  { %5219 = vmatprep.subr.bf16.mxu0 %v8376_v47  ;;  %v8460_v47 = vld [vmem:[#allocation5 + $0x16c4] ss:$16 sps:$4 sm:$0xff]  }
 0x2e1   :  { %5630 = vmatpush1.bf16.msra.mxu1 %v8377_v49  ;;  %v8461_v49 = vld [vmem:[#allocation5 + $0x12c8] ss:$16 sps:$4 sm:$0xff]  }
 0x2e2   :  { %5220 = vmatpush1.bf16.msra.mxu0 %v8374_v48  ;;  %5631 = vmatprep.subr.bf16.mxu1 %v8385_v53  ;;  %v8458_v48 = vld [vmem:[#allocation5 + $0x16c0] ss:$16 sps:$4 sm:$0xff]   ;;  %v8469_v53 = vld [vmem:[#allocation5 + $0x12ec] ss:$16 sps:$4 sm:$0xff]  }
 0x2e3   :  { %5221 = vmatprep.subr.bf16.mxu0 %v8382_v51  ;;  %v8466_v51 = vld [vmem:[#allocation5 + $0x16e4] ss:$16 sps:$4 sm:$0xff]  }
 0x2e5   :  { %5632 = vmatpush1.bf16.msra.mxu1 %v8383_v54  ;;  %v8467_v54 = vld [vmem:[#allocation5 + $0x12e8] ss:$16 sps:$4 sm:$0xff]  }
 0x2e6   :  { %5222 = vmatpush1.bf16.msra.mxu0 %v8380_v25  ;;  %5633 = vmatprep.subr.bf16.mxu1 %v8391_v59  ;;  %v8464_v25 = vld [vmem:[#allocation5 + $0x16e0] ss:$16 sps:$4 sm:$0xff]   ;;  %v8475_v59 = vld [vmem:[#allocation5 + $0x130c] ss:$16 sps:$4 sm:$0xff]  }
 0x2e7   :  { %5223 = vmatprep.subr.bf16.mxu0 %v8388_v58  ;;  %v8472_v58 = vld [vmem:[#allocation5 + $0x1704] ss:$16 sps:$4 sm:$0xff]  }
 0x2e9   :  { %5634 = vmatpush1.bf16.msra.mxu1 %v8389_v8  ;;  %v8473_v8 = vld [vmem:[#allocation5 + $0x1308] ss:$16 sps:$4 sm:$0xff]  }
 0x2ea   :  { %5224 = vmatpush1.bf16.msra.mxu0 %v8386_v60  ;;  %5635 = vmatprep.subr.bf16.mxu1 %v8397_v63  ;;  %v8470_v60 = vld [vmem:[#allocation5 + $0x1700] ss:$16 sps:$4 sm:$0xff]   ;;  %v8481_v63 = vld [vmem:[#allocation5 + $0x132c] ss:$16 sps:$4 sm:$0xff]  }
 0x2eb   :  { %5225 = vmatprep.subr.bf16.mxu0 %v8394_v62  ;;  %v8478_v62 = vld [vmem:[#allocation5 + $0x1724] ss:$16 sps:$4 sm:$0xff]  }
 0x2ed   :  { %5636 = vmatpush1.bf16.msra.mxu1 %v8395_v0  ;;  %v8479_v0 = vld [vmem:[#allocation5 + $0x1328] ss:$16 sps:$4 sm:$0xff]  }
 0x2ee   :  { %5226 = vmatpush1.bf16.msra.mxu0 %v8392_v32  ;;  %5637 = vmatprep.subr.bf16.mxu1 %v8403_v3  ;;  %v8476_v32 = vld [vmem:[#allocation5 + $0x1720] ss:$16 sps:$4 sm:$0xff]   ;;  %v8487_v3 = vld [vmem:[#allocation5 + $0x134c] ss:$16 sps:$4 sm:$0xff]  }
 0x2ef   :  { %5227 = vmatprep.subr.bf16.mxu0 %v8400_v2  ;;  %v8484_v2 = vld [vmem:[#allocation5 + $0x1744] ss:$16 sps:$4 sm:$0xff]  }
 0x2f1   :  { %5638 = vmatpush1.bf16.msra.mxu1 %v8401_v5  ;;  %v8485_v5 = vld [vmem:[#allocation5 + $0x1348] ss:$16 sps:$4 sm:$0xff]  }
 0x2f2   :  { %5228 = vmatpush1.bf16.msra.mxu0 %v8398_v4  ;;  %5639 = vmatprep.subr.bf16.mxu1 %v8409_v7  ;;  %v8482_v4 = vld [vmem:[#allocation5 + $0x1740] ss:$16 sps:$4 sm:$0xff]   ;;  %v8493_v7 = vld [vmem:[#allocation5 + $0x136c] ss:$16 sps:$4 sm:$0xff]  }
 0x2f3   :  { %5229 = vmatprep.subr.bf16.mxu0 %v8406_v6  ;;  %v8490_v6 = vld [vmem:[#allocation5 + $0x1764] ss:$16 sps:$4 sm:$0xff]  }
 0x2f5   :  { %5640 = vmatpush1.bf16.msra.mxu1 %v8407_v9  ;;  %v8491_v9 = vld [vmem:[#allocation5 + $0x1368] ss:$16 sps:$4 sm:$0xff]  }
 0x2f6   :  { %5230 = vmatpush1.bf16.msra.mxu0 %v8404_v42  ;;  %5641 = vmatprep.subr.bf16.mxu1 %v8415_v13  ;;  %v8488_v42 = vld [vmem:[#allocation5 + $0x1760] ss:$16 sps:$4 sm:$0xff]   ;;  %v8499_v13 = vld [vmem:[#allocation5 + $0x138c] ss:$16 sps:$4 sm:$0xff]  }
 0x2f7   :  { %5231 = vmatprep.subr.bf16.mxu0 %v8412_v12  ;;  %v8496_v12 = vld [vmem:[#allocation5 + $0x1784] ss:$16 sps:$4 sm:$0xff]  }
 0x2f9   :  { %5642 = vmatpush1.bf16.msra.mxu1 %v8413_v15  ;;  %v8497_v15 = vld [vmem:[#allocation5 + $0x1388] ss:$16 sps:$4 sm:$0xff]  }
 0x2fa   :  { %5232 = vmatpush1.bf16.msra.mxu0 %v8410_v14  ;;  %5643 = vmatprep.subr.bf16.mxu1 %v8421_v18  ;;  %v8494_v14 = vld [vmem:[#allocation5 + $0x1780] ss:$16 sps:$4 sm:$0xff]   ;;  %v8505_v18 = vld [vmem:[#allocation5 + $0x13ac] ss:$16 sps:$4 sm:$0xff]  }
 0x2fb   :  { %5233 = vmatprep.subr.bf16.mxu0 %v8418_v17  ;;  %v8502_v17 = vld [vmem:[#allocation5 + $0x17a4] ss:$16 sps:$4 sm:$0xff]  }
 0x2fd   :  { %5644 = vmatpush1.bf16.msra.mxu1 %v8419_v19  ;;  %v8503_v19 = vld [vmem:[#allocation5 + $0x13a8] ss:$16 sps:$4 sm:$0xff]  }
 0x2fe   :  { %5234 = vmatpush1.bf16.msra.mxu0 %v8416_v50  ;;  %5654 = vmatprep.subr.bf16.mxu1 %v8427_v24  ;;  %v8500_v50 = vld [vmem:[#allocation5 + $0x17a0] ss:$16 sps:$4 sm:$0xff]  }
 0x2ff   :  { %5244 = vmatprep.subr.bf16.mxu0 %v8424_v22  ;;  %v8511_v22 = vld [vmem:[#allocation5 + $0x13cc] ss:$16 sps:$4 sm:$0xff]   ;;  %v8506_v24 = vld [vmem:[#allocation5 + $0x17c0] ss:$16 sps:$4 sm:$0xff]  }
 0x300   :  { %5646 = vmatmul.mubr.bf16.vlgmr.msra.gmra.mrb[4].mxu1 %v9122_v11  ;;  %v8445_v11 = vld [vmem:[#allocation5 + $0x126c] ss:$16 sps:$4 sm:$0xff]  }
 0x301   :  { %5236 = vmatmul.mubr.bf16.vlgmr.msra.gmra.mrb[0].mxu0 %v9138_v57  ;;  %5655 = vmatpush1.bf16.msra.mxu1 %v8425_v28  ;;  %v8517_v28 = vld [vmem:[#allocation5 + $0x13ec] ss:$16 sps:$4 sm:$0xff]  }
 0x302   :  { %5245 = vmatpush1.bf16.msra.mxu0 %v8422_v27  ;;  %5656 = vmatprep.subr.bf16.mxu1 %v8433_v29  ;;  %v8514_v27 = vld [vmem:[#allocation5 + $0x17e4] ss:$16 sps:$4 sm:$0xff]   ;;  %v8515_v29 = vld [vmem:[#allocation5 + $0x13e8] ss:$16 sps:$4 sm:$0xff]  }
 0x303   :  { %5246 = vmatprep.subr.bf16.mxu0 %v8430_v61  ;;  %5276 = vmatprep.mubr.bf16.mxu0 %v9140_v30  ;;  %v8512_v61 = vld [vmem:[#allocation5 + $0x17e0] ss:$16 sps:$4 sm:$0xff]  }
 0x304   :  { %5686 = vmatprep.mubr.bf16.mxu1 %v9124_v10  ;;  %v8449_v10 = vld [vmem:[#allocation5 + $0x1288] ss:$16 sps:$4 sm:$0xff]  }
 0x305   :  { %5657 = vmatpush1.bf16.msra.mxu1 %v8431_v33  ;;  %v8520_v33 = vld [vmem:[#allocation5 + $0x140c] ss:$16 sps:$4 sm:$0xff]  }
 0x306   :  { %5247 = vmatpush1.bf16.msra.mxu0 %v8428_v31  ;;  %5658 = vmatprep.subr.bf16.mxu1 %v8439_v1  ;;  %v137_v31 = vld [vmem:[#allocation2 + $0xb0] sm:$0xff]  ;;  %v8518_v1 = vld [vmem:[#allocation5 + $0x1408] ss:$16 sps:$4 sm:$0xff]  }
 0x307   :  { %5248 = vmatprep.subr.bf16.mxu0 %v8436_v34  ;;  %v9146_v34 = vpack.c.bf16 %v137_v31, %v137_v31  ;;  %v8565_v31 = vld [vmem:[#allocation5 + $0x15ec] ss:$16 sps:$4 sm:$0xff]  }
 0x309   :  { %5659 = vmatpush1.bf16.msra.mxu1 %v8437_v52  ;;  %v8614_v52 = vld [vmem:[#allocation8] ss:$8 sps:$4 sm:$0xff]  }
 0x30a   :  { %5249 = vmatpush1.bf16.msra.mxu0 %v8434_v35  ;;  %5660 = vmatprep.subr.bf16.mxu1 %v8445_v11  ;;  %v8523_v35 = vld [vmem:[#allocation5 + $0x142c] ss:$16 sps:$4 sm:$0xff]   ;;  %v8521_v11 = vld [vmem:[#allocation5 + $0x1428] ss:$16 sps:$4 sm:$0xff]  }
 0x30b   :  { %5250 = vmatprep.subr.bf16.mxu0 %v8442_v37  ;;  %v8616_v37 = vld [vmem:[#allocation8 + $0x4] ss:$8 sps:$4 sm:$0xff]  }
 0x30d   :  { %5661 = vmatpush1.bf16.msra.mxu1 %v8443_v39  ;;  %v8526_v39 = vld [vmem:[#allocation5 + $0x144c] ss:$16 sps:$4 sm:$0xff]  }
 0x30e   :  { %5251 = vmatpush1.bf16.msra.mxu0 %v8440_v38  ;;  %5662 = vmatprep.subr.bf16.mxu1 %v8451_v41  ;;  %v8619_v38 = vld [vmem:[#allocation8 + $0x14] ss:$8 sps:$4 sm:$0xff]   ;;  %v8622_v41 = vld [vmem:[#allocation8 + $0x24] ss:$8 sps:$4 sm:$0xff]  }
 0x30f   :  { %5252 = vmatprep.subr.bf16.mxu0 %v8448_v40  ;;  %v8617_v40 = vld [vmem:[#allocation8 + $0x10] ss:$8 sps:$4 sm:$0xff]  }
 0x311   :  { %5663 = vmatpush1.bf16.msra.mxu1 %v8449_v10  ;;  %v8529_v10 = vld [vmem:[#allocation5 + $0x146c] ss:$16 sps:$4 sm:$0xff]  }
 0x312   :  { %5253 = vmatpush1.bf16.msra.mxu0 %v8446_v36  ;;  %5664 = vmatprep.subr.bf16.mxu1 %v8457_v43  ;;  %v8524_v36 = vld [vmem:[#allocation5 + $0x1448] ss:$16 sps:$4 sm:$0xff]  }
 0x313   :  { %5254 = vmatprep.subr.bf16.mxu0 %v8454_v16  ;;  %v8625_v16 = vld [vmem:[#allocation8 + $0x34] ss:$8 sps:$4 sm:$0xff]  }
 0x314   :  { %v8527_v43 = vld [vmem:[#allocation5 + $0x1468] ss:$16 sps:$4 sm:$0xff]  }
 0x315   :  { %5665 = vmatpush1.bf16.msra.mxu1 %v8455_v45  ;;  %v8628_v45 = vld [vmem:[#allocation8 + $0x44] ss:$8 sps:$4 sm:$0xff]  }
 0x316   :  { %5255 = vmatpush1.bf16.msra.mxu0 %v8452_v44  ;;  %5666 = vmatprep.subr.bf16.mxu1 %v8463_v23  ;;  %v8623_v44 = vld [vmem:[#allocation8 + $0x30] ss:$8 sps:$4 sm:$0xff]  }
 0x317   :  { %5256 = vmatprep.subr.bf16.mxu0 %v8460_v47  ;;  %v8530_v47 = vld [vmem:[#allocation5 + $0x1488] ss:$16 sps:$4 sm:$0xff]   ;;  %v8535_v23 = vld [vmem:[#allocation5 + $0x14ac] ss:$16 sps:$4 sm:$0xff]  }
 0x319   :  { %5667 = vmatpush1.bf16.msra.mxu1 %v8461_v49  ;;  %v8631_v49 = vld [vmem:[#allocation8 + $0x54] ss:$8 sps:$4 sm:$0xff]  }
 0x31a   :  { %5257 = vmatpush1.bf16.msra.mxu0 %v8458_v48  ;;  %5668 = vmatprep.subr.bf16.mxu1 %v8469_v53  ;;  %v8626_v48 = vld [vmem:[#allocation8 + $0x40] ss:$8 sps:$4 sm:$0xff]  }
 0x31b   :  { %5258 = vmatprep.subr.bf16.mxu0 %v8466_v51  ;;  %v8533_v51 = vld [vmem:[#allocation5 + $0x14a8] ss:$16 sps:$4 sm:$0xff]   ;;  %v8538_v53 = vld [vmem:[#allocation5 + $0x14cc] ss:$16 sps:$4 sm:$0xff]  }
 0x31d   :  { %5669 = vmatpush1.bf16.msra.mxu1 %v8467_v54  ;;  %v8634_v54 = vld [vmem:[#allocation8 + $0x64] ss:$8 sps:$4 sm:$0xff]  }
 0x31e   :  { %5259 = vmatpush1.bf16.msra.mxu0 %v8464_v25  ;;  %5670 = vmatprep.subr.bf16.mxu1 %v8475_v59  ;;  %v8629_v25 = vld [vmem:[#allocation8 + $0x50] ss:$8 sps:$4 sm:$0xff]  }
 0x31f   :  { %5260 = vmatprep.subr.bf16.mxu0 %v8472_v58  ;;  %v8536_v58 = vld [vmem:[#allocation5 + $0x14c8] ss:$16 sps:$4 sm:$0xff]   ;;  %v8541_v59 = vld [vmem:[#allocation5 + $0x14ec] ss:$16 sps:$4 sm:$0xff]  }
 0x321   :  { %5671 = vmatpush1.bf16.msra.mxu1 %v8473_v8  ;;  %v8637_v8 = vld [vmem:[#allocation8 + $0x74] ss:$8 sps:$4 sm:$0xff]  }
 0x322   :  { %5261 = vmatpush1.bf16.msra.mxu0 %v8470_v60  ;;  %5672 = vmatprep.subr.bf16.mxu1 %v8481_v63  ;;  %v8632_v60 = vld [vmem:[#allocation8 + $0x60] ss:$8 sps:$4 sm:$0xff]  }
 0x323   :  { %5262 = vmatprep.subr.bf16.mxu0 %v8478_v62  ;;  %v8539_v62 = vld [vmem:[#allocation5 + $0x14e8] ss:$16 sps:$4 sm:$0xff]   ;;  %v8544_v63 = vld [vmem:[#allocation5 + $0x150c] ss:$16 sps:$4 sm:$0xff]  }
 0x325   :  { %5673 = vmatpush1.bf16.msra.mxu1 %v8479_v0  ;;  %v8640_v0 = vld [vmem:[#allocation8 + $0x84] ss:$8 sps:$4 sm:$0xff]  }
 0x326   :  { %5263 = vmatpush1.bf16.msra.mxu0 %v8476_v32  ;;  %5674 = vmatprep.subr.bf16.mxu1 %v8487_v3  ;;  %v8635_v32 = vld [vmem:[#allocation8 + $0x70] ss:$8 sps:$4 sm:$0xff]  }
 0x327   :  { %5264 = vmatprep.subr.bf16.mxu0 %v8484_v2  ;;  %v8542_v2 = vld [vmem:[#allocation5 + $0x1508] ss:$16 sps:$4 sm:$0xff]   ;;  %v8547_v3 = vld [vmem:[#allocation5 + $0x152c] ss:$16 sps:$4 sm:$0xff]  }
 0x329   :  { %5675 = vmatpush1.bf16.msra.mxu1 %v8485_v5  ;;  %v8643_v5 = vld [vmem:[#allocation8 + $0x94] ss:$8 sps:$4 sm:$0xff]  }
 0x32a   :  { %5265 = vmatpush1.bf16.msra.mxu0 %v8482_v4  ;;  %5676 = vmatprep.subr.bf16.mxu1 %v8493_v7  ;;  %v8638_v4 = vld [vmem:[#allocation8 + $0x80] ss:$8 sps:$4 sm:$0xff]  }
 0x32b   :  { %5266 = vmatprep.subr.bf16.mxu0 %v8490_v6  ;;  %v8545_v6 = vld [vmem:[#allocation5 + $0x1528] ss:$16 sps:$4 sm:$0xff]   ;;  %v8550_v7 = vld [vmem:[#allocation5 + $0x154c] ss:$16 sps:$4 sm:$0xff]  }
 0x32d   :  { %5677 = vmatpush1.bf16.msra.mxu1 %v8491_v9  ;;  %v8646_v9 = vld [vmem:[#allocation8 + $0xa4] ss:$8 sps:$4 sm:$0xff]  }
 0x32e   :  { %5267 = vmatpush1.bf16.msra.mxu0 %v8488_v42  ;;  %5678 = vmatprep.subr.bf16.mxu1 %v8499_v13  ;;  %v8641_v42 = vld [vmem:[#allocation8 + $0x90] ss:$8 sps:$4 sm:$0xff]  }
 0x32f   :  { %5268 = vmatprep.subr.bf16.mxu0 %v8496_v12  ;;  %v8548_v12 = vld [vmem:[#allocation5 + $0x1548] ss:$16 sps:$4 sm:$0xff]   ;;  %v8553_v13 = vld [vmem:[#allocation5 + $0x156c] ss:$16 sps:$4 sm:$0xff]  }
 0x331   :  { %5679 = vmatpush1.bf16.msra.mxu1 %v8497_v15  ;;  %v8649_v15 = vld [vmem:[#allocation8 + $0xb4] ss:$8 sps:$4 sm:$0xff]  }
 0x332   :  { %5269 = vmatpush1.bf16.msra.mxu0 %v8494_v14  ;;  %5680 = vmatprep.subr.bf16.mxu1 %v8505_v18  ;;  %v8644_v14 = vld [vmem:[#allocation8 + $0xa0] ss:$8 sps:$4 sm:$0xff]  }
 0x333   :  { %5270 = vmatprep.subr.bf16.mxu0 %v8502_v17  ;;  %v8551_v17 = vld [vmem:[#allocation5 + $0x1568] ss:$16 sps:$4 sm:$0xff]   ;;  %v8556_v18 = vld [vmem:[#allocation5 + $0x158c] ss:$16 sps:$4 sm:$0xff]  }
 0x335   :  { %5681 = vmatpush1.bf16.msra.mxu1 %v8503_v19  ;;  %v8652_v19 = vld [vmem:[#allocation8 + $0xc4] ss:$8 sps:$4 sm:$0xff]  }
 0x336   :  { %5271 = vmatpush1.bf16.msra.mxu0 %v8500_v50  ;;  %5682 = vmatprep.subr.bf16.mxu1 %v8511_v22  ;;  %v8647_v50 = vld [vmem:[#allocation8 + $0xb0] ss:$8 sps:$4 sm:$0xff]  }
 0x337   :  { %5272 = vmatprep.subr.bf16.mxu0 %v8508_v21  ;;  %v8554_v21 = vld [vmem:[#allocation5 + $0x1588] ss:$16 sps:$4 sm:$0xff]   ;;  %v8559_v22 = vld [vmem:[#allocation5 + $0x15ac] ss:$16 sps:$4 sm:$0xff]  }
 0x339   :  { %5683 = vmatpush1.bf16.msra.mxu1 %v8509_v26  ;;  %v8655_v26 = vld [vmem:[#allocation8 + $0xd4] ss:$8 sps:$4 sm:$0xff]  }
 0x33a   :  { %5273 = vmatpush1.bf16.msra.mxu0 %v8506_v24  ;;  %5684 = vmatprep.subr.bf16.mxu1 %v8517_v28  ;;  %v8650_v24 = vld [vmem:[#allocation8 + $0xc0] ss:$8 sps:$4 sm:$0xff]  }
 0x33b   :  { %5274 = vmatprep.subr.bf16.mxu0 %v8514_v27  ;;  %v8557_v27 = vld [vmem:[#allocation5 + $0x15a8] ss:$16 sps:$4 sm:$0xff]   ;;  %v8562_v28 = vld [vmem:[#allocation5 + $0x15cc] ss:$16 sps:$4 sm:$0xff]  }
 0x33d   :  { %5685 = vmatpush1.bf16.msra.mxu1 %v8515_v29  ;;  %v8560_v29 = vld [vmem:[#allocation5 + $0x15c8] ss:$16 sps:$4 sm:$0xff]  }
 0x33e   :  { %5275 = vmatpush1.bf16.msra.mxu0 %v8512_v61  ;;  %5695 = vmatprep.subr.bf16.mxu1 %v8520_v33  ;;  %v8653_v61 = vld [vmem:[#allocation8 + $0xd0] ss:$8 sps:$4 sm:$0xff]   ;;  %v8563_v33 = vld [vmem:[#allocation5 + $0x15e8] ss:$16 sps:$4 sm:$0xff]  }
 0x33f   :  { %6189 = vmatprep.subr.bf16.mxu0 %v8616_v37  ;;  %v8569_v37 = vld [vmem:[#allocation5 + $0x1628] ss:$16 sps:$4 sm:$0xff]  }
 0x340   :  { %5687 = vmatmul.mubr.bf16.vlgmr.msra.gmra.mrb[4].mxu1 %v9130_v46  ;;  %v8620_v46 = vld [vmem:[#allocation8 + $0x20] ss:$8 sps:$4 sm:$0xff]  }
 0x341   :  { %5277 = vmatmul.mubr.bf16.vlgmr.msra.gmra.mrb[0].mxu0 %v9146_v34  ;;  %5696 = vmatpush1.bf16.msra.mxu1 %v8518_v1  ;;  %v8568_v1 = vld [vmem:[#allocation5 + $0x160c] ss:$16 sps:$4 sm:$0xff]  }
 0x342   :  { %5727 = vmatprep.mubr.bf16.mxu1 %v9132_v20  ;;  %5697 = vmatprep.subr.bf16.mxu1 %v8523_v35  ;;  %v8532_v20 = vld [vmem:[#allocation5 + $0x148c] ss:$16 sps:$4 sm:$0xff]   ;;  %v8566_v35 = vld [vmem:[#allocation5 + $0x1608] ss:$16 sps:$4 sm:$0xff]  }
 0x343   :  { %6190 = vmatpush1.bf16.msra.mxu0 %v8614_v52  ;;  %v8571_v52 = vld [vmem:[#allocation5 + $0x162c] ss:$16 sps:$4 sm:$0xff]  }
 0x344   :  { %6191 = vmatprep.subr.bf16.mxu0 %v8619_v38  ;;  %v8572_v38 = vld [vmem:[#allocation5 + $0x1648] ss:$16 sps:$4 sm:$0xff]  }
 0x345   :  { %5698 = vmatpush1.bf16.msra.mxu1 %v8521_v11  ;;  %v8574_v11 = vld [vmem:[#allocation5 + $0x164c] ss:$16 sps:$4 sm:$0xff]  }
 0x346   :  { %5699 = vmatprep.subr.bf16.mxu1 %v8526_v39  ;;  %v8577_v39 = vld [vmem:[#allocation5 + $0x166c] ss:$16 sps:$4 sm:$0xff]  }
 0x347   :  { %6192 = vmatpush1.bf16.msra.mxu0 %v8617_v40  ;;  %v8575_v40 = vld [vmem:[#allocation5 + $0x1668] ss:$16 sps:$4 sm:$0xff]  }
 0x348   :  { %6193 = vmatprep.subr.bf16.mxu0 %v8622_v41  ;;  %v8580_v41 = vld [vmem:[#allocation5 + $0x168c] ss:$16 sps:$4 sm:$0xff]  }
 0x349   :  { %5700 = vmatpush1.bf16.msra.mxu1 %v8524_v36  ;;  %v8578_v36 = vld [vmem:[#allocation5 + $0x1688] ss:$16 sps:$4 sm:$0xff]  }
 0x34a   :  { %5701 = vmatprep.subr.bf16.mxu1 %v8529_v10  ;;  %v8583_v10 = vld [vmem:[#allocation5 + $0x16ac] ss:$16 sps:$4 sm:$0xff]  }
 0x34b   :  { %6194 = vmatpush1.bf16.msra.mxu0 %v8620_v46  ;;  %v8586_v46 = vld [vmem:[#allocation5 + $0x16cc] ss:$16 sps:$4 sm:$0xff]  }
 0x34c   :  { %6195 = vmatprep.subr.bf16.mxu0 %v8625_v16  ;;  %v8658_v16 = vld [vmem:[#allocation8 + $0xe4] ss:$8 sps:$4 sm:$0xff]  }
 0x34d   :  { %5702 = vmatpush1.bf16.msra.mxu1 %v8527_v43  ;;  %v8584_v43 = vld [vmem:[#allocation5 + $0x16c8] ss:$16 sps:$4 sm:$0xff]  }
 0x34e   :  { %5703 = vmatprep.subr.bf16.mxu1 %v8532_v20  ;;  %v8589_v20 = vld [vmem:[#allocation5 + $0x16ec] ss:$16 sps:$4 sm:$0xff]  }
 0x34f   :  { %6196 = vmatpush1.bf16.msra.mxu0 %v8623_v44  ;;  %v8661_v44 = vld [vmem:[#allocation8 + $0xf4] ss:$8 sps:$4 sm:$0xff]  }
 0x350   :  { %6197 = vmatprep.subr.bf16.mxu0 %v8628_v45  ;;  %v8659_v45 = vld [vmem:[#allocation8 + $0xf0] ss:$8 sps:$4 sm:$0xff]  }
 0x351   :  { %5704 = vmatpush1.bf16.msra.mxu1 %v8530_v47  ;;  %v8587_v47 = vld [vmem:[#allocation5 + $0x16e8] ss:$16 sps:$4 sm:$0xff]  }
 0x352   :  { %5705 = vmatprep.subr.bf16.mxu1 %v8535_v23  ;;  %v8592_v23 = vld [vmem:[#allocation5 + $0x170c] ss:$16 sps:$4 sm:$0xff]  }
 0x353   :  { %6198 = vmatpush1.bf16.msra.mxu0 %v8626_v48  ;;  %v8590_v48 = vld [vmem:[#allocation5 + $0x1708] ss:$16 sps:$4 sm:$0xff]  }
 0x354   :  { %6199 = vmatprep.subr.bf16.mxu0 %v8631_v49  ;;  %v8664_v49 = vld [vmem:[#allocation8 + $0x104] ss:$8 sps:$4 sm:$0xff]  }
 0x355   :  { %5706 = vmatpush1.bf16.msra.mxu1 %v8533_v51  ;;  %v8595_v51 = vld [vmem:[#allocation5 + $0x172c] ss:$16 sps:$4 sm:$0xff]  }
 0x356   :  { %5707 = vmatprep.subr.bf16.mxu1 %v8538_v53  ;;  %v8593_v53 = vld [vmem:[#allocation5 + $0x1728] ss:$16 sps:$4 sm:$0xff]  }
 0x357   :  { %6200 = vmatpush1.bf16.msra.mxu0 %v8629_v25  ;;  %v8598_v25 = vld [vmem:[#allocation5 + $0x174c] ss:$16 sps:$4 sm:$0xff]  }
 0x358   :  { %6201 = vmatprep.subr.bf16.mxu0 %v8634_v54  ;;  %v8596_v54 = vld [vmem:[#allocation5 + $0x1748] ss:$16 sps:$4 sm:$0xff]  }
 0x359   :  { %5708 = vmatpush1.bf16.msra.mxu1 %v8536_v58  ;;  %v8601_v58 = vld [vmem:[#allocation5 + $0x176c] ss:$16 sps:$4 sm:$0xff]  }
 0x35a   :  { %5709 = vmatprep.subr.bf16.mxu1 %v8541_v59  ;;  %v8599_v59 = vld [vmem:[#allocation5 + $0x1768] ss:$16 sps:$4 sm:$0xff]  }
 0x35b   :  { %6202 = vmatpush1.bf16.msra.mxu0 %v8632_v60  ;;  %v8604_v60 = vld [vmem:[#allocation5 + $0x178c] ss:$16 sps:$4 sm:$0xff]  }
 0x35c   :  { %6203 = vmatprep.subr.bf16.mxu0 %v8637_v8  ;;  %v8602_v8 = vld [vmem:[#allocation5 + $0x1788] ss:$16 sps:$4 sm:$0xff]  }
 0x35d   :  { %5710 = vmatpush1.bf16.msra.mxu1 %v8539_v62  ;;  %v8607_v62 = vld [vmem:[#allocation5 + $0x17ac] ss:$16 sps:$4 sm:$0xff]  }
 0x35e   :  { %5711 = vmatprep.subr.bf16.mxu1 %v8544_v63  ;;  %v8605_v63 = vld [vmem:[#allocation5 + $0x17a8] ss:$16 sps:$4 sm:$0xff]  }
 0x35f   :  { %6204 = vmatpush1.bf16.msra.mxu0 %v8635_v32  ;;  %v8610_v32 = vld [vmem:[#allocation5 + $0x17cc] ss:$16 sps:$4 sm:$0xff]  }
 0x360   :  { %6205 = vmatprep.subr.bf16.mxu0 %v8640_v0  ;;  %v8608_v0 = vld [vmem:[#allocation5 + $0x17c8] ss:$16 sps:$4 sm:$0xff]  }
 0x361   :  { %5712 = vmatpush1.bf16.msra.mxu1 %v8542_v2  ;;  %v8613_v2 = vld [vmem:[#allocation5 + $0x17ec] ss:$16 sps:$4 sm:$0xff]  }
 0x362   :  { %5713 = vmatprep.subr.bf16.mxu1 %v8547_v3  ;;  %v8611_v3 = vld [vmem:[#allocation5 + $0x17e8] ss:$16 sps:$4 sm:$0xff]  }
 0x363   :  { %6206 = vmatpush1.bf16.msra.mxu0 %v8638_v4  ;;  %v933_v4 = vlaneseq }
 0x364   :  { %6207 = vmatprep.subr.bf16.mxu0 %v8643_v5 }
 0x365   :  { %5714 = vmatpush1.bf16.msra.mxu1 %v8545_v6  ;;  %v9154_v5 = vshrl.u32 %v933_v4, 7 }
 0x366   :  { %5715 = vmatprep.subr.bf16.mxu1 %v8550_v7  ;;  %v9157_v7 = vld [vmem:[#allocation7] sm:$0xf] }
 0x367   :  { %6208 = vmatpush1.bf16.msra.mxu0 %v8641_v42  ;;  %v935_v6 = vsub.s32 0, %v9154_v5  ;;  %v939_v42 = vsub.s32 1, %v9154_v5  ;;  %v943_v4 = vsub.s32 2, %v9154_v5 }
 0x368   :  { %6209 = vmatprep.subr.bf16.mxu0 %v8646_v9 }
 0x369   :  { %5716 = vmatpush1.bf16.msra.mxu1 %v8548_v12  ;;  %v936_v9 = vrot.slane %v9157_v7, %v935_v6  ;;  %v940_v12 = vrot.slane %v9157_v7, %v939_v42 }
 0x36a   :  { %5717 = vmatprep.subr.bf16.mxu1 %v8553_v13 }
 0x36b   :  { %6210 = vmatpush1.bf16.msra.mxu0 %v8644_v14  ;;  %v4828_v13 = vadd.f32 %v9094_v55, %v936_v9  ;;  %v8710_v55 = vld [vmem:[#allocation11 + $0x40] sm:$0xff]   ;;  %v947_v9 = vsub.s32 3, %v9154_v5 }
 0x36c   :  { %6211 = vmatprep.subr.bf16.mxu0 %v8649_v15 }
 0x36d   :  { %5718 = vmatpush1.bf16.msra.mxu1 %v8551_v17 }
 0x36e   :  { %5719 = vmatprep.subr.bf16.mxu1 %v8556_v18 }
 0x36f   :  { %6212 = vmatpush1.bf16.msra.mxu0 %v8647_v50 }
 0x370   :  { %6213 = vmatprep.subr.bf16.mxu0 %v8652_v19 }
 0x371   :  { %5720 = vmatpush1.bf16.msra.mxu1 %v8554_v21 }
 0x372   :  { %5721 = vmatprep.subr.bf16.mxu1 %v8559_v22 }
 0x373   :  { %6214 = vmatpush1.bf16.msra.mxu0 %v8650_v24 }
 0x374   :  { %6215 = vmatprep.subr.bf16.mxu0 %v8655_v26 }
 0x375   :  { %5722 = vmatpush1.bf16.msra.mxu1 %v8557_v27 }
 0x376   :  { %5723 = vmatprep.subr.bf16.mxu1 %v8562_v28  ;;  %v8662_v28 = vld [vmem:[#allocation8 + $0x100] ss:$8 sps:$4 sm:$0xff]  }
 0x377   :  { %6216 = vmatpush1.bf16.msra.mxu0 %v8653_v61 }
 0x378   :  { %6217 = vmatprep.subr.bf16.mxu0 %v8658_v16  ;;  %v8719_v16 = vld [vmem:[#allocation11 + $0x20] sm:$0xff]  }
 0x379   :  { %5724 = vmatpush1.bf16.msra.mxu1 %v8560_v29  ;;  %v8667_v29 = vld [vmem:[#allocation8 + $0x114] ss:$8 sps:$4 sm:$0xff]  }
 0x37a   :  { %5725 = vmatprep.subr.bf16.mxu1 %v8565_v31  ;;  %v8712_v31 = vld [vmem:[#allocation11 + $0x48] sm:$0xff]  }
 0x37d   :  { %5726 = vmatpush1.bf16.msra.mxu1 %v8563_v33  ;;  %v8665_v33 = vld [vmem:[#allocation8 + $0x110] ss:$8 sps:$4 sm:$0xff]  }
 0x37e   :  { %5736 = vmatprep.subr.bf16.mxu1 %v8568_v1  ;;  %v8670_v1 = vld [vmem:[#allocation8 + $0x124] ss:$8 sps:$4 sm:$0xff]  }
 0x380   :  { %5728 = vmatmul.mubr.bf16.vlgmr.msra.gmra.mrb[4].mxu1 %v9138_v57  ;;  %v8581_v57 = vld [vmem:[#allocation5 + $0x16a8] ss:$16 sps:$4 sm:$0xff]  }
 0x381   :  { %5737 = vmatpush1.bf16.msra.mxu1 %v8566_v35  ;;  %5768 = vmatprep.mubr.bf16.mxu1 %v9140_v30  ;;  %v8656_v30 = vld [vmem:[#allocation8 + $0xe0] ss:$8 sps:$4 sm:$0xff]  }
 0x382   :  { %5738 = vmatprep.subr.bf16.mxu1 %v8571_v52  ;;  %6218 = vmatpush1.bf16.msra.mxu0 %v8656_v30  ;;  %v8713_v35 = vld [vmem:[#allocation11 + $0x8] sm:$0xff]   ;;  %v8714_v52 = vld [vmem:[#allocation11 + $0x50] sm:$0xff]  }
 0x383   :  { %6219 = vmatprep.subr.bf16.mxu0 %v8661_v44  ;;  %v8720_v30 = vld [vmem:[#allocation11 + $0x68] sm:$0xff]  }
 0x384   :  { %v8721_v44 = vld [vmem:[#allocation11 + $0x28] sm:$0xff]  }
 0x385   :  { %5739 = vmatpush1.bf16.msra.mxu1 %v8569_v37  ;;  %v8668_v37 = vld [vmem:[#allocation8 + $0x120] ss:$8 sps:$4 sm:$0xff]  }
 0x386   :  { %5740 = vmatprep.subr.bf16.mxu1 %v8574_v11  ;;  %6220 = vmatpush1.bf16.msra.mxu0 %v8659_v45  ;;  %v8673_v11 = vld [vmem:[#allocation8 + $0x134] ss:$8 sps:$4 sm:$0xff]   ;;  %v8680_v45 = vld [vmem:[#allocation8 + $0x160] ss:$8 sps:$4 sm:$0xff]  }
 0x387   :  { %6230 = vmatprep.subr.bf16.mxu0 %v8664_v49  ;;  %v8686_v49 = vld [vmem:[#allocation8 + $0x180] ss:$8 sps:$4 sm:$0xff]  }
 0x389   :  { %5741 = vmatpush1.bf16.msra.mxu1 %v8572_v38  ;;  %v8715_v38 = vld [vmem:[#allocation11 + $0x10] sm:$0xff]  }
 0x38a   :  { %5742 = vmatprep.subr.bf16.mxu1 %v8577_v39  ;;  %v8716_v39 = vld [vmem:[#allocation11 + $0x58] sm:$0xff]  }
 0x38d   :  { %5743 = vmatpush1.bf16.msra.mxu1 %v8575_v40  ;;  %v8671_v40 = vld [vmem:[#allocation8 + $0x130] ss:$8 sps:$4 sm:$0xff]  }
 0x38e   :  { %5744 = vmatprep.subr.bf16.mxu1 %v8580_v41  ;;  %v8676_v41 = vld [vmem:[#allocation8 + $0x144] ss:$8 sps:$4 sm:$0xff]  }
 0x391   :  { %5745 = vmatpush1.bf16.msra.mxu1 %v8578_v36  ;;  %v8717_v36 = vld [vmem:[#allocation11 + $0x18] sm:$0xff]  }
 0x392   :  { %5746 = vmatprep.subr.bf16.mxu1 %v8583_v10  ;;  %v8718_v10 = vld [vmem:[#allocation11 + $0x60] sm:$0xff]  }
 0x395   :  { %5747 = vmatpush1.bf16.msra.mxu1 %v8581_v57  ;;  %v8674_v57 = vld [vmem:[#allocation8 + $0x140] ss:$8 sps:$4 sm:$0xff]  }
 0x396   :  { %5748 = vmatprep.subr.bf16.mxu1 %v8586_v46  ;;  %v8679_v46 = vld [vmem:[#allocation8 + $0x154] ss:$8 sps:$4 sm:$0xff]  }
 0x399   :  { %5749 = vmatpush1.bf16.msra.mxu1 %v8584_v43  ;;  %v8677_v43 = vld [vmem:[#allocation8 + $0x150] ss:$8 sps:$4 sm:$0xff]  }
 0x39a   :  { %5750 = vmatprep.subr.bf16.mxu1 %v8589_v20  ;;  %v8682_v20 = vld [vmem:[#allocation8 + $0x164] ss:$8 sps:$4 sm:$0xff]  }
 0x39d   :  { %5751 = vmatpush1.bf16.msra.mxu1 %v8587_v47  ;;  %v8685_v47 = vld [vmem:[#allocation8 + $0x174] ss:$8 sps:$4 sm:$0xff]  }
 0x39e   :  { %5752 = vmatprep.subr.bf16.mxu1 %v8592_v23  ;;  %v8683_v23 = vld [vmem:[#allocation8 + $0x170] ss:$8 sps:$4 sm:$0xff]  }
 0x3a1   :  { %5753 = vmatpush1.bf16.msra.mxu1 %v8590_v48  ;;  %v8688_v48 = vld [vmem:[#allocation8 + $0x184] ss:$8 sps:$4 sm:$0xff]  }
 0x3a2   :  { %5754 = vmatprep.subr.bf16.mxu1 %v8595_v51  ;;  %v8691_v51 = vld [vmem:[#allocation8 + $0x194] ss:$8 sps:$4 sm:$0xff]  }
 0x3a5   :  { %5755 = vmatpush1.bf16.msra.mxu1 %v8593_v53  ;;  %v8689_v53 = vld [vmem:[#allocation8 + $0x190] ss:$8 sps:$4 sm:$0xff]  }
 0x3a6   :  { %5756 = vmatprep.subr.bf16.mxu1 %v8598_v25  ;;  %v8694_v25 = vld [vmem:[#allocation8 + $0x1a4] ss:$8 sps:$4 sm:$0xff]  }
 0x3a9   :  { %5757 = vmatpush1.bf16.msra.mxu1 %v8596_v54  ;;  %v8692_v54 = vld [vmem:[#allocation8 + $0x1a0] ss:$8 sps:$4 sm:$0xff]  }
 0x3aa   :  { %5758 = vmatprep.subr.bf16.mxu1 %v8601_v58  ;;  %v8697_v58 = vld [vmem:[#allocation8 + $0x1b4] ss:$8 sps:$4 sm:$0xff]  }
 0x3ad   :  { %5759 = vmatpush1.bf16.msra.mxu1 %v8599_v59  ;;  %v8695_v59 = vld [vmem:[#allocation8 + $0x1b0] ss:$8 sps:$4 sm:$0xff]  }
 0x3ae   :  { %5760 = vmatprep.subr.bf16.mxu1 %v8604_v60  ;;  %v8700_v60 = vld [vmem:[#allocation8 + $0x1c4] ss:$8 sps:$4 sm:$0xff]  }
 0x3b1   :  { %5761 = vmatpush1.bf16.msra.mxu1 %v8602_v8  ;;  %v8698_v8 = vld [vmem:[#allocation8 + $0x1c0] ss:$8 sps:$4 sm:$0xff]  }
 0x3b2   :  { %5762 = vmatprep.subr.bf16.mxu1 %v8607_v62  ;;  %v8703_v62 = vld [vmem:[#allocation8 + $0x1d4] ss:$8 sps:$4 sm:$0xff]  }
 0x3b5   :  { %5763 = vmatpush1.bf16.msra.mxu1 %v8605_v63  ;;  %v8701_v63 = vld [vmem:[#allocation8 + $0x1d0] ss:$8 sps:$4 sm:$0xff]  }
 0x3b6   :  { %5764 = vmatprep.subr.bf16.mxu1 %v8610_v32  ;;  %v8706_v32 = vld [vmem:[#allocation8 + $0x1e4] ss:$8 sps:$4 sm:$0xff]  }
 0x3b9   :  { %5765 = vmatpush1.bf16.msra.mxu1 %v8608_v0  ;;  %v8704_v0 = vld [vmem:[#allocation8 + $0x1e0] ss:$8 sps:$4 sm:$0xff]  }
 0x3ba   :  { %5766 = vmatprep.subr.bf16.mxu1 %v8613_v2  ;;  %v8709_v2 = vld [vmem:[#allocation8 + $0x1f4] ss:$8 sps:$4 sm:$0xff]  }
 0x3bd   :  { %5767 = vmatpush1.bf16.msra.mxu1 %v8611_v3  ;;  %v8707_v3 = vld [vmem:[#allocation8 + $0x1f0] ss:$8 sps:$4 sm:$0xff]  }
 0x3be   :  { %7330 = vmatprep.subr.bf16.mxu1 %v8710_v55  ;;  %v5857_v55 = vld [vmem:[#allocation10] sm:$0x3] }
 0x3c0   :  { %5769 = vmatmul.mubr.bf16.vlgmr.msra.gmra.mrb[4].mxu1 %v9146_v34  ;;  %v4830_v34 = vadd.f32 %v9096_v56, %v940_v12  ;;  %v8711_v56 = vld [vmem:[#allocation11] sm:$0xff]   ;;  %v944_v12 = vrot.slane %v9157_v7, %v943_v4 }
 0x3c1   :  { %7331 = vmatpush3.bf16.msra.mxu1 %v8711_v56  ;;  %v5862_v56 = vrot.slane %v5857_v55, %v935_v6 }
 0x3c2   :  { %7332 = vmatprep.subr.bf16.mxu1 %v8712_v31  ;;  %v5866_v31 = vrot.slane %v5857_v55, %v939_v42 }
 0x3c5   :  { %7333 = vmatpush3.bf16.msra.mxu1 %v8713_v35 }
 0x3c6   :  { %7334 = vmatprep.subr.bf16.mxu1 %v8714_v52 }
 0x3c9   :  { %7335 = vmatpush3.bf16.msra.mxu1 %v8715_v38 }
 0x3ca   :  { %7336 = vmatprep.subr.bf16.mxu1 %v8716_v39 }
 0x3cd   :  { %7337 = vmatpush3.bf16.msra.mxu1 %v8717_v36 }
 0x3ce   :  { %7338 = vmatprep.subr.bf16.mxu1 %v8718_v10 }
 0x3d1   :  { %7339 = vmatpush3.bf16.msra.mxu1 %v8719_v16 }
 0x3d2   :  { %7340 = vmatprep.subr.bf16.mxu1 %v8720_v30 }
 0x3d5   :  { %7341 = vmatpush3.bf16.msra.mxu1 %v8721_v44 }
 0x414   :  { %v5278_v14 = vpop.f32.mrb[0].mxu0 }
 0x415   :  { %v7353_v15 = vadd.f32 %v5278_v14, %v4828_v13  ;;  %v5280_v17 = vpop.f32.mrb[1].mxu0  ;;  %v948_v13 = vrot.slane %v9157_v7, %v947_v9  ;;  %v8724_v7 = vld [vmem:[#allocation11 + $0x78] sm:$0xff]  }
 0x416   :  { %v7355_v18 = vadd.f32 %v5280_v17, %v4830_v34  ;;  %v5282_v50 = vpop.f32.mrb[2].mxu0 }
 0x417   :  { %vm5777_vm0 = vcmp.gt.f32.partialorder %v7353_v15, 0.0  ;;  %v5781_v19 = vmul.f32 0.2, %v7353_v15  ;;  %v5283_v21 = vpop.f32.mrb[3].mxu0 }
 0x418   :  { %vm5778_vm1 = vcmp.gt.f32.partialorder %v7355_v18, 0.0  ;;  %v5782_v22 = vmul.f32 0.2, %v7355_v18 }
 0x419   :  { %v5785_v24 = vsel %vm5777_vm0, %v7353_v15, %v5781_v19 }
 0x41a   :  { %v5786_v26 = vsel %vm5778_vm1, %v7355_v18, %v5782_v22  ;;  %v5789_v61 = vpack.c.bf16 %v5785_v24, %v5785_v24 }
 0x41b   :  { %v5790_v27 = vpack.c.bf16 %v5786_v26, %v5786_v26 }
 0x41d   :  { %6221 = vmatprep.mubr.bf16.mxu0 %v5790_v27 }
 0x41e   :  { %6222 = vmatmul.mubr.bf16.vlgmr.msra.gmra.mrb[4].mxu0 %v5789_v61  ;;  %v8723_v61 = vld [vmem:[#allocation11 + $0x30] sm:$0xff]  }
 0x41f   :  { %6231 = vmatpush1.bf16.msra.mxu0 %v8662_v28  ;;  %v8722_v28 = vld [vmem:[#allocation11 + $0x70] sm:$0xff]  }
 0x420   :  { %6232 = vmatprep.subr.bf16.mxu0 %v8667_v29  ;;  %7342 = vmatprep.subr.bf16.mxu1 %v8722_v28  ;;  %v8725_v29 = vld [vmem:[#allocation11 + $0x38] sm:$0xff]  }
 0x421   :  { %7343 = vmatpush3.bf16.msra.mxu1 %v8723_v61 }
 0x422   :  { %7344 = vmatprep.subr.bf16.mxu1 %v8724_v7 }
 0x423   :  { %6233 = vmatpush1.bf16.msra.mxu0 %v8665_v33 }
 0x424   :  { %6234 = vmatprep.subr.bf16.mxu0 %v8670_v1 }
 0x425   :  { %7345 = vmatpush3.bf16.msra.mxu1 %v8725_v29 }
 0x427   :  { %6235 = vmatpush1.bf16.msra.mxu0 %v8668_v37 }
 0x428   :  { %6236 = vmatprep.subr.bf16.mxu0 %v8673_v11 }
 0x42b   :  { %6237 = vmatpush1.bf16.msra.mxu0 %v8671_v40 }
 0x42c   :  { %6238 = vmatprep.subr.bf16.mxu0 %v8676_v41 }
 0x42f   :  { %6239 = vmatpush1.bf16.msra.mxu0 %v8674_v57  ;;  %v7312_v57 = vld [vmem:[#allocation13] ss:$0 sm:$0xff] }
 0x430   :  { %6240 = vmatprep.subr.bf16.mxu0 %v8679_v46 }
 0x433   :  { %6241 = vmatpush1.bf16.msra.mxu0 %v8677_v43 }
 0x434   :  { %6242 = vmatprep.subr.bf16.mxu0 %v8682_v20 }
 0x437   :  { %6243 = vmatpush1.bf16.msra.mxu0 %v8680_v45 }
 0x438   :  { %6244 = vmatprep.subr.bf16.mxu0 %v8685_v47 }
 0x43b   :  { %6245 = vmatpush1.bf16.msra.mxu0 %v8683_v23 }
 0x43c   :  { %6246 = vmatprep.subr.bf16.mxu0 %v8688_v48 }
 0x43f   :  { %6247 = vmatpush1.bf16.msra.mxu0 %v8686_v49 }
 0x440   :  { %6248 = vmatprep.subr.bf16.mxu0 %v8691_v51 }
 0x443   :  { %6249 = vmatpush1.bf16.msra.mxu0 %v8689_v53 }
 0x444   :  { %6250 = vmatprep.subr.bf16.mxu0 %v8694_v25 }
 0x447   :  { %6251 = vmatpush1.bf16.msra.mxu0 %v8692_v54 }
 0x448   :  { %6252 = vmatprep.subr.bf16.mxu0 %v8697_v58 }
 0x44b   :  { %6253 = vmatpush1.bf16.msra.mxu0 %v8695_v59 }
 0x44c   :  { %6254 = vmatprep.subr.bf16.mxu0 %v8700_v60 }
 0x44f   :  { %6255 = vmatpush1.bf16.msra.mxu0 %v8698_v8 }
 0x450   :  { %6256 = vmatprep.subr.bf16.mxu0 %v8703_v62 }
 0x453   :  { %6257 = vmatpush1.bf16.msra.mxu0 %v8701_v63 }
 0x454   :  { %6258 = vmatprep.subr.bf16.mxu0 %v8706_v32 }
 0x457   :  { %6259 = vmatpush1.bf16.msra.mxu0 %v8704_v0 }
 0x458   :  { %6260 = vmatprep.subr.bf16.mxu0 %v8709_v2 }
 0x45b   :  { %6261 = vmatpush1.bf16.msra.mxu0 %v8707_v3 }
 0x493   :  { %v5770_v34 = vpop.f32.mrb[4].mxu1 }
 0x494   :  { %v7356_v14 = vadd.f32 %v5770_v34, %v944_v12  ;;  %v5772_v15 = vpop.f32.mrb[5].mxu1 }
 0x495   :  { %v7357_v17 = vadd.f32 %v5772_v15, %v948_v13  ;;  %v5774_v18 = vpop.f32.mrb[6].mxu1 }
 0x496   :  { %vm5779_vm2 = vcmp.gt.f32.partialorder %v7356_v14, 0.0  ;;  %v5783_v50 = vmul.f32 0.2, %v7356_v14  ;;  %v5775_v19 = vpop.f32.mrb[7].mxu1 }
 0x497   :  { %vm5780_vm3 = vcmp.gt.f32.partialorder %v7357_v17, 0.0  ;;  %v5784_v21 = vmul.f32 0.2, %v7357_v17 }
 0x498   :  { %v5787_v22 = vsel %vm5779_vm2, %v7356_v14, %v5783_v50 }
 0x499   :  { %v5788_v24 = vsel %vm5780_vm3, %v7357_v17, %v5784_v21  ;;  %v5791_v27 = vpack.c.bf16 %v5787_v22, %v5787_v22 }
 0x49a   :  { %v5792_v26 = vpack.c.bf16 %v5788_v24, %v5788_v24 }
 0x49c   :  { %6262 = vmatprep.mubr.bf16.mxu0 %v5792_v26 }
 0x49d   :  { %6263 = vmatmul.mubr.bf16.vlgmr.msra.gmra.mrb[4].mxu0 %v5791_v27 }
 0x570   :  { %v6264_v33 = vpop.f32.mrb[4].mxu0 }
 0x571   :  { %v7358_v1 = vadd.f32 %v6264_v33, %v5862_v56  ;;  %v6266_v35 = vpop.f32.mrb[5].mxu0 }
 0x572   :  { %v7359_v52 = vadd.f32 %v6266_v35, %v5866_v31  ;;  %v6268_v37 = vpop.f32.mrb[6].mxu0 }
 0x573   :  { %vm6271_vm4 = vcmp.gt.f32.partialorder %v7358_v1, 0.0  ;;  %v6273_v11 = vmul.f32 0.2, %v7358_v1  ;;  %v6269_v38 = vpop.f32.mrb[7].mxu0 }
 0x574   :  { %vm6272_vm5 = vcmp.gt.f32.partialorder %v7359_v52, 0.0  ;;  %v6274_v39 = vmul.f32 0.2, %v7359_v52 }
 0x575   :  { %v6275_v40 = vsel %vm6271_vm4, %v7358_v1, %v6273_v11 }
 0x576   :  { %v6276_v41 = vsel %vm6272_vm5, %v7359_v52, %v6274_v39  ;;  %v6277_v10 = vpack.c.bf16 %v6275_v40, %v6275_v40 }
 0x577   :  { %v6278_v36 = vpack.c.bf16 %v6276_v41, %v6276_v41 }
 0x579   :  { %6446 = vmatprep.mubr.bf16.mxu1 %v6278_v36 }
 0x57a   :  { %6447 = vmatmul.mubr.bf16.vlgmr.msra.gmra.mrb[8].mxu1 %v6277_v10 }
 0x64d   :  { %v7346_v6 = vpop.f32.mrb[8].mxu1 }
 0x64e   :  { %v7347_v5 = vpop.f32.mrb[9].mxu1 }
 0x64f   :  { %v7348_v42 = vadd.f32 %v7347_v5, %v7346_v6  ;;  %v7349_v46 = vpop.f32.mrb[10].mxu1 }
 0x650   :  { %v7350_v16 = vpop.f32.mrb[11].mxu1 }
 0x651   :  { %v6449_v30 = vadd.f32 %v7348_v42, %v7312_v57 }
 0x653   :  { %v7329_v43 = vmul.f32 -1.442695, %v6449_v30 }
 0x655   :  { %8726 = vpow2.f32 %v7329_v43 }
 0x65f   :  { %v8727_v20 = vpop.eup %8726 }
 0x660   :  { %v6457_v44 = vadd.f32 1.0, %v8727_v20 }
 0x662   :  { %8728 = vrcp.f32 %v6457_v44 }
 0x66c   :  { %v8729_v45 = vpop.eup %8728 }
 0x66d   :  { %v6460_v47 = vpack.c.bf16 %v8729_v45, %v8729_v45 }
 0x66f   :  { %6461 = vst [vmem:[#allocation14] sm:$0xf] %v6460_v47 }
 0x670   :  { %8895 = shalt.err (!%p8892_p4)
}
 0x671   :  { %s8896_s15 = scalar_lea.hbm %s9195_s7, 64 }
 0x672   :  { %p8897_p5 = scmp.ne.s32.totalorder %s9195_s7, %s8896_s15  ;;  %p8900_p6 = scmp.lt.u32.totalorder %s8896_s15, %s9195_s7 }
 0x674   :  { %p8902_p7 = pnand %p8900_p6, %p8897_p5 }
 0x676   :  { %8905 = shalt.err (!%p8902_p7)
}
 0x677   :  { %6471 = dma.vmem_to_hbm [thread:$0]  %s6469_s13, 64, %s9195_s7, [#allocation4]  }
 0x678   :  { %8914 = dma.done.wait [#allocation4], 64  }
 0x679   :  { %8915 = vsyncadd [#allocation4], 4294967232 }
 0x67a   :  { %6475 = vsyncpa [#allocation3], 1 }
 0x67b   :  { %6476 = vsyncpa [#allocation6], 1 }
 0x67c   :  { %6477 = vsyncpa [#allocation9], 1 }
 0x67d   :  { %6478 = vsyncpa [#allocation12], 1 }
 0x67e   :  { %6479 = vsyncpa [#allocation4], 1 }

// kernel: tpu_custom_call.1
= control target key start
LH: loop header
LB: loop body
LE: loop exit
PB: predicated region body
PF: predicated region fallthrough
CT: control target
= control target key end

     0   :  { %12 = vsyncpa [#allocation3], 0  ;;  %s9188_s0 = inlined_call_operand.hbm [shape: f32[8,3072], index: 0, kind: input, shape index: {}]   ;;  %s9189_s1 = inlined_call_operand.hbm [shape: bf16[3072,512], index: 1, kind: input, shape index: {}]   ;;  %s9190_s2 = inlined_call_operand.hbm [shape: f32[1,512], index: 2, kind: input, shape index: {}]   ;;  %s9191_s3 = inlined_call_operand.hbm [shape: bf16[512,256], index: 3, kind: input, shape index: {}]   ;;  %s9192_s4 = inlined_call_operand.hbm [shape: f32[1,256], index: 4, kind: input, shape index: {}]   ;;  %s9193_s5 = inlined_call_operand.hbm [shape: bf16[256,128], index: 5, kind: input, shape index: {}]   ;;  %s9194_s6 = inlined_call_operand.hbm [shape: f32[1,128], index: 6, kind: input, shape index: {}]   ;;  %s9195_s7 = inlined_call_operand.hbm [shape: bf16[8,128], index: 7, kind: output, shape index: {}]  }
   0x1   :  { %13 = vsyncpa [#allocation6], 0 }
   0x2   :  { %14 = vsyncpa [#allocation9], 0 }
   0x3   :  { %15 = vsyncpa [#allocation12], 0 }
   0x4   :  { %16 = vsyncpa [#allocation4], 0  ;;  %s8916_s24 = smov [#allocation5]   ;;  %s8730_s28 = scalar_lea.hbm %s9189_s1, 98304 }
   0x5   :  { %s32_s25 = sshll.u32 %s8916_s24, 4  ;;  %p8731_p0 = scmp.ne.s32.totalorder %s9189_s1, %s8730_s28  ;;  %s33_s25 = int_to_ptr.vmem [resolvable:$true] %s32_s25 }
   0x6   :  { %p8734_p1 = scmp.lt.u32.totalorder %s8730_s28, %s9189_s1 }
   0x8   :  { %p8736_p2 = pnand %p8734_p1, %p8731_p0 }
   0xa   :  { %8739 = shalt.err (!%p8736_p2)
}
   0xb   :  { %s8740_s10 = scalar_lea.vmem %s33_s25, 98304  ;;  %p8745_p4 = scmp.lt.s32.totalorder %s33_s25, %s33_s25 }
   0xc   :  { %p8741_p3 = scmp.ne.s32.totalorder %s33_s25, %s8740_s10  ;;  %p8746_p5 = scmp.lt.s32.totalorder %s8740_s10, %s8740_s10 }
   0xe   :  { %p8747_p6 = por %p8746_p5, %p8745_p4 }
  0x10   :  { %p8748_p7 = pnand %p8747_p6, %p8741_p3 }
  0x12   :  { %8751 = shalt.err (!%p8748_p7)
}
  0x13   :  { %s8917_s11 = smov 256   ;;  %s8918_s12 = smov 16  }
  0x14   :  { %38 = dma.hbm_to_vmem [thread:$0]  %s9189_s1, 98304, %s33_s25, [#allocation6], %s8917_s11, %s8917_s11, %s8918_s12  }
  0x15   :  { %s8919_s15 = smov [#allocation8]   ;;  %s8752_s19 = scalar_lea.hbm %s9191_s3, 8192 }
  0x16   :  { %s54_s16 = sshll.u32 %s8919_s15, 4  ;;  %p8753_p8 = scmp.ne.s32.totalorder %s9191_s3, %s8752_s19  ;;  %s55_s16 = int_to_ptr.vmem [resolvable:$true] %s54_s16 }
  0x17   :  { %p8756_p9 = scmp.lt.u32.totalorder %s8752_s19, %s9191_s3 }
  0x19   :  { %p8758_p10 = pnand %p8756_p9, %p8753_p8 }
  0x1b   :  { %8761 = shalt.err (!%p8758_p10)
}
  0x1c   :  { %s8762_s24 = scalar_lea.vmem %s55_s16, 8192  ;;  %p8767_p12 = scmp.lt.s32.totalorder %s55_s16, %s55_s16 }
  0x1d   :  { %p8763_p11 = scmp.ne.s32.totalorder %s55_s16, %s8762_s24  ;;  %p8768_p13 = scmp.lt.s32.totalorder %s8762_s24, %s8762_s24 }
  0x1f   :  { %p8769_p0 = por %p8768_p13, %p8767_p12 }
  0x21   :  { %p8770_p1 = pnand %p8769_p0, %p8763_p11 }
  0x23   :  { %8773 = shalt.err (!%p8770_p1)
}
  0x24   :  { %s8920_s1 = smov 128   ;;  %s8921_s25 = smov 8  }
  0x25   :  { %60 = dma.hbm_to_vmem [thread:$0]  %s9191_s3, 8192, %s55_s16, [#allocation9], %s8920_s1, %s8920_s1, %s8921_s25  }
  0x26   :  { %s8922_s28 = smov [#allocation11]   ;;  %s8774_s9 = scalar_lea.hbm %s9193_s5, 2048 }
  0x27   :  { %s76_s29 = sshll.u32 %s8922_s28, 4  ;;  %p8775_p2 = scmp.ne.s32.totalorder %s9193_s5, %s8774_s9  ;;  %s77_s29 = int_to_ptr.vmem [resolvable:$true] %s76_s29 }
  0x28   :  { %p8778_p3 = scmp.lt.u32.totalorder %s8774_s9, %s9193_s5 }
  0x2a   :  { %p8780_p4 = pnand %p8778_p3, %p8775_p2 }
  0x2c   :  { %8783 = shalt.err (!%p8780_p4)
}
  0x2d   :  { %s8784_s14 = scalar_lea.vmem %s77_s29, 2048  ;;  %p8789_p6 = scmp.lt.s32.totalorder %s77_s29, %s77_s29 }
  0x2e   :  { %p8785_p5 = scmp.ne.s32.totalorder %s77_s29, %s8784_s14  ;;  %p8790_p7 = scmp.lt.s32.totalorder %s8784_s14, %s8784_s14 }
  0x30   :  { %p8791_p8 = por %p8790_p7, %p8789_p6 }
  0x32   :  { %p8792_p9 = pnand %p8791_p8, %p8785_p5 }
  0x34   :  { %8795 = shalt.err (!%p8792_p9)
}
  0x35   :  { %s8923_s3 = smov 64   ;;  %s8924_s15 = smov 4  }
  0x36   :  { %82 = dma.hbm_to_vmem [thread:$0]  %s9193_s5, 2048, %s77_s29, [#allocation12], %s8923_s3, %s8923_s3, %s8924_s15  }
  0x37   :  { %s8925_s18 = smov [#allocation2]   ;;  %s8926_s20 = smov [#allocation7]  }
  0x38   :  { %s23_s19 = sshll.u32 %s8925_s18, 4  ;;  %s45_s21 = sshll.u32 %s8926_s20, 4  ;;  %s24_s19 = int_to_ptr.vmem [resolvable:$true] %s23_s19  ;;  %s46_s21 = int_to_ptr.vmem [resolvable:$true] %s45_s21 }
  0x39   :  { %s8796_s24 = scalar_lea.hbm %s9188_s0, 3072 }
  0x3a   :  { %p8797_p10 = scmp.ne.s32.totalorder %s9188_s0, %s8796_s24  ;;  %p8800_p11 = scmp.lt.u32.totalorder %s8796_s24, %s9188_s0 }
  0x3c   :  { %p8802_p12 = pnand %p8800_p11, %p8797_p10 }
  0x3e   :  { %8805 = shalt.err (!%p8802_p12)
}
  0x3f   :  { %s8806_s5 = scalar_lea.vmem %s24_s19, 3072  ;;  %p8811_p0 = scmp.lt.s32.totalorder %s24_s19, %s24_s19 }
  0x40   :  { %p8807_p13 = scmp.ne.s32.totalorder %s24_s19, %s8806_s5  ;;  %p8812_p1 = scmp.lt.s32.totalorder %s8806_s5, %s8806_s5 }
  0x42   :  { %p8813_p2 = por %p8812_p1, %p8811_p0 }
  0x44   :  { %p8814_p3 = pnand %p8813_p2, %p8807_p13 }
  0x46   :  { %8817 = shalt.err (!%p8814_p3)
}
  0x47   :  { %26 = dma.hbm_to_vmem [thread:$0]  %s9188_s0, 3072, %s24_s19, [#allocation3]  }
  0x48   :  { %s8818_s9 = scalar_lea.hbm %s9190_s2, 64 }
  0x49   :  { %p8819_p4 = scmp.ne.s32.totalorder %s9190_s2, %s8818_s9  ;;  %p8822_p5 = scmp.lt.u32.totalorder %s8818_s9, %s9190_s2 }
  0x4b   :  { %p8824_p6 = pnand %p8822_p5, %p8819_p4 }
  0x4d   :  { %8827 = shalt.err (!%p8824_p6)
}
  0x4e   :  { %s8828_s14 = scalar_lea.vmem %s46_s21, 64  ;;  %p8833_p8 = scmp.lt.s32.totalorder %s46_s21, %s46_s21 }
  0x4f   :  { %p8829_p7 = scmp.ne.s32.totalorder %s46_s21, %s8828_s14  ;;  %p8834_p9 = scmp.lt.s32.totalorder %s8828_s14, %s8828_s14 }
  0x51   :  { %p8835_p10 = por %p8834_p9, %p8833_p8 }
  0x53   :  { %p8836_p11 = pnand %p8835_p10, %p8829_p7 }
  0x55   :  { %8839 = shalt.err (!%p8836_p11)
}
  0x56   :  { %48 = dma.hbm_to_vmem [thread:$0]  %s9190_s2, 64, %s46_s21, [#allocation6]  }
  0x57   :  { %s8927_s15 = smov [#allocation10]   ;;  %s8928_s17 = smov [#allocation13]  }
  0x58   :  { %s67_s16 = sshll.u32 %s8927_s15, 4  ;;  %s89_s18 = sshll.u32 %s8928_s17, 4  ;;  %s68_s16 = int_to_ptr.vmem [resolvable:$true] %s67_s16  ;;  %s90_s18 = int_to_ptr.vmem [resolvable:$true] %s89_s18 }
  0x59   :  { %s8840_s22 = scalar_lea.hbm %s9192_s4, 32 }
  0x5a   :  { %p8841_p12 = scmp.ne.s32.totalorder %s9192_s4, %s8840_s22  ;;  %p8844_p13 = scmp.lt.u32.totalorder %s8840_s22, %s9192_s4 }
  0x5c   :  { %p8846_p0 = pnand %p8844_p13, %p8841_p12 }
  0x5e   :  { %8849 = shalt.err (!%p8846_p0)
}
  0x5f   :  { %s8850_s2 = scalar_lea.vmem %s68_s16, 32  ;;  %p8855_p2 = scmp.lt.s32.totalorder %s68_s16, %s68_s16 }
  0x60   :  { %p8851_p1 = scmp.ne.s32.totalorder %s68_s16, %s8850_s2  ;;  %p8856_p3 = scmp.lt.s32.totalorder %s8850_s2, %s8850_s2 }
  0x62   :  { %p8857_p4 = por %p8856_p3, %p8855_p2 }
  0x64   :  { %p8858_p5 = pnand %p8857_p4, %p8851_p1 }
  0x66   :  { %8861 = shalt.err (!%p8858_p5)
}
  0x67   :  { %70 = dma.hbm_to_vmem [thread:$0]  %s9192_s4, 32, %s68_s16, [#allocation9]  }
  0x68   :  { %s8862_s28 = scalar_lea.hbm %s9194_s6, 16 }
  0x69   :  { %p8863_p6 = scmp.ne.s32.totalorder %s9194_s6, %s8862_s28  ;;  %p8866_p7 = scmp.lt.u32.totalorder %s8862_s28, %s9194_s6 }
  0x6b   :  { %p8868_p8 = pnand %p8866_p7, %p8863_p6 }
  0x6d   :  { %8871 = shalt.err (!%p8868_p8)
}
  0x6e   :  { %s8872_s10 = scalar_lea.vmem %s90_s18, 16  ;;  %s8876_s11 = scalar_lea.vmem %s90_s18, 32 }
  0x6f   :  { %p8873_p9 = scmp.ne.s32.totalorder %s90_s18, %s8872_s10  ;;  %p8877_p10 = scmp.lt.s32.totalorder %s90_s18, %s90_s18 }
  0x70   :  { %p8878_p11 = scmp.lt.s32.totalorder %s8876_s11, %s8872_s10 }
  0x72   :  { %p8879_p12 = por %p8878_p11, %p8877_p10 }
  0x74   :  { %p8880_p13 = pnand %p8879_p12, %p8873_p9 }
  0x76   :  { %8883 = shalt.err (!%p8880_p13)
}
  0x77   :  { %92 = dma.hbm_to_vmem [thread:$0]  %s9194_s6, 16, %s90_s18, [#allocation12]  }
  0x78   :  { %8906 = dma.done.wait [#allocation3], 3072  }
  0x79   :  { %8907 = vsyncadd [#allocation3], 4294964224 }
  0x7a   :  { %8908 = dma.done.wait [#allocation6], 98368  }
  0x7b   :  { %8909 = vsyncadd [#allocation6], 4294868928 }
  0x7c   :  { %8910 = dma.done.wait [#allocation9], 8224  }
  0x7d   :  { %8911 = vsyncadd [#allocation9], 4294959072 }
  0x7e   :  { %8912 = dma.done.wait [#allocation12], 2064  }
  0x7f   :  { %8913 = vsyncadd [#allocation12], 4294965232  ;;  %v7462_v0 = vld [vmem:[#allocation5 + $0x4] ss:$16 sps:$4 sm:$0xff]   ;;  %v7466_v2 = vld [vmem:[#allocation5] ss:$16 sps:$4 sm:$0xff]  }
  0x80   :  { %v7464_v1 = vld [vmem:[#allocation5 + $0x204] ss:$16 sps:$4 sm:$0xff]   ;;  %4793 = vmatprep.subr.bf16.mxu1 %v7462_v0  ;;  %v7467_v3 = vld [vmem:[#allocation5 + $0x200] ss:$16 sps:$4 sm:$0xff]   ;;  %v116_v46 = vld [vmem:[#allocation2 + $0x8] sm:$0xff]  ;;  %s8929_s6 = smov [#allocation14]  }
  0x81   :  { %4834 = vmatprep.subr.bf16.mxu0 %v7464_v1  ;;  %v7468_v4 = vld [vmem:[#allocation5 + $0x24] ss:$16 sps:$4 sm:$0xff]   ;;  %4794 = vmatpush1.bf16.msra.mxu1 %v7466_v2  ;;  %v7472_v6 = vld [vmem:[#allocation5 + $0x20] ss:$16 sps:$4 sm:$0xff]   ;;  %v9054_v48 = vpack.c.bf16 %v116_v46, %v116_v46  ;;  %v118_v49 = vld [vmem:[#allocation2 + $0x18] sm:$0xff]  ;;  %s6468_s13 = sshll.u32 %s8929_s6, 4  ;;  %s6469_s13 = int_to_ptr.vmem [resolvable:$true] %s6468_s13 }
  0x82   :  { %4835 = vmatpush1.bf16.msra.mxu0 %v7467_v3  ;;  %v7470_v5 = vld [vmem:[#allocation5 + $0x224] ss:$16 sps:$4 sm:$0xff]   ;;  %4795 = vmatprep.subr.bf16.mxu1 %v7468_v4  ;;  %v7473_v7 = vld [vmem:[#allocation5 + $0x220] ss:$16 sps:$4 sm:$0xff]   ;;  %v9056_v52 = vpack.c.bf16 %v118_v49, %v118_v49  ;;  %v7615_v49 = vld [vmem:[#allocation5 + $0x128] ss:$16 sps:$4 sm:$0xff]   ;;  %p8889_p1 = scmp.lt.s32.totalorder %s6469_s13, %s6469_s13 }
  0x83   :  { %4836 = vmatprep.subr.bf16.mxu0 %v7470_v5  ;;  %v7474_v8 = vld [vmem:[#allocation5 + $0x44] ss:$16 sps:$4 sm:$0xff]   ;;  %v7478_v10 = vld [vmem:[#allocation5 + $0x40] ss:$16 sps:$4 sm:$0xff]   ;;  %4825 = vmatprep.mubr.bf16.mxu1 %v9054_v48  ;;  %s8884_s14 = scalar_lea.vmem %s6469_s13, 64 }
  0x84   :  { %v7476_v9 = vld [vmem:[#allocation5 + $0x244] ss:$16 sps:$4 sm:$0xff]   ;;  %v7479_v11 = vld [vmem:[#allocation5 + $0x240] ss:$16 sps:$4 sm:$0xff]   ;;  %4866 = vmatprep.mubr.bf16.mxu0 %v9056_v52  ;;  %p8885_p0 = scmp.ne.s32.totalorder %s6469_s13, %s8884_s14  ;;  %p8890_p2 = scmp.lt.s32.totalorder %s8884_s14, %s8884_s14 }
  0x85   :  { %4796 = vmatpush1.bf16.msra.mxu1 %v7472_v6  ;;  %v7480_v12 = vld [vmem:[#allocation5 + $0x64] ss:$16 sps:$4 sm:$0xff]   ;;  %v7484_v14 = vld [vmem:[#allocation5 + $0x60] ss:$16 sps:$4 sm:$0xff]  }
  0x86   :  { %4837 = vmatpush1.bf16.msra.mxu0 %v7473_v7  ;;  %4797 = vmatprep.subr.bf16.mxu1 %v7474_v8  ;;  %v7482_v13 = vld [vmem:[#allocation5 + $0x264] ss:$16 sps:$4 sm:$0xff]   ;;  %v7485_v15 = vld [vmem:[#allocation5 + $0x260] ss:$16 sps:$4 sm:$0xff]   ;;  %v7563_v7 = vld [vmem:[#allocation5 + $0xc] ss:$16 sps:$4 sm:$0xff]   ;;  %p8891_p3 = por %p8890_p2, %p8889_p1 }
  0x87   :  { %4838 = vmatprep.subr.bf16.mxu0 %v7476_v9  ;;  %v7486_v16 = vld [vmem:[#allocation5 + $0x84] ss:$16 sps:$4 sm:$0xff]   ;;  %v7490_v18 = vld [vmem:[#allocation5 + $0x80] ss:$16 sps:$4 sm:$0xff]  }
  0x88   :  { %v7488_v17 = vld [vmem:[#allocation5 + $0x284] ss:$16 sps:$4 sm:$0xff]   ;;  %v7491_v19 = vld [vmem:[#allocation5 + $0x280] ss:$16 sps:$4 sm:$0xff]   ;;  %p8892_p4 = pnand %p8891_p3, %p8885_p0 }
  0x89   :  { %4798 = vmatpush1.bf16.msra.mxu1 %v7478_v10  ;;  %v7492_v20 = vld [vmem:[#allocation5 + $0xa4] ss:$16 sps:$4 sm:$0xff]   ;;  %v7496_v22 = vld [vmem:[#allocation5 + $0xa0] ss:$16 sps:$4 sm:$0xff]   ;;  %v7561_v10 = vld [vmem:[#allocation5 + $0x8] ss:$16 sps:$4 sm:$0xff]  }
  0x8a   :  { %4839 = vmatpush1.bf16.msra.mxu0 %v7479_v11  ;;  %4799 = vmatprep.subr.bf16.mxu1 %v7480_v12  ;;  %v7494_v21 = vld [vmem:[#allocation5 + $0x2a4] ss:$16 sps:$4 sm:$0xff]   ;;  %v7497_v23 = vld [vmem:[#allocation5 + $0x2a0] ss:$16 sps:$4 sm:$0xff]  }
  0x8b   :  { %4840 = vmatprep.subr.bf16.mxu0 %v7482_v13  ;;  %v7498_v24 = vld [vmem:[#allocation5 + $0xc4] ss:$16 sps:$4 sm:$0xff]   ;;  %v7502_v26 = vld [vmem:[#allocation5 + $0xc0] ss:$16 sps:$4 sm:$0xff]   ;;  %v7569_v13 = vld [vmem:[#allocation5 + $0x2c] ss:$16 sps:$4 sm:$0xff]  }
  0x8c   :  { %v7500_v25 = vld [vmem:[#allocation5 + $0x2c4] ss:$16 sps:$4 sm:$0xff]   ;;  %v7503_v27 = vld [vmem:[#allocation5 + $0x2c0] ss:$16 sps:$4 sm:$0xff]  }
  0x8d   :  { %4800 = vmatpush1.bf16.msra.mxu1 %v7484_v14  ;;  %v7504_v28 = vld [vmem:[#allocation5 + $0xe4] ss:$16 sps:$4 sm:$0xff]   ;;  %v7508_v30 = vld [vmem:[#allocation5 + $0xe0] ss:$16 sps:$4 sm:$0xff]  }
  0x8e   :  { %4841 = vmatpush1.bf16.msra.mxu0 %v7485_v15  ;;  %4801 = vmatprep.subr.bf16.mxu1 %v7486_v16  ;;  %v7506_v29 = vld [vmem:[#allocation5 + $0x2e4] ss:$16 sps:$4 sm:$0xff]   ;;  %v7509_v31 = vld [vmem:[#allocation5 + $0x2e0] ss:$16 sps:$4 sm:$0xff]   ;;  %v7567_v15 = vld [vmem:[#allocation5 + $0x28] ss:$16 sps:$4 sm:$0xff]  }
  0x8f   :  { %4842 = vmatprep.subr.bf16.mxu0 %v7488_v17  ;;  %v7510_v32 = vld [vmem:[#allocation5 + $0x104] ss:$16 sps:$4 sm:$0xff]   ;;  %v7514_v34 = vld [vmem:[#allocation5 + $0x100] ss:$16 sps:$4 sm:$0xff]   ;;  %v7575_v17 = vld [vmem:[#allocation5 + $0x4c] ss:$16 sps:$4 sm:$0xff]  }
  0x90   :  { %v7512_v33 = vld [vmem:[#allocation5 + $0x304] ss:$16 sps:$4 sm:$0xff]   ;;  %v7515_v35 = vld [vmem:[#allocation5 + $0x300] ss:$16 sps:$4 sm:$0xff]  }
  0x91   :  { %4802 = vmatpush1.bf16.msra.mxu1 %v7490_v18  ;;  %v7516_v36 = vld [vmem:[#allocation5 + $0x124] ss:$16 sps:$4 sm:$0xff]   ;;  %v7520_v38 = vld [vmem:[#allocation5 + $0x120] ss:$16 sps:$4 sm:$0xff]  }
  0x92   :  { %4843 = vmatpush1.bf16.msra.mxu0 %v7491_v19  ;;  %4803 = vmatprep.subr.bf16.mxu1 %v7492_v20  ;;  %v7518_v37 = vld [vmem:[#allocation5 + $0x324] ss:$16 sps:$4 sm:$0xff]   ;;  %v7521_v39 = vld [vmem:[#allocation5 + $0x320] ss:$16 sps:$4 sm:$0xff]   ;;  %v7573_v19 = vld [vmem:[#allocation5 + $0x48] ss:$16 sps:$4 sm:$0xff]  }
  0x93   :  { %4844 = vmatprep.subr.bf16.mxu0 %v7494_v21  ;;  %v7522_v40 = vld [vmem:[#allocation5 + $0x144] ss:$16 sps:$4 sm:$0xff]   ;;  %v7526_v42 = vld [vmem:[#allocation5 + $0x140] ss:$16 sps:$4 sm:$0xff]   ;;  %v7581_v21 = vld [vmem:[#allocation5 + $0x6c] ss:$16 sps:$4 sm:$0xff]  }
  0x94   :  { %v7524_v41 = vld [vmem:[#allocation5 + $0x344] ss:$16 sps:$4 sm:$0xff]   ;;  %v7527_v43 = vld [vmem:[#allocation5 + $0x340] ss:$16 sps:$4 sm:$0xff]  }
  0x95   :  { %4804 = vmatpush1.bf16.msra.mxu1 %v7496_v22  ;;  %v7528_v44 = vld [vmem:[#allocation5 + $0x164] ss:$16 sps:$4 sm:$0xff]   ;;  %v7532_v47 = vld [vmem:[#allocation5 + $0x160] ss:$16 sps:$4 sm:$0xff]  }
  0x96   :  { %4845 = vmatpush1.bf16.msra.mxu0 %v7497_v23  ;;  %4805 = vmatprep.subr.bf16.mxu1 %v7498_v24  ;;  %v7530_v45 = vld [vmem:[#allocation5 + $0x364] ss:$16 sps:$4 sm:$0xff]   ;;  %v7533_v50 = vld [vmem:[#allocation5 + $0x360] ss:$16 sps:$4 sm:$0xff]   ;;  %v7579_v23 = vld [vmem:[#allocation5 + $0x68] ss:$16 sps:$4 sm:$0xff]  }
  0x97   :  { %4846 = vmatprep.subr.bf16.mxu0 %v7500_v25  ;;  %v7534_v51 = vld [vmem:[#allocation5 + $0x184] ss:$16 sps:$4 sm:$0xff]   ;;  %v7538_v54 = vld [vmem:[#allocation5 + $0x180] ss:$16 sps:$4 sm:$0xff]   ;;  %v7587_v25 = vld [vmem:[#allocation5 + $0x8c] ss:$16 sps:$4 sm:$0xff]  }
  0x98   :  { %v7536_v53 = vld [vmem:[#allocation5 + $0x384] ss:$16 sps:$4 sm:$0xff]   ;;  %v7539_v55 = vld [vmem:[#allocation5 + $0x380] ss:$16 sps:$4 sm:$0xff]  }
  0x99   :  { %4806 = vmatpush1.bf16.msra.mxu1 %v7502_v26  ;;  %v7540_v56 = vld [vmem:[#allocation5 + $0x1a4] ss:$16 sps:$4 sm:$0xff]   ;;  %v7544_v58 = vld [vmem:[#allocation5 + $0x1a0] ss:$16 sps:$4 sm:$0xff]  }
  0x9a   :  { %4847 = vmatpush1.bf16.msra.mxu0 %v7503_v27  ;;  %4807 = vmatprep.subr.bf16.mxu1 %v7504_v28  ;;  %v7542_v57 = vld [vmem:[#allocation5 + $0x3a4] ss:$16 sps:$4 sm:$0xff]   ;;  %v7545_v59 = vld [vmem:[#allocation5 + $0x3a0] ss:$16 sps:$4 sm:$0xff]   ;;  %v7585_v27 = vld [vmem:[#allocation5 + $0x88] ss:$16 sps:$4 sm:$0xff]  }
  0x9b   :  { %4848 = vmatprep.subr.bf16.mxu0 %v7506_v29  ;;  %v7546_v60 = vld [vmem:[#allocation5 + $0x1c4] ss:$16 sps:$4 sm:$0xff]   ;;  %v7550_v62 = vld [vmem:[#allocation5 + $0x1c0] ss:$16 sps:$4 sm:$0xff]   ;;  %v7593_v29 = vld [vmem:[#allocation5 + $0xac] ss:$16 sps:$4 sm:$0xff]  }
  0x9c   :  { %v7548_v61 = vld [vmem:[#allocation5 + $0x3c4] ss:$16 sps:$4 sm:$0xff]   ;;  %v7551_v63 = vld [vmem:[#allocation5 + $0x3c0] ss:$16 sps:$4 sm:$0xff]  }
  0x9d   :  { %4808 = vmatpush1.bf16.msra.mxu1 %v7508_v30  ;;  %v7552_v0 = vld [vmem:[#allocation5 + $0x1e4] ss:$16 sps:$4 sm:$0xff]   ;;  %v7556_v2 = vld [vmem:[#allocation5 + $0x1e0] ss:$16 sps:$4 sm:$0xff]  }
  0x9e   :  { %4849 = vmatpush1.bf16.msra.mxu0 %v7509_v31  ;;  %4809 = vmatprep.subr.bf16.mxu1 %v7510_v32  ;;  %v7554_v1 = vld [vmem:[#allocation5 + $0x3e4] ss:$16 sps:$4 sm:$0xff]   ;;  %v7557_v3 = vld [vmem:[#allocation5 + $0x3e0] ss:$16 sps:$4 sm:$0xff]   ;;  %v7591_v31 = vld [vmem:[#allocation5 + $0xa8] ss:$16 sps:$4 sm:$0xff]  }
  0x9f   :  { %4850 = vmatprep.subr.bf16.mxu0 %v7512_v33  ;;  %v115_v4 = vld [vmem:[#allocation2] sm:$0xff]  ;;  %v117_v6 = vld [vmem:[#allocation2 + $0x10] sm:$0xff]  ;;  %v7599_v33 = vld [vmem:[#allocation5 + $0xcc] ss:$16 sps:$4 sm:$0xff]  }
  0xa0   :  { %v7560_v5 = vld [vmem:[#allocation5 + $0x404] ss:$16 sps:$4 sm:$0xff]   ;;  %v9060_v8 = vpack.c.bf16 %v115_v4, %v115_v4  ;;  %v7558_v9 = vld [vmem:[#allocation5 + $0x400] ss:$16 sps:$4 sm:$0xff]   ;;  %v9062_v11 = vpack.c.bf16 %v117_v6, %v117_v6  ;;  %v7647_v4 = vld [vmem:[#allocation5 + $0x1cc] ss:$16 sps:$4 sm:$0xff]  }
  0xa1   :  { %4810 = vmatpush1.bf16.msra.mxu1 %v7514_v34  ;;  %v7566_v12 = vld [vmem:[#allocation5 + $0x424] ss:$16 sps:$4 sm:$0xff]   ;;  %v7564_v14 = vld [vmem:[#allocation5 + $0x420] ss:$16 sps:$4 sm:$0xff]   ;;  %v120_v34 = vld [vmem:[#allocation2 + $0x28] sm:$0xff] }
  0xa2   :  { %4851 = vmatpush1.bf16.msra.mxu0 %v7515_v35  ;;  %4811 = vmatprep.subr.bf16.mxu1 %v7516_v36  ;;  %v7572_v16 = vld [vmem:[#allocation5 + $0x444] ss:$16 sps:$4 sm:$0xff]   ;;  %v7570_v18 = vld [vmem:[#allocation5 + $0x440] ss:$16 sps:$4 sm:$0xff]   ;;  %v9067_v36 = vpack.c.bf16 %v120_v34, %v120_v34  ;;  %v7645_v6 = vld [vmem:[#allocation5 + $0x1c8] ss:$16 sps:$4 sm:$0xff]  }
  0xa3   :  { %4852 = vmatprep.subr.bf16.mxu0 %v7518_v37  ;;  %v7578_v20 = vld [vmem:[#allocation5 + $0x464] ss:$16 sps:$4 sm:$0xff]   ;;  %v7576_v22 = vld [vmem:[#allocation5 + $0x460] ss:$16 sps:$4 sm:$0xff]   ;;  %v7597_v37 = vld [vmem:[#allocation5 + $0xc8] ss:$16 sps:$4 sm:$0xff]  }
  0xa4   :  { %v7584_v24 = vld [vmem:[#allocation5 + $0x484] ss:$16 sps:$4 sm:$0xff]   ;;  %v7582_v26 = vld [vmem:[#allocation5 + $0x480] ss:$16 sps:$4 sm:$0xff]  }
  0xa5   :  { %4812 = vmatpush1.bf16.msra.mxu1 %v7520_v38  ;;  %v7590_v28 = vld [vmem:[#allocation5 + $0x4a4] ss:$16 sps:$4 sm:$0xff]   ;;  %v7588_v30 = vld [vmem:[#allocation5 + $0x4a0] ss:$16 sps:$4 sm:$0xff]  }
  0xa6   :  { %4853 = vmatpush1.bf16.msra.mxu0 %v7521_v39  ;;  %4813 = vmatprep.subr.bf16.mxu1 %v7522_v40  ;;  %v7596_v32 = vld [vmem:[#allocation5 + $0x4c4] ss:$16 sps:$4 sm:$0xff]   ;;  %v7594_v35 = vld [vmem:[#allocation5 + $0x4c0] ss:$16 sps:$4 sm:$0xff]   ;;  %v7605_v39 = vld [vmem:[#allocation5 + $0xec] ss:$16 sps:$4 sm:$0xff]  }
  0xa7   :  { %4854 = vmatprep.subr.bf16.mxu0 %v7524_v41  ;;  %v7602_v38 = vld [vmem:[#allocation5 + $0x4e4] ss:$16 sps:$4 sm:$0xff]   ;;  %v7600_v40 = vld [vmem:[#allocation5 + $0x4e0] ss:$16 sps:$4 sm:$0xff]   ;;  %v7603_v41 = vld [vmem:[#allocation5 + $0xe8] ss:$16 sps:$4 sm:$0xff]  }
  0xa8   :  { %v7614_v46 = vld [vmem:[#allocation5 + $0x524] ss:$16 sps:$4 sm:$0xff]   ;;  %v7678_v34 = vld [vmem:[#allocation5 + $0x680] ss:$16 sps:$4 sm:$0xff]  }
  0xa9   :  { %4814 = vmatpush1.bf16.msra.mxu1 %v7526_v42  ;;  %v7608_v42 = vld [vmem:[#allocation5 + $0x504] ss:$16 sps:$4 sm:$0xff]  }
  0xaa   :  { %4855 = vmatpush1.bf16.msra.mxu0 %v7527_v43  ;;  %4815 = vmatprep.subr.bf16.mxu1 %v7528_v44  ;;  %v7611_v43 = vld [vmem:[#allocation5 + $0x10c] ss:$16 sps:$4 sm:$0xff]   ;;  %v7606_v44 = vld [vmem:[#allocation5 + $0x500] ss:$16 sps:$4 sm:$0xff]  }
  0xab   :  { %4856 = vmatprep.subr.bf16.mxu0 %v7530_v45  ;;  %v7609_v45 = vld [vmem:[#allocation5 + $0x108] ss:$16 sps:$4 sm:$0xff]  }
  0xad   :  { %4816 = vmatpush1.bf16.msra.mxu1 %v7532_v47  ;;  %v7617_v47 = vld [vmem:[#allocation5 + $0x12c] ss:$16 sps:$4 sm:$0xff]  }
  0xae   :  { %4857 = vmatpush1.bf16.msra.mxu0 %v7533_v50  ;;  %4817 = vmatprep.subr.bf16.mxu1 %v7534_v51  ;;  %v7620_v50 = vld [vmem:[#allocation5 + $0x544] ss:$16 sps:$4 sm:$0xff]   ;;  %v7623_v51 = vld [vmem:[#allocation5 + $0x14c] ss:$16 sps:$4 sm:$0xff]  }
  0xaf   :  { %4858 = vmatprep.subr.bf16.mxu0 %v7536_v53  ;;  %v7618_v53 = vld [vmem:[#allocation5 + $0x540] ss:$16 sps:$4 sm:$0xff]  }
  0xb1   :  { %4818 = vmatpush1.bf16.msra.mxu1 %v7538_v54  ;;  %v7621_v54 = vld [vmem:[#allocation5 + $0x148] ss:$16 sps:$4 sm:$0xff]  }
  0xb2   :  { %4859 = vmatpush1.bf16.msra.mxu0 %v7539_v55  ;;  %4819 = vmatprep.subr.bf16.mxu1 %v7540_v56  ;;  %v7626_v55 = vld [vmem:[#allocation5 + $0x564] ss:$16 sps:$4 sm:$0xff]   ;;  %v7629_v56 = vld [vmem:[#allocation5 + $0x16c] ss:$16 sps:$4 sm:$0xff]  }
  0xb3   :  { %4860 = vmatprep.subr.bf16.mxu0 %v7542_v57  ;;  %v7624_v57 = vld [vmem:[#allocation5 + $0x560] ss:$16 sps:$4 sm:$0xff]  }
  0xb5   :  { %4820 = vmatpush1.bf16.msra.mxu1 %v7544_v58  ;;  %v7627_v58 = vld [vmem:[#allocation5 + $0x168] ss:$16 sps:$4 sm:$0xff]  }
  0xb6   :  { %4861 = vmatpush1.bf16.msra.mxu0 %v7545_v59  ;;  %4821 = vmatprep.subr.bf16.mxu1 %v7546_v60  ;;  %v7632_v59 = vld [vmem:[#allocation5 + $0x584] ss:$16 sps:$4 sm:$0xff]   ;;  %v7635_v60 = vld [vmem:[#allocation5 + $0x18c] ss:$16 sps:$4 sm:$0xff]  }
  0xb7   :  { %4862 = vmatprep.subr.bf16.mxu0 %v7548_v61  ;;  %v7630_v61 = vld [vmem:[#allocation5 + $0x580] ss:$16 sps:$4 sm:$0xff]  }
  0xb9   :  { %4822 = vmatpush1.bf16.msra.mxu1 %v7550_v62  ;;  %v7633_v62 = vld [vmem:[#allocation5 + $0x188] ss:$16 sps:$4 sm:$0xff]  }
  0xba   :  { %4863 = vmatpush1.bf16.msra.mxu0 %v7551_v63  ;;  %4823 = vmatprep.subr.bf16.mxu1 %v7552_v0  ;;  %v7638_v63 = vld [vmem:[#allocation5 + $0x5a4] ss:$16 sps:$4 sm:$0xff]   ;;  %v7641_v0 = vld [vmem:[#allocation5 + $0x1ac] ss:$16 sps:$4 sm:$0xff]  }
  0xbb   :  { %4864 = vmatprep.subr.bf16.mxu0 %v7554_v1  ;;  %v7636_v1 = vld [vmem:[#allocation5 + $0x5a0] ss:$16 sps:$4 sm:$0xff]  }
  0xbd   :  { %4824 = vmatpush1.bf16.msra.mxu1 %v7556_v2  ;;  %v7639_v2 = vld [vmem:[#allocation5 + $0x1a8] ss:$16 sps:$4 sm:$0xff]  }
  0xbe   :  { %4865 = vmatpush1.bf16.msra.mxu0 %v7557_v3  ;;  %5285 = vmatprep.subr.bf16.mxu1 %v7563_v7  ;;  %v7644_v3 = vld [vmem:[#allocation5 + $0x5c4] ss:$16 sps:$4 sm:$0xff]  }
  0xbf   :  { %4875 = vmatprep.subr.bf16.mxu0 %v7560_v5  ;;  %v7642_v5 = vld [vmem:[#allocation5 + $0x5c0] ss:$16 sps:$4 sm:$0xff]   ;;  %v7650_v7 = vld [vmem:[#allocation5 + $0x5e4] ss:$16 sps:$4 sm:$0xff]  }
  0xc0   :  { %4826 = vmatmul.mubr.bf16.vlgmr.msra.gmra.mrb[0].mxu1 %v9060_v8 }
  0xc1   :  { %4867 = vmatmul.mubr.bf16.vlgmr.msra.gmra.mrb[0].mxu0 %v9062_v11  ;;  %5286 = vmatpush1.bf16.msra.mxu1 %v7561_v10  ;;  %v7648_v10 = vld [vmem:[#allocation5 + $0x5e0] ss:$16 sps:$4 sm:$0xff]  }
  0xc2   :  { %4876 = vmatpush1.bf16.msra.mxu0 %v7558_v9  ;;  %5287 = vmatprep.subr.bf16.mxu1 %v7569_v13  ;;  %v7653_v9 = vld [vmem:[#allocation5 + $0x1ec] ss:$16 sps:$4 sm:$0xff]   ;;  %v119_v13 = vld [vmem:[#allocation2 + $0x20] sm:$0xff] }
  0xc3   :  { %4877 = vmatprep.subr.bf16.mxu0 %v7566_v12  ;;  %5317 = vmatprep.mubr.bf16.mxu1 %v9054_v48  ;;  %v7612_v48 = vld [vmem:[#allocation5 + $0x520] ss:$16 sps:$4 sm:$0xff]   ;;  %v7651_v12 = vld [vmem:[#allocation5 + $0x1e8] ss:$16 sps:$4 sm:$0xff]  }
  0xc4   :  { %4907 = vmatprep.mubr.bf16.mxu0 %v9067_v36 }
  0xc5   :  { %5288 = vmatpush1.bf16.msra.mxu1 %v7567_v15  ;;  %v7659_v15 = vld [vmem:[#allocation5 + $0x20c] ss:$16 sps:$4 sm:$0xff]  }
  0xc6   :  { %4878 = vmatpush1.bf16.msra.mxu0 %v7564_v14  ;;  %5289 = vmatprep.subr.bf16.mxu1 %v7575_v17  ;;  %v7656_v14 = vld [vmem:[#allocation5 + $0x604] ss:$16 sps:$4 sm:$0xff]   ;;  %v7654_v17 = vld [vmem:[#allocation5 + $0x600] ss:$16 sps:$4 sm:$0xff]  }
  0xc7   :  { %4879 = vmatprep.subr.bf16.mxu0 %v7572_v16  ;;  %v9070_v16 = vpack.c.bf16 %v119_v13, %v119_v13  ;;  %v7738_v13 = vld [vmem:[#allocation5 + $0x7c0] ss:$16 sps:$4 sm:$0xff]  }
  0xc9   :  { %5290 = vmatpush1.bf16.msra.mxu1 %v7573_v19  ;;  %v7662_v19 = vld [vmem:[#allocation5 + $0x624] ss:$16 sps:$4 sm:$0xff]  }
  0xca   :  { %4880 = vmatpush1.bf16.msra.mxu0 %v7570_v18  ;;  %5291 = vmatprep.subr.bf16.mxu1 %v7581_v21  ;;  %v7657_v18 = vld [vmem:[#allocation5 + $0x208] ss:$16 sps:$4 sm:$0xff]  }
  0xcb   :  { %4881 = vmatprep.subr.bf16.mxu0 %v7578_v20  ;;  %v7665_v20 = vld [vmem:[#allocation5 + $0x22c] ss:$16 sps:$4 sm:$0xff]  }
  0xcc   :  { %v122_v21 = vld [vmem:[#allocation2 + $0x38] sm:$0xff] }
  0xcd   :  { %5292 = vmatpush1.bf16.msra.mxu1 %v7579_v23  ;;  %v9074_v23 = vpack.c.bf16 %v122_v21, %v122_v21  ;;  %v121_v21 = vld [vmem:[#allocation2 + $0x30] sm:$0xff] }
  0xce   :  { %4882 = vmatpush1.bf16.msra.mxu0 %v7576_v22  ;;  %5293 = vmatprep.subr.bf16.mxu1 %v7587_v25  ;;  %v7660_v22 = vld [vmem:[#allocation5 + $0x620] ss:$16 sps:$4 sm:$0xff]   ;;  %v7668_v25 = vld [vmem:[#allocation5 + $0x644] ss:$16 sps:$4 sm:$0xff]  }
  0xcf   :  { %4883 = vmatprep.subr.bf16.mxu0 %v7584_v24  ;;  %v7663_v24 = vld [vmem:[#allocation5 + $0x228] ss:$16 sps:$4 sm:$0xff]  }
  0xd1   :  { %5294 = vmatpush1.bf16.msra.mxu1 %v7585_v27  ;;  %v7666_v27 = vld [vmem:[#allocation5 + $0x640] ss:$16 sps:$4 sm:$0xff]  }
  0xd2   :  { %4884 = vmatpush1.bf16.msra.mxu0 %v7582_v26  ;;  %5295 = vmatprep.subr.bf16.mxu1 %v7593_v29  ;;  %v7671_v26 = vld [vmem:[#allocation5 + $0x24c] ss:$16 sps:$4 sm:$0xff]   ;;  %v7674_v29 = vld [vmem:[#allocation5 + $0x664] ss:$16 sps:$4 sm:$0xff]  }
  0xd3   :  { %4885 = vmatprep.subr.bf16.mxu0 %v7590_v28  ;;  %v7669_v28 = vld [vmem:[#allocation5 + $0x248] ss:$16 sps:$4 sm:$0xff]  }
  0xd5   :  { %5296 = vmatpush1.bf16.msra.mxu1 %v7591_v31  ;;  %v7675_v31 = vld [vmem:[#allocation5 + $0x268] ss:$16 sps:$4 sm:$0xff]  }
  0xd6   :  { %4886 = vmatpush1.bf16.msra.mxu0 %v7588_v30  ;;  %5297 = vmatprep.subr.bf16.mxu1 %v7599_v33  ;;  %v7672_v30 = vld [vmem:[#allocation5 + $0x660] ss:$16 sps:$4 sm:$0xff]   ;;  %v7683_v33 = vld [vmem:[#allocation5 + $0x28c] ss:$16 sps:$4 sm:$0xff]  }
  0xd7   :  { %4887 = vmatprep.subr.bf16.mxu0 %v7596_v32  ;;  %v7680_v32 = vld [vmem:[#allocation5 + $0x684] ss:$16 sps:$4 sm:$0xff]  }
  0xd9   :  { %5298 = vmatpush1.bf16.msra.mxu1 %v7597_v37  ;;  %v7689_v37 = vld [vmem:[#allocation5 + $0x2ac] ss:$16 sps:$4 sm:$0xff]  }
  0xda   :  { %4888 = vmatpush1.bf16.msra.mxu0 %v7594_v35  ;;  %5299 = vmatprep.subr.bf16.mxu1 %v7605_v39  ;;  %v7681_v35 = vld [vmem:[#allocation5 + $0x288] ss:$16 sps:$4 sm:$0xff]  }
  0xdb   :  { %4889 = vmatprep.subr.bf16.mxu0 %v7602_v38  ;;  %v7684_v38 = vld [vmem:[#allocation5 + $0x6a0] ss:$16 sps:$4 sm:$0xff]   ;;  %v7687_v39 = vld [vmem:[#allocation5 + $0x2a8] ss:$16 sps:$4 sm:$0xff]  }
  0xdd   :  { %5300 = vmatpush1.bf16.msra.mxu1 %v7603_v41  ;;  %v7695_v41 = vld [vmem:[#allocation5 + $0x2cc] ss:$16 sps:$4 sm:$0xff]  }
  0xde   :  { %4890 = vmatpush1.bf16.msra.mxu0 %v7600_v40  ;;  %5301 = vmatprep.subr.bf16.mxu1 %v7611_v43  ;;  %v7692_v40 = vld [vmem:[#allocation5 + $0x6c4] ss:$16 sps:$4 sm:$0xff]   ;;  %v7693_v43 = vld [vmem:[#allocation5 + $0x2c8] ss:$16 sps:$4 sm:$0xff]  }
  0xdf   :  { %4891 = vmatprep.subr.bf16.mxu0 %v7608_v42  ;;  %v7690_v42 = vld [vmem:[#allocation5 + $0x6c0] ss:$16 sps:$4 sm:$0xff]  }
  0xe1   :  { %5302 = vmatpush1.bf16.msra.mxu1 %v7609_v45  ;;  %v7701_v45 = vld [vmem:[#allocation5 + $0x2ec] ss:$16 sps:$4 sm:$0xff]  }
  0xe2   :  { %4892 = vmatpush1.bf16.msra.mxu0 %v7606_v44  ;;  %5303 = vmatprep.subr.bf16.mxu1 %v7617_v47  ;;  %v7698_v44 = vld [vmem:[#allocation5 + $0x6e4] ss:$16 sps:$4 sm:$0xff]   ;;  %v7699_v47 = vld [vmem:[#allocation5 + $0x2e8] ss:$16 sps:$4 sm:$0xff]  }
  0xe3   :  { %4893 = vmatprep.subr.bf16.mxu0 %v7614_v46  ;;  %v7696_v46 = vld [vmem:[#allocation5 + $0x6e0] ss:$16 sps:$4 sm:$0xff]  }
  0xe5   :  { %5304 = vmatpush1.bf16.msra.mxu1 %v7615_v49  ;;  %v7707_v49 = vld [vmem:[#allocation5 + $0x30c] ss:$16 sps:$4 sm:$0xff]  }
  0xe6   :  { %4894 = vmatpush1.bf16.msra.mxu0 %v7612_v48  ;;  %5305 = vmatprep.subr.bf16.mxu1 %v7623_v51  ;;  %v7704_v48 = vld [vmem:[#allocation5 + $0x704] ss:$16 sps:$4 sm:$0xff]   ;;  %v7705_v51 = vld [vmem:[#allocation5 + $0x308] ss:$16 sps:$4 sm:$0xff]  }
  0xe7   :  { %4895 = vmatprep.subr.bf16.mxu0 %v7620_v50  ;;  %v7702_v50 = vld [vmem:[#allocation5 + $0x700] ss:$16 sps:$4 sm:$0xff]  }
  0xe9   :  { %5306 = vmatpush1.bf16.msra.mxu1 %v7621_v54  ;;  %v7713_v54 = vld [vmem:[#allocation5 + $0x32c] ss:$16 sps:$4 sm:$0xff]  }
  0xea   :  { %4896 = vmatpush1.bf16.msra.mxu0 %v7618_v53  ;;  %5307 = vmatprep.subr.bf16.mxu1 %v7629_v56  ;;  %v7710_v53 = vld [vmem:[#allocation5 + $0x724] ss:$16 sps:$4 sm:$0xff]   ;;  %v7711_v56 = vld [vmem:[#allocation5 + $0x328] ss:$16 sps:$4 sm:$0xff]  }
  0xeb   :  { %4897 = vmatprep.subr.bf16.mxu0 %v7626_v55  ;;  %v7708_v55 = vld [vmem:[#allocation5 + $0x720] ss:$16 sps:$4 sm:$0xff]  }
  0xed   :  { %5308 = vmatpush1.bf16.msra.mxu1 %v7627_v58  ;;  %v7719_v58 = vld [vmem:[#allocation5 + $0x34c] ss:$16 sps:$4 sm:$0xff]  }
  0xee   :  { %4898 = vmatpush1.bf16.msra.mxu0 %v7624_v57  ;;  %5309 = vmatprep.subr.bf16.mxu1 %v7635_v60  ;;  %v7716_v57 = vld [vmem:[#allocation5 + $0x744] ss:$16 sps:$4 sm:$0xff]   ;;  %v7717_v60 = vld [vmem:[#allocation5 + $0x348] ss:$16 sps:$4 sm:$0xff]  }
  0xef   :  { %4899 = vmatprep.subr.bf16.mxu0 %v7632_v59  ;;  %v7714_v59 = vld [vmem:[#allocation5 + $0x740] ss:$16 sps:$4 sm:$0xff]  }
  0xf1   :  { %5310 = vmatpush1.bf16.msra.mxu1 %v7633_v62  ;;  %v7725_v62 = vld [vmem:[#allocation5 + $0x36c] ss:$16 sps:$4 sm:$0xff]  }
  0xf2   :  { %4900 = vmatpush1.bf16.msra.mxu0 %v7630_v61  ;;  %5311 = vmatprep.subr.bf16.mxu1 %v7641_v0  ;;  %v7722_v61 = vld [vmem:[#allocation5 + $0x764] ss:$16 sps:$4 sm:$0xff]   ;;  %v7723_v0 = vld [vmem:[#allocation5 + $0x368] ss:$16 sps:$4 sm:$0xff]  }
  0xf3   :  { %4901 = vmatprep.subr.bf16.mxu0 %v7638_v63  ;;  %v7720_v63 = vld [vmem:[#allocation5 + $0x760] ss:$16 sps:$4 sm:$0xff]  }
  0xf5   :  { %5312 = vmatpush1.bf16.msra.mxu1 %v7639_v2  ;;  %v7731_v2 = vld [vmem:[#allocation5 + $0x38c] ss:$16 sps:$4 sm:$0xff]  }
  0xf6   :  { %4902 = vmatpush1.bf16.msra.mxu0 %v7636_v1  ;;  %5313 = vmatprep.subr.bf16.mxu1 %v7647_v4  ;;  %v7728_v1 = vld [vmem:[#allocation5 + $0x784] ss:$16 sps:$4 sm:$0xff]   ;;  %v7729_v4 = vld [vmem:[#allocation5 + $0x388] ss:$16 sps:$4 sm:$0xff]  }
  0xf7   :  { %4903 = vmatprep.subr.bf16.mxu0 %v7644_v3  ;;  %v7726_v3 = vld [vmem:[#allocation5 + $0x780] ss:$16 sps:$4 sm:$0xff]  }
  0xf9   :  { %5314 = vmatpush1.bf16.msra.mxu1 %v7645_v6  ;;  %v7737_v6 = vld [vmem:[#allocation5 + $0x3ac] ss:$16 sps:$4 sm:$0xff]  }
  0xfa   :  { %4904 = vmatpush1.bf16.msra.mxu0 %v7642_v5  ;;  %5315 = vmatprep.subr.bf16.mxu1 %v7653_v9  ;;  %v7734_v5 = vld [vmem:[#allocation5 + $0x7a4] ss:$16 sps:$4 sm:$0xff]   ;;  %v7735_v9 = vld [vmem:[#allocation5 + $0x3a8] ss:$16 sps:$4 sm:$0xff]  }
  0xfb   :  { %4905 = vmatprep.subr.bf16.mxu0 %v7650_v7  ;;  %v7732_v7 = vld [vmem:[#allocation5 + $0x7a0] ss:$16 sps:$4 sm:$0xff]  }
  0xfd   :  { %5316 = vmatpush1.bf16.msra.mxu1 %v7651_v12  ;;  %v7743_v12 = vld [vmem:[#allocation5 + $0x3cc] ss:$16 sps:$4 sm:$0xff]  }
  0xfe   :  { %4906 = vmatpush1.bf16.msra.mxu0 %v7648_v10  ;;  %5326 = vmatprep.subr.bf16.mxu1 %v7659_v15  ;;  %v7740_v10 = vld [vmem:[#allocation5 + $0x7c4] ss:$16 sps:$4 sm:$0xff]  }
  0xff   :  { %4916 = vmatprep.subr.bf16.mxu0 %v7656_v14  ;;  %v7741_v14 = vld [vmem:[#allocation5 + $0x3c8] ss:$16 sps:$4 sm:$0xff]   ;;  %v7746_v15 = vld [vmem:[#allocation5 + $0x7e4] ss:$16 sps:$4 sm:$0xff]  }
 0x100   :  { %5318 = vmatmul.mubr.bf16.vlgmr.msra.gmra.mrb[4].mxu1 %v9060_v8  ;;  %v7677_v8 = vld [vmem:[#allocation5 + $0x26c] ss:$16 sps:$4 sm:$0xff]  }
 0x101   :  { %4908 = vmatmul.mubr.bf16.vlgmr.msra.gmra.mrb[0].mxu0 %v9070_v16  ;;  %5327 = vmatpush1.bf16.msra.mxu1 %v7657_v18  ;;  %v7744_v18 = vld [vmem:[#allocation5 + $0x7e0] ss:$16 sps:$4 sm:$0xff]  }
 0x102   :  { %4917 = vmatpush1.bf16.msra.mxu0 %v7654_v17  ;;  %5328 = vmatprep.subr.bf16.mxu1 %v7665_v20  ;;  %v7749_v17 = vld [vmem:[#allocation5 + $0x3ec] ss:$16 sps:$4 sm:$0xff]   ;;  %v7752_v20 = vld [vmem:[#allocation5 + $0x804] ss:$16 sps:$4 sm:$0xff]  }
 0x103   :  { %4918 = vmatprep.subr.bf16.mxu0 %v7662_v19  ;;  %4948 = vmatprep.mubr.bf16.mxu0 %v9074_v23  ;;  %v7747_v19 = vld [vmem:[#allocation5 + $0x3e8] ss:$16 sps:$4 sm:$0xff]  }
 0x104   :  { %5358 = vmatprep.mubr.bf16.mxu1 %v9056_v52  ;;  %v7686_v52 = vld [vmem:[#allocation5 + $0x6a4] ss:$16 sps:$4 sm:$0xff]  }
 0x105   :  { %5329 = vmatpush1.bf16.msra.mxu1 %v7663_v24  ;;  %v7750_v24 = vld [vmem:[#allocation5 + $0x800] ss:$16 sps:$4 sm:$0xff]  }
 0x106   :  { %4919 = vmatpush1.bf16.msra.mxu0 %v7660_v22  ;;  %5330 = vmatprep.subr.bf16.mxu1 %v7671_v26  ;;  %v7755_v22 = vld [vmem:[#allocation5 + $0x40c] ss:$16 sps:$4 sm:$0xff]  }
 0x107   :  { %4920 = vmatprep.subr.bf16.mxu0 %v7668_v25  ;;  %v9078_v25 = vpack.c.bf16 %v121_v21, %v121_v21  ;;  %v124_v26 = vld [vmem:[#allocation2 + $0x48] sm:$0xff] }
 0x108   :  { %v7837_v21 = vld [vmem:[#allocation5 + $0x5c8] ss:$16 sps:$4 sm:$0xff]  }
 0x109   :  { %5331 = vmatpush1.bf16.msra.mxu1 %v7669_v28  ;;  %v7758_v28 = vld [vmem:[#allocation5 + $0x824] ss:$16 sps:$4 sm:$0xff]  }
 0x10a   :  { %4921 = vmatpush1.bf16.msra.mxu0 %v7666_v27  ;;  %5332 = vmatprep.subr.bf16.mxu1 %v7677_v8  ;;  %v7753_v27 = vld [vmem:[#allocation5 + $0x408] ss:$16 sps:$4 sm:$0xff]   ;;  %v9080_v8 = vpack.c.bf16 %v124_v26, %v124_v26  ;;  %v7840_v26 = vld [vmem:[#allocation5 + $0x9e0] ss:$16 sps:$4 sm:$0xff]  }
 0x10b   :  { %4922 = vmatprep.subr.bf16.mxu0 %v7674_v29  ;;  %v7761_v29 = vld [vmem:[#allocation5 + $0x42c] ss:$16 sps:$4 sm:$0xff]  }
 0x10d   :  { %5333 = vmatpush1.bf16.msra.mxu1 %v7675_v31  ;;  %v7759_v31 = vld [vmem:[#allocation5 + $0x428] ss:$16 sps:$4 sm:$0xff]  }
 0x10e   :  { %4923 = vmatpush1.bf16.msra.mxu0 %v7672_v30  ;;  %5334 = vmatprep.subr.bf16.mxu1 %v7683_v33  ;;  %v7756_v30 = vld [vmem:[#allocation5 + $0x820] ss:$16 sps:$4 sm:$0xff]   ;;  %v7767_v33 = vld [vmem:[#allocation5 + $0x44c] ss:$16 sps:$4 sm:$0xff]  }
 0x10f   :  { %4924 = vmatprep.subr.bf16.mxu0 %v7680_v32  ;;  %v7764_v32 = vld [vmem:[#allocation5 + $0x844] ss:$16 sps:$4 sm:$0xff]  }
 0x111   :  { %5335 = vmatpush1.bf16.msra.mxu1 %v7681_v35  ;;  %v7765_v35 = vld [vmem:[#allocation5 + $0x448] ss:$16 sps:$4 sm:$0xff]  }
 0x112   :  { %4925 = vmatpush1.bf16.msra.mxu0 %v7678_v34  ;;  %5336 = vmatprep.subr.bf16.mxu1 %v7689_v37  ;;  %v7762_v34 = vld [vmem:[#allocation5 + $0x840] ss:$16 sps:$4 sm:$0xff]  }
 0x113   :  { %4926 = vmatprep.subr.bf16.mxu0 %v7686_v52  ;;  %v7770_v52 = vld [vmem:[#allocation5 + $0x864] ss:$16 sps:$4 sm:$0xff]   ;;  %v7768_v37 = vld [vmem:[#allocation5 + $0x860] ss:$16 sps:$4 sm:$0xff]  }
 0x115   :  { %5337 = vmatpush1.bf16.msra.mxu1 %v7687_v39  ;;  %v7776_v39 = vld [vmem:[#allocation5 + $0x884] ss:$16 sps:$4 sm:$0xff]  }
 0x116   :  { %4927 = vmatpush1.bf16.msra.mxu0 %v7684_v38  ;;  %5338 = vmatprep.subr.bf16.mxu1 %v7695_v41  ;;  %v7771_v38 = vld [vmem:[#allocation5 + $0x468] ss:$16 sps:$4 sm:$0xff]   ;;  %v7774_v41 = vld [vmem:[#allocation5 + $0x880] ss:$16 sps:$4 sm:$0xff]  }
 0x117   :  { %4928 = vmatprep.subr.bf16.mxu0 %v7692_v40  ;;  %v7779_v40 = vld [vmem:[#allocation5 + $0x48c] ss:$16 sps:$4 sm:$0xff]  }
 0x119   :  { %5339 = vmatpush1.bf16.msra.mxu1 %v7693_v43  ;;  %v7785_v43 = vld [vmem:[#allocation5 + $0x4ac] ss:$16 sps:$4 sm:$0xff]  }
 0x11a   :  { %4929 = vmatpush1.bf16.msra.mxu0 %v7690_v42  ;;  %5340 = vmatprep.subr.bf16.mxu1 %v7701_v45  ;;  %v7782_v42 = vld [vmem:[#allocation5 + $0x8a4] ss:$16 sps:$4 sm:$0xff]   ;;  %v7783_v45 = vld [vmem:[#allocation5 + $0x4a8] ss:$16 sps:$4 sm:$0xff]  }
 0x11b   :  { %4930 = vmatprep.subr.bf16.mxu0 %v7698_v44  ;;  %v7780_v44 = vld [vmem:[#allocation5 + $0x8a0] ss:$16 sps:$4 sm:$0xff]  }
 0x11d   :  { %5341 = vmatpush1.bf16.msra.mxu1 %v7699_v47  ;;  %v7791_v47 = vld [vmem:[#allocation5 + $0x4cc] ss:$16 sps:$4 sm:$0xff]  }
 0x11e   :  { %4931 = vmatpush1.bf16.msra.mxu0 %v7696_v46  ;;  %5342 = vmatprep.subr.bf16.mxu1 %v7707_v49  ;;  %v7788_v46 = vld [vmem:[#allocation5 + $0x8c4] ss:$16 sps:$4 sm:$0xff]   ;;  %v7789_v49 = vld [vmem:[#allocation5 + $0x4c8] ss:$16 sps:$4 sm:$0xff]  }
 0x11f   :  { %4932 = vmatprep.subr.bf16.mxu0 %v7704_v48  ;;  %v7786_v48 = vld [vmem:[#allocation5 + $0x8c0] ss:$16 sps:$4 sm:$0xff]  }
 0x121   :  { %5343 = vmatpush1.bf16.msra.mxu1 %v7705_v51  ;;  %v7797_v51 = vld [vmem:[#allocation5 + $0x4ec] ss:$16 sps:$4 sm:$0xff]  }
 0x122   :  { %4933 = vmatpush1.bf16.msra.mxu0 %v7702_v50  ;;  %5344 = vmatprep.subr.bf16.mxu1 %v7713_v54  ;;  %v7794_v50 = vld [vmem:[#allocation5 + $0x8e4] ss:$16 sps:$4 sm:$0xff]   ;;  %v7795_v54 = vld [vmem:[#allocation5 + $0x4e8] ss:$16 sps:$4 sm:$0xff]  }
 0x123   :  { %4934 = vmatprep.subr.bf16.mxu0 %v7710_v53  ;;  %v7792_v53 = vld [vmem:[#allocation5 + $0x8e0] ss:$16 sps:$4 sm:$0xff]  }
 0x125   :  { %5345 = vmatpush1.bf16.msra.mxu1 %v7711_v56  ;;  %v7803_v56 = vld [vmem:[#allocation5 + $0x50c] ss:$16 sps:$4 sm:$0xff]  }
 0x126   :  { %4935 = vmatpush1.bf16.msra.mxu0 %v7708_v55  ;;  %5346 = vmatprep.subr.bf16.mxu1 %v7719_v58  ;;  %v7800_v55 = vld [vmem:[#allocation5 + $0x904] ss:$16 sps:$4 sm:$0xff]   ;;  %v7801_v58 = vld [vmem:[#allocation5 + $0x508] ss:$16 sps:$4 sm:$0xff]  }
 0x127   :  { %4936 = vmatprep.subr.bf16.mxu0 %v7716_v57  ;;  %v7798_v57 = vld [vmem:[#allocation5 + $0x900] ss:$16 sps:$4 sm:$0xff]  }
 0x129   :  { %5347 = vmatpush1.bf16.msra.mxu1 %v7717_v60  ;;  %v7809_v60 = vld [vmem:[#allocation5 + $0x52c] ss:$16 sps:$4 sm:$0xff]  }
 0x12a   :  { %4937 = vmatpush1.bf16.msra.mxu0 %v7714_v59  ;;  %5348 = vmatprep.subr.bf16.mxu1 %v7725_v62  ;;  %v7806_v59 = vld [vmem:[#allocation5 + $0x924] ss:$16 sps:$4 sm:$0xff]   ;;  %v7807_v62 = vld [vmem:[#allocation5 + $0x528] ss:$16 sps:$4 sm:$0xff]  }
 0x12b   :  { %4938 = vmatprep.subr.bf16.mxu0 %v7722_v61  ;;  %v7804_v61 = vld [vmem:[#allocation5 + $0x920] ss:$16 sps:$4 sm:$0xff]  }
 0x12d   :  { %5349 = vmatpush1.bf16.msra.mxu1 %v7723_v0  ;;  %v7815_v0 = vld [vmem:[#allocation5 + $0x54c] ss:$16 sps:$4 sm:$0xff]  }
 0x12e   :  { %4939 = vmatpush1.bf16.msra.mxu0 %v7720_v63  ;;  %5350 = vmatprep.subr.bf16.mxu1 %v7731_v2  ;;  %v7812_v63 = vld [vmem:[#allocation5 + $0x944] ss:$16 sps:$4 sm:$0xff]   ;;  %v7813_v2 = vld [vmem:[#allocation5 + $0x548] ss:$16 sps:$4 sm:$0xff]  }
 0x12f   :  { %4940 = vmatprep.subr.bf16.mxu0 %v7728_v1  ;;  %v7810_v1 = vld [vmem:[#allocation5 + $0x940] ss:$16 sps:$4 sm:$0xff]  }
 0x131   :  { %5351 = vmatpush1.bf16.msra.mxu1 %v7729_v4  ;;  %v7821_v4 = vld [vmem:[#allocation5 + $0x56c] ss:$16 sps:$4 sm:$0xff]  }
 0x132   :  { %4941 = vmatpush1.bf16.msra.mxu0 %v7726_v3  ;;  %5352 = vmatprep.subr.bf16.mxu1 %v7737_v6  ;;  %v7818_v3 = vld [vmem:[#allocation5 + $0x964] ss:$16 sps:$4 sm:$0xff]   ;;  %v7819_v6 = vld [vmem:[#allocation5 + $0x568] ss:$16 sps:$4 sm:$0xff]  }
 0x133   :  { %4942 = vmatprep.subr.bf16.mxu0 %v7734_v5  ;;  %v7816_v5 = vld [vmem:[#allocation5 + $0x960] ss:$16 sps:$4 sm:$0xff]  }
 0x135   :  { %5353 = vmatpush1.bf16.msra.mxu1 %v7735_v9  ;;  %v7827_v9 = vld [vmem:[#allocation5 + $0x58c] ss:$16 sps:$4 sm:$0xff]  }
 0x136   :  { %4943 = vmatpush1.bf16.msra.mxu0 %v7732_v7  ;;  %5354 = vmatprep.subr.bf16.mxu1 %v7743_v12  ;;  %v7824_v7 = vld [vmem:[#allocation5 + $0x984] ss:$16 sps:$4 sm:$0xff]   ;;  %v7825_v12 = vld [vmem:[#allocation5 + $0x588] ss:$16 sps:$4 sm:$0xff]  }
 0x137   :  { %4944 = vmatprep.subr.bf16.mxu0 %v7740_v10  ;;  %v7822_v10 = vld [vmem:[#allocation5 + $0x980] ss:$16 sps:$4 sm:$0xff]  }
 0x139   :  { %5355 = vmatpush1.bf16.msra.mxu1 %v7741_v14  ;;  %v7833_v14 = vld [vmem:[#allocation5 + $0x5ac] ss:$16 sps:$4 sm:$0xff]  }
 0x13a   :  { %4945 = vmatpush1.bf16.msra.mxu0 %v7738_v13  ;;  %5356 = vmatprep.subr.bf16.mxu1 %v7749_v17  ;;  %v7830_v13 = vld [vmem:[#allocation5 + $0x9a4] ss:$16 sps:$4 sm:$0xff]   ;;  %v7831_v17 = vld [vmem:[#allocation5 + $0x5a8] ss:$16 sps:$4 sm:$0xff]  }
 0x13b   :  { %4946 = vmatprep.subr.bf16.mxu0 %v7746_v15  ;;  %v7828_v15 = vld [vmem:[#allocation5 + $0x9a0] ss:$16 sps:$4 sm:$0xff]  }
 0x13d   :  { %5357 = vmatpush1.bf16.msra.mxu1 %v7747_v19  ;;  %v7839_v19 = vld [vmem:[#allocation5 + $0x5cc] ss:$16 sps:$4 sm:$0xff]  }
 0x13e   :  { %4947 = vmatpush1.bf16.msra.mxu0 %v7744_v18  ;;  %5367 = vmatprep.subr.bf16.mxu1 %v7755_v22  ;;  %v7836_v18 = vld [vmem:[#allocation5 + $0x9c4] ss:$16 sps:$4 sm:$0xff]  }
 0x13f   :  { %4957 = vmatprep.subr.bf16.mxu0 %v7752_v20  ;;  %v7834_v20 = vld [vmem:[#allocation5 + $0x9c0] ss:$16 sps:$4 sm:$0xff]   ;;  %v7842_v22 = vld [vmem:[#allocation5 + $0x9e4] ss:$16 sps:$4 sm:$0xff]  }
 0x140   :  { %5359 = vmatmul.mubr.bf16.vlgmr.msra.gmra.mrb[4].mxu1 %v9062_v11  ;;  %v7773_v11 = vld [vmem:[#allocation5 + $0x46c] ss:$16 sps:$4 sm:$0xff]  }
 0x141   :  { %4949 = vmatmul.mubr.bf16.vlgmr.msra.gmra.mrb[0].mxu0 %v9078_v25  ;;  %5368 = vmatpush1.bf16.msra.mxu1 %v7753_v27  ;;  %v7843_v27 = vld [vmem:[#allocation5 + $0x5e8] ss:$16 sps:$4 sm:$0xff]  }
 0x142   :  { %4958 = vmatpush1.bf16.msra.mxu0 %v7750_v24  ;;  %5369 = vmatprep.subr.bf16.mxu1 %v7761_v29  ;;  %v7845_v24 = vld [vmem:[#allocation5 + $0x5ec] ss:$16 sps:$4 sm:$0xff]   ;;  %v7848_v29 = vld [vmem:[#allocation5 + $0xa04] ss:$16 sps:$4 sm:$0xff]  }
 0x143   :  { %4959 = vmatprep.subr.bf16.mxu0 %v7758_v28  ;;  %4989 = vmatprep.mubr.bf16.mxu0 %v9080_v8  ;;  %v123_v28 = vld [vmem:[#allocation2 + $0x40] sm:$0xff] }
 0x144   :  { %5399 = vmatprep.mubr.bf16.mxu1 %v9067_v36  ;;  %v7777_v36 = vld [vmem:[#allocation5 + $0x488] ss:$16 sps:$4 sm:$0xff]  }
 0x145   :  { %5370 = vmatpush1.bf16.msra.mxu1 %v7759_v31  ;;  %v7846_v31 = vld [vmem:[#allocation5 + $0xa00] ss:$16 sps:$4 sm:$0xff]  }
 0x146   :  { %4960 = vmatpush1.bf16.msra.mxu0 %v7756_v30  ;;  %5371 = vmatprep.subr.bf16.mxu1 %v7767_v33  ;;  %v7851_v30 = vld [vmem:[#allocation5 + $0x60c] ss:$16 sps:$4 sm:$0xff]  }
 0x147   :  { %4961 = vmatprep.subr.bf16.mxu0 %v7764_v32  ;;  %v9086_v32 = vpack.c.bf16 %v123_v28, %v123_v28  ;;  %v126_v33 = vld [vmem:[#allocation2 + $0x58] sm:$0xff]  ;;  %v7924_v28 = vld [vmem:[#allocation5 + $0xba0] ss:$16 sps:$4 sm:$0xff]  }
 0x149   :  { %5372 = vmatpush1.bf16.msra.mxu1 %v7765_v35  ;;  %v7854_v35 = vld [vmem:[#allocation5 + $0xa24] ss:$16 sps:$4 sm:$0xff]  }
 0x14a   :  { %4962 = vmatpush1.bf16.msra.mxu0 %v7762_v34  ;;  %5373 = vmatprep.subr.bf16.mxu1 %v7773_v11  ;;  %v7849_v34 = vld [vmem:[#allocation5 + $0x608] ss:$16 sps:$4 sm:$0xff]   ;;  %v9088_v11 = vpack.c.bf16 %v126_v33, %v126_v33  ;;  %v7930_v33 = vld [vmem:[#allocation5 + $0xbc0] ss:$16 sps:$4 sm:$0xff]  }
 0x14b   :  { %4963 = vmatprep.subr.bf16.mxu0 %v7770_v52  ;;  %v7857_v52 = vld [vmem:[#allocation5 + $0x62c] ss:$16 sps:$4 sm:$0xff]  }
 0x14d   :  { %5374 = vmatpush1.bf16.msra.mxu1 %v7771_v38  ;;  %v7855_v38 = vld [vmem:[#allocation5 + $0x628] ss:$16 sps:$4 sm:$0xff]  }
 0x14e   :  { %4964 = vmatpush1.bf16.msra.mxu0 %v7768_v37  ;;  %5375 = vmatprep.subr.bf16.mxu1 %v7779_v40  ;;  %v7852_v37 = vld [vmem:[#allocation5 + $0xa20] ss:$16 sps:$4 sm:$0xff]   ;;  %v7863_v40 = vld [vmem:[#allocation5 + $0x64c] ss:$16 sps:$4 sm:$0xff]  }
 0x14f   :  { %4965 = vmatprep.subr.bf16.mxu0 %v7776_v39  ;;  %v7860_v39 = vld [vmem:[#allocation5 + $0xa44] ss:$16 sps:$4 sm:$0xff]  }
 0x151   :  { %5376 = vmatpush1.bf16.msra.mxu1 %v7777_v36  ;;  %v7861_v36 = vld [vmem:[#allocation5 + $0x648] ss:$16 sps:$4 sm:$0xff]  }
 0x152   :  { %4966 = vmatpush1.bf16.msra.mxu0 %v7774_v41  ;;  %5377 = vmatprep.subr.bf16.mxu1 %v7785_v43  ;;  %v7858_v41 = vld [vmem:[#allocation5 + $0xa40] ss:$16 sps:$4 sm:$0xff]  }
 0x153   :  { %4967 = vmatprep.subr.bf16.mxu0 %v7782_v42  ;;  %v7866_v42 = vld [vmem:[#allocation5 + $0xa64] ss:$16 sps:$4 sm:$0xff]   ;;  %v7864_v43 = vld [vmem:[#allocation5 + $0xa60] ss:$16 sps:$4 sm:$0xff]  }
 0x155   :  { %5378 = vmatpush1.bf16.msra.mxu1 %v7783_v45  ;;  %v7872_v45 = vld [vmem:[#allocation5 + $0xa84] ss:$16 sps:$4 sm:$0xff]  }
 0x156   :  { %4968 = vmatpush1.bf16.msra.mxu0 %v7780_v44  ;;  %5379 = vmatprep.subr.bf16.mxu1 %v7791_v47  ;;  %v7867_v44 = vld [vmem:[#allocation5 + $0x668] ss:$16 sps:$4 sm:$0xff]   ;;  %v7870_v47 = vld [vmem:[#allocation5 + $0xa80] ss:$16 sps:$4 sm:$0xff]  }
 0x157   :  { %4969 = vmatprep.subr.bf16.mxu0 %v7788_v46  ;;  %v7875_v46 = vld [vmem:[#allocation5 + $0x68c] ss:$16 sps:$4 sm:$0xff]  }
 0x159   :  { %5380 = vmatpush1.bf16.msra.mxu1 %v7789_v49  ;;  %v7881_v49 = vld [vmem:[#allocation5 + $0x6ac] ss:$16 sps:$4 sm:$0xff]  }
 0x15a   :  { %4970 = vmatpush1.bf16.msra.mxu0 %v7786_v48  ;;  %5381 = vmatprep.subr.bf16.mxu1 %v7797_v51  ;;  %v7878_v48 = vld [vmem:[#allocation5 + $0xaa4] ss:$16 sps:$4 sm:$0xff]   ;;  %v7879_v51 = vld [vmem:[#allocation5 + $0x6a8] ss:$16 sps:$4 sm:$0xff]  }
 0x15b   :  { %4971 = vmatprep.subr.bf16.mxu0 %v7794_v50  ;;  %v7876_v50 = vld [vmem:[#allocation5 + $0xaa0] ss:$16 sps:$4 sm:$0xff]  }
 0x15d   :  { %5382 = vmatpush1.bf16.msra.mxu1 %v7795_v54  ;;  %v7887_v54 = vld [vmem:[#allocation5 + $0x6cc] ss:$16 sps:$4 sm:$0xff]  }
 0x15e   :  { %4972 = vmatpush1.bf16.msra.mxu0 %v7792_v53  ;;  %5383 = vmatprep.subr.bf16.mxu1 %v7803_v56  ;;  %v7884_v53 = vld [vmem:[#allocation5 + $0xac4] ss:$16 sps:$4 sm:$0xff]  }
 0x15f   :  { %4973 = vmatprep.subr.bf16.mxu0 %v7800_v55 }
 0x161   :  { %5384 = vmatpush1.bf16.msra.mxu1 %v7801_v58  ;;  %v7882_v58 = vld [vmem:[#allocation5 + $0xac0] ss:$16 sps:$4 sm:$0xff]  }
 0x162   :  { %4974 = vmatpush1.bf16.msra.mxu0 %v7798_v57  ;;  %5385 = vmatprep.subr.bf16.mxu1 %v7809_v60 }
 0x163   :  { %4975 = vmatprep.subr.bf16.mxu0 %v7806_v59  ;;  %v7885_v59 = vld [vmem:[#allocation5 + $0x6c8] ss:$16 sps:$4 sm:$0xff]  }
 0x165   :  { %5386 = vmatpush1.bf16.msra.mxu1 %v7807_v62  ;;  %v7893_v62 = vld [vmem:[#allocation5 + $0x6ec] ss:$16 sps:$4 sm:$0xff]  }
 0x166   :  { %4976 = vmatpush1.bf16.msra.mxu0 %v7804_v61  ;;  %5387 = vmatprep.subr.bf16.mxu1 %v7815_v0  ;;  %v7890_v61 = vld [vmem:[#allocation5 + $0xae4] ss:$16 sps:$4 sm:$0xff]   ;;  %v7891_v0 = vld [vmem:[#allocation5 + $0x6e8] ss:$16 sps:$4 sm:$0xff]  }
 0x167   :  { %4977 = vmatprep.subr.bf16.mxu0 %v7812_v63  ;;  %v7888_v63 = vld [vmem:[#allocation5 + $0xae0] ss:$16 sps:$4 sm:$0xff]  }
 0x169   :  { %5388 = vmatpush1.bf16.msra.mxu1 %v7813_v2  ;;  %v7899_v2 = vld [vmem:[#allocation5 + $0x70c] ss:$16 sps:$4 sm:$0xff]  }
 0x16a   :  { %4978 = vmatpush1.bf16.msra.mxu0 %v7810_v1  ;;  %5389 = vmatprep.subr.bf16.mxu1 %v7821_v4  ;;  %v7896_v1 = vld [vmem:[#allocation5 + $0xb04] ss:$16 sps:$4 sm:$0xff]   ;;  %v7897_v4 = vld [vmem:[#allocation5 + $0x708] ss:$16 sps:$4 sm:$0xff]  }
 0x16b   :  { %4979 = vmatprep.subr.bf16.mxu0 %v7818_v3  ;;  %v7894_v3 = vld [vmem:[#allocation5 + $0xb00] ss:$16 sps:$4 sm:$0xff]  }
 0x16d   :  { %5390 = vmatpush1.bf16.msra.mxu1 %v7819_v6  ;;  %v7905_v6 = vld [vmem:[#allocation5 + $0x72c] ss:$16 sps:$4 sm:$0xff]  }
 0x16e   :  { %4980 = vmatpush1.bf16.msra.mxu0 %v7816_v5  ;;  %5391 = vmatprep.subr.bf16.mxu1 %v7827_v9  ;;  %v7902_v5 = vld [vmem:[#allocation5 + $0xb24] ss:$16 sps:$4 sm:$0xff]   ;;  %v7903_v9 = vld [vmem:[#allocation5 + $0x728] ss:$16 sps:$4 sm:$0xff]  }
 0x16f   :  { %4981 = vmatprep.subr.bf16.mxu0 %v7824_v7  ;;  %v7900_v7 = vld [vmem:[#allocation5 + $0xb20] ss:$16 sps:$4 sm:$0xff]  }
 0x171   :  { %5392 = vmatpush1.bf16.msra.mxu1 %v7825_v12  ;;  %v7911_v12 = vld [vmem:[#allocation5 + $0x74c] ss:$16 sps:$4 sm:$0xff]  }
 0x172   :  { %4982 = vmatpush1.bf16.msra.mxu0 %v7822_v10  ;;  %5393 = vmatprep.subr.bf16.mxu1 %v7833_v14  ;;  %v7908_v10 = vld [vmem:[#allocation5 + $0xb44] ss:$16 sps:$4 sm:$0xff]   ;;  %v7909_v14 = vld [vmem:[#allocation5 + $0x748] ss:$16 sps:$4 sm:$0xff]  }
 0x173   :  { %4983 = vmatprep.subr.bf16.mxu0 %v7830_v13  ;;  %v7906_v13 = vld [vmem:[#allocation5 + $0xb40] ss:$16 sps:$4 sm:$0xff]  }
 0x175   :  { %5394 = vmatpush1.bf16.msra.mxu1 %v7831_v17  ;;  %v7917_v17 = vld [vmem:[#allocation5 + $0x76c] ss:$16 sps:$4 sm:$0xff]  }
 0x176   :  { %4984 = vmatpush1.bf16.msra.mxu0 %v7828_v15  ;;  %5395 = vmatprep.subr.bf16.mxu1 %v7839_v19  ;;  %v7914_v15 = vld [vmem:[#allocation5 + $0xb64] ss:$16 sps:$4 sm:$0xff]   ;;  %v7915_v19 = vld [vmem:[#allocation5 + $0x768] ss:$16 sps:$4 sm:$0xff]  }
 0x177   :  { %4985 = vmatprep.subr.bf16.mxu0 %v7836_v18  ;;  %v7912_v18 = vld [vmem:[#allocation5 + $0xb60] ss:$16 sps:$4 sm:$0xff]  }
 0x179   :  { %5396 = vmatpush1.bf16.msra.mxu1 %v7837_v21  ;;  %v7923_v21 = vld [vmem:[#allocation5 + $0x78c] ss:$16 sps:$4 sm:$0xff]  }
 0x17a   :  { %4986 = vmatpush1.bf16.msra.mxu0 %v7834_v20  ;;  %5397 = vmatprep.subr.bf16.mxu1 %v7845_v24  ;;  %v7920_v20 = vld [vmem:[#allocation5 + $0xb84] ss:$16 sps:$4 sm:$0xff]   ;;  %v7921_v24 = vld [vmem:[#allocation5 + $0x788] ss:$16 sps:$4 sm:$0xff]  }
 0x17b   :  { %4987 = vmatprep.subr.bf16.mxu0 %v7842_v22  ;;  %v7918_v22 = vld [vmem:[#allocation5 + $0xb80] ss:$16 sps:$4 sm:$0xff]  }
 0x17d   :  { %5398 = vmatpush1.bf16.msra.mxu1 %v7843_v27  ;;  %v7929_v27 = vld [vmem:[#allocation5 + $0x7ac] ss:$16 sps:$4 sm:$0xff]  }
 0x17e   :  { %4988 = vmatpush1.bf16.msra.mxu0 %v7840_v26  ;;  %5408 = vmatprep.subr.bf16.mxu1 %v7851_v30  ;;  %v7926_v26 = vld [vmem:[#allocation5 + $0xba4] ss:$16 sps:$4 sm:$0xff]  }
 0x17f   :  { %4998 = vmatprep.subr.bf16.mxu0 %v7848_v29  ;;  %v7927_v29 = vld [vmem:[#allocation5 + $0x7a8] ss:$16 sps:$4 sm:$0xff]   ;;  %v7932_v30 = vld [vmem:[#allocation5 + $0xbc4] ss:$16 sps:$4 sm:$0xff]  }
 0x180   :  { %5400 = vmatmul.mubr.bf16.vlgmr.msra.gmra.mrb[4].mxu1 %v9070_v16  ;;  %v7869_v16 = vld [vmem:[#allocation5 + $0x66c] ss:$16 sps:$4 sm:$0xff]  }
 0x181   :  { %4990 = vmatmul.mubr.bf16.vlgmr.msra.gmra.mrb[0].mxu0 %v9086_v32  ;;  %5409 = vmatpush1.bf16.msra.mxu1 %v7849_v34  ;;  %v7933_v34 = vld [vmem:[#allocation5 + $0x7c8] ss:$16 sps:$4 sm:$0xff]  }
 0x182   :  { %4999 = vmatpush1.bf16.msra.mxu0 %v7846_v31  ;;  %5410 = vmatprep.subr.bf16.mxu1 %v7857_v52  ;;  %v7935_v31 = vld [vmem:[#allocation5 + $0x7cc] ss:$16 sps:$4 sm:$0xff]  }
 0x183   :  { %5000 = vmatprep.subr.bf16.mxu0 %v7854_v35  ;;  %5030 = vmatprep.mubr.bf16.mxu0 %v9088_v11  ;;  %v7938_v35 = vld [vmem:[#allocation5 + $0xbe4] ss:$16 sps:$4 sm:$0xff]   ;;  %v7941_v52 = vld [vmem:[#allocation5 + $0x7ec] ss:$16 sps:$4 sm:$0xff]  }
 0x184   :  { %5440 = vmatprep.mubr.bf16.mxu1 %v9074_v23  ;;  %v7873_v23 = vld [vmem:[#allocation5 + $0x688] ss:$16 sps:$4 sm:$0xff]  }
 0x185   :  { %5411 = vmatpush1.bf16.msra.mxu1 %v7855_v38  ;;  %v7939_v38 = vld [vmem:[#allocation5 + $0x7e8] ss:$16 sps:$4 sm:$0xff]  }
 0x186   :  { %5001 = vmatpush1.bf16.msra.mxu0 %v7852_v37  ;;  %5412 = vmatprep.subr.bf16.mxu1 %v7863_v40  ;;  %v7936_v37 = vld [vmem:[#allocation5 + $0xbe0] ss:$16 sps:$4 sm:$0xff]  }
 0x187   :  { %5002 = vmatprep.subr.bf16.mxu0 %v7860_v39  ;;  %v7944_v39 = vld [vmem:[#allocation5 + $0xc04] ss:$16 sps:$4 sm:$0xff]  }
 0x188   :  { %v125_v40 = vld [vmem:[#allocation2 + $0x50] sm:$0xff] }
 0x189   :  { %5413 = vmatpush1.bf16.msra.mxu1 %v7861_v36  ;;  %v128_v36 = vld [vmem:[#allocation2 + $0x68] sm:$0xff] }
 0x18a   :  { %5003 = vmatpush1.bf16.msra.mxu0 %v7858_v41  ;;  %5414 = vmatprep.subr.bf16.mxu1 %v7869_v16  ;;  %v7947_v41 = vld [vmem:[#allocation5 + $0x80c] ss:$16 sps:$4 sm:$0xff]   ;;  %v7942_v16 = vld [vmem:[#allocation5 + $0xc00] ss:$16 sps:$4 sm:$0xff]  }
 0x18b   :  { %5004 = vmatprep.subr.bf16.mxu0 %v7866_v42  ;;  %v9098_v42 = vpack.c.bf16 %v125_v40, %v125_v40  ;;  %v8031_v40 = vld [vmem:[#allocation5 + $0x9cc] ss:$16 sps:$4 sm:$0xff]  }
 0x18d   :  { %5415 = vmatpush1.bf16.msra.mxu1 %v7867_v44  ;;  %v7950_v44 = vld [vmem:[#allocation5 + $0xc24] ss:$16 sps:$4 sm:$0xff]  }
 0x18e   :  { %5005 = vmatpush1.bf16.msra.mxu0 %v7864_v43  ;;  %5416 = vmatprep.subr.bf16.mxu1 %v7875_v46  ;;  %v7945_v43 = vld [vmem:[#allocation5 + $0x808] ss:$16 sps:$4 sm:$0xff]   ;;  %v9100_v46 = vpack.c.bf16 %v128_v36, %v128_v36 }
 0x18f   :  { %5006 = vmatprep.subr.bf16.mxu0 %v7872_v45  ;;  %v7953_v45 = vld [vmem:[#allocation5 + $0x82c] ss:$16 sps:$4 sm:$0xff]   ;;  %v8029_v36 = vld [vmem:[#allocation5 + $0x9c8] ss:$16 sps:$4 sm:$0xff]  }
 0x191   :  { %5417 = vmatpush1.bf16.msra.mxu1 %v7873_v23  ;;  %v7951_v23 = vld [vmem:[#allocation5 + $0x828] ss:$16 sps:$4 sm:$0xff]  }
 0x192   :  { %5007 = vmatpush1.bf16.msra.mxu0 %v7870_v47  ;;  %5418 = vmatprep.subr.bf16.mxu1 %v7881_v49  ;;  %v7948_v47 = vld [vmem:[#allocation5 + $0xc20] ss:$16 sps:$4 sm:$0xff]   ;;  %v7959_v49 = vld [vmem:[#allocation5 + $0x84c] ss:$16 sps:$4 sm:$0xff]  }
 0x193   :  { %5008 = vmatprep.subr.bf16.mxu0 %v7878_v48  ;;  %v9094_v55 = vpop.f32.mrb[0].mxu1  ;;  %v7956_v48 = vld [vmem:[#allocation5 + $0xc44] ss:$16 sps:$4 sm:$0xff]  }
 0x194   :  { %v9096_v56 = vpop.f32.mrb[1].mxu1 }
 0x195   :  { %v4831_v57 = vpop.f32.mrb[2].mxu1  ;;  %5419 = vmatpush1.bf16.msra.mxu1 %v7879_v51  ;;  %v7957_v51 = vld [vmem:[#allocation5 + $0x848] ss:$16 sps:$4 sm:$0xff]  }
 0x196   :  { %5009 = vmatpush1.bf16.msra.mxu0 %v7876_v50  ;;  %v4832_v60 = vpop.f32.mrb[3].mxu1  ;;  %5420 = vmatprep.subr.bf16.mxu1 %v7887_v54  ;;  %v7954_v50 = vld [vmem:[#allocation5 + $0xc40] ss:$16 sps:$4 sm:$0xff]   ;;  %v7963_v57 = vld [vmem:[#allocation5 + $0x868] ss:$16 sps:$4 sm:$0xff]  }
 0x197   :  { %5010 = vmatprep.subr.bf16.mxu0 %v7884_v53  ;;  %v7962_v53 = vld [vmem:[#allocation5 + $0xc64] ss:$16 sps:$4 sm:$0xff]   ;;  %v7960_v54 = vld [vmem:[#allocation5 + $0xc60] ss:$16 sps:$4 sm:$0xff]  }
 0x198   :  { %v7966_v60 = vld [vmem:[#allocation5 + $0xc80] ss:$16 sps:$4 sm:$0xff]  }
 0x199   :  { %5421 = vmatpush1.bf16.msra.mxu1 %v7885_v59  ;;  %v7971_v59 = vld [vmem:[#allocation5 + $0x88c] ss:$16 sps:$4 sm:$0xff]  }
 0x19a   :  { %5011 = vmatpush1.bf16.msra.mxu0 %v7882_v58  ;;  %5422 = vmatprep.subr.bf16.mxu1 %v7893_v62  ;;  %v7968_v58 = vld [vmem:[#allocation5 + $0xc84] ss:$16 sps:$4 sm:$0xff]   ;;  %v7977_v62 = vld [vmem:[#allocation5 + $0x8ac] ss:$16 sps:$4 sm:$0xff]  }
 0x19b   :  { %5012 = vmatprep.subr.bf16.mxu0 %v7890_v61  ;;  %v7974_v61 = vld [vmem:[#allocation5 + $0xca4] ss:$16 sps:$4 sm:$0xff]  }
 0x19d   :  { %5423 = vmatpush1.bf16.msra.mxu1 %v7891_v0  ;;  %v7975_v0 = vld [vmem:[#allocation5 + $0x8a8] ss:$16 sps:$4 sm:$0xff]  }
 0x19e   :  { %5013 = vmatpush1.bf16.msra.mxu0 %v7888_v63  ;;  %5424 = vmatprep.subr.bf16.mxu1 %v7899_v2  ;;  %v7972_v63 = vld [vmem:[#allocation5 + $0xca0] ss:$16 sps:$4 sm:$0xff]   ;;  %v7983_v2 = vld [vmem:[#allocation5 + $0x8cc] ss:$16 sps:$4 sm:$0xff]  }
 0x19f   :  { %5014 = vmatprep.subr.bf16.mxu0 %v7896_v1  ;;  %v7980_v1 = vld [vmem:[#allocation5 + $0xcc4] ss:$16 sps:$4 sm:$0xff]  }
 0x1a1   :  { %5425 = vmatpush1.bf16.msra.mxu1 %v7897_v4  ;;  %v7981_v4 = vld [vmem:[#allocation5 + $0x8c8] ss:$16 sps:$4 sm:$0xff]  }
 0x1a2   :  { %5015 = vmatpush1.bf16.msra.mxu0 %v7894_v3  ;;  %5426 = vmatprep.subr.bf16.mxu1 %v7905_v6  ;;  %v7978_v3 = vld [vmem:[#allocation5 + $0xcc0] ss:$16 sps:$4 sm:$0xff]   ;;  %v7989_v6 = vld [vmem:[#allocation5 + $0x8ec] ss:$16 sps:$4 sm:$0xff]  }
 0x1a3   :  { %5016 = vmatprep.subr.bf16.mxu0 %v7902_v5  ;;  %v7986_v5 = vld [vmem:[#allocation5 + $0xce4] ss:$16 sps:$4 sm:$0xff]  }
 0x1a5   :  { %5427 = vmatpush1.bf16.msra.mxu1 %v7903_v9  ;;  %v7987_v9 = vld [vmem:[#allocation5 + $0x8e8] ss:$16 sps:$4 sm:$0xff]  }
 0x1a6   :  { %5017 = vmatpush1.bf16.msra.mxu0 %v7900_v7  ;;  %5428 = vmatprep.subr.bf16.mxu1 %v7911_v12  ;;  %v7984_v7 = vld [vmem:[#allocation5 + $0xce0] ss:$16 sps:$4 sm:$0xff]   ;;  %v7995_v12 = vld [vmem:[#allocation5 + $0x90c] ss:$16 sps:$4 sm:$0xff]  }
 0x1a7   :  { %5018 = vmatprep.subr.bf16.mxu0 %v7908_v10  ;;  %v7992_v10 = vld [vmem:[#allocation5 + $0xd04] ss:$16 sps:$4 sm:$0xff]  }
 0x1a9   :  { %5429 = vmatpush1.bf16.msra.mxu1 %v7909_v14  ;;  %v7993_v14 = vld [vmem:[#allocation5 + $0x908] ss:$16 sps:$4 sm:$0xff]  }
 0x1aa   :  { %5019 = vmatpush1.bf16.msra.mxu0 %v7906_v13  ;;  %5430 = vmatprep.subr.bf16.mxu1 %v7917_v17  ;;  %v7990_v13 = vld [vmem:[#allocation5 + $0xd00] ss:$16 sps:$4 sm:$0xff]   ;;  %v8001_v17 = vld [vmem:[#allocation5 + $0x92c] ss:$16 sps:$4 sm:$0xff]  }
 0x1ab   :  { %5020 = vmatprep.subr.bf16.mxu0 %v7914_v15  ;;  %v7998_v15 = vld [vmem:[#allocation5 + $0xd24] ss:$16 sps:$4 sm:$0xff]  }
 0x1ad   :  { %5431 = vmatpush1.bf16.msra.mxu1 %v7915_v19  ;;  %v7999_v19 = vld [vmem:[#allocation5 + $0x928] ss:$16 sps:$4 sm:$0xff]  }
 0x1ae   :  { %5021 = vmatpush1.bf16.msra.mxu0 %v7912_v18  ;;  %5432 = vmatprep.subr.bf16.mxu1 %v7923_v21  ;;  %v7996_v18 = vld [vmem:[#allocation5 + $0xd20] ss:$16 sps:$4 sm:$0xff]   ;;  %v8007_v21 = vld [vmem:[#allocation5 + $0x94c] ss:$16 sps:$4 sm:$0xff]  }
 0x1af   :  { %5022 = vmatprep.subr.bf16.mxu0 %v7920_v20  ;;  %v8004_v20 = vld [vmem:[#allocation5 + $0xd44] ss:$16 sps:$4 sm:$0xff]  }
 0x1b1   :  { %5433 = vmatpush1.bf16.msra.mxu1 %v7921_v24  ;;  %v8005_v24 = vld [vmem:[#allocation5 + $0x948] ss:$16 sps:$4 sm:$0xff]  }
 0x1b2   :  { %5023 = vmatpush1.bf16.msra.mxu0 %v7918_v22  ;;  %5434 = vmatprep.subr.bf16.mxu1 %v7929_v27  ;;  %v8002_v22 = vld [vmem:[#allocation5 + $0xd40] ss:$16 sps:$4 sm:$0xff]   ;;  %v8013_v27 = vld [vmem:[#allocation5 + $0x96c] ss:$16 sps:$4 sm:$0xff]  }
 0x1b3   :  { %5024 = vmatprep.subr.bf16.mxu0 %v7926_v26  ;;  %v8010_v26 = vld [vmem:[#allocation5 + $0xd64] ss:$16 sps:$4 sm:$0xff]  }
 0x1b5   :  { %5435 = vmatpush1.bf16.msra.mxu1 %v7927_v29  ;;  %v8011_v29 = vld [vmem:[#allocation5 + $0x968] ss:$16 sps:$4 sm:$0xff]  }
 0x1b6   :  { %5025 = vmatpush1.bf16.msra.mxu0 %v7924_v28  ;;  %5436 = vmatprep.subr.bf16.mxu1 %v7935_v31  ;;  %v8008_v28 = vld [vmem:[#allocation5 + $0xd60] ss:$16 sps:$4 sm:$0xff]   ;;  %v8019_v31 = vld [vmem:[#allocation5 + $0x98c] ss:$16 sps:$4 sm:$0xff]  }
 0x1b7   :  { %5026 = vmatprep.subr.bf16.mxu0 %v7932_v30  ;;  %v8016_v30 = vld [vmem:[#allocation5 + $0xd84] ss:$16 sps:$4 sm:$0xff]  }
 0x1b9   :  { %5437 = vmatpush1.bf16.msra.mxu1 %v7933_v34  ;;  %v8017_v34 = vld [vmem:[#allocation5 + $0x988] ss:$16 sps:$4 sm:$0xff]  }
 0x1ba   :  { %5027 = vmatpush1.bf16.msra.mxu0 %v7930_v33  ;;  %5438 = vmatprep.subr.bf16.mxu1 %v7941_v52  ;;  %v8014_v33 = vld [vmem:[#allocation5 + $0xd80] ss:$16 sps:$4 sm:$0xff]   ;;  %v8025_v52 = vld [vmem:[#allocation5 + $0x9ac] ss:$16 sps:$4 sm:$0xff]  }
 0x1bb   :  { %5028 = vmatprep.subr.bf16.mxu0 %v7938_v35  ;;  %v8022_v35 = vld [vmem:[#allocation5 + $0xda4] ss:$16 sps:$4 sm:$0xff]  }
 0x1bd   :  { %5439 = vmatpush1.bf16.msra.mxu1 %v7939_v38  ;;  %v8023_v38 = vld [vmem:[#allocation5 + $0x9a8] ss:$16 sps:$4 sm:$0xff]  }
 0x1be   :  { %5029 = vmatpush1.bf16.msra.mxu0 %v7936_v37  ;;  %5449 = vmatprep.subr.bf16.mxu1 %v7947_v41  ;;  %v8020_v37 = vld [vmem:[#allocation5 + $0xda0] ss:$16 sps:$4 sm:$0xff]  }
 0x1bf   :  { %5039 = vmatprep.subr.bf16.mxu0 %v7944_v39  ;;  %v8028_v39 = vld [vmem:[#allocation5 + $0xdc4] ss:$16 sps:$4 sm:$0xff]   ;;  %v8026_v41 = vld [vmem:[#allocation5 + $0xdc0] ss:$16 sps:$4 sm:$0xff]  }
 0x1c0   :  { %5441 = vmatmul.mubr.bf16.vlgmr.msra.gmra.mrb[4].mxu1 %v9078_v25  ;;  %v7965_v25 = vld [vmem:[#allocation5 + $0x86c] ss:$16 sps:$4 sm:$0xff]  }
 0x1c1   :  { %5031 = vmatmul.mubr.bf16.vlgmr.msra.gmra.mrb[0].mxu0 %v9098_v42  ;;  %5450 = vmatpush1.bf16.msra.mxu1 %v7945_v43  ;;  %v8037_v43 = vld [vmem:[#allocation5 + $0x9ec] ss:$16 sps:$4 sm:$0xff]  }
 0x1c2   :  { %5040 = vmatpush1.bf16.msra.mxu0 %v7942_v16  ;;  %5451 = vmatprep.subr.bf16.mxu1 %v7953_v45  ;;  %v8034_v16 = vld [vmem:[#allocation5 + $0xde4] ss:$16 sps:$4 sm:$0xff]   ;;  %v8035_v45 = vld [vmem:[#allocation5 + $0x9e8] ss:$16 sps:$4 sm:$0xff]  }
 0x1c3   :  { %5041 = vmatprep.subr.bf16.mxu0 %v7950_v44  ;;  %5071 = vmatprep.mubr.bf16.mxu0 %v9100_v46  ;;  %v8032_v44 = vld [vmem:[#allocation5 + $0xde0] ss:$16 sps:$4 sm:$0xff]  }
 0x1c4   :  { %5481 = vmatprep.mubr.bf16.mxu1 %v9080_v8  ;;  %v7969_v8 = vld [vmem:[#allocation5 + $0x888] ss:$16 sps:$4 sm:$0xff]  }
 0x1c5   :  { %5452 = vmatpush1.bf16.msra.mxu1 %v7951_v23  ;;  %v127_v23 = vld [vmem:[#allocation2 + $0x60] sm:$0xff] }
 0x1c6   :  { %5042 = vmatpush1.bf16.msra.mxu0 %v7948_v47  ;;  %5453 = vmatprep.subr.bf16.mxu1 %v7959_v49  ;;  %v8040_v47 = vld [vmem:[#allocation5 + $0xe04] ss:$16 sps:$4 sm:$0xff]   ;;  %v130_v49 = vld [vmem:[#allocation2 + $0x78] sm:$0xff] }
 0x1c7   :  { %5043 = vmatprep.subr.bf16.mxu0 %v7956_v48  ;;  %v8043_v48 = vld [vmem:[#allocation5 + $0xa0c] ss:$16 sps:$4 sm:$0xff]  }
 0x1c9   :  { %5454 = vmatpush1.bf16.msra.mxu1 %v7957_v51  ;;  %v8038_v51 = vld [vmem:[#allocation5 + $0xe00] ss:$16 sps:$4 sm:$0xff]  }
 0x1ca   :  { %5044 = vmatpush1.bf16.msra.mxu0 %v7954_v50  ;;  %5455 = vmatprep.subr.bf16.mxu1 %v7965_v25  ;;  %v9106_v50 = vpack.c.bf16 %v127_v23, %v127_v23  ;;  %v8046_v25 = vld [vmem:[#allocation5 + $0xe24] ss:$16 sps:$4 sm:$0xff]   ;;  %v8127_v23 = vld [vmem:[#allocation5 + $0xbcc] ss:$16 sps:$4 sm:$0xff]  }
 0x1cb   :  { %5045 = vmatprep.subr.bf16.mxu0 %v7962_v53  ;;  %v8041_v53 = vld [vmem:[#allocation5 + $0xa08] ss:$16 sps:$4 sm:$0xff]  }
 0x1cd   :  { %5456 = vmatpush1.bf16.msra.mxu1 %v7963_v57  ;;  %v9108_v57 = vpack.c.bf16 %v130_v49, %v130_v49  ;;  %v8125_v49 = vld [vmem:[#allocation5 + $0xbc8] ss:$16 sps:$4 sm:$0xff]  }
 0x1ce   :  { %5046 = vmatpush1.bf16.msra.mxu0 %v7960_v54  ;;  %5457 = vmatprep.subr.bf16.mxu1 %v7971_v59  ;;  %v8049_v54 = vld [vmem:[#allocation5 + $0xa2c] ss:$16 sps:$4 sm:$0xff]   ;;  %v8047_v59 = vld [vmem:[#allocation5 + $0xa28] ss:$16 sps:$4 sm:$0xff]  }
 0x1cf   :  { %5047 = vmatprep.subr.bf16.mxu0 %v7968_v58  ;;  %v8044_v58 = vld [vmem:[#allocation5 + $0xe20] ss:$16 sps:$4 sm:$0xff]  }
 0x1d1   :  { %5458 = vmatpush1.bf16.msra.mxu1 %v7969_v8  ;;  %v8055_v8 = vld [vmem:[#allocation5 + $0xa4c] ss:$16 sps:$4 sm:$0xff]  }
 0x1d2   :  { %5048 = vmatpush1.bf16.msra.mxu0 %v7966_v60  ;;  %5459 = vmatprep.subr.bf16.mxu1 %v7977_v62  ;;  %v8052_v60 = vld [vmem:[#allocation5 + $0xe44] ss:$16 sps:$4 sm:$0xff]   ;;  %v8053_v62 = vld [vmem:[#allocation5 + $0xa48] ss:$16 sps:$4 sm:$0xff]  }
 0x1d3   :  { %5049 = vmatprep.subr.bf16.mxu0 %v7974_v61  ;;  %v8050_v61 = vld [vmem:[#allocation5 + $0xe40] ss:$16 sps:$4 sm:$0xff]  }
 0x1d5   :  { %5460 = vmatpush1.bf16.msra.mxu1 %v7975_v0  ;;  %v8056_v0 = vld [vmem:[#allocation5 + $0xe60] ss:$16 sps:$4 sm:$0xff]  }
 0x1d6   :  { %5050 = vmatpush1.bf16.msra.mxu0 %v7972_v63  ;;  %5461 = vmatprep.subr.bf16.mxu1 %v7983_v2  ;;  %v8058_v63 = vld [vmem:[#allocation5 + $0xe64] ss:$16 sps:$4 sm:$0xff]  }
 0x1d7   :  { %5051 = vmatprep.subr.bf16.mxu0 %v7980_v1  ;;  %v8059_v1 = vld [vmem:[#allocation5 + $0xa68] ss:$16 sps:$4 sm:$0xff]   ;;  %v8064_v2 = vld [vmem:[#allocation5 + $0xe84] ss:$16 sps:$4 sm:$0xff]  }
 0x1d9   :  { %5462 = vmatpush1.bf16.msra.mxu1 %v7981_v4  ;;  %v8062_v4 = vld [vmem:[#allocation5 + $0xe80] ss:$16 sps:$4 sm:$0xff]  }
 0x1da   :  { %5052 = vmatpush1.bf16.msra.mxu0 %v7978_v3  ;;  %5463 = vmatprep.subr.bf16.mxu1 %v7989_v6  ;;  %v8067_v3 = vld [vmem:[#allocation5 + $0xa8c] ss:$16 sps:$4 sm:$0xff]  }
 0x1db   :  { %5053 = vmatprep.subr.bf16.mxu0 %v7986_v5  ;;  %v8070_v5 = vld [vmem:[#allocation5 + $0xea4] ss:$16 sps:$4 sm:$0xff]   ;;  %v8073_v6 = vld [vmem:[#allocation5 + $0xaac] ss:$16 sps:$4 sm:$0xff]  }
 0x1dd   :  { %5464 = vmatpush1.bf16.msra.mxu1 %v7987_v9  ;;  %v8071_v9 = vld [vmem:[#allocation5 + $0xaa8] ss:$16 sps:$4 sm:$0xff]  }
 0x1de   :  { %5054 = vmatpush1.bf16.msra.mxu0 %v7984_v7  ;;  %5465 = vmatprep.subr.bf16.mxu1 %v7995_v12  ;;  %v8068_v7 = vld [vmem:[#allocation5 + $0xea0] ss:$16 sps:$4 sm:$0xff]   ;;  %v8079_v12 = vld [vmem:[#allocation5 + $0xacc] ss:$16 sps:$4 sm:$0xff]  }
 0x1df   :  { %5055 = vmatprep.subr.bf16.mxu0 %v7992_v10  ;;  %v8076_v10 = vld [vmem:[#allocation5 + $0xec4] ss:$16 sps:$4 sm:$0xff]  }
 0x1e1   :  { %5466 = vmatpush1.bf16.msra.mxu1 %v7993_v14  ;;  %v8077_v14 = vld [vmem:[#allocation5 + $0xac8] ss:$16 sps:$4 sm:$0xff]  }
 0x1e2   :  { %5056 = vmatpush1.bf16.msra.mxu0 %v7990_v13  ;;  %5467 = vmatprep.subr.bf16.mxu1 %v8001_v17  ;;  %v8074_v13 = vld [vmem:[#allocation5 + $0xec0] ss:$16 sps:$4 sm:$0xff]   ;;  %v8085_v17 = vld [vmem:[#allocation5 + $0xaec] ss:$16 sps:$4 sm:$0xff]  }
 0x1e3   :  { %5057 = vmatprep.subr.bf16.mxu0 %v7998_v15  ;;  %v8082_v15 = vld [vmem:[#allocation5 + $0xee4] ss:$16 sps:$4 sm:$0xff]  }
 0x1e5   :  { %5468 = vmatpush1.bf16.msra.mxu1 %v7999_v19  ;;  %v8083_v19 = vld [vmem:[#allocation5 + $0xae8] ss:$16 sps:$4 sm:$0xff]  }
 0x1e6   :  { %5058 = vmatpush1.bf16.msra.mxu0 %v7996_v18  ;;  %5469 = vmatprep.subr.bf16.mxu1 %v8007_v21  ;;  %v8080_v18 = vld [vmem:[#allocation5 + $0xee0] ss:$16 sps:$4 sm:$0xff]   ;;  %v8091_v21 = vld [vmem:[#allocation5 + $0xb0c] ss:$16 sps:$4 sm:$0xff]  }
 0x1e7   :  { %5059 = vmatprep.subr.bf16.mxu0 %v8004_v20  ;;  %v8088_v20 = vld [vmem:[#allocation5 + $0xf04] ss:$16 sps:$4 sm:$0xff]  }
 0x1e9   :  { %5470 = vmatpush1.bf16.msra.mxu1 %v8005_v24  ;;  %v8089_v24 = vld [vmem:[#allocation5 + $0xb08] ss:$16 sps:$4 sm:$0xff]  }
 0x1ea   :  { %5060 = vmatpush1.bf16.msra.mxu0 %v8002_v22  ;;  %5471 = vmatprep.subr.bf16.mxu1 %v8013_v27  ;;  %v8086_v22 = vld [vmem:[#allocation5 + $0xf00] ss:$16 sps:$4 sm:$0xff]   ;;  %v8097_v27 = vld [vmem:[#allocation5 + $0xb2c] ss:$16 sps:$4 sm:$0xff]  }
 0x1eb   :  { %5061 = vmatprep.subr.bf16.mxu0 %v8010_v26  ;;  %v8094_v26 = vld [vmem:[#allocation5 + $0xf24] ss:$16 sps:$4 sm:$0xff]  }
 0x1ed   :  { %5472 = vmatpush1.bf16.msra.mxu1 %v8011_v29  ;;  %v8095_v29 = vld [vmem:[#allocation5 + $0xb28] ss:$16 sps:$4 sm:$0xff]  }
 0x1ee   :  { %5062 = vmatpush1.bf16.msra.mxu0 %v8008_v28  ;;  %5473 = vmatprep.subr.bf16.mxu1 %v8019_v31  ;;  %v8092_v28 = vld [vmem:[#allocation5 + $0xf20] ss:$16 sps:$4 sm:$0xff]   ;;  %v8103_v31 = vld [vmem:[#allocation5 + $0xb4c] ss:$16 sps:$4 sm:$0xff]  }
 0x1ef   :  { %5063 = vmatprep.subr.bf16.mxu0 %v8016_v30  ;;  %v8100_v30 = vld [vmem:[#allocation5 + $0xf44] ss:$16 sps:$4 sm:$0xff]  }
 0x1f1   :  { %5474 = vmatpush1.bf16.msra.mxu1 %v8017_v34  ;;  %v8101_v34 = vld [vmem:[#allocation5 + $0xb48] ss:$16 sps:$4 sm:$0xff]  }
 0x1f2   :  { %5064 = vmatpush1.bf16.msra.mxu0 %v8014_v33  ;;  %5475 = vmatprep.subr.bf16.mxu1 %v8025_v52  ;;  %v8098_v33 = vld [vmem:[#allocation5 + $0xf40] ss:$16 sps:$4 sm:$0xff]   ;;  %v8109_v52 = vld [vmem:[#allocation5 + $0xb6c] ss:$16 sps:$4 sm:$0xff]  }
 0x1f3   :  { %5065 = vmatprep.subr.bf16.mxu0 %v8022_v35  ;;  %v8106_v35 = vld [vmem:[#allocation5 + $0xf64] ss:$16 sps:$4 sm:$0xff]  }
 0x1f5   :  { %5476 = vmatpush1.bf16.msra.mxu1 %v8023_v38  ;;  %v8107_v38 = vld [vmem:[#allocation5 + $0xb68] ss:$16 sps:$4 sm:$0xff]  }
 0x1f6   :  { %5066 = vmatpush1.bf16.msra.mxu0 %v8020_v37  ;;  %5477 = vmatprep.subr.bf16.mxu1 %v8031_v40  ;;  %v8104_v37 = vld [vmem:[#allocation5 + $0xf60] ss:$16 sps:$4 sm:$0xff]   ;;  %v8115_v40 = vld [vmem:[#allocation5 + $0xb8c] ss:$16 sps:$4 sm:$0xff]  }
 0x1f7   :  { %5067 = vmatprep.subr.bf16.mxu0 %v8028_v39  ;;  %v8112_v39 = vld [vmem:[#allocation5 + $0xf84] ss:$16 sps:$4 sm:$0xff]  }
 0x1f9   :  { %5478 = vmatpush1.bf16.msra.mxu1 %v8029_v36  ;;  %v8113_v36 = vld [vmem:[#allocation5 + $0xb88] ss:$16 sps:$4 sm:$0xff]  }
 0x1fa   :  { %5068 = vmatpush1.bf16.msra.mxu0 %v8026_v41  ;;  %5479 = vmatprep.subr.bf16.mxu1 %v8037_v43  ;;  %v8110_v41 = vld [vmem:[#allocation5 + $0xf80] ss:$16 sps:$4 sm:$0xff]   ;;  %v8121_v43 = vld [vmem:[#allocation5 + $0xbac] ss:$16 sps:$4 sm:$0xff]  }
 0x1fb   :  { %5069 = vmatprep.subr.bf16.mxu0 %v8034_v16  ;;  %v8118_v16 = vld [vmem:[#allocation5 + $0xfa4] ss:$16 sps:$4 sm:$0xff]  }
 0x1fd   :  { %5480 = vmatpush1.bf16.msra.mxu1 %v8035_v45  ;;  %v8119_v45 = vld [vmem:[#allocation5 + $0xba8] ss:$16 sps:$4 sm:$0xff]  }
 0x1fe   :  { %5070 = vmatpush1.bf16.msra.mxu0 %v8032_v44  ;;  %5490 = vmatprep.subr.bf16.mxu1 %v8043_v48  ;;  %v8116_v44 = vld [vmem:[#allocation5 + $0xfa0] ss:$16 sps:$4 sm:$0xff]  }
 0x1ff   :  { %5080 = vmatprep.subr.bf16.mxu0 %v8040_v47  ;;  %v8124_v47 = vld [vmem:[#allocation5 + $0xfc4] ss:$16 sps:$4 sm:$0xff]   ;;  %v8122_v48 = vld [vmem:[#allocation5 + $0xfc0] ss:$16 sps:$4 sm:$0xff]  }
 0x200   :  { %5482 = vmatmul.mubr.bf16.vlgmr.msra.gmra.mrb[4].mxu1 %v9086_v32  ;;  %v8061_v32 = vld [vmem:[#allocation5 + $0xa6c] ss:$16 sps:$4 sm:$0xff]  }
 0x201   :  { %5072 = vmatmul.mubr.bf16.vlgmr.msra.gmra.mrb[0].mxu0 %v9106_v50  ;;  %5491 = vmatpush1.bf16.msra.mxu1 %v8041_v53  ;;  %v8133_v53 = vld [vmem:[#allocation5 + $0xbec] ss:$16 sps:$4 sm:$0xff]  }
 0x202   :  { %5081 = vmatpush1.bf16.msra.mxu0 %v8038_v51  ;;  %5492 = vmatprep.subr.bf16.mxu1 %v8049_v54  ;;  %v8130_v51 = vld [vmem:[#allocation5 + $0xfe4] ss:$16 sps:$4 sm:$0xff]   ;;  %v8131_v54 = vld [vmem:[#allocation5 + $0xbe8] ss:$16 sps:$4 sm:$0xff]  }
 0x203   :  { %5082 = vmatprep.subr.bf16.mxu0 %v8046_v25  ;;  %5112 = vmatprep.mubr.bf16.mxu0 %v9108_v57  ;;  %v8128_v25 = vld [vmem:[#allocation5 + $0xfe0] ss:$16 sps:$4 sm:$0xff]  }
 0x204   :  { %5522 = vmatprep.mubr.bf16.mxu1 %v9088_v11  ;;  %v8065_v11 = vld [vmem:[#allocation5 + $0xa88] ss:$16 sps:$4 sm:$0xff]  }
 0x205   :  { %5493 = vmatpush1.bf16.msra.mxu1 %v8047_v59  ;;  %v129_v59 = vld [vmem:[#allocation2 + $0x70] sm:$0xff] }
 0x206   :  { %5083 = vmatpush1.bf16.msra.mxu0 %v8044_v58  ;;  %5494 = vmatprep.subr.bf16.mxu1 %v8055_v8  ;;  %v8136_v58 = vld [vmem:[#allocation5 + $0x1004] ss:$16 sps:$4 sm:$0xff]   ;;  %v132_v8 = vld [vmem:[#allocation2 + $0x88] sm:$0xff] }
 0x207   :  { %5084 = vmatprep.subr.bf16.mxu0 %v8052_v60  ;;  %v8139_v60 = vld [vmem:[#allocation5 + $0xc0c] ss:$16 sps:$4 sm:$0xff]  }
 0x209   :  { %5495 = vmatpush1.bf16.msra.mxu1 %v8053_v62  ;;  %v8134_v62 = vld [vmem:[#allocation5 + $0x1000] ss:$16 sps:$4 sm:$0xff]  }
 0x20a   :  { %5085 = vmatpush1.bf16.msra.mxu0 %v8050_v61  ;;  %5496 = vmatprep.subr.bf16.mxu1 %v8061_v32  ;;  %v9114_v61 = vpack.c.bf16 %v129_v59, %v129_v59  ;;  %v8142_v32 = vld [vmem:[#allocation5 + $0x1024] ss:$16 sps:$4 sm:$0xff]   ;;  %v8223_v59 = vld [vmem:[#allocation5 + $0xdcc] ss:$16 sps:$4 sm:$0xff]  }
 0x20b   :  { %5086 = vmatprep.subr.bf16.mxu0 %v8058_v63  ;;  %v8137_v63 = vld [vmem:[#allocation5 + $0xc08] ss:$16 sps:$4 sm:$0xff]  }
 0x20d   :  { %5497 = vmatpush1.bf16.msra.mxu1 %v8059_v1  ;;  %v9116_v1 = vpack.c.bf16 %v132_v8, %v132_v8  ;;  %v8221_v8 = vld [vmem:[#allocation5 + $0xdc8] ss:$16 sps:$4 sm:$0xff]  }
 0x20e   :  { %5087 = vmatpush1.bf16.msra.mxu0 %v8056_v0  ;;  %5498 = vmatprep.subr.bf16.mxu1 %v8067_v3  ;;  %v8145_v0 = vld [vmem:[#allocation5 + $0xc2c] ss:$16 sps:$4 sm:$0xff]   ;;  %v8143_v3 = vld [vmem:[#allocation5 + $0xc28] ss:$16 sps:$4 sm:$0xff]  }
 0x20f   :  { %5088 = vmatprep.subr.bf16.mxu0 %v8064_v2  ;;  %v8140_v2 = vld [vmem:[#allocation5 + $0x1020] ss:$16 sps:$4 sm:$0xff]  }
 0x211   :  { %5499 = vmatpush1.bf16.msra.mxu1 %v8065_v11  ;;  %v8151_v11 = vld [vmem:[#allocation5 + $0xc4c] ss:$16 sps:$4 sm:$0xff]  }
 0x212   :  { %5089 = vmatpush1.bf16.msra.mxu0 %v8062_v4  ;;  %5500 = vmatprep.subr.bf16.mxu1 %v8073_v6  ;;  %v8148_v4 = vld [vmem:[#allocation5 + $0x1044] ss:$16 sps:$4 sm:$0xff]   ;;  %v8149_v6 = vld [vmem:[#allocation5 + $0xc48] ss:$16 sps:$4 sm:$0xff]  }
 0x213   :  { %5090 = vmatprep.subr.bf16.mxu0 %v8070_v5  ;;  %v8146_v5 = vld [vmem:[#allocation5 + $0x1040] ss:$16 sps:$4 sm:$0xff]  }
 0x215   :  { %5501 = vmatpush1.bf16.msra.mxu1 %v8071_v9  ;;  %v8152_v9 = vld [vmem:[#allocation5 + $0x1060] ss:$16 sps:$4 sm:$0xff]  }
 0x216   :  { %5091 = vmatpush1.bf16.msra.mxu0 %v8068_v7  ;;  %5502 = vmatprep.subr.bf16.mxu1 %v8079_v12  ;;  %v8154_v7 = vld [vmem:[#allocation5 + $0x1064] ss:$16 sps:$4 sm:$0xff]  }
 0x217   :  { %5092 = vmatprep.subr.bf16.mxu0 %v8076_v10  ;;  %v8155_v10 = vld [vmem:[#allocation5 + $0xc68] ss:$16 sps:$4 sm:$0xff]   ;;  %v8160_v12 = vld [vmem:[#allocation5 + $0x1084] ss:$16 sps:$4 sm:$0xff]  }
 0x219   :  { %5503 = vmatpush1.bf16.msra.mxu1 %v8077_v14  ;;  %v8158_v14 = vld [vmem:[#allocation5 + $0x1080] ss:$16 sps:$4 sm:$0xff]  }
 0x21a   :  { %5093 = vmatpush1.bf16.msra.mxu0 %v8074_v13  ;;  %5504 = vmatprep.subr.bf16.mxu1 %v8085_v17  ;;  %v8163_v13 = vld [vmem:[#allocation5 + $0xc8c] ss:$16 sps:$4 sm:$0xff]  }
 0x21b   :  { %5094 = vmatprep.subr.bf16.mxu0 %v8082_v15  ;;  %v8166_v15 = vld [vmem:[#allocation5 + $0x10a4] ss:$16 sps:$4 sm:$0xff]   ;;  %v8169_v17 = vld [vmem:[#allocation5 + $0xcac] ss:$16 sps:$4 sm:$0xff]  }
 0x21d   :  { %5505 = vmatpush1.bf16.msra.mxu1 %v8083_v19  ;;  %v8167_v19 = vld [vmem:[#allocation5 + $0xca8] ss:$16 sps:$4 sm:$0xff]  }
 0x21e   :  { %5095 = vmatpush1.bf16.msra.mxu0 %v8080_v18  ;;  %5506 = vmatprep.subr.bf16.mxu1 %v8091_v21  ;;  %v8164_v18 = vld [vmem:[#allocation5 + $0x10a0] ss:$16 sps:$4 sm:$0xff]   ;;  %v8175_v21 = vld [vmem:[#allocation5 + $0xccc] ss:$16 sps:$4 sm:$0xff]  }
 0x21f   :  { %5096 = vmatprep.subr.bf16.mxu0 %v8088_v20  ;;  %v8172_v20 = vld [vmem:[#allocation5 + $0x10c4] ss:$16 sps:$4 sm:$0xff]  }
 0x221   :  { %5507 = vmatpush1.bf16.msra.mxu1 %v8089_v24  ;;  %v8173_v24 = vld [vmem:[#allocation5 + $0xcc8] ss:$16 sps:$4 sm:$0xff]  }
 0x222   :  { %5097 = vmatpush1.bf16.msra.mxu0 %v8086_v22  ;;  %5508 = vmatprep.subr.bf16.mxu1 %v8097_v27  ;;  %v8170_v22 = vld [vmem:[#allocation5 + $0x10c0] ss:$16 sps:$4 sm:$0xff]   ;;  %v8181_v27 = vld [vmem:[#allocation5 + $0xcec] ss:$16 sps:$4 sm:$0xff]  }
 0x223   :  { %5098 = vmatprep.subr.bf16.mxu0 %v8094_v26  ;;  %v8178_v26 = vld [vmem:[#allocation5 + $0x10e4] ss:$16 sps:$4 sm:$0xff]  }
 0x225   :  { %5509 = vmatpush1.bf16.msra.mxu1 %v8095_v29  ;;  %v8179_v29 = vld [vmem:[#allocation5 + $0xce8] ss:$16 sps:$4 sm:$0xff]  }
 0x226   :  { %5099 = vmatpush1.bf16.msra.mxu0 %v8092_v28  ;;  %5510 = vmatprep.subr.bf16.mxu1 %v8103_v31  ;;  %v8176_v28 = vld [vmem:[#allocation5 + $0x10e0] ss:$16 sps:$4 sm:$0xff]   ;;  %v8187_v31 = vld [vmem:[#allocation5 + $0xd0c] ss:$16 sps:$4 sm:$0xff]  }
 0x227   :  { %5100 = vmatprep.subr.bf16.mxu0 %v8100_v30  ;;  %v8184_v30 = vld [vmem:[#allocation5 + $0x1104] ss:$16 sps:$4 sm:$0xff]  }
 0x229   :  { %5511 = vmatpush1.bf16.msra.mxu1 %v8101_v34  ;;  %v8185_v34 = vld [vmem:[#allocation5 + $0xd08] ss:$16 sps:$4 sm:$0xff]  }
 0x22a   :  { %5101 = vmatpush1.bf16.msra.mxu0 %v8098_v33  ;;  %5512 = vmatprep.subr.bf16.mxu1 %v8109_v52  ;;  %v8182_v33 = vld [vmem:[#allocation5 + $0x1100] ss:$16 sps:$4 sm:$0xff]   ;;  %v8193_v52 = vld [vmem:[#allocation5 + $0xd2c] ss:$16 sps:$4 sm:$0xff]  }
 0x22b   :  { %5102 = vmatprep.subr.bf16.mxu0 %v8106_v35  ;;  %v8190_v35 = vld [vmem:[#allocation5 + $0x1124] ss:$16 sps:$4 sm:$0xff]  }
 0x22d   :  { %5513 = vmatpush1.bf16.msra.mxu1 %v8107_v38  ;;  %v8191_v38 = vld [vmem:[#allocation5 + $0xd28] ss:$16 sps:$4 sm:$0xff]  }
 0x22e   :  { %5103 = vmatpush1.bf16.msra.mxu0 %v8104_v37  ;;  %5514 = vmatprep.subr.bf16.mxu1 %v8115_v40  ;;  %v8188_v37 = vld [vmem:[#allocation5 + $0x1120] ss:$16 sps:$4 sm:$0xff]   ;;  %v8199_v40 = vld [vmem:[#allocation5 + $0xd4c] ss:$16 sps:$4 sm:$0xff]  }
 0x22f   :  { %5104 = vmatprep.subr.bf16.mxu0 %v8112_v39  ;;  %v8196_v39 = vld [vmem:[#allocation5 + $0x1144] ss:$16 sps:$4 sm:$0xff]  }
 0x231   :  { %5515 = vmatpush1.bf16.msra.mxu1 %v8113_v36  ;;  %v8197_v36 = vld [vmem:[#allocation5 + $0xd48] ss:$16 sps:$4 sm:$0xff]  }
 0x232   :  { %5105 = vmatpush1.bf16.msra.mxu0 %v8110_v41  ;;  %5516 = vmatprep.subr.bf16.mxu1 %v8121_v43  ;;  %v8194_v41 = vld [vmem:[#allocation5 + $0x1140] ss:$16 sps:$4 sm:$0xff]   ;;  %v8205_v43 = vld [vmem:[#allocation5 + $0xd6c] ss:$16 sps:$4 sm:$0xff]  }
 0x233   :  { %5106 = vmatprep.subr.bf16.mxu0 %v8118_v16  ;;  %v8202_v16 = vld [vmem:[#allocation5 + $0x1164] ss:$16 sps:$4 sm:$0xff]  }
 0x235   :  { %5517 = vmatpush1.bf16.msra.mxu1 %v8119_v45  ;;  %v8203_v45 = vld [vmem:[#allocation5 + $0xd68] ss:$16 sps:$4 sm:$0xff]  }
 0x236   :  { %5107 = vmatpush1.bf16.msra.mxu0 %v8116_v44  ;;  %5518 = vmatprep.subr.bf16.mxu1 %v8127_v23  ;;  %v8200_v44 = vld [vmem:[#allocation5 + $0x1160] ss:$16 sps:$4 sm:$0xff]   ;;  %v8211_v23 = vld [vmem:[#allocation5 + $0xd8c] ss:$16 sps:$4 sm:$0xff]  }
 0x237   :  { %5108 = vmatprep.subr.bf16.mxu0 %v8124_v47  ;;  %v8208_v47 = vld [vmem:[#allocation5 + $0x1184] ss:$16 sps:$4 sm:$0xff]  }
 0x239   :  { %5519 = vmatpush1.bf16.msra.mxu1 %v8125_v49  ;;  %v8209_v49 = vld [vmem:[#allocation5 + $0xd88] ss:$16 sps:$4 sm:$0xff]  }
 0x23a   :  { %5109 = vmatpush1.bf16.msra.mxu0 %v8122_v48  ;;  %5520 = vmatprep.subr.bf16.mxu1 %v8133_v53  ;;  %v8206_v48 = vld [vmem:[#allocation5 + $0x1180] ss:$16 sps:$4 sm:$0xff]   ;;  %v8217_v53 = vld [vmem:[#allocation5 + $0xdac] ss:$16 sps:$4 sm:$0xff]  }
 0x23b   :  { %5110 = vmatprep.subr.bf16.mxu0 %v8130_v51  ;;  %v8214_v51 = vld [vmem:[#allocation5 + $0x11a4] ss:$16 sps:$4 sm:$0xff]  }
 0x23d   :  { %5521 = vmatpush1.bf16.msra.mxu1 %v8131_v54  ;;  %v8215_v54 = vld [vmem:[#allocation5 + $0xda8] ss:$16 sps:$4 sm:$0xff]  }
 0x23e   :  { %5111 = vmatpush1.bf16.msra.mxu0 %v8128_v25  ;;  %5531 = vmatprep.subr.bf16.mxu1 %v8139_v60  ;;  %v8212_v25 = vld [vmem:[#allocation5 + $0x11a0] ss:$16 sps:$4 sm:$0xff]  }
 0x23f   :  { %5121 = vmatprep.subr.bf16.mxu0 %v8136_v58  ;;  %v8220_v58 = vld [vmem:[#allocation5 + $0x11c4] ss:$16 sps:$4 sm:$0xff]   ;;  %v8218_v60 = vld [vmem:[#allocation5 + $0x11c0] ss:$16 sps:$4 sm:$0xff]  }
 0x240   :  { %5523 = vmatmul.mubr.bf16.vlgmr.msra.gmra.mrb[4].mxu1 %v9098_v42  ;;  %v8157_v42 = vld [vmem:[#allocation5 + $0xc6c] ss:$16 sps:$4 sm:$0xff]  }
 0x241   :  { %5113 = vmatmul.mubr.bf16.vlgmr.msra.gmra.mrb[0].mxu0 %v9114_v61  ;;  %5532 = vmatpush1.bf16.msra.mxu1 %v8137_v63  ;;  %v8229_v63 = vld [vmem:[#allocation5 + $0xdec] ss:$16 sps:$4 sm:$0xff]  }
 0x242   :  { %5122 = vmatpush1.bf16.msra.mxu0 %v8134_v62  ;;  %5533 = vmatprep.subr.bf16.mxu1 %v8145_v0  ;;  %v8226_v62 = vld [vmem:[#allocation5 + $0x11e4] ss:$16 sps:$4 sm:$0xff]   ;;  %v8227_v0 = vld [vmem:[#allocation5 + $0xde8] ss:$16 sps:$4 sm:$0xff]  }
 0x243   :  { %5123 = vmatprep.subr.bf16.mxu0 %v8142_v32  ;;  %5153 = vmatprep.mubr.bf16.mxu0 %v9116_v1  ;;  %v8224_v32 = vld [vmem:[#allocation5 + $0x11e0] ss:$16 sps:$4 sm:$0xff]  }
 0x244   :  { %5563 = vmatprep.mubr.bf16.mxu1 %v9100_v46  ;;  %v8161_v46 = vld [vmem:[#allocation5 + $0xc88] ss:$16 sps:$4 sm:$0xff]  }
 0x245   :  { %5534 = vmatpush1.bf16.msra.mxu1 %v8143_v3  ;;  %v8232_v3 = vld [vmem:[#allocation5 + $0x1204] ss:$16 sps:$4 sm:$0xff]  }
 0x246   :  { %5124 = vmatpush1.bf16.msra.mxu0 %v8140_v2  ;;  %5535 = vmatprep.subr.bf16.mxu1 %v8151_v11  ;;  %v131_v2 = vld [vmem:[#allocation2 + $0x80] sm:$0xff] }
 0x247   :  { %5125 = vmatprep.subr.bf16.mxu0 %v8148_v4  ;;  %v8235_v4 = vld [vmem:[#allocation5 + $0xe0c] ss:$16 sps:$4 sm:$0xff]   ;;  %v9122_v11 = vpack.c.bf16 %v131_v2, %v131_v2  ;;  %v8316_v2 = vld [vmem:[#allocation5 + $0x13c4] ss:$16 sps:$4 sm:$0xff]  }
 0x249   :  { %5536 = vmatpush1.bf16.msra.mxu1 %v8149_v6  ;;  %v8230_v6 = vld [vmem:[#allocation5 + $0x1200] ss:$16 sps:$4 sm:$0xff]  }
 0x24a   :  { %5126 = vmatpush1.bf16.msra.mxu0 %v8146_v5  ;;  %5537 = vmatprep.subr.bf16.mxu1 %v8157_v42  ;;  %v134_v5 = vld [vmem:[#allocation2 + $0x98] sm:$0xff]  ;;  %v8238_v42 = vld [vmem:[#allocation5 + $0x1224] ss:$16 sps:$4 sm:$0xff]  }
 0x24b   :  { %5127 = vmatprep.subr.bf16.mxu0 %v8154_v7  ;;  %v8233_v7 = vld [vmem:[#allocation5 + $0xe08] ss:$16 sps:$4 sm:$0xff]  }
 0x24d   :  { %5538 = vmatpush1.bf16.msra.mxu1 %v8155_v10  ;;  %v9124_v10 = vpack.c.bf16 %v134_v5, %v134_v5  ;;  %v8317_v5 = vld [vmem:[#allocation5 + $0xfc8] ss:$16 sps:$4 sm:$0xff]  }
 0x24e   :  { %5128 = vmatpush1.bf16.msra.mxu0 %v8152_v9  ;;  %5539 = vmatprep.subr.bf16.mxu1 %v8163_v13  ;;  %v8241_v9 = vld [vmem:[#allocation5 + $0xe2c] ss:$16 sps:$4 sm:$0xff]   ;;  %v8239_v13 = vld [vmem:[#allocation5 + $0xe28] ss:$16 sps:$4 sm:$0xff]  }
 0x24f   :  { %5129 = vmatprep.subr.bf16.mxu0 %v8160_v12  ;;  %v8236_v12 = vld [vmem:[#allocation5 + $0x1220] ss:$16 sps:$4 sm:$0xff]  }
 0x251   :  { %5540 = vmatpush1.bf16.msra.mxu1 %v8161_v46  ;;  %v8247_v46 = vld [vmem:[#allocation5 + $0xe4c] ss:$16 sps:$4 sm:$0xff]  }
 0x252   :  { %5130 = vmatpush1.bf16.msra.mxu0 %v8158_v14  ;;  %5541 = vmatprep.subr.bf16.mxu1 %v8169_v17  ;;  %v8244_v14 = vld [vmem:[#allocation5 + $0x1244] ss:$16 sps:$4 sm:$0xff]   ;;  %v8245_v17 = vld [vmem:[#allocation5 + $0xe48] ss:$16 sps:$4 sm:$0xff]  }
 0x253   :  { %5131 = vmatprep.subr.bf16.mxu0 %v8166_v15  ;;  %v8242_v15 = vld [vmem:[#allocation5 + $0x1240] ss:$16 sps:$4 sm:$0xff]  }
 0x255   :  { %5542 = vmatpush1.bf16.msra.mxu1 %v8167_v19  ;;  %v8248_v19 = vld [vmem:[#allocation5 + $0x1260] ss:$16 sps:$4 sm:$0xff]  }
 0x256   :  { %5132 = vmatpush1.bf16.msra.mxu0 %v8164_v18  ;;  %5543 = vmatprep.subr.bf16.mxu1 %v8175_v21  ;;  %v8250_v18 = vld [vmem:[#allocation5 + $0x1264] ss:$16 sps:$4 sm:$0xff]  }
 0x257   :  { %5133 = vmatprep.subr.bf16.mxu0 %v8172_v20  ;;  %v8251_v20 = vld [vmem:[#allocation5 + $0xe68] ss:$16 sps:$4 sm:$0xff]   ;;  %v8256_v21 = vld [vmem:[#allocation5 + $0x1284] ss:$16 sps:$4 sm:$0xff]  }
 0x259   :  { %5544 = vmatpush1.bf16.msra.mxu1 %v8173_v24  ;;  %v8254_v24 = vld [vmem:[#allocation5 + $0x1280] ss:$16 sps:$4 sm:$0xff]  }
 0x25a   :  { %5134 = vmatpush1.bf16.msra.mxu0 %v8170_v22  ;;  %5545 = vmatprep.subr.bf16.mxu1 %v8181_v27  ;;  %v8259_v22 = vld [vmem:[#allocation5 + $0xe8c] ss:$16 sps:$4 sm:$0xff]  }
 0x25b   :  { %5135 = vmatprep.subr.bf16.mxu0 %v8178_v26  ;;  %v8262_v26 = vld [vmem:[#allocation5 + $0x12a4] ss:$16 sps:$4 sm:$0xff]   ;;  %v8265_v27 = vld [vmem:[#allocation5 + $0xeac] ss:$16 sps:$4 sm:$0xff]  }
 0x25d   :  { %5546 = vmatpush1.bf16.msra.mxu1 %v8179_v29  ;;  %v8263_v29 = vld [vmem:[#allocation5 + $0xea8] ss:$16 sps:$4 sm:$0xff]  }
 0x25e   :  { %5136 = vmatpush1.bf16.msra.mxu0 %v8176_v28  ;;  %5547 = vmatprep.subr.bf16.mxu1 %v8187_v31  ;;  %v8260_v28 = vld [vmem:[#allocation5 + $0x12a0] ss:$16 sps:$4 sm:$0xff]   ;;  %v8271_v31 = vld [vmem:[#allocation5 + $0xecc] ss:$16 sps:$4 sm:$0xff]  }
 0x25f   :  { %5137 = vmatprep.subr.bf16.mxu0 %v8184_v30  ;;  %v8268_v30 = vld [vmem:[#allocation5 + $0x12c4] ss:$16 sps:$4 sm:$0xff]  }
 0x261   :  { %5548 = vmatpush1.bf16.msra.mxu1 %v8185_v34  ;;  %v8269_v34 = vld [vmem:[#allocation5 + $0xec8] ss:$16 sps:$4 sm:$0xff]  }
 0x262   :  { %5138 = vmatpush1.bf16.msra.mxu0 %v8182_v33  ;;  %5549 = vmatprep.subr.bf16.mxu1 %v8193_v52  ;;  %v8266_v33 = vld [vmem:[#allocation5 + $0x12c0] ss:$16 sps:$4 sm:$0xff]   ;;  %v8277_v52 = vld [vmem:[#allocation5 + $0xeec] ss:$16 sps:$4 sm:$0xff]  }
 0x263   :  { %5139 = vmatprep.subr.bf16.mxu0 %v8190_v35  ;;  %v8274_v35 = vld [vmem:[#allocation5 + $0x12e4] ss:$16 sps:$4 sm:$0xff]  }
 0x265   :  { %5550 = vmatpush1.bf16.msra.mxu1 %v8191_v38  ;;  %v8275_v38 = vld [vmem:[#allocation5 + $0xee8] ss:$16 sps:$4 sm:$0xff]  }
 0x266   :  { %5140 = vmatpush1.bf16.msra.mxu0 %v8188_v37  ;;  %5551 = vmatprep.subr.bf16.mxu1 %v8199_v40  ;;  %v8272_v37 = vld [vmem:[#allocation5 + $0x12e0] ss:$16 sps:$4 sm:$0xff]   ;;  %v8283_v40 = vld [vmem:[#allocation5 + $0xf0c] ss:$16 sps:$4 sm:$0xff]  }
 0x267   :  { %5141 = vmatprep.subr.bf16.mxu0 %v8196_v39  ;;  %v8280_v39 = vld [vmem:[#allocation5 + $0x1304] ss:$16 sps:$4 sm:$0xff]  }
 0x269   :  { %5552 = vmatpush1.bf16.msra.mxu1 %v8197_v36  ;;  %v8281_v36 = vld [vmem:[#allocation5 + $0xf08] ss:$16 sps:$4 sm:$0xff]  }
 0x26a   :  { %5142 = vmatpush1.bf16.msra.mxu0 %v8194_v41  ;;  %5553 = vmatprep.subr.bf16.mxu1 %v8205_v43  ;;  %v8278_v41 = vld [vmem:[#allocation5 + $0x1300] ss:$16 sps:$4 sm:$0xff]   ;;  %v8289_v43 = vld [vmem:[#allocation5 + $0xf2c] ss:$16 sps:$4 sm:$0xff]  }
 0x26b   :  { %5143 = vmatprep.subr.bf16.mxu0 %v8202_v16  ;;  %v8286_v16 = vld [vmem:[#allocation5 + $0x1324] ss:$16 sps:$4 sm:$0xff]  }
 0x26d   :  { %5554 = vmatpush1.bf16.msra.mxu1 %v8203_v45  ;;  %v8287_v45 = vld [vmem:[#allocation5 + $0xf28] ss:$16 sps:$4 sm:$0xff]  }
 0x26e   :  { %5144 = vmatpush1.bf16.msra.mxu0 %v8200_v44  ;;  %5555 = vmatprep.subr.bf16.mxu1 %v8211_v23  ;;  %v8284_v44 = vld [vmem:[#allocation5 + $0x1320] ss:$16 sps:$4 sm:$0xff]   ;;  %v8295_v23 = vld [vmem:[#allocation5 + $0xf4c] ss:$16 sps:$4 sm:$0xff]  }
 0x26f   :  { %5145 = vmatprep.subr.bf16.mxu0 %v8208_v47  ;;  %v8292_v47 = vld [vmem:[#allocation5 + $0x1344] ss:$16 sps:$4 sm:$0xff]  }
 0x271   :  { %5556 = vmatpush1.bf16.msra.mxu1 %v8209_v49  ;;  %v8293_v49 = vld [vmem:[#allocation5 + $0xf48] ss:$16 sps:$4 sm:$0xff]  }
 0x272   :  { %5146 = vmatpush1.bf16.msra.mxu0 %v8206_v48  ;;  %5557 = vmatprep.subr.bf16.mxu1 %v8217_v53  ;;  %v8290_v48 = vld [vmem:[#allocation5 + $0x1340] ss:$16 sps:$4 sm:$0xff]   ;;  %v8301_v53 = vld [vmem:[#allocation5 + $0xf6c] ss:$16 sps:$4 sm:$0xff]  }
 0x273   :  { %5147 = vmatprep.subr.bf16.mxu0 %v8214_v51  ;;  %v8298_v51 = vld [vmem:[#allocation5 + $0x1364] ss:$16 sps:$4 sm:$0xff]  }
 0x275   :  { %5558 = vmatpush1.bf16.msra.mxu1 %v8215_v54  ;;  %v8299_v54 = vld [vmem:[#allocation5 + $0xf68] ss:$16 sps:$4 sm:$0xff]  }
 0x276   :  { %5148 = vmatpush1.bf16.msra.mxu0 %v8212_v25  ;;  %5559 = vmatprep.subr.bf16.mxu1 %v8223_v59  ;;  %v8296_v25 = vld [vmem:[#allocation5 + $0x1360] ss:$16 sps:$4 sm:$0xff]   ;;  %v8307_v59 = vld [vmem:[#allocation5 + $0xf8c] ss:$16 sps:$4 sm:$0xff]  }
 0x277   :  { %5149 = vmatprep.subr.bf16.mxu0 %v8220_v58  ;;  %v8304_v58 = vld [vmem:[#allocation5 + $0x1384] ss:$16 sps:$4 sm:$0xff]  }
 0x279   :  { %5560 = vmatpush1.bf16.msra.mxu1 %v8221_v8  ;;  %v8305_v8 = vld [vmem:[#allocation5 + $0xf88] ss:$16 sps:$4 sm:$0xff]  }
 0x27a   :  { %5150 = vmatpush1.bf16.msra.mxu0 %v8218_v60  ;;  %5561 = vmatprep.subr.bf16.mxu1 %v8229_v63  ;;  %v8302_v60 = vld [vmem:[#allocation5 + $0x1380] ss:$16 sps:$4 sm:$0xff]   ;;  %v8313_v63 = vld [vmem:[#allocation5 + $0xfac] ss:$16 sps:$4 sm:$0xff]  }
 0x27b   :  { %5151 = vmatprep.subr.bf16.mxu0 %v8226_v62  ;;  %v8310_v62 = vld [vmem:[#allocation5 + $0x13a4] ss:$16 sps:$4 sm:$0xff]  }
 0x27d   :  { %5562 = vmatpush1.bf16.msra.mxu1 %v8227_v0  ;;  %v8311_v0 = vld [vmem:[#allocation5 + $0xfa8] ss:$16 sps:$4 sm:$0xff]  }
 0x27e   :  { %5152 = vmatpush1.bf16.msra.mxu0 %v8224_v32  ;;  %5572 = vmatprep.subr.bf16.mxu1 %v8235_v4  ;;  %v8308_v32 = vld [vmem:[#allocation5 + $0x13a0] ss:$16 sps:$4 sm:$0xff]  }
 0x27f   :  { %5162 = vmatprep.subr.bf16.mxu0 %v8232_v3  ;;  %v8319_v3 = vld [vmem:[#allocation5 + $0xfcc] ss:$16 sps:$4 sm:$0xff]   ;;  %v8314_v4 = vld [vmem:[#allocation5 + $0x13c0] ss:$16 sps:$4 sm:$0xff]  }
 0x280   :  { %5564 = vmatmul.mubr.bf16.vlgmr.msra.gmra.mrb[4].mxu1 %v9106_v50  ;;  %v8253_v50 = vld [vmem:[#allocation5 + $0xe6c] ss:$16 sps:$4 sm:$0xff]  }
 0x281   :  { %5154 = vmatmul.mubr.bf16.vlgmr.msra.gmra.mrb[0].mxu0 %v9122_v11  ;;  %5573 = vmatpush1.bf16.msra.mxu1 %v8233_v7  ;;  %v8325_v7 = vld [vmem:[#allocation5 + $0xfec] ss:$16 sps:$4 sm:$0xff]  }
 0x282   :  { %5163 = vmatpush1.bf16.msra.mxu0 %v8230_v6  ;;  %5574 = vmatprep.subr.bf16.mxu1 %v8241_v9  ;;  %v8322_v6 = vld [vmem:[#allocation5 + $0x13e4] ss:$16 sps:$4 sm:$0xff]   ;;  %v8323_v9 = vld [vmem:[#allocation5 + $0xfe8] ss:$16 sps:$4 sm:$0xff]  }
 0x283   :  { %5164 = vmatprep.subr.bf16.mxu0 %v8238_v42  ;;  %5194 = vmatprep.mubr.bf16.mxu0 %v9124_v10  ;;  %v8320_v42 = vld [vmem:[#allocation5 + $0x13e0] ss:$16 sps:$4 sm:$0xff]  }
 0x284   :  { %5604 = vmatprep.mubr.bf16.mxu1 %v9108_v57  ;;  %v8257_v57 = vld [vmem:[#allocation5 + $0xe88] ss:$16 sps:$4 sm:$0xff]  }
 0x285   :  { %5575 = vmatpush1.bf16.msra.mxu1 %v8239_v13  ;;  %v8328_v13 = vld [vmem:[#allocation5 + $0x1404] ss:$16 sps:$4 sm:$0xff]  }
 0x286   :  { %5165 = vmatpush1.bf16.msra.mxu0 %v8236_v12  ;;  %5576 = vmatprep.subr.bf16.mxu1 %v8247_v46  ;;  %v133_v12 = vld [vmem:[#allocation2 + $0x90] sm:$0xff] }
 0x287   :  { %5166 = vmatprep.subr.bf16.mxu0 %v8244_v14  ;;  %v8331_v14 = vld [vmem:[#allocation5 + $0x100c] ss:$16 sps:$4 sm:$0xff]   ;;  %v9130_v46 = vpack.c.bf16 %v133_v12, %v133_v12  ;;  %v8412_v12 = vld [vmem:[#allocation5 + $0x15c4] ss:$16 sps:$4 sm:$0xff]  }
 0x289   :  { %5577 = vmatpush1.bf16.msra.mxu1 %v8245_v17  ;;  %v8326_v17 = vld [vmem:[#allocation5 + $0x1400] ss:$16 sps:$4 sm:$0xff]  }
 0x28a   :  { %5167 = vmatpush1.bf16.msra.mxu0 %v8242_v15  ;;  %5578 = vmatprep.subr.bf16.mxu1 %v8253_v50  ;;  %v136_v15 = vld [vmem:[#allocation2 + $0xa8] sm:$0xff]  ;;  %v8334_v50 = vld [vmem:[#allocation5 + $0x1424] ss:$16 sps:$4 sm:$0xff]  }
 0x28b   :  { %5168 = vmatprep.subr.bf16.mxu0 %v8250_v18  ;;  %v8329_v18 = vld [vmem:[#allocation5 + $0x1008] ss:$16 sps:$4 sm:$0xff]  }
 0x28d   :  { %5579 = vmatpush1.bf16.msra.mxu1 %v8251_v20  ;;  %v9132_v20 = vpack.c.bf16 %v136_v15, %v136_v15  ;;  %v8413_v15 = vld [vmem:[#allocation5 + $0x11c8] ss:$16 sps:$4 sm:$0xff]  }
 0x28e   :  { %5169 = vmatpush1.bf16.msra.mxu0 %v8248_v19  ;;  %5580 = vmatprep.subr.bf16.mxu1 %v8259_v22  ;;  %v8337_v19 = vld [vmem:[#allocation5 + $0x102c] ss:$16 sps:$4 sm:$0xff]   ;;  %v8335_v22 = vld [vmem:[#allocation5 + $0x1028] ss:$16 sps:$4 sm:$0xff]  }
 0x28f   :  { %5170 = vmatprep.subr.bf16.mxu0 %v8256_v21  ;;  %v8332_v21 = vld [vmem:[#allocation5 + $0x1420] ss:$16 sps:$4 sm:$0xff]  }
 0x291   :  { %5581 = vmatpush1.bf16.msra.mxu1 %v8257_v57  ;;  %v8343_v57 = vld [vmem:[#allocation5 + $0x104c] ss:$16 sps:$4 sm:$0xff]  }
 0x292   :  { %5171 = vmatpush1.bf16.msra.mxu0 %v8254_v24  ;;  %5582 = vmatprep.subr.bf16.mxu1 %v8265_v27  ;;  %v8340_v24 = vld [vmem:[#allocation5 + $0x1444] ss:$16 sps:$4 sm:$0xff]   ;;  %v8341_v27 = vld [vmem:[#allocation5 + $0x1048] ss:$16 sps:$4 sm:$0xff]  }
 0x293   :  { %5172 = vmatprep.subr.bf16.mxu0 %v8262_v26  ;;  %v8338_v26 = vld [vmem:[#allocation5 + $0x1440] ss:$16 sps:$4 sm:$0xff]  }
 0x295   :  { %5583 = vmatpush1.bf16.msra.mxu1 %v8263_v29  ;;  %v8344_v29 = vld [vmem:[#allocation5 + $0x1460] ss:$16 sps:$4 sm:$0xff]  }
 0x296   :  { %5173 = vmatpush1.bf16.msra.mxu0 %v8260_v28  ;;  %5584 = vmatprep.subr.bf16.mxu1 %v8271_v31  ;;  %v8346_v28 = vld [vmem:[#allocation5 + $0x1464] ss:$16 sps:$4 sm:$0xff]  }
 0x297   :  { %5174 = vmatprep.subr.bf16.mxu0 %v8268_v30  ;;  %v8347_v30 = vld [vmem:[#allocation5 + $0x1068] ss:$16 sps:$4 sm:$0xff]   ;;  %v8352_v31 = vld [vmem:[#allocation5 + $0x1484] ss:$16 sps:$4 sm:$0xff]  }
 0x299   :  { %5585 = vmatpush1.bf16.msra.mxu1 %v8269_v34  ;;  %v8350_v34 = vld [vmem:[#allocation5 + $0x1480] ss:$16 sps:$4 sm:$0xff]  }
 0x29a   :  { %5175 = vmatpush1.bf16.msra.mxu0 %v8266_v33  ;;  %5586 = vmatprep.subr.bf16.mxu1 %v8277_v52  ;;  %v8355_v33 = vld [vmem:[#allocation5 + $0x108c] ss:$16 sps:$4 sm:$0xff]  }
 0x29b   :  { %5176 = vmatprep.subr.bf16.mxu0 %v8274_v35  ;;  %v8358_v35 = vld [vmem:[#allocation5 + $0x14a4] ss:$16 sps:$4 sm:$0xff]   ;;  %v8361_v52 = vld [vmem:[#allocation5 + $0x10ac] ss:$16 sps:$4 sm:$0xff]  }
 0x29d   :  { %5587 = vmatpush1.bf16.msra.mxu1 %v8275_v38  ;;  %v8359_v38 = vld [vmem:[#allocation5 + $0x10a8] ss:$16 sps:$4 sm:$0xff]  }
 0x29e   :  { %5177 = vmatpush1.bf16.msra.mxu0 %v8272_v37  ;;  %5588 = vmatprep.subr.bf16.mxu1 %v8283_v40  ;;  %v8356_v37 = vld [vmem:[#allocation5 + $0x14a0] ss:$16 sps:$4 sm:$0xff]   ;;  %v8367_v40 = vld [vmem:[#allocation5 + $0x10cc] ss:$16 sps:$4 sm:$0xff]  }
 0x29f   :  { %5178 = vmatprep.subr.bf16.mxu0 %v8280_v39  ;;  %v8364_v39 = vld [vmem:[#allocation5 + $0x14c4] ss:$16 sps:$4 sm:$0xff]  }
 0x2a1   :  { %5589 = vmatpush1.bf16.msra.mxu1 %v8281_v36  ;;  %v8365_v36 = vld [vmem:[#allocation5 + $0x10c8] ss:$16 sps:$4 sm:$0xff]  }
 0x2a2   :  { %5179 = vmatpush1.bf16.msra.mxu0 %v8278_v41  ;;  %5590 = vmatprep.subr.bf16.mxu1 %v8289_v43  ;;  %v8362_v41 = vld [vmem:[#allocation5 + $0x14c0] ss:$16 sps:$4 sm:$0xff]   ;;  %v8373_v43 = vld [vmem:[#allocation5 + $0x10ec] ss:$16 sps:$4 sm:$0xff]  }
 0x2a3   :  { %5180 = vmatprep.subr.bf16.mxu0 %v8286_v16  ;;  %v8370_v16 = vld [vmem:[#allocation5 + $0x14e4] ss:$16 sps:$4 sm:$0xff]  }
 0x2a5   :  { %5591 = vmatpush1.bf16.msra.mxu1 %v8287_v45  ;;  %v8371_v45 = vld [vmem:[#allocation5 + $0x10e8] ss:$16 sps:$4 sm:$0xff]  }
 0x2a6   :  { %5181 = vmatpush1.bf16.msra.mxu0 %v8284_v44  ;;  %5592 = vmatprep.subr.bf16.mxu1 %v8295_v23  ;;  %v8368_v44 = vld [vmem:[#allocation5 + $0x14e0] ss:$16 sps:$4 sm:$0xff]   ;;  %v8379_v23 = vld [vmem:[#allocation5 + $0x110c] ss:$16 sps:$4 sm:$0xff]  }
 0x2a7   :  { %5182 = vmatprep.subr.bf16.mxu0 %v8292_v47  ;;  %v8376_v47 = vld [vmem:[#allocation5 + $0x1504] ss:$16 sps:$4 sm:$0xff]  }
 0x2a9   :  { %5593 = vmatpush1.bf16.msra.mxu1 %v8293_v49  ;;  %v8377_v49 = vld [vmem:[#allocation5 + $0x1108] ss:$16 sps:$4 sm:$0xff]  }
 0x2aa   :  { %5183 = vmatpush1.bf16.msra.mxu0 %v8290_v48  ;;  %5594 = vmatprep.subr.bf16.mxu1 %v8301_v53  ;;  %v8374_v48 = vld [vmem:[#allocation5 + $0x1500] ss:$16 sps:$4 sm:$0xff]   ;;  %v8385_v53 = vld [vmem:[#allocation5 + $0x112c] ss:$16 sps:$4 sm:$0xff]  }
 0x2ab   :  { %5184 = vmatprep.subr.bf16.mxu0 %v8298_v51  ;;  %v8382_v51 = vld [vmem:[#allocation5 + $0x1524] ss:$16 sps:$4 sm:$0xff]  }
 0x2ad   :  { %5595 = vmatpush1.bf16.msra.mxu1 %v8299_v54  ;;  %v8383_v54 = vld [vmem:[#allocation5 + $0x1128] ss:$16 sps:$4 sm:$0xff]  }
 0x2ae   :  { %5185 = vmatpush1.bf16.msra.mxu0 %v8296_v25  ;;  %5596 = vmatprep.subr.bf16.mxu1 %v8307_v59  ;;  %v8380_v25 = vld [vmem:[#allocation5 + $0x1520] ss:$16 sps:$4 sm:$0xff]   ;;  %v8391_v59 = vld [vmem:[#allocation5 + $0x114c] ss:$16 sps:$4 sm:$0xff]  }
 0x2af   :  { %5186 = vmatprep.subr.bf16.mxu0 %v8304_v58  ;;  %v8388_v58 = vld [vmem:[#allocation5 + $0x1544] ss:$16 sps:$4 sm:$0xff]  }
 0x2b1   :  { %5597 = vmatpush1.bf16.msra.mxu1 %v8305_v8  ;;  %v8389_v8 = vld [vmem:[#allocation5 + $0x1148] ss:$16 sps:$4 sm:$0xff]  }
 0x2b2   :  { %5187 = vmatpush1.bf16.msra.mxu0 %v8302_v60  ;;  %5598 = vmatprep.subr.bf16.mxu1 %v8313_v63  ;;  %v8386_v60 = vld [vmem:[#allocation5 + $0x1540] ss:$16 sps:$4 sm:$0xff]   ;;  %v8397_v63 = vld [vmem:[#allocation5 + $0x116c] ss:$16 sps:$4 sm:$0xff]  }
 0x2b3   :  { %5188 = vmatprep.subr.bf16.mxu0 %v8310_v62  ;;  %v8394_v62 = vld [vmem:[#allocation5 + $0x1564] ss:$16 sps:$4 sm:$0xff]  }
 0x2b5   :  { %5599 = vmatpush1.bf16.msra.mxu1 %v8311_v0  ;;  %v8395_v0 = vld [vmem:[#allocation5 + $0x1168] ss:$16 sps:$4 sm:$0xff]  }
 0x2b6   :  { %5189 = vmatpush1.bf16.msra.mxu0 %v8308_v32  ;;  %5600 = vmatprep.subr.bf16.mxu1 %v8319_v3  ;;  %v8392_v32 = vld [vmem:[#allocation5 + $0x1560] ss:$16 sps:$4 sm:$0xff]   ;;  %v8403_v3 = vld [vmem:[#allocation5 + $0x118c] ss:$16 sps:$4 sm:$0xff]  }
 0x2b7   :  { %5190 = vmatprep.subr.bf16.mxu0 %v8316_v2  ;;  %v8400_v2 = vld [vmem:[#allocation5 + $0x1584] ss:$16 sps:$4 sm:$0xff]  }
 0x2b9   :  { %5601 = vmatpush1.bf16.msra.mxu1 %v8317_v5  ;;  %v8401_v5 = vld [vmem:[#allocation5 + $0x1188] ss:$16 sps:$4 sm:$0xff]  }
 0x2ba   :  { %5191 = vmatpush1.bf16.msra.mxu0 %v8314_v4  ;;  %5602 = vmatprep.subr.bf16.mxu1 %v8325_v7  ;;  %v8398_v4 = vld [vmem:[#allocation5 + $0x1580] ss:$16 sps:$4 sm:$0xff]   ;;  %v8409_v7 = vld [vmem:[#allocation5 + $0x11ac] ss:$16 sps:$4 sm:$0xff]  }
 0x2bb   :  { %5192 = vmatprep.subr.bf16.mxu0 %v8322_v6  ;;  %v8406_v6 = vld [vmem:[#allocation5 + $0x15a4] ss:$16 sps:$4 sm:$0xff]  }
 0x2bd   :  { %5603 = vmatpush1.bf16.msra.mxu1 %v8323_v9  ;;  %v8407_v9 = vld [vmem:[#allocation5 + $0x11a8] ss:$16 sps:$4 sm:$0xff]  }
 0x2be   :  { %5193 = vmatpush1.bf16.msra.mxu0 %v8320_v42  ;;  %5613 = vmatprep.subr.bf16.mxu1 %v8331_v14  ;;  %v8404_v42 = vld [vmem:[#allocation5 + $0x15a0] ss:$16 sps:$4 sm:$0xff]  }
 0x2bf   :  { %5203 = vmatprep.subr.bf16.mxu0 %v8328_v13  ;;  %v8415_v13 = vld [vmem:[#allocation5 + $0x11cc] ss:$16 sps:$4 sm:$0xff]   ;;  %v8410_v14 = vld [vmem:[#allocation5 + $0x15c0] ss:$16 sps:$4 sm:$0xff]  }
 0x2c0   :  { %5605 = vmatmul.mubr.bf16.vlgmr.msra.gmra.mrb[4].mxu1 %v9114_v61  ;;  %v8349_v61 = vld [vmem:[#allocation5 + $0x106c] ss:$16 sps:$4 sm:$0xff]  }
 0x2c1   :  { %5195 = vmatmul.mubr.bf16.vlgmr.msra.gmra.mrb[0].mxu0 %v9130_v46  ;;  %5614 = vmatpush1.bf16.msra.mxu1 %v8329_v18  ;;  %v8421_v18 = vld [vmem:[#allocation5 + $0x11ec] ss:$16 sps:$4 sm:$0xff]  }
 0x2c2   :  { %5204 = vmatpush1.bf16.msra.mxu0 %v8326_v17  ;;  %5615 = vmatprep.subr.bf16.mxu1 %v8337_v19  ;;  %v8418_v17 = vld [vmem:[#allocation5 + $0x15e4] ss:$16 sps:$4 sm:$0xff]   ;;  %v8419_v19 = vld [vmem:[#allocation5 + $0x11e8] ss:$16 sps:$4 sm:$0xff]  }
 0x2c3   :  { %5205 = vmatprep.subr.bf16.mxu0 %v8334_v50  ;;  %5235 = vmatprep.mubr.bf16.mxu0 %v9132_v20  ;;  %v8416_v50 = vld [vmem:[#allocation5 + $0x15e0] ss:$16 sps:$4 sm:$0xff]  }
 0x2c4   :  { %5645 = vmatprep.mubr.bf16.mxu1 %v9116_v1  ;;  %v8353_v1 = vld [vmem:[#allocation5 + $0x1088] ss:$16 sps:$4 sm:$0xff]  }
 0x2c5   :  { %5616 = vmatpush1.bf16.msra.mxu1 %v8335_v22  ;;  %v8424_v22 = vld [vmem:[#allocation5 + $0x1604] ss:$16 sps:$4 sm:$0xff]  }
 0x2c6   :  { %5206 = vmatpush1.bf16.msra.mxu0 %v8332_v21  ;;  %5617 = vmatprep.subr.bf16.mxu1 %v8343_v57  ;;  %v135_v21 = vld [vmem:[#allocation2 + $0xa0] sm:$0xff] }
 0x2c7   :  { %5207 = vmatprep.subr.bf16.mxu0 %v8340_v24  ;;  %v8427_v24 = vld [vmem:[#allocation5 + $0x120c] ss:$16 sps:$4 sm:$0xff]   ;;  %v9138_v57 = vpack.c.bf16 %v135_v21, %v135_v21  ;;  %v8508_v21 = vld [vmem:[#allocation5 + $0x17c4] ss:$16 sps:$4 sm:$0xff]  }
 0x2c9   :  { %5618 = vmatpush1.bf16.msra.mxu1 %v8341_v27  ;;  %v8422_v27 = vld [vmem:[#allocation5 + $0x1600] ss:$16 sps:$4 sm:$0xff]  }
 0x2ca   :  { %5208 = vmatpush1.bf16.msra.mxu0 %v8338_v26  ;;  %5619 = vmatprep.subr.bf16.mxu1 %v8349_v61  ;;  %v138_v26 = vld [vmem:[#allocation2 + $0xb8] sm:$0xff]  ;;  %v8430_v61 = vld [vmem:[#allocation5 + $0x1624] ss:$16 sps:$4 sm:$0xff]  }
 0x2cb   :  { %5209 = vmatprep.subr.bf16.mxu0 %v8346_v28  ;;  %v8425_v28 = vld [vmem:[#allocation5 + $0x1208] ss:$16 sps:$4 sm:$0xff]  }
 0x2cd   :  { %5620 = vmatpush1.bf16.msra.mxu1 %v8347_v30  ;;  %v9140_v30 = vpack.c.bf16 %v138_v26, %v138_v26  ;;  %v8509_v26 = vld [vmem:[#allocation5 + $0x13c8] ss:$16 sps:$4 sm:$0xff]  }
 0x2ce   :  { %5210 = vmatpush1.bf16.msra.mxu0 %v8344_v29  ;;  %5621 = vmatprep.subr.bf16.mxu1 %v8355_v33  ;;  %v8433_v29 = vld [vmem:[#allocation5 + $0x122c] ss:$16 sps:$4 sm:$0xff]   ;;  %v8431_v33 = vld [vmem:[#allocation5 + $0x1228] ss:$16 sps:$4 sm:$0xff]  }
 0x2cf   :  { %5211 = vmatprep.subr.bf16.mxu0 %v8352_v31  ;;  %v8428_v31 = vld [vmem:[#allocation5 + $0x1620] ss:$16 sps:$4 sm:$0xff]  }
 0x2d1   :  { %5622 = vmatpush1.bf16.msra.mxu1 %v8353_v1  ;;  %v8439_v1 = vld [vmem:[#allocation5 + $0x124c] ss:$16 sps:$4 sm:$0xff]  }
 0x2d2   :  { %5212 = vmatpush1.bf16.msra.mxu0 %v8350_v34  ;;  %5623 = vmatprep.subr.bf16.mxu1 %v8361_v52  ;;  %v8436_v34 = vld [vmem:[#allocation5 + $0x1644] ss:$16 sps:$4 sm:$0xff]   ;;  %v8437_v52 = vld [vmem:[#allocation5 + $0x1248] ss:$16 sps:$4 sm:$0xff]  }
 0x2d3   :  { %5213 = vmatprep.subr.bf16.mxu0 %v8358_v35  ;;  %v8434_v35 = vld [vmem:[#allocation5 + $0x1640] ss:$16 sps:$4 sm:$0xff]  }
 0x2d5   :  { %5624 = vmatpush1.bf16.msra.mxu1 %v8359_v38  ;;  %v8440_v38 = vld [vmem:[#allocation5 + $0x1660] ss:$16 sps:$4 sm:$0xff]  }
 0x2d6   :  { %5214 = vmatpush1.bf16.msra.mxu0 %v8356_v37  ;;  %5625 = vmatprep.subr.bf16.mxu1 %v8367_v40  ;;  %v8442_v37 = vld [vmem:[#allocation5 + $0x1664] ss:$16 sps:$4 sm:$0xff]  }
 0x2d7   :  { %5215 = vmatprep.subr.bf16.mxu0 %v8364_v39  ;;  %v8443_v39 = vld [vmem:[#allocation5 + $0x1268] ss:$16 sps:$4 sm:$0xff]   ;;  %v8448_v40 = vld [vmem:[#allocation5 + $0x1684] ss:$16 sps:$4 sm:$0xff]  }
 0x2d9   :  { %5626 = vmatpush1.bf16.msra.mxu1 %v8365_v36  ;;  %v8446_v36 = vld [vmem:[#allocation5 + $0x1680] ss:$16 sps:$4 sm:$0xff]  }
 0x2da   :  { %5216 = vmatpush1.bf16.msra.mxu0 %v8362_v41  ;;  %5627 = vmatprep.subr.bf16.mxu1 %v8373_v43  ;;  %v8451_v41 = vld [vmem:[#allocation5 + $0x128c] ss:$16 sps:$4 sm:$0xff]  }
 0x2db   :  { %5217 = vmatprep.subr.bf16.mxu0 %v8370_v16  ;;  %v8454_v16 = vld [vmem:[#allocation5 + $0x16a4] ss:$16 sps:$4 sm:$0xff]   ;;  %v8457_v43 = vld [vmem:[#allocation5 + $0x12ac] ss:$16 sps:$4 sm:$0xff]  }
 0x2dd   :  { %5628 = vmatpush1.bf16.msra.mxu1 %v8371_v45  ;;  %v8455_v45 = vld [vmem:[#allocation5 + $0x12a8] ss:$16 sps:$4 sm:$0xff]  }
 0x2de   :  { %5218 = vmatpush1.bf16.msra.mxu0 %v8368_v44  ;;  %5629 = vmatprep.subr.bf16.mxu1 %v8379_v23  ;;  %v8452_v44 = vld [vmem:[#allocation5 + $0x16a0] ss:$16 sps:$4 sm:$0xff]   ;;  %v8463_v23 = vld [vmem:[#allocation5 + $0x12cc] ss:$16 sps:$4 sm:$0xff]  }
 0x2df   :  { %5219 = vmatprep.subr.bf16.mxu0 %v8376_v47  ;;  %v8460_v47 = vld [vmem:[#allocation5 + $0x16c4] ss:$16 sps:$4 sm:$0xff]  }
 0x2e1   :  { %5630 = vmatpush1.bf16.msra.mxu1 %v8377_v49  ;;  %v8461_v49 = vld [vmem:[#allocation5 + $0x12c8] ss:$16 sps:$4 sm:$0xff]  }
 0x2e2   :  { %5220 = vmatpush1.bf16.msra.mxu0 %v8374_v48  ;;  %5631 = vmatprep.subr.bf16.mxu1 %v8385_v53  ;;  %v8458_v48 = vld [vmem:[#allocation5 + $0x16c0] ss:$16 sps:$4 sm:$0xff]   ;;  %v8469_v53 = vld [vmem:[#allocation5 + $0x12ec] ss:$16 sps:$4 sm:$0xff]  }
 0x2e3   :  { %5221 = vmatprep.subr.bf16.mxu0 %v8382_v51  ;;  %v8466_v51 = vld [vmem:[#allocation5 + $0x16e4] ss:$16 sps:$4 sm:$0xff]  }
 0x2e5   :  { %5632 = vmatpush1.bf16.msra.mxu1 %v8383_v54  ;;  %v8467_v54 = vld [vmem:[#allocation5 + $0x12e8] ss:$16 sps:$4 sm:$0xff]  }
 0x2e6   :  { %5222 = vmatpush1.bf16.msra.mxu0 %v8380_v25  ;;  %5633 = vmatprep.subr.bf16.mxu1 %v8391_v59  ;;  %v8464_v25 = vld [vmem:[#allocation5 + $0x16e0] ss:$16 sps:$4 sm:$0xff]   ;;  %v8475_v59 = vld [vmem:[#allocation5 + $0x130c] ss:$16 sps:$4 sm:$0xff]  }
 0x2e7   :  { %5223 = vmatprep.subr.bf16.mxu0 %v8388_v58  ;;  %v8472_v58 = vld [vmem:[#allocation5 + $0x1704] ss:$16 sps:$4 sm:$0xff]  }
 0x2e9   :  { %5634 = vmatpush1.bf16.msra.mxu1 %v8389_v8  ;;  %v8473_v8 = vld [vmem:[#allocation5 + $0x1308] ss:$16 sps:$4 sm:$0xff]  }
 0x2ea   :  { %5224 = vmatpush1.bf16.msra.mxu0 %v8386_v60  ;;  %5635 = vmatprep.subr.bf16.mxu1 %v8397_v63  ;;  %v8470_v60 = vld [vmem:[#allocation5 + $0x1700] ss:$16 sps:$4 sm:$0xff]   ;;  %v8481_v63 = vld [vmem:[#allocation5 + $0x132c] ss:$16 sps:$4 sm:$0xff]  }
 0x2eb   :  { %5225 = vmatprep.subr.bf16.mxu0 %v8394_v62  ;;  %v8478_v62 = vld [vmem:[#allocation5 + $0x1724] ss:$16 sps:$4 sm:$0xff]  }
 0x2ed   :  { %5636 = vmatpush1.bf16.msra.mxu1 %v8395_v0  ;;  %v8479_v0 = vld [vmem:[#allocation5 + $0x1328] ss:$16 sps:$4 sm:$0xff]  }
 0x2ee   :  { %5226 = vmatpush1.bf16.msra.mxu0 %v8392_v32  ;;  %5637 = vmatprep.subr.bf16.mxu1 %v8403_v3  ;;  %v8476_v32 = vld [vmem:[#allocation5 + $0x1720] ss:$16 sps:$4 sm:$0xff]   ;;  %v8487_v3 = vld [vmem:[#allocation5 + $0x134c] ss:$16 sps:$4 sm:$0xff]  }
 0x2ef   :  { %5227 = vmatprep.subr.bf16.mxu0 %v8400_v2  ;;  %v8484_v2 = vld [vmem:[#allocation5 + $0x1744] ss:$16 sps:$4 sm:$0xff]  }
 0x2f1   :  { %5638 = vmatpush1.bf16.msra.mxu1 %v8401_v5  ;;  %v8485_v5 = vld [vmem:[#allocation5 + $0x1348] ss:$16 sps:$4 sm:$0xff]  }
 0x2f2   :  { %5228 = vmatpush1.bf16.msra.mxu0 %v8398_v4  ;;  %5639 = vmatprep.subr.bf16.mxu1 %v8409_v7  ;;  %v8482_v4 = vld [vmem:[#allocation5 + $0x1740] ss:$16 sps:$4 sm:$0xff]   ;;  %v8493_v7 = vld [vmem:[#allocation5 + $0x136c] ss:$16 sps:$4 sm:$0xff]  }
 0x2f3   :  { %5229 = vmatprep.subr.bf16.mxu0 %v8406_v6  ;;  %v8490_v6 = vld [vmem:[#allocation5 + $0x1764] ss:$16 sps:$4 sm:$0xff]  }
 0x2f5   :  { %5640 = vmatpush1.bf16.msra.mxu1 %v8407_v9  ;;  %v8491_v9 = vld [vmem:[#allocation5 + $0x1368] ss:$16 sps:$4 sm:$0xff]  }
 0x2f6   :  { %5230 = vmatpush1.bf16.msra.mxu0 %v8404_v42  ;;  %5641 = vmatprep.subr.bf16.mxu1 %v8415_v13  ;;  %v8488_v42 = vld [vmem:[#allocation5 + $0x1760] ss:$16 sps:$4 sm:$0xff]   ;;  %v8499_v13 = vld [vmem:[#allocation5 + $0x138c] ss:$16 sps:$4 sm:$0xff]  }
 0x2f7   :  { %5231 = vmatprep.subr.bf16.mxu0 %v8412_v12  ;;  %v8496_v12 = vld [vmem:[#allocation5 + $0x1784] ss:$16 sps:$4 sm:$0xff]  }
 0x2f9   :  { %5642 = vmatpush1.bf16.msra.mxu1 %v8413_v15  ;;  %v8497_v15 = vld [vmem:[#allocation5 + $0x1388] ss:$16 sps:$4 sm:$0xff]  }
 0x2fa   :  { %5232 = vmatpush1.bf16.msra.mxu0 %v8410_v14  ;;  %5643 = vmatprep.subr.bf16.mxu1 %v8421_v18  ;;  %v8494_v14 = vld [vmem:[#allocation5 + $0x1780] ss:$16 sps:$4 sm:$0xff]   ;;  %v8505_v18 = vld [vmem:[#allocation5 + $0x13ac] ss:$16 sps:$4 sm:$0xff]  }
 0x2fb   :  { %5233 = vmatprep.subr.bf16.mxu0 %v8418_v17  ;;  %v8502_v17 = vld [vmem:[#allocation5 + $0x17a4] ss:$16 sps:$4 sm:$0xff]  }
 0x2fd   :  { %5644 = vmatpush1.bf16.msra.mxu1 %v8419_v19  ;;  %v8503_v19 = vld [vmem:[#allocation5 + $0x13a8] ss:$16 sps:$4 sm:$0xff]  }
 0x2fe   :  { %5234 = vmatpush1.bf16.msra.mxu0 %v8416_v50  ;;  %5654 = vmatprep.subr.bf16.mxu1 %v8427_v24  ;;  %v8500_v50 = vld [vmem:[#allocation5 + $0x17a0] ss:$16 sps:$4 sm:$0xff]  }
 0x2ff   :  { %5244 = vmatprep.subr.bf16.mxu0 %v8424_v22  ;;  %v8511_v22 = vld [vmem:[#allocation5 + $0x13cc] ss:$16 sps:$4 sm:$0xff]   ;;  %v8506_v24 = vld [vmem:[#allocation5 + $0x17c0] ss:$16 sps:$4 sm:$0xff]  }
 0x300   :  { %5646 = vmatmul.mubr.bf16.vlgmr.msra.gmra.mrb[4].mxu1 %v9122_v11  ;;  %v8445_v11 = vld [vmem:[#allocation5 + $0x126c] ss:$16 sps:$4 sm:$0xff]  }
 0x301   :  { %5236 = vmatmul.mubr.bf16.vlgmr.msra.gmra.mrb[0].mxu0 %v9138_v57  ;;  %5655 = vmatpush1.bf16.msra.mxu1 %v8425_v28  ;;  %v8517_v28 = vld [vmem:[#allocation5 + $0x13ec] ss:$16 sps:$4 sm:$0xff]  }
 0x302   :  { %5245 = vmatpush1.bf16.msra.mxu0 %v8422_v27  ;;  %5656 = vmatprep.subr.bf16.mxu1 %v8433_v29  ;;  %v8514_v27 = vld [vmem:[#allocation5 + $0x17e4] ss:$16 sps:$4 sm:$0xff]   ;;  %v8515_v29 = vld [vmem:[#allocation5 + $0x13e8] ss:$16 sps:$4 sm:$0xff]  }
 0x303   :  { %5246 = vmatprep.subr.bf16.mxu0 %v8430_v61  ;;  %5276 = vmatprep.mubr.bf16.mxu0 %v9140_v30  ;;  %v8512_v61 = vld [vmem:[#allocation5 + $0x17e0] ss:$16 sps:$4 sm:$0xff]  }
 0x304   :  { %5686 = vmatprep.mubr.bf16.mxu1 %v9124_v10  ;;  %v8449_v10 = vld [vmem:[#allocation5 + $0x1288] ss:$16 sps:$4 sm:$0xff]  }
 0x305   :  { %5657 = vmatpush1.bf16.msra.mxu1 %v8431_v33  ;;  %v8520_v33 = vld [vmem:[#allocation5 + $0x140c] ss:$16 sps:$4 sm:$0xff]  }
 0x306   :  { %5247 = vmatpush1.bf16.msra.mxu0 %v8428_v31  ;;  %5658 = vmatprep.subr.bf16.mxu1 %v8439_v1  ;;  %v137_v31 = vld [vmem:[#allocation2 + $0xb0] sm:$0xff]  ;;  %v8518_v1 = vld [vmem:[#allocation5 + $0x1408] ss:$16 sps:$4 sm:$0xff]  }
 0x307   :  { %5248 = vmatprep.subr.bf16.mxu0 %v8436_v34  ;;  %v9146_v34 = vpack.c.bf16 %v137_v31, %v137_v31  ;;  %v8565_v31 = vld [vmem:[#allocation5 + $0x15ec] ss:$16 sps:$4 sm:$0xff]  }
 0x309   :  { %5659 = vmatpush1.bf16.msra.mxu1 %v8437_v52  ;;  %v8614_v52 = vld [vmem:[#allocation8] ss:$8 sps:$4 sm:$0xff]  }
 0x30a   :  { %5249 = vmatpush1.bf16.msra.mxu0 %v8434_v35  ;;  %5660 = vmatprep.subr.bf16.mxu1 %v8445_v11  ;;  %v8523_v35 = vld [vmem:[#allocation5 + $0x142c] ss:$16 sps:$4 sm:$0xff]   ;;  %v8521_v11 = vld [vmem:[#allocation5 + $0x1428] ss:$16 sps:$4 sm:$0xff]  }
 0x30b   :  { %5250 = vmatprep.subr.bf16.mxu0 %v8442_v37  ;;  %v8616_v37 = vld [vmem:[#allocation8 + $0x4] ss:$8 sps:$4 sm:$0xff]  }
 0x30d   :  { %5661 = vmatpush1.bf16.msra.mxu1 %v8443_v39  ;;  %v8526_v39 = vld [vmem:[#allocation5 + $0x144c] ss:$16 sps:$4 sm:$0xff]  }
 0x30e   :  { %5251 = vmatpush1.bf16.msra.mxu0 %v8440_v38  ;;  %5662 = vmatprep.subr.bf16.mxu1 %v8451_v41  ;;  %v8619_v38 = vld [vmem:[#allocation8 + $0x14] ss:$8 sps:$4 sm:$0xff]   ;;  %v8622_v41 = vld [vmem:[#allocation8 + $0x24] ss:$8 sps:$4 sm:$0xff]  }
 0x30f   :  { %5252 = vmatprep.subr.bf16.mxu0 %v8448_v40  ;;  %v8617_v40 = vld [vmem:[#allocation8 + $0x10] ss:$8 sps:$4 sm:$0xff]  }
 0x311   :  { %5663 = vmatpush1.bf16.msra.mxu1 %v8449_v10  ;;  %v8529_v10 = vld [vmem:[#allocation5 + $0x146c] ss:$16 sps:$4 sm:$0xff]  }
 0x312   :  { %5253 = vmatpush1.bf16.msra.mxu0 %v8446_v36  ;;  %5664 = vmatprep.subr.bf16.mxu1 %v8457_v43  ;;  %v8524_v36 = vld [vmem:[#allocation5 + $0x1448] ss:$16 sps:$4 sm:$0xff]  }
 0x313   :  { %5254 = vmatprep.subr.bf16.mxu0 %v8454_v16  ;;  %v8625_v16 = vld [vmem:[#allocation8 + $0x34] ss:$8 sps:$4 sm:$0xff]  }
 0x314   :  { %v8527_v43 = vld [vmem:[#allocation5 + $0x1468] ss:$16 sps:$4 sm:$0xff]  }
 0x315   :  { %5665 = vmatpush1.bf16.msra.mxu1 %v8455_v45  ;;  %v8628_v45 = vld [vmem:[#allocation8 + $0x44] ss:$8 sps:$4 sm:$0xff]  }
 0x316   :  { %5255 = vmatpush1.bf16.msra.mxu0 %v8452_v44  ;;  %5666 = vmatprep.subr.bf16.mxu1 %v8463_v23  ;;  %v8623_v44 = vld [vmem:[#allocation8 + $0x30] ss:$8 sps:$4 sm:$0xff]  }
 0x317   :  { %5256 = vmatprep.subr.bf16.mxu0 %v8460_v47  ;;  %v8530_v47 = vld [vmem:[#allocation5 + $0x1488] ss:$16 sps:$4 sm:$0xff]   ;;  %v8535_v23 = vld [vmem:[#allocation5 + $0x14ac] ss:$16 sps:$4 sm:$0xff]  }
 0x319   :  { %5667 = vmatpush1.bf16.msra.mxu1 %v8461_v49  ;;  %v8631_v49 = vld [vmem:[#allocation8 + $0x54] ss:$8 sps:$4 sm:$0xff]  }
 0x31a   :  { %5257 = vmatpush1.bf16.msra.mxu0 %v8458_v48  ;;  %5668 = vmatprep.subr.bf16.mxu1 %v8469_v53  ;;  %v8626_v48 = vld [vmem:[#allocation8 + $0x40] ss:$8 sps:$4 sm:$0xff]  }
 0x31b   :  { %5258 = vmatprep.subr.bf16.mxu0 %v8466_v51  ;;  %v8533_v51 = vld [vmem:[#allocation5 + $0x14a8] ss:$16 sps:$4 sm:$0xff]   ;;  %v8538_v53 = vld [vmem:[#allocation5 + $0x14cc] ss:$16 sps:$4 sm:$0xff]  }
 0x31d   :  { %5669 = vmatpush1.bf16.msra.mxu1 %v8467_v54  ;;  %v8634_v54 = vld [vmem:[#allocation8 + $0x64] ss:$8 sps:$4 sm:$0xff]  }
 0x31e   :  { %5259 = vmatpush1.bf16.msra.mxu0 %v8464_v25  ;;  %5670 = vmatprep.subr.bf16.mxu1 %v8475_v59  ;;  %v8629_v25 = vld [vmem:[#allocation8 + $0x50] ss:$8 sps:$4 sm:$0xff]  }
 0x31f   :  { %5260 = vmatprep.subr.bf16.mxu0 %v8472_v58  ;;  %v8536_v58 = vld [vmem:[#allocation5 + $0x14c8] ss:$16 sps:$4 sm:$0xff]   ;;  %v8541_v59 = vld [vmem:[#allocation5 + $0x14ec] ss:$16 sps:$4 sm:$0xff]  }
 0x321   :  { %5671 = vmatpush1.bf16.msra.mxu1 %v8473_v8  ;;  %v8637_v8 = vld [vmem:[#allocation8 + $0x74] ss:$8 sps:$4 sm:$0xff]  }
 0x322   :  { %5261 = vmatpush1.bf16.msra.mxu0 %v8470_v60  ;;  %5672 = vmatprep.subr.bf16.mxu1 %v8481_v63  ;;  %v8632_v60 = vld [vmem:[#allocation8 + $0x60] ss:$8 sps:$4 sm:$0xff]  }
 0x323   :  { %5262 = vmatprep.subr.bf16.mxu0 %v8478_v62  ;;  %v8539_v62 = vld [vmem:[#allocation5 + $0x14e8] ss:$16 sps:$4 sm:$0xff]   ;;  %v8544_v63 = vld [vmem:[#allocation5 + $0x150c] ss:$16 sps:$4 sm:$0xff]  }
 0x325   :  { %5673 = vmatpush1.bf16.msra.mxu1 %v8479_v0  ;;  %v8640_v0 = vld [vmem:[#allocation8 + $0x84] ss:$8 sps:$4 sm:$0xff]  }
 0x326   :  { %5263 = vmatpush1.bf16.msra.mxu0 %v8476_v32  ;;  %5674 = vmatprep.subr.bf16.mxu1 %v8487_v3  ;;  %v8635_v32 = vld [vmem:[#allocation8 + $0x70] ss:$8 sps:$4 sm:$0xff]  }
 0x327   :  { %5264 = vmatprep.subr.bf16.mxu0 %v8484_v2  ;;  %v8542_v2 = vld [vmem:[#allocation5 + $0x1508] ss:$16 sps:$4 sm:$0xff]   ;;  %v8547_v3 = vld [vmem:[#allocation5 + $0x152c] ss:$16 sps:$4 sm:$0xff]  }
 0x329   :  { %5675 = vmatpush1.bf16.msra.mxu1 %v8485_v5  ;;  %v8643_v5 = vld [vmem:[#allocation8 + $0x94] ss:$8 sps:$4 sm:$0xff]  }
 0x32a   :  { %5265 = vmatpush1.bf16.msra.mxu0 %v8482_v4  ;;  %5676 = vmatprep.subr.bf16.mxu1 %v8493_v7  ;;  %v8638_v4 = vld [vmem:[#allocation8 + $0x80] ss:$8 sps:$4 sm:$0xff]  }
 0x32b   :  { %5266 = vmatprep.subr.bf16.mxu0 %v8490_v6  ;;  %v8545_v6 = vld [vmem:[#allocation5 + $0x1528] ss:$16 sps:$4 sm:$0xff]   ;;  %v8550_v7 = vld [vmem:[#allocation5 + $0x154c] ss:$16 sps:$4 sm:$0xff]  }
 0x32d   :  { %5677 = vmatpush1.bf16.msra.mxu1 %v8491_v9  ;;  %v8646_v9 = vld [vmem:[#allocation8 + $0xa4] ss:$8 sps:$4 sm:$0xff]  }
 0x32e   :  { %5267 = vmatpush1.bf16.msra.mxu0 %v8488_v42  ;;  %5678 = vmatprep.subr.bf16.mxu1 %v8499_v13  ;;  %v8641_v42 = vld [vmem:[#allocation8 + $0x90] ss:$8 sps:$4 sm:$0xff]  }
 0x32f   :  { %5268 = vmatprep.subr.bf16.mxu0 %v8496_v12  ;;  %v8548_v12 = vld [vmem:[#allocation5 + $0x1548] ss:$16 sps:$4 sm:$0xff]   ;;  %v8553_v13 = vld [vmem:[#allocation5 + $0x156c] ss:$16 sps:$4 sm:$0xff]  }
 0x331   :  { %5679 = vmatpush1.bf16.msra.mxu1 %v8497_v15  ;;  %v8649_v15 = vld [vmem:[#allocation8 + $0xb4] ss:$8 sps:$4 sm:$0xff]  }
 0x332   :  { %5269 = vmatpush1.bf16.msra.mxu0 %v8494_v14  ;;  %5680 = vmatprep.subr.bf16.mxu1 %v8505_v18  ;;  %v8644_v14 = vld [vmem:[#allocation8 + $0xa0] ss:$8 sps:$4 sm:$0xff]  }
 0x333   :  { %5270 = vmatprep.subr.bf16.mxu0 %v8502_v17  ;;  %v8551_v17 = vld [vmem:[#allocation5 + $0x1568] ss:$16 sps:$4 sm:$0xff]   ;;  %v8556_v18 = vld [vmem:[#allocation5 + $0x158c] ss:$16 sps:$4 sm:$0xff]  }
 0x335   :  { %5681 = vmatpush1.bf16.msra.mxu1 %v8503_v19  ;;  %v8652_v19 = vld [vmem:[#allocation8 + $0xc4] ss:$8 sps:$4 sm:$0xff]  }
 0x336   :  { %5271 = vmatpush1.bf16.msra.mxu0 %v8500_v50  ;;  %5682 = vmatprep.subr.bf16.mxu1 %v8511_v22  ;;  %v8647_v50 = vld [vmem:[#allocation8 + $0xb0] ss:$8 sps:$4 sm:$0xff]  }
 0x337   :  { %5272 = vmatprep.subr.bf16.mxu0 %v8508_v21  ;;  %v8554_v21 = vld [vmem:[#allocation5 + $0x1588] ss:$16 sps:$4 sm:$0xff]   ;;  %v8559_v22 = vld [vmem:[#allocation5 + $0x15ac] ss:$16 sps:$4 sm:$0xff]  }
 0x339   :  { %5683 = vmatpush1.bf16.msra.mxu1 %v8509_v26  ;;  %v8655_v26 = vld [vmem:[#allocation8 + $0xd4] ss:$8 sps:$4 sm:$0xff]  }
 0x33a   :  { %5273 = vmatpush1.bf16.msra.mxu0 %v8506_v24  ;;  %5684 = vmatprep.subr.bf16.mxu1 %v8517_v28  ;;  %v8650_v24 = vld [vmem:[#allocation8 + $0xc0] ss:$8 sps:$4 sm:$0xff]  }
 0x33b   :  { %5274 = vmatprep.subr.bf16.mxu0 %v8514_v27  ;;  %v8557_v27 = vld [vmem:[#allocation5 + $0x15a8] ss:$16 sps:$4 sm:$0xff]   ;;  %v8562_v28 = vld [vmem:[#allocation5 + $0x15cc] ss:$16 sps:$4 sm:$0xff]  }
 0x33d   :  { %5685 = vmatpush1.bf16.msra.mxu1 %v8515_v29  ;;  %v8560_v29 = vld [vmem:[#allocation5 + $0x15c8] ss:$16 sps:$4 sm:$0xff]  }
 0x33e   :  { %5275 = vmatpush1.bf16.msra.mxu0 %v8512_v61  ;;  %5695 = vmatprep.subr.bf16.mxu1 %v8520_v33  ;;  %v8653_v61 = vld [vmem:[#allocation8 + $0xd0] ss:$8 sps:$4 sm:$0xff]   ;;  %v8563_v33 = vld [vmem:[#allocation5 + $0x15e8] ss:$16 sps:$4 sm:$0xff]  }
 0x33f   :  { %6189 = vmatprep.subr.bf16.mxu0 %v8616_v37  ;;  %v8569_v37 = vld [vmem:[#allocation5 + $0x1628] ss:$16 sps:$4 sm:$0xff]  }
 0x340   :  { %5687 = vmatmul.mubr.bf16.vlgmr.msra.gmra.mrb[4].mxu1 %v9130_v46  ;;  %v8620_v46 = vld [vmem:[#allocation8 + $0x20] ss:$8 sps:$4 sm:$0xff]  }
 0x341   :  { %5277 = vmatmul.mubr.bf16.vlgmr.msra.gmra.mrb[0].mxu0 %v9146_v34  ;;  %5696 = vmatpush1.bf16.msra.mxu1 %v8518_v1  ;;  %v8568_v1 = vld [vmem:[#allocation5 + $0x160c] ss:$16 sps:$4 sm:$0xff]  }
 0x342   :  { %5727 = vmatprep.mubr.bf16.mxu1 %v9132_v20  ;;  %5697 = vmatprep.subr.bf16.mxu1 %v8523_v35  ;;  %v8532_v20 = vld [vmem:[#allocation5 + $0x148c] ss:$16 sps:$4 sm:$0xff]   ;;  %v8566_v35 = vld [vmem:[#allocation5 + $0x1608] ss:$16 sps:$4 sm:$0xff]  }
 0x343   :  { %6190 = vmatpush1.bf16.msra.mxu0 %v8614_v52  ;;  %v8571_v52 = vld [vmem:[#allocation5 + $0x162c] ss:$16 sps:$4 sm:$0xff]  }
 0x344   :  { %6191 = vmatprep.subr.bf16.mxu0 %v8619_v38  ;;  %v8572_v38 = vld [vmem:[#allocation5 + $0x1648] ss:$16 sps:$4 sm:$0xff]  }
 0x345   :  { %5698 = vmatpush1.bf16.msra.mxu1 %v8521_v11  ;;  %v8574_v11 = vld [vmem:[#allocation5 + $0x164c] ss:$16 sps:$4 sm:$0xff]  }
 0x346   :  { %5699 = vmatprep.subr.bf16.mxu1 %v8526_v39  ;;  %v8577_v39 = vld [vmem:[#allocation5 + $0x166c] ss:$16 sps:$4 sm:$0xff]  }
 0x347   :  { %6192 = vmatpush1.bf16.msra.mxu0 %v8617_v40  ;;  %v8575_v40 = vld [vmem:[#allocation5 + $0x1668] ss:$16 sps:$4 sm:$0xff]  }
 0x348   :  { %6193 = vmatprep.subr.bf16.mxu0 %v8622_v41  ;;  %v8580_v41 = vld [vmem:[#allocation5 + $0x168c] ss:$16 sps:$4 sm:$0xff]  }
 0x349   :  { %5700 = vmatpush1.bf16.msra.mxu1 %v8524_v36  ;;  %v8578_v36 = vld [vmem:[#allocation5 + $0x1688] ss:$16 sps:$4 sm:$0xff]  }
 0x34a   :  { %5701 = vmatprep.subr.bf16.mxu1 %v8529_v10  ;;  %v8583_v10 = vld [vmem:[#allocation5 + $0x16ac] ss:$16 sps:$4 sm:$0xff]  }
 0x34b   :  { %6194 = vmatpush1.bf16.msra.mxu0 %v8620_v46  ;;  %v8586_v46 = vld [vmem:[#allocation5 + $0x16cc] ss:$16 sps:$4 sm:$0xff]  }
 0x34c   :  { %6195 = vmatprep.subr.bf16.mxu0 %v8625_v16  ;;  %v8658_v16 = vld [vmem:[#allocation8 + $0xe4] ss:$8 sps:$4 sm:$0xff]  }
 0x34d   :  { %5702 = vmatpush1.bf16.msra.mxu1 %v8527_v43  ;;  %v8584_v43 = vld [vmem:[#allocation5 + $0x16c8] ss:$16 sps:$4 sm:$0xff]  }
 0x34e   :  { %5703 = vmatprep.subr.bf16.mxu1 %v8532_v20  ;;  %v8589_v20 = vld [vmem:[#allocation5 + $0x16ec] ss:$16 sps:$4 sm:$0xff]  }
 0x34f   :  { %6196 = vmatpush1.bf16.msra.mxu0 %v8623_v44  ;;  %v8661_v44 = vld [vmem:[#allocation8 + $0xf4] ss:$8 sps:$4 sm:$0xff]  }
 0x350   :  { %6197 = vmatprep.subr.bf16.mxu0 %v8628_v45  ;;  %v8659_v45 = vld [vmem:[#allocation8 + $0xf0] ss:$8 sps:$4 sm:$0xff]  }
 0x351   :  { %5704 = vmatpush1.bf16.msra.mxu1 %v8530_v47  ;;  %v8587_v47 = vld [vmem:[#allocation5 + $0x16e8] ss:$16 sps:$4 sm:$0xff]  }
 0x352   :  { %5705 = vmatprep.subr.bf16.mxu1 %v8535_v23  ;;  %v8592_v23 = vld [vmem:[#allocation5 + $0x170c] ss:$16 sps:$4 sm:$0xff]  }
 0x353   :  { %6198 = vmatpush1.bf16.msra.mxu0 %v8626_v48  ;;  %v8590_v48 = vld [vmem:[#allocation5 + $0x1708] ss:$16 sps:$4 sm:$0xff]  }
 0x354   :  { %6199 = vmatprep.subr.bf16.mxu0 %v8631_v49  ;;  %v8664_v49 = vld [vmem:[#allocation8 + $0x104] ss:$8 sps:$4 sm:$0xff]  }
 0x355   :  { %5706 = vmatpush1.bf16.msra.mxu1 %v8533_v51  ;;  %v8595_v51 = vld [vmem:[#allocation5 + $0x172c] ss:$16 sps:$4 sm:$0xff]  }
 0x356   :  { %5707 = vmatprep.subr.bf16.mxu1 %v8538_v53  ;;  %v8593_v53 = vld [vmem:[#allocation5 + $0x1728] ss:$16 sps:$4 sm:$0xff]  }
 0x357   :  { %6200 = vmatpush1.bf16.msra.mxu0 %v8629_v25  ;;  %v8598_v25 = vld [vmem:[#allocation5 + $0x174c] ss:$16 sps:$4 sm:$0xff]  }
 0x358   :  { %6201 = vmatprep.subr.bf16.mxu0 %v8634_v54  ;;  %v8596_v54 = vld [vmem:[#allocation5 + $0x1748] ss:$16 sps:$4 sm:$0xff]  }
 0x359   :  { %5708 = vmatpush1.bf16.msra.mxu1 %v8536_v58  ;;  %v8601_v58 = vld [vmem:[#allocation5 + $0x176c] ss:$16 sps:$4 sm:$0xff]  }
 0x35a   :  { %5709 = vmatprep.subr.bf16.mxu1 %v8541_v59  ;;  %v8599_v59 = vld [vmem:[#allocation5 + $0x1768] ss:$16 sps:$4 sm:$0xff]  }
 0x35b   :  { %6202 = vmatpush1.bf16.msra.mxu0 %v8632_v60  ;;  %v8604_v60 = vld [vmem:[#allocation5 + $0x178c] ss:$16 sps:$4 sm:$0xff]  }
 0x35c   :  { %6203 = vmatprep.subr.bf16.mxu0 %v8637_v8  ;;  %v8602_v8 = vld [vmem:[#allocation5 + $0x1788] ss:$16 sps:$4 sm:$0xff]  }
 0x35d   :  { %5710 = vmatpush1.bf16.msra.mxu1 %v8539_v62  ;;  %v8607_v62 = vld [vmem:[#allocation5 + $0x17ac] ss:$16 sps:$4 sm:$0xff]  }
 0x35e   :  { %5711 = vmatprep.subr.bf16.mxu1 %v8544_v63  ;;  %v8605_v63 = vld [vmem:[#allocation5 + $0x17a8] ss:$16 sps:$4 sm:$0xff]  }
 0x35f   :  { %6204 = vmatpush1.bf16.msra.mxu0 %v8635_v32  ;;  %v8610_v32 = vld [vmem:[#allocation5 + $0x17cc] ss:$16 sps:$4 sm:$0xff]  }
 0x360   :  { %6205 = vmatprep.subr.bf16.mxu0 %v8640_v0  ;;  %v8608_v0 = vld [vmem:[#allocation5 + $0x17c8] ss:$16 sps:$4 sm:$0xff]  }
 0x361   :  { %5712 = vmatpush1.bf16.msra.mxu1 %v8542_v2  ;;  %v8613_v2 = vld [vmem:[#allocation5 + $0x17ec] ss:$16 sps:$4 sm:$0xff]  }
 0x362   :  { %5713 = vmatprep.subr.bf16.mxu1 %v8547_v3  ;;  %v8611_v3 = vld [vmem:[#allocation5 + $0x17e8] ss:$16 sps:$4 sm:$0xff]  }
 0x363   :  { %6206 = vmatpush1.bf16.msra.mxu0 %v8638_v4  ;;  %v933_v4 = vlaneseq }
 0x364   :  { %6207 = vmatprep.subr.bf16.mxu0 %v8643_v5 }
 0x365   :  { %5714 = vmatpush1.bf16.msra.mxu1 %v8545_v6  ;;  %v9154_v5 = vshrl.u32 %v933_v4, 7 }
 0x366   :  { %5715 = vmatprep.subr.bf16.mxu1 %v8550_v7  ;;  %v9157_v7 = vld [vmem:[#allocation7] sm:$0xf] }
 0x367   :  { %6208 = vmatpush1.bf16.msra.mxu0 %v8641_v42  ;;  %v935_v6 = vsub.s32 0, %v9154_v5  ;;  %v939_v42 = vsub.s32 1, %v9154_v5  ;;  %v943_v4 = vsub.s32 2, %v9154_v5 }
 0x368   :  { %6209 = vmatprep.subr.bf16.mxu0 %v8646_v9 }
 0x369   :  { %5716 = vmatpush1.bf16.msra.mxu1 %v8548_v12  ;;  %v936_v9 = vrot.slane %v9157_v7, %v935_v6  ;;  %v940_v12 = vrot.slane %v9157_v7, %v939_v42 }
 0x36a   :  { %5717 = vmatprep.subr.bf16.mxu1 %v8553_v13 }
 0x36b   :  { %6210 = vmatpush1.bf16.msra.mxu0 %v8644_v14  ;;  %v4828_v13 = vadd.f32 %v9094_v55, %v936_v9  ;;  %v8710_v55 = vld [vmem:[#allocation11 + $0x40] sm:$0xff]   ;;  %v947_v9 = vsub.s32 3, %v9154_v5 }
 0x36c   :  { %6211 = vmatprep.subr.bf16.mxu0 %v8649_v15 }
 0x36d   :  { %5718 = vmatpush1.bf16.msra.mxu1 %v8551_v17 }
 0x36e   :  { %5719 = vmatprep.subr.bf16.mxu1 %v8556_v18 }
 0x36f   :  { %6212 = vmatpush1.bf16.msra.mxu0 %v8647_v50 }
 0x370   :  { %6213 = vmatprep.subr.bf16.mxu0 %v8652_v19 }
 0x371   :  { %5720 = vmatpush1.bf16.msra.mxu1 %v8554_v21 }
 0x372   :  { %5721 = vmatprep.subr.bf16.mxu1 %v8559_v22 }
 0x373   :  { %6214 = vmatpush1.bf16.msra.mxu0 %v8650_v24 }
 0x374   :  { %6215 = vmatprep.subr.bf16.mxu0 %v8655_v26 }
 0x375   :  { %5722 = vmatpush1.bf16.msra.mxu1 %v8557_v27 }
 0x376   :  { %5723 = vmatprep.subr.bf16.mxu1 %v8562_v28  ;;  %v8662_v28 = vld [vmem:[#allocation8 + $0x100] ss:$8 sps:$4 sm:$0xff]  }
 0x377   :  { %6216 = vmatpush1.bf16.msra.mxu0 %v8653_v61 }
 0x378   :  { %6217 = vmatprep.subr.bf16.mxu0 %v8658_v16  ;;  %v8719_v16 = vld [vmem:[#allocation11 + $0x20] sm:$0xff]  }
 0x379   :  { %5724 = vmatpush1.bf16.msra.mxu1 %v8560_v29  ;;  %v8667_v29 = vld [vmem:[#allocation8 + $0x114] ss:$8 sps:$4 sm:$0xff]  }
 0x37a   :  { %5725 = vmatprep.subr.bf16.mxu1 %v8565_v31  ;;  %v8712_v31 = vld [vmem:[#allocation11 + $0x48] sm:$0xff]  }
 0x37d   :  { %5726 = vmatpush1.bf16.msra.mxu1 %v8563_v33  ;;  %v8665_v33 = vld [vmem:[#allocation8 + $0x110] ss:$8 sps:$4 sm:$0xff]  }
 0x37e   :  { %5736 = vmatprep.subr.bf16.mxu1 %v8568_v1  ;;  %v8670_v1 = vld [vmem:[#allocation8 + $0x124] ss:$8 sps:$4 sm:$0xff]  }
 0x380   :  { %5728 = vmatmul.mubr.bf16.vlgmr.msra.gmra.mrb[4].mxu1 %v9138_v57  ;;  %v8581_v57 = vld [vmem:[#allocation5 + $0x16a8] ss:$16 sps:$4 sm:$0xff]  }
 0x381   :  { %5737 = vmatpush1.bf16.msra.mxu1 %v8566_v35  ;;  %5768 = vmatprep.mubr.bf16.mxu1 %v9140_v30  ;;  %v8656_v30 = vld [vmem:[#allocation8 + $0xe0] ss:$8 sps:$4 sm:$0xff]  }
 0x382   :  { %5738 = vmatprep.subr.bf16.mxu1 %v8571_v52  ;;  %6218 = vmatpush1.bf16.msra.mxu0 %v8656_v30  ;;  %v8713_v35 = vld [vmem:[#allocation11 + $0x8] sm:$0xff]   ;;  %v8714_v52 = vld [vmem:[#allocation11 + $0x50] sm:$0xff]  }
 0x383   :  { %6219 = vmatprep.subr.bf16.mxu0 %v8661_v44  ;;  %v8720_v30 = vld [vmem:[#allocation11 + $0x68] sm:$0xff]  }
 0x384   :  { %v8721_v44 = vld [vmem:[#allocation11 + $0x28] sm:$0xff]  }
 0x385   :  { %5739 = vmatpush1.bf16.msra.mxu1 %v8569_v37  ;;  %v8668_v37 = vld [vmem:[#allocation8 + $0x120] ss:$8 sps:$4 sm:$0xff]  }
 0x386   :  { %5740 = vmatprep.subr.bf16.mxu1 %v8574_v11  ;;  %6220 = vmatpush1.bf16.msra.mxu0 %v8659_v45  ;;  %v8673_v11 = vld [vmem:[#allocation8 + $0x134] ss:$8 sps:$4 sm:$0xff]   ;;  %v8680_v45 = vld [vmem:[#allocation8 + $0x160] ss:$8 sps:$4 sm:$0xff]  }
 0x387   :  { %6230 = vmatprep.subr.bf16.mxu0 %v8664_v49  ;;  %v8686_v49 = vld [vmem:[#allocation8 + $0x180] ss:$8 sps:$4 sm:$0xff]  }
 0x389   :  { %5741 = vmatpush1.bf16.msra.mxu1 %v8572_v38  ;;  %v8715_v38 = vld [vmem:[#allocation11 + $0x10] sm:$0xff]  }
 0x38a   :  { %5742 = vmatprep.subr.bf16.mxu1 %v8577_v39  ;;  %v8716_v39 = vld [vmem:[#allocation11 + $0x58] sm:$0xff]  }
 0x38d   :  { %5743 = vmatpush1.bf16.msra.mxu1 %v8575_v40  ;;  %v8671_v40 = vld [vmem:[#allocation8 + $0x130] ss:$8 sps:$4 sm:$0xff]  }
 0x38e   :  { %5744 = vmatprep.subr.bf16.mxu1 %v8580_v41  ;;  %v8676_v41 = vld [vmem:[#allocation8 + $0x144] ss:$8 sps:$4 sm:$0xff]  }
 0x391   :  { %5745 = vmatpush1.bf16.msra.mxu1 %v8578_v36  ;;  %v8717_v36 = vld [vmem:[#allocation11 + $0x18] sm:$0xff]  }
 0x392   :  { %5746 = vmatprep.subr.bf16.mxu1 %v8583_v10  ;;  %v8718_v10 = vld [vmem:[#allocation11 + $0x60] sm:$0xff]  }
 0x395   :  { %5747 = vmatpush1.bf16.msra.mxu1 %v8581_v57  ;;  %v8674_v57 = vld [vmem:[#allocation8 + $0x140] ss:$8 sps:$4 sm:$0xff]  }
 0x396   :  { %5748 = vmatprep.subr.bf16.mxu1 %v8586_v46  ;;  %v8679_v46 = vld [vmem:[#allocation8 + $0x154] ss:$8 sps:$4 sm:$0xff]  }
 0x399   :  { %5749 = vmatpush1.bf16.msra.mxu1 %v8584_v43  ;;  %v8677_v43 = vld [vmem:[#allocation8 + $0x150] ss:$8 sps:$4 sm:$0xff]  }
 0x39a   :  { %5750 = vmatprep.subr.bf16.mxu1 %v8589_v20  ;;  %v8682_v20 = vld [vmem:[#allocation8 + $0x164] ss:$8 sps:$4 sm:$0xff]  }
 0x39d   :  { %5751 = vmatpush1.bf16.msra.mxu1 %v8587_v47  ;;  %v8685_v47 = vld [vmem:[#allocation8 + $0x174] ss:$8 sps:$4 sm:$0xff]  }
 0x39e   :  { %5752 = vmatprep.subr.bf16.mxu1 %v8592_v23  ;;  %v8683_v23 = vld [vmem:[#allocation8 + $0x170] ss:$8 sps:$4 sm:$0xff]  }
 0x3a1   :  { %5753 = vmatpush1.bf16.msra.mxu1 %v8590_v48  ;;  %v8688_v48 = vld [vmem:[#allocation8 + $0x184] ss:$8 sps:$4 sm:$0xff]  }
 0x3a2   :  { %5754 = vmatprep.subr.bf16.mxu1 %v8595_v51  ;;  %v8691_v51 = vld [vmem:[#allocation8 + $0x194] ss:$8 sps:$4 sm:$0xff]  }
 0x3a5   :  { %5755 = vmatpush1.bf16.msra.mxu1 %v8593_v53  ;;  %v8689_v53 = vld [vmem:[#allocation8 + $0x190] ss:$8 sps:$4 sm:$0xff]  }
 0x3a6   :  { %5756 = vmatprep.subr.bf16.mxu1 %v8598_v25  ;;  %v8694_v25 = vld [vmem:[#allocation8 + $0x1a4] ss:$8 sps:$4 sm:$0xff]  }
 0x3a9   :  { %5757 = vmatpush1.bf16.msra.mxu1 %v8596_v54  ;;  %v8692_v54 = vld [vmem:[#allocation8 + $0x1a0] ss:$8 sps:$4 sm:$0xff]  }
 0x3aa   :  { %5758 = vmatprep.subr.bf16.mxu1 %v8601_v58  ;;  %v8697_v58 = vld [vmem:[#allocation8 + $0x1b4] ss:$8 sps:$4 sm:$0xff]  }
 0x3ad   :  { %5759 = vmatpush1.bf16.msra.mxu1 %v8599_v59  ;;  %v8695_v59 = vld [vmem:[#allocation8 + $0x1b0] ss:$8 sps:$4 sm:$0xff]  }
 0x3ae   :  { %5760 = vmatprep.subr.bf16.mxu1 %v8604_v60  ;;  %v8700_v60 = vld [vmem:[#allocation8 + $0x1c4] ss:$8 sps:$4 sm:$0xff]  }
 0x3b1   :  { %5761 = vmatpush1.bf16.msra.mxu1 %v8602_v8  ;;  %v8698_v8 = vld [vmem:[#allocation8 + $0x1c0] ss:$8 sps:$4 sm:$0xff]  }
 0x3b2   :  { %5762 = vmatprep.subr.bf16.mxu1 %v8607_v62  ;;  %v8703_v62 = vld [vmem:[#allocation8 + $0x1d4] ss:$8 sps:$4 sm:$0xff]  }
 0x3b5   :  { %5763 = vmatpush1.bf16.msra.mxu1 %v8605_v63  ;;  %v8701_v63 = vld [vmem:[#allocation8 + $0x1d0] ss:$8 sps:$4 sm:$0xff]  }
 0x3b6   :  { %5764 = vmatprep.subr.bf16.mxu1 %v8610_v32  ;;  %v8706_v32 = vld [vmem:[#allocation8 + $0x1e4] ss:$8 sps:$4 sm:$0xff]  }
 0x3b9   :  { %5765 = vmatpush1.bf16.msra.mxu1 %v8608_v0  ;;  %v8704_v0 = vld [vmem:[#allocation8 + $0x1e0] ss:$8 sps:$4 sm:$0xff]  }
 0x3ba   :  { %5766 = vmatprep.subr.bf16.mxu1 %v8613_v2  ;;  %v8709_v2 = vld [vmem:[#allocation8 + $0x1f4] ss:$8 sps:$4 sm:$0xff]  }
 0x3bd   :  { %5767 = vmatpush1.bf16.msra.mxu1 %v8611_v3  ;;  %v8707_v3 = vld [vmem:[#allocation8 + $0x1f0] ss:$8 sps:$4 sm:$0xff]  }
 0x3be   :  { %7330 = vmatprep.subr.bf16.mxu1 %v8710_v55  ;;  %v5857_v55 = vld [vmem:[#allocation10] sm:$0x3] }
 0x3c0   :  { %5769 = vmatmul.mubr.bf16.vlgmr.msra.gmra.mrb[4].mxu1 %v9146_v34  ;;  %v4830_v34 = vadd.f32 %v9096_v56, %v940_v12  ;;  %v8711_v56 = vld [vmem:[#allocation11] sm:$0xff]   ;;  %v944_v12 = vrot.slane %v9157_v7, %v943_v4 }
 0x3c1   :  { %7331 = vmatpush3.bf16.msra.mxu1 %v8711_v56  ;;  %v5862_v56 = vrot.slane %v5857_v55, %v935_v6 }
 0x3c2   :  { %7332 = vmatprep.subr.bf16.mxu1 %v8712_v31  ;;  %v5866_v31 = vrot.slane %v5857_v55, %v939_v42 }
 0x3c5   :  { %7333 = vmatpush3.bf16.msra.mxu1 %v8713_v35 }
 0x3c6   :  { %7334 = vmatprep.subr.bf16.mxu1 %v8714_v52 }
 0x3c9   :  { %7335 = vmatpush3.bf16.msra.mxu1 %v8715_v38 }
 0x3ca   :  { %7336 = vmatprep.subr.bf16.mxu1 %v8716_v39 }
 0x3cd   :  { %7337 = vmatpush3.bf16.msra.mxu1 %v8717_v36 }
 0x3ce   :  { %7338 = vmatprep.subr.bf16.mxu1 %v8718_v10 }
 0x3d1   :  { %7339 = vmatpush3.bf16.msra.mxu1 %v8719_v16 }
 0x3d2   :  { %7340 = vmatprep.subr.bf16.mxu1 %v8720_v30 }
 0x3d5   :  { %7341 = vmatpush3.bf16.msra.mxu1 %v8721_v44 }
 0x414   :  { %v5278_v14 = vpop.f32.mrb[0].mxu0 }
 0x415   :  { %v7353_v15 = vadd.f32 %v5278_v14, %v4828_v13  ;;  %v5280_v17 = vpop.f32.mrb[1].mxu0  ;;  %v948_v13 = vrot.slane %v9157_v7, %v947_v9  ;;  %v8724_v7 = vld [vmem:[#allocation11 + $0x78] sm:$0xff]  }
 0x416   :  { %v7355_v18 = vadd.f32 %v5280_v17, %v4830_v34  ;;  %v5282_v50 = vpop.f32.mrb[2].mxu0 }
 0x417   :  { %vm5777_vm0 = vcmp.gt.f32.partialorder %v7353_v15, 0.0  ;;  %v5781_v19 = vmul.f32 0.2, %v7353_v15  ;;  %v5283_v21 = vpop.f32.mrb[3].mxu0 }
 0x418   :  { %vm5778_vm1 = vcmp.gt.f32.partialorder %v7355_v18, 0.0  ;;  %v5782_v22 = vmul.f32 0.2, %v7355_v18 }
 0x419   :  { %v5785_v24 = vsel %vm5777_vm0, %v7353_v15, %v5781_v19 }
 0x41a   :  { %v5786_v26 = vsel %vm5778_vm1, %v7355_v18, %v5782_v22  ;;  %v5789_v61 = vpack.c.bf16 %v5785_v24, %v5785_v24 }
 0x41b   :  { %v5790_v27 = vpack.c.bf16 %v5786_v26, %v5786_v26 }
 0x41d   :  { %6221 = vmatprep.mubr.bf16.mxu0 %v5790_v27 }
 0x41e   :  { %6222 = vmatmul.mubr.bf16.vlgmr.msra.gmra.mrb[4].mxu0 %v5789_v61  ;;  %v8723_v61 = vld [vmem:[#allocation11 + $0x30] sm:$0xff]  }
 0x41f   :  { %6231 = vmatpush1.bf16.msra.mxu0 %v8662_v28  ;;  %v8722_v28 = vld [vmem:[#allocation11 + $0x70] sm:$0xff]  }
 0x420   :  { %6232 = vmatprep.subr.bf16.mxu0 %v8667_v29  ;;  %7342 = vmatprep.subr.bf16.mxu1 %v8722_v28  ;;  %v8725_v29 = vld [vmem:[#allocation11 + $0x38] sm:$0xff]  }
 0x421   :  { %7343 = vmatpush3.bf16.msra.mxu1 %v8723_v61 }
 0x422   :  { %7344 = vmatprep.subr.bf16.mxu1 %v8724_v7 }
 0x423   :  { %6233 = vmatpush1.bf16.msra.mxu0 %v8665_v33 }
 0x424   :  { %6234 = vmatprep.subr.bf16.mxu0 %v8670_v1 }
 0x425   :  { %7345 = vmatpush3.bf16.msra.mxu1 %v8725_v29 }
 0x427   :  { %6235 = vmatpush1.bf16.msra.mxu0 %v8668_v37 }
 0x428   :  { %6236 = vmatprep.subr.bf16.mxu0 %v8673_v11 }
 0x42b   :  { %6237 = vmatpush1.bf16.msra.mxu0 %v8671_v40 }
 0x42c   :  { %6238 = vmatprep.subr.bf16.mxu0 %v8676_v41 }
 0x42f   :  { %6239 = vmatpush1.bf16.msra.mxu0 %v8674_v57  ;;  %v7312_v57 = vld [vmem:[#allocation13] ss:$0 sm:$0xff] }
 0x430   :  { %6240 = vmatprep.subr.bf16.mxu0 %v8679_v46 }
 0x433   :  { %6241 = vmatpush1.bf16.msra.mxu0 %v8677_v43 }
 0x434   :  { %6242 = vmatprep.subr.bf16.mxu0 %v8682_v20 }
 0x437   :  { %6243 = vmatpush1.bf16.msra.mxu0 %v8680_v45 }
 0x438   :  { %6244 = vmatprep.subr.bf16.mxu0 %v8685_v47 }
 0x43b   :  { %6245 = vmatpush1.bf16.msra.mxu0 %v8683_v23 }
 0x43c   :  { %6246 = vmatprep.subr.bf16.mxu0 %v8688_v48 }
 0x43f   :  { %6247 = vmatpush1.bf16.msra.mxu0 %v8686_v49 }
 0x440   :  { %6248 = vmatprep.subr.bf16.mxu0 %v8691_v51 }
 0x443   :  { %6249 = vmatpush1.bf16.msra.mxu0 %v8689_v53 }
 0x444   :  { %6250 = vmatprep.subr.bf16.mxu0 %v8694_v25 }
 0x447   :  { %6251 = vmatpush1.bf16.msra.mxu0 %v8692_v54 }
 0x448   :  { %6252 = vmatprep.subr.bf16.mxu0 %v8697_v58 }
 0x44b   :  { %6253 = vmatpush1.bf16.msra.mxu0 %v8695_v59 }
 0x44c   :  { %6254 = vmatprep.subr.bf16.mxu0 %v8700_v60 }
 0x44f   :  { %6255 = vmatpush1.bf16.msra.mxu0 %v8698_v8 }
 0x450   :  { %6256 = vmatprep.subr.bf16.mxu0 %v8703_v62 }
 0x453   :  { %6257 = vmatpush1.bf16.msra.mxu0 %v8701_v63 }
 0x454   :  { %6258 = vmatprep.subr.bf16.mxu0 %v8706_v32 }
 0x457   :  { %6259 = vmatpush1.bf16.msra.mxu0 %v8704_v0 }
 0x458   :  { %6260 = vmatprep.subr.bf16.mxu0 %v8709_v2 }
 0x45b   :  { %6261 = vmatpush1.bf16.msra.mxu0 %v8707_v3 }
 0x493   :  { %v5770_v34 = vpop.f32.mrb[4].mxu1 }
 0x494   :  { %v7356_v14 = vadd.f32 %v5770_v34, %v944_v12  ;;  %v5772_v15 = vpop.f32.mrb[5].mxu1 }
 0x495   :  { %v7357_v17 = vadd.f32 %v5772_v15, %v948_v13  ;;  %v5774_v18 = vpop.f32.mrb[6].mxu1 }
 0x496   :  { %vm5779_vm2 = vcmp.gt.f32.partialorder %v7356_v14, 0.0  ;;  %v5783_v50 = vmul.f32 0.2, %v7356_v14  ;;  %v5775_v19 = vpop.f32.mrb[7].mxu1 }
 0x497   :  { %vm5780_vm3 = vcmp.gt.f32.partialorder %v7357_v17, 0.0  ;;  %v5784_v21 = vmul.f32 0.2, %v7357_v17 }
 0x498   :  { %v5787_v22 = vsel %vm5779_vm2, %v7356_v14, %v5783_v50 }
 0x499   :  { %v5788_v24 = vsel %vm5780_vm3, %v7357_v17, %v5784_v21  ;;  %v5791_v27 = vpack.c.bf16 %v5787_v22, %v5787_v22 }
 0x49a   :  { %v5792_v26 = vpack.c.bf16 %v5788_v24, %v5788_v24 }
 0x49c   :  { %6262 = vmatprep.mubr.bf16.mxu0 %v5792_v26 }
 0x49d   :  { %6263 = vmatmul.mubr.bf16.vlgmr.msra.gmra.mrb[4].mxu0 %v5791_v27 }
 0x570   :  { %v6264_v33 = vpop.f32.mrb[4].mxu0 }
 0x571   :  { %v7358_v1 = vadd.f32 %v6264_v33, %v5862_v56  ;;  %v6266_v35 = vpop.f32.mrb[5].mxu0 }
 0x572   :  { %v7359_v52 = vadd.f32 %v6266_v35, %v5866_v31  ;;  %v6268_v37 = vpop.f32.mrb[6].mxu0 }
 0x573   :  { %vm6271_vm4 = vcmp.gt.f32.partialorder %v7358_v1, 0.0  ;;  %v6273_v11 = vmul.f32 0.2, %v7358_v1  ;;  %v6269_v38 = vpop.f32.mrb[7].mxu0 }
 0x574   :  { %vm6272_vm5 = vcmp.gt.f32.partialorder %v7359_v52, 0.0  ;;  %v6274_v39 = vmul.f32 0.2, %v7359_v52 }
 0x575   :  { %v6275_v40 = vsel %vm6271_vm4, %v7358_v1, %v6273_v11 }
 0x576   :  { %v6276_v41 = vsel %vm6272_vm5, %v7359_v52, %v6274_v39  ;;  %v6277_v10 = vpack.c.bf16 %v6275_v40, %v6275_v40 }
 0x577   :  { %v6278_v36 = vpack.c.bf16 %v6276_v41, %v6276_v41 }
 0x579   :  { %6446 = vmatprep.mubr.bf16.mxu1 %v6278_v36 }
 0x57a   :  { %6447 = vmatmul.mubr.bf16.vlgmr.msra.gmra.mrb[8].mxu1 %v6277_v10 }
 0x64d   :  { %v7346_v6 = vpop.f32.mrb[8].mxu1 }
 0x64e   :  { %v7347_v5 = vpop.f32.mrb[9].mxu1 }
 0x64f   :  { %v7348_v42 = vadd.f32 %v7347_v5, %v7346_v6  ;;  %v7349_v46 = vpop.f32.mrb[10].mxu1 }
 0x650   :  { %v7350_v16 = vpop.f32.mrb[11].mxu1 }
 0x651   :  { %v6449_v30 = vadd.f32 %v7348_v42, %v7312_v57 }
 0x653   :  { %v7329_v43 = vmul.f32 -1.442695, %v6449_v30 }
 0x655   :  { %8726 = vpow2.f32 %v7329_v43 }
 0x65f   :  { %v8727_v20 = vpop.eup %8726 }
 0x660   :  { %v6457_v44 = vadd.f32 1.0, %v8727_v20 }
 0x662   :  { %8728 = vrcp.f32 %v6457_v44 }
 0x66c   :  { %v8729_v45 = vpop.eup %8728 }
 0x66d   :  { %v6460_v47 = vpack.c.bf16 %v8729_v45, %v8729_v45 }
 0x66f   :  { %6461 = vst [vmem:[#allocation14] sm:$0xf] %v6460_v47 }
 0x670   :  { %8895 = shalt.err (!%p8892_p4)
}
 0x671   :  { %s8896_s15 = scalar_lea.hbm %s9195_s7, 64 }
 0x672   :  { %p8897_p5 = scmp.ne.s32.totalorder %s9195_s7, %s8896_s15  ;;  %p8900_p6 = scmp.lt.u32.totalorder %s8896_s15, %s9195_s7 }
 0x674   :  { %p8902_p7 = pnand %p8900_p6, %p8897_p5 }
 0x676   :  { %8905 = shalt.err (!%p8902_p7)
}
 0x677   :  { %6471 = dma.vmem_to_hbm [thread:$0]  %s6469_s13, 64, %s9195_s7, [#allocation4]  }
 0x678   :  { %8914 = dma.done.wait [#allocation4], 64  }
 0x679   :  { %8915 = vsyncadd [#allocation4], 4294967232 }
 0x67a   :  { %6475 = vsyncpa [#allocation3], 1 }
 0x67b   :  { %6476 = vsyncpa [#allocation6], 1 }
 0x67c   :  { %6477 = vsyncpa [#allocation9], 1 }
 0x67d   :  { %6478 = vsyncpa [#allocation12], 1 }
 0x67e   :  { %6479 = vsyncpa [#allocation4], 1 }

</bundles_post_ra>
